<compile_context>
chip_gen: v7x
topology: tpu7x:2x2x1
jax: 0.10.0
libtpu: 0.0.40
codegen_flags: <defaults>
</compile_context>

<pallas_src>
import functools

import jax
import jax.numpy as jnp
from jax.experimental import pallas as pl
from jax.experimental.pallas import tpu as pltpu

EPS = 1e-5      # nn.BatchNorm2d default eps
LANE = 128


def _round_up(x, m):
    return (x + m - 1) // m * m


def _pack_conv_weight(w, dtype):
    """(Cout, Cin, 3, 3) PyTorch conv weight -> (9*Cin, Cout) matmul RHS.

    Tap-major (t = ky*3 + kx); taps packed contiguously at stride Cin -- no
    per-tap 128-lane slots and no zero K rows.
    """
    cout, cin = w.shape[0], w.shape[1]
    return jnp.transpose(w, (2, 3, 1, 0)).reshape(9 * cin, cout).astype(dtype)


def _conv3x3(v, w_ref, pad_ref, col_ref):
    """3x3 / stride-1 / pad-1 convolution of one (H, W, C) f32 image.

    w_ref  : (9*C, Cout) tap-major packed weight (compute dtype).
    pad_ref: (H+2, round_up(W+2, 8), C) compute-dtype scratch (zero halo).
    col_ref: (H, W, 9*C) compute-dtype scratch (only used when C < 128).
    Returns (H*W, Cout) f32.
    """
    H, W, C = v.shape
    Hp, Wp, _ = pad_ref.shape
    cd = pad_ref.dtype

    # Zero only the 1-wide halo strips (not the whole buffer).  Re-done every
    # grid step so there is no cross-step scratch state and the batch grid
    # axis can stay "parallel" (megacore-shardable on v7x).
    pad_ref[0:1, :, :] = jnp.zeros((1, Wp, C), cd)
    pad_ref[H + 1:H + 2, :, :] = jnp.zeros((1, Wp, C), cd)
    pad_ref[:, 0:1, :] = jnp.zeros((Hp, 1, C), cd)
    pad_ref[:, W + 1:W + 2, :] = jnp.zeros((Hp, 1, C), cd)
    pad_ref[1:H + 1, 1:W + 1, :] = v.astype(cd)

    M = H * W
    if C >= LANE:
        # K = C already fills the MXU contraction depth: accumulate 9 matmuls
        # straight from pad_ref and skip the im2col copy traffic entirely.
        acc = None
        for ky in range(3):
            for kx in range(3):
                t = ky * 3 + kx
                patch = pad_ref[ky:ky + H, kx:kx + W, :].reshape(M, C)
                part = jnp.dot(patch, w_ref[t * C:(t + 1) * C, :],
                               preferred_element_type=jnp.float32)
                acc = part if acc is None else acc + part
        return acc

    # Small C: pack the 9 taps contiguously (stride C, K = 9*C) and run ONE
    # MXU matmul.  No per-tap lane-slot padding, no pad-column zeroing.
    for ky in range(3):
        for kx in range(3):
            t = ky * 3 + kx
            col_ref[:, :, t * C:(t + 1) * C] = pad_ref[ky:ky + H, kx:kx + W, :]
    return jnp.dot(col_ref[...].reshape(M, 9 * C), w_ref[...],
                   preferred_element_type=jnp.float32)


def _conv_stats_kernel(x_ref, w_ref, scale_ref, shift_ref, raw_ref, stats_ref,
                       pad_ref, col_ref, *, pre_bn_relu):
    """One grid step = one batch element.

    Optionally applies the previous stage's folded BN (scale/shift) + ReLU,
    then the 3x3 conv; stores the raw conv output (compute dtype) and this
    element's per-channel (sum, sum-of-squares) partials for the NEXT BN.
    """
    _, H, W, C = raw_ref.shape
    v = x_ref[...].reshape(H, W, C).astype(jnp.float32)
    if pre_bn_relu:
        v = jnp.maximum(v * scale_ref[...] + shift_ref[...], 0.0)
    acc = _conv3x3(v, w_ref, pad_ref, col_ref)                  # (H*W, C) f32
    raw_ref[...] = acc.reshape(1, H, W, C).astype(raw_ref.dtype)
    # BN partials: the squared temporary is tile-sized, not full-tensor-sized.
    stats_ref[0:1, 0:1, :] = jnp.sum(acc, axis=0, keepdims=True).reshape(1, 1, C)
    stats_ref[0:1, 1:2, :] = jnp.sum(acc * acc, axis=0,
                                     keepdims=True).reshape(1, 1, C)


def _finalize_kernel(raw2_ref, x_ref, scale_ref, shift_ref, out_ref):
    """out = relu(bn2(conv2_raw) + identity); one batch element per step."""
    y = raw2_ref[...].astype(jnp.float32) * scale_ref[...] + shift_ref[...]
    y = y + x_ref[...].astype(jnp.float32)
    out_ref[...] = jnp.maximum(y, 0.0).astype(out_ref.dtype)


@functools.partial(jax.jit, static_argnames=("compute_dtype", "out_dtype"))
def basic_block_forward_nhwc(x, params, *, compute_dtype=jnp.bfloat16,
                             out_dtype=jnp.float32):
    """BasicBlock forward (stride=1, downsample=None), NHWC in / NHWC out.

    x: (N, H, W, C) float32.  params: conv{1,2}_w (Cout, Cin, 3, 3) PyTorch
    layout, bn{1,2}_{gamma,beta} (Cout,).
    """
    N, H, W, C = x.shape
    if params["conv1_w"].shape[:2] != (C, C) or params["conv2_w"].shape[:2] != (C, C):
        # TODO(synk): downsample / stride>1 / channel-changing path.
        raise NotImplementedError("only stride=1, downsample=None, Cin == Cout")

    w1 = _pack_conv_weight(params["conv1_w"], compute_dtype)
    w2 = _pack_conv_weight(params["conv2_w"], compute_dtype)
    ones = jnp.ones((1, C), jnp.float32)
    zeros = jnp.zeros((1, C), jnp.float32)

    Wp = _round_up(W + 2, 8)                      # sublane-aligned padded width
    col_shape = (H, W, 9 * C) if C < LANE else (8, LANE)   # col unused for C>=128
    scratch = [pltpu.VMEM((H + 2, Wp, C), compute_dtype),  # padded activation
               pltpu.VMEM(col_shape, compute_dtype)]        # contiguous im2col

    tile_spec = pl.BlockSpec((1, H, W, C), lambda b: (b, 0, 0, 0))
    vec_spec = pl.BlockSpec((1, C), lambda b: (0, 0))
    w_spec = pl.BlockSpec((9 * C, C), lambda b: (0, 0))
    stats_spec = pl.BlockSpec((1, 2, C), lambda b: (b, 0, 0))
    # Batch axis is embarrassingly parallel (per-step stats partials, no
    # cross-step scratch state) -> v7x megacore can split it.  Per-step VMEM
    # (pad + col + double-buffered blocks) fits every generation's default
    # scoped VMEM limit, so no explicit vmem_limit_bytes override.
    parallel = pltpu.CompilerParams(dimension_semantics=("parallel",))

    def conv_stage(inp, w, scale, shift, pre_bn_relu):
        return pl.pallas_call(
            functools.partial(_conv_stats_kernel, pre_bn_relu=pre_bn_relu),
            grid=(N,),
            in_specs=[tile_spec, w_spec, vec_spec, vec_spec],
            out_specs=(tile_spec, stats_spec),
            out_shape=(jax.ShapeDtypeStruct((N, H, W, C), compute_dtype),
                       jax.ShapeDtypeStruct((N, 2, C), jnp.float32)),
            scratch_shapes=scratch,
            compiler_params=parallel,
        )(inp, w, scale, shift)

    m = N * H * W

    def fold_bn(stats, gamma, beta):
        # Training-mode BN folded to one per-channel scale/shift.
        # NOTE: var = E[x^2] - E[x]^2 (biased) in f32; fine for zero-mean conv
        # outputs at bf16 tolerance (Welford/two-pass if that ever changes).
        s = jnp.sum(stats, axis=0)                        # (2, C)
        mean = s[0] / m
        var = jnp.maximum(s[1] / m - mean * mean, 0.0)
        scale = gamma.astype(jnp.float32) * jax.lax.rsqrt(var + EPS)
        shift = beta.astype(jnp.float32) - mean * scale
        return scale.reshape(1, C), shift.reshape(1, C)

    # Phase 1: conv1 + bn1 partials.
    raw1, st1 = conv_stage(x, w1, ones, zeros, False)
    scale1, shift1 = fold_bn(st1, params["bn1_gamma"], params["bn1_beta"])
    # Phase 2: bn1 + relu + conv2 + bn2 partials.
    raw2, st2 = conv_stage(raw1, w2, scale1, shift1, True)
    scale2, shift2 = fold_bn(st2, params["bn2_gamma"], params["bn2_beta"])
    # Phase 3: bn2 + residual add + relu.
    out = pl.pallas_call(
        _finalize_kernel,
        grid=(N,),
        in_specs=[tile_spec, tile_spec, vec_spec, vec_spec],
        out_specs=tile_spec,
        out_shape=jax.ShapeDtypeStruct((N, H, W, C), out_dtype),
        compiler_params=parallel,
    )(raw2, x, scale2, shift2)
    return out


def basic_block_forward_nchw(x_nchw, params, **kw):
    """PyTorch-layout convenience wrapper (adds two transpose passes; prefer
    the NHWC entry point between consecutive blocks)."""
    x = jnp.transpose(x_nchw, (0, 2, 3, 1))
    y = basic_block_forward_nhwc(x, params, **kw)
    return jnp.transpose(y, (0, 3, 1, 2))


def init_params(key, in_channel, out_channel):
    """Deterministic synthetic parameters matching BasicBlock.__init__ shapes."""
    k1, k2 = jax.random.split(key)
    conv1_w = 0.1 * jax.random.normal(k1, (out_channel, in_channel, 3, 3), jnp.float32)
    conv2_w = 0.1 * jax.random.normal(k2, (out_channel, out_channel, 3, 3), jnp.float32)
    return {
        "conv1_w": conv1_w,
        "conv2_w": conv2_w,
        # nn.BatchNorm2d default init: weight=1, bias=0
        "bn1_gamma": jnp.ones((out_channel,), jnp.float32),
        "bn1_beta": jnp.zeros((out_channel,), jnp.float32),
        "bn2_gamma": jnp.ones((out_channel,), jnp.float32),
        "bn2_beta": jnp.zeros((out_channel,), jnp.float32),
    }


def _ref_forward_nhwc(x, p):
    """Pure-JAX f32 reference of BasicBlock.forward (training-mode BN), NHWC."""
    def conv(a, w):                                   # w in PyTorch OIHW layout
        w_hwio = jnp.transpose(w, (2, 3, 1, 0))
        return jax.lax.conv_general_dilated(
            a, w_hwio, window_strides=(1, 1), padding=((1, 1), (1, 1)),
            dimension_numbers=("NHWC", "HWIO", "NHWC"))

    def bn(a, g, b):
        mean = jnp.mean(a, axis=(0, 1, 2), keepdims=True)
        var = jnp.mean((a - mean) ** 2, axis=(0, 1, 2), keepdims=True)  # biased
        return ((a - mean) * jax.lax.rsqrt(var + EPS) * g.reshape(1, 1, 1, -1)
                + b.reshape(1, 1, 1, -1))

    h = jax.nn.relu(bn(conv(x, p["conv1_w"]), p["bn1_gamma"], p["bn1_beta"]))
    h = bn(conv(h, p["conv2_w"]), p["bn2_gamma"], p["bn2_beta"]) + x
    return jax.nn.relu(h)


if __name__ == "__main__":
    key = jax.random.PRNGKey(0)
    kx, kp = jax.random.split(key)

    # Small NHWC shapes; in_channel == out_channel (stride=1, downsample=None).
    N, H, W, C = 2, 16, 16, 4
    x = jax.random.normal(kx, (N, H, W, C), jnp.float32)
    params = init_params(kp, in_channel=C, out_channel=C)

    out = jax.block_until_ready(basic_block_forward_nhwc(x, params))
    assert out.shape == (N, H, W, C)
    assert bool(jnp.all(out >= 0.0))                 # final ReLU

    # Loose tolerance: kernel uses bf16 matmul operands / intermediates with
    # f32 accumulation and f32 BN statistics.
    ref = jax.block_until_ready(_ref_forward_nhwc(x, params))
    max_err = float(jnp.max(jnp.abs(out - ref)))
    assert max_err < 1e-1, f"mismatch vs f32 reference: max abs err = {max_err}"
    print("KERNEL_OK")
</pallas_src>

<mosaic_0001>
module attributes {stable_mosaic.version = 11 : i64} {
  func.func @_conv_stats_kernel(%arg0: i32, %arg1: memref<1x16x16x4xf32, #tpu.memory_space<vmem>>, %arg2: memref<36x4xbf16, #tpu.memory_space<vmem>>, %arg3: memref<1x4xf32, #tpu.memory_space<vmem>>, %arg4: memref<1x4xf32, #tpu.memory_space<vmem>>, %arg5: memref<1x16x16x4xbf16, #tpu.memory_space<vmem>>, %arg6: memref<1x2x4xf32, #tpu.memory_space<vmem>>, %arg7: memref<18x24x4xbf16, #tpu.memory_space<vmem>>, %arg8: memref<16x16x36xbf16, #tpu.memory_space<vmem>>) attributes {dimension_semantics = [#tpu.dimension_semantics<parallel>], iteration_bounds = array<i64: 2>, scalar_prefetch = 0 : i64, scratch_operands = 2 : i64, tpu.core_type = #tpu.core_type<tc>, window_params = [{transform_indices = @transform_0, window_bounds = array<i64: 1, 16, 16, 4>}, {pipeline_mode = #tpu.pipeline_mode<synchronous>, transform_indices = @transform_1, window_bounds = array<i64: 36, 4>}, {pipeline_mode = #tpu.pipeline_mode<synchronous>, transform_indices = @transform_2, window_bounds = array<i64: 1, 4>}, {pipeline_mode = #tpu.pipeline_mode<synchronous>, transform_indices = @transform_3, window_bounds = array<i64: 1, 4>}, {transform_indices = @transform_4, window_bounds = array<i64: 1, 16, 16, 4>}, {transform_indices = @transform_5, window_bounds = array<i64: 1, 2, 4>}]} {
    %c0 = arith.constant 0 : index
    %c0_0 = arith.constant 0 : index
    %c0_1 = arith.constant 0 : index
    %c0_2 = arith.constant 0 : index
    %0 = vector.load %arg1[%c0, %c0_0, %c0_1, %c0_2] : memref<1x16x16x4xf32, #tpu.memory_space<vmem>>, vector<1x16x16x4xf32>
    %1 = vector.shape_cast %0 : vector<1x16x16x4xf32> to vector<16x16x4xf32>
    %cst = arith.constant 0.000000e+00 : bf16
    %2 = vector.broadcast %cst : bf16 to vector<1x24x4xbf16>
    %c0_3 = arith.constant 0 : index
    %c0_4 = arith.constant 0 : index
    %c0_5 = arith.constant 0 : index
    %3 = vector.load %arg7[%c0_3, %c0_4, %c0_5] : memref<18x24x4xbf16, #tpu.memory_space<vmem>>, vector<1x24x4xbf16>
    tpu.vector_store %arg7[%c0_3, %c0_4, %c0_5], %2 {strides = array<i32>} : memref<18x24x4xbf16, #tpu.memory_space<vmem>>, vector<1x24x4xbf16>,
    %cst_6 = arith.constant 0.000000e+00 : bf16
    %4 = vector.broadcast %cst_6 : bf16 to vector<1x24x4xbf16>
    %c17 = arith.constant 17 : index
    %c0_7 = arith.constant 0 : index
    %c0_8 = arith.constant 0 : index
    %5 = vector.load %arg7[%c17, %c0_7, %c0_8] : memref<18x24x4xbf16, #tpu.memory_space<vmem>>, vector<1x24x4xbf16>
    tpu.vector_store %arg7[%c17, %c0_7, %c0_8], %4 {strides = array<i32>} : memref<18x24x4xbf16, #tpu.memory_space<vmem>>, vector<1x24x4xbf16>,
    %cst_9 = arith.constant 0.000000e+00 : bf16
    %6 = vector.broadcast %cst_9 : bf16 to vector<18x1x4xbf16>
    %c0_10 = arith.constant 0 : index
    %c0_11 = arith.constant 0 : index
    %c0_12 = arith.constant 0 : index
    %7 = vector.load %arg7[%c0_10, %c0_11, %c0_12] : memref<18x24x4xbf16, #tpu.memory_space<vmem>>, vector<18x1x4xbf16>
    tpu.vector_store %arg7[%c0_10, %c0_11, %c0_12], %6 {strides = array<i32>} : memref<18x24x4xbf16, #tpu.memory_space<vmem>>, vector<18x1x4xbf16>,
    %cst_13 = arith.constant 0.000000e+00 : bf16
    %8 = vector.broadcast %cst_13 : bf16 to vector<18x1x4xbf16>
    %c0_14 = arith.constant 0 : index
    %c17_15 = arith.constant 17 : index
    %c0_16 = arith.constant 0 : index
    %9 = vector.load %arg7[%c0_14, %c17_15, %c0_16] : memref<18x24x4xbf16, #tpu.memory_space<vmem>>, vector<18x1x4xbf16>
    tpu.vector_store %arg7[%c0_14, %c17_15, %c0_16], %8 {strides = array<i32>} : memref<18x24x4xbf16, #tpu.memory_space<vmem>>, vector<18x1x4xbf16>,
    %10 = arith.truncf %1 : vector<16x16x4xf32> to vector<16x16x4xbf16>
    %c1 = arith.constant 1 : index
    %c1_17 = arith.constant 1 : index
    %c0_18 = arith.constant 0 : index
    %11 = vector.load %arg7[%c1, %c1_17, %c0_18] : memref<18x24x4xbf16, #tpu.memory_space<vmem>>, vector<16x16x4xbf16>
    tpu.vector_store %arg7[%c1, %c1_17, %c0_18], %10 {strides = array<i32>} : memref<18x24x4xbf16, #tpu.memory_space<vmem>>, vector<16x16x4xbf16>,
    %c0_19 = arith.constant 0 : index
    %c0_20 = arith.constant 0 : index
    %c0_21 = arith.constant 0 : index
    %12 = vector.load %arg7[%c0_19, %c0_20, %c0_21] : memref<18x24x4xbf16, #tpu.memory_space<vmem>>, vector<16x16x4xbf16>
    %c0_22 = arith.constant 0 : index
    %c0_23 = arith.constant 0 : index
    %c0_24 = arith.constant 0 : index
    %13 = vector.load %arg8[%c0_22, %c0_23, %c0_24] : memref<16x16x36xbf16, #tpu.memory_space<vmem>>, vector<16x16x4xbf16>
    tpu.vector_store %arg8[%c0_22, %c0_23, %c0_24], %12 {strides = array<i32>} : memref<16x16x36xbf16, #tpu.memory_space<vmem>>, vector<16x16x4xbf16>,
    %c0_25 = arith.constant 0 : index
    %c1_26 = arith.constant 1 : index
    %c0_27 = arith.constant 0 : index
    %14 = vector.load %arg7[%c0_25, %c1_26, %c0_27] : memref<18x24x4xbf16, #tpu.memory_space<vmem>>, vector<16x16x4xbf16>
    %c0_28 = arith.constant 0 : index
    %c0_29 = arith.constant 0 : index
    %c4 = arith.constant 4 : index
    %15 = vector.load %arg8[%c0_28, %c0_29, %c4] : memref<16x16x36xbf16, #tpu.memory_space<vmem>>, vector<16x16x4xbf16>
    tpu.vector_store %arg8[%c0_28, %c0_29, %c4], %14 {strides = array<i32>} : memref<16x16x36xbf16, #tpu.memory_space<vmem>>, vector<16x16x4xbf16>,
    %c0_30 = arith.constant 0 : index
    %c2 = arith.constant 2 : index
    %c0_31 = arith.constant 0 : index
    %16 = vector.load %arg7[%c0_30, %c2, %c0_31] : memref<18x24x4xbf16, #tpu.memory_space<vmem>>, vector<16x16x4xbf16>
    %c0_32 = arith.constant 0 : index
    %c0_33 = arith.constant 0 : index
    %c8 = arith.constant 8 : index
    %17 = vector.load %arg8[%c0_32, %c0_33, %c8] : memref<16x16x36xbf16, #tpu.memory_space<vmem>>, vector<16x16x4xbf16>
    tpu.vector_store %arg8[%c0_32, %c0_33, %c8], %16 {strides = array<i32>} : memref<16x16x36xbf16, #tpu.memory_space<vmem>>, vector<16x16x4xbf16>,
    %c1_34 = arith.constant 1 : index
    %c0_35 = arith.constant 0 : index
    %c0_36 = arith.constant 0 : index
    %18 = vector.load %arg7[%c1_34, %c0_35, %c0_36] : memref<18x24x4xbf16, #tpu.memory_space<vmem>>, vector<16x16x4xbf16>
    %c0_37 = arith.constant 0 : index
    %c0_38 = arith.constant 0 : index
    %c12 = arith.constant 12 : index
    %19 = vector.load %arg8[%c0_37, %c0_38, %c12] : memref<16x16x36xbf16, #tpu.memory_space<vmem>>, vector<16x16x4xbf16>
    tpu.vector_store %arg8[%c0_37, %c0_38, %c12], %18 {strides = array<i32>} : memref<16x16x36xbf16, #tpu.memory_space<vmem>>, vector<16x16x4xbf16>,
    %c1_39 = arith.constant 1 : index
    %c1_40 = arith.constant 1 : index
    %c0_41 = arith.constant 0 : index
    %20 = vector.load %arg7[%c1_39, %c1_40, %c0_41] : memref<18x24x4xbf16, #tpu.memory_space<vmem>>, vector<16x16x4xbf16>
    %c0_42 = arith.constant 0 : index
    %c0_43 = arith.constant 0 : index
    %c16 = arith.constant 16 : index
    %21 = vector.load %arg8[%c0_42, %c0_43, %c16] : memref<16x16x36xbf16, #tpu.memory_space<vmem>>, vector<16x16x4xbf16>
    tpu.vector_store %arg8[%c0_42, %c0_43, %c16], %20 {strides = array<i32>} : memref<16x16x36xbf16, #tpu.memory_space<vmem>>, vector<16x16x4xbf16>,
    %c1_44 = arith.constant 1 : index
    %c2_45 = arith.constant 2 : index
    %c0_46 = arith.constant 0 : index
    %22 = vector.load %arg7[%c1_44, %c2_45, %c0_46] : memref<18x24x4xbf16, #tpu.memory_space<vmem>>, vector<16x16x4xbf16>
    %c0_47 = arith.constant 0 : index
    %c0_48 = arith.constant 0 : index
    %c20 = arith.constant 20 : index
    %23 = vector.load %arg8[%c0_47, %c0_48, %c20] : memref<16x16x36xbf16, #tpu.memory_space<vmem>>, vector<16x16x4xbf16>
    tpu.vector_store %arg8[%c0_47, %c0_48, %c20], %22 {strides = array<i32>} : memref<16x16x36xbf16, #tpu.memory_space<vmem>>, vector<16x16x4xbf16>,
    %c2_49 = arith.constant 2 : index
    %c0_50 = arith.constant 0 : index
    %c0_51 = arith.constant 0 : index
    %24 = vector.load %arg7[%c2_49, %c0_50, %c0_51] : memref<18x24x4xbf16, #tpu.memory_space<vmem>>, vector<16x16x4xbf16>
    %c0_52 = arith.constant 0 : index
    %c0_53 = arith.constant 0 : index
    %c24 = arith.constant 24 : index
    %25 = vector.load %arg8[%c0_52, %c0_53, %c24] : memref<16x16x36xbf16, #tpu.memory_space<vmem>>, vector<16x16x4xbf16>
    tpu.vector_store %arg8[%c0_52, %c0_53, %c24], %24 {strides = array<i32>} : memref<16x16x36xbf16, #tpu.memory_space<vmem>>, vector<16x16x4xbf16>,
    %c2_54 = arith.constant 2 : index
    %c1_55 = arith.constant 1 : index
    %c0_56 = arith.constant 0 : index
    %26 = vector.load %arg7[%c2_54, %c1_55, %c0_56] : memref<18x24x4xbf16, #tpu.memory_space<vmem>>, vector<16x16x4xbf16>
    %c0_57 = arith.constant 0 : index
    %c0_58 = arith.constant 0 : index
    %c28 = arith.constant 28 : index
    %27 = vector.load %arg8[%c0_57, %c0_58, %c28] : memref<16x16x36xbf16, #tpu.memory_space<vmem>>, vector<16x16x4xbf16>
    tpu.vector_store %arg8[%c0_57, %c0_58, %c28], %26 {strides = array<i32>} : memref<16x16x36xbf16, #tpu.memory_space<vmem>>, vector<16x16x4xbf16>,
    %c2_59 = arith.constant 2 : index
    %c2_60 = arith.constant 2 : index
    %c0_61 = arith.constant 0 : index
    %28 = vector.load %arg7[%c2_59, %c2_60, %c0_61] : memref<18x24x4xbf16, #tpu.memory_space<vmem>>, vector<16x16x4xbf16>
    %c0_62 = arith.constant 0 : index
    %c0_63 = arith.constant 0 : index
    %c32 = arith.constant 32 : index
    %29 = vector.load %arg8[%c0_62, %c0_63, %c32] : memref<16x16x36xbf16, #tpu.memory_space<vmem>>, vector<16x16x4xbf16>
    tpu.vector_store %arg8[%c0_62, %c0_63, %c32], %28 {strides = array<i32>} : memref<16x16x36xbf16, #tpu.memory_space<vmem>>, vector<16x16x4xbf16>,
    %c0_64 = arith.constant 0 : index
    %c0_65 = arith.constant 0 : index
    %c0_66 = arith.constant 0 : index
    %30 = vector.load %arg8[%c0_64, %c0_65, %c0_66] : memref<16x16x36xbf16, #tpu.memory_space<vmem>>, vector<16x16x36xbf16>
    %31 = vector.shape_cast %30 : vector<16x16x36xbf16> to vector<256x36xbf16>
    %c0_67 = arith.constant 0 : index
    %c0_68 = arith.constant 0 : index
    %32 = vector.load %arg2[%c0_67, %c0_68] : memref<36x4xbf16, #tpu.memory_space<vmem>>, vector<36x4xbf16>
    %cst_69 = arith.constant dense<0.000000e+00> : vector<256x4xf32>
    %33 = tpu.matmul %31, %32, %cst_69 {dimension_numbers = #tpu.dot_dimension_numbers<[1], [0], [0], [1], [0, 0, 1, 1], [], []>} : vector<256x36xbf16>, vector<36x4xbf16>, vector<256x4xf32> -> vector<256x4xf32>
    %34 = vector.shape_cast %33 : vector<256x4xf32> to vector<1x16x16x4xf32>
    %35 = arith.truncf %34 : vector<1x16x16x4xf32> to vector<1x16x16x4xbf16>
    %c0_70 = arith.constant 0 : index
    %c0_71 = arith.constant 0 : index
    %c0_72 = arith.constant 0 : index
    %c0_73 = arith.constant 0 : index
    %36 = vector.load %arg5[%c0_70, %c0_71, %c0_72, %c0_73] : memref<1x16x16x4xbf16, #tpu.memory_space<vmem>>, vector<1x16x16x4xbf16>
    tpu.vector_store %arg5[%c0_70, %c0_71, %c0_72, %c0_73], %35 {strides = array<i32>} : memref<1x16x16x4xbf16, #tpu.memory_space<vmem>>, vector<1x16x16x4xbf16>,
    %cst_74 = arith.constant dense<0.000000e+00> : vector<4xf32>
    %37 = vector.multi_reduction <add>, %33, %cst_74 [0] : vector<256x4xf32> to vector<4xf32>
    %38 = vector.shape_cast %37 : vector<4xf32> to vector<1x4xf32>
    %39 = vector.shape_cast %38 : vector<1x4xf32> to vector<1x1x4xf32>
    %c0_75 = arith.constant 0 : index
    %c0_76 = arith.constant 0 : index
    %c0_77 = arith.constant 0 : index
    %40 = vector.load %arg6[%c0_75, %c0_76, %c0_77] : memref<1x2x4xf32, #tpu.memory_space<vmem>>, vector<1x1x4xf32>
    tpu.vector_store %arg6[%c0_75, %c0_76, %c0_77], %39 {strides = array<i32>} : memref<1x2x4xf32, #tpu.memory_space<vmem>>, vector<1x1x4xf32>,
    %41 = arith.mulf %33, %33 : vector<256x4xf32>
    %cst_78 = arith.constant dense<0.000000e+00> : vector<4xf32>
    %42 = vector.multi_reduction <add>, %41, %cst_78 [0] : vector<256x4xf32> to vector<4xf32>
    %43 = vector.shape_cast %42 : vector<4xf32> to vector<1x4xf32>
    %44 = vector.shape_cast %43 : vector<1x4xf32> to vector<1x1x4xf32>
    %c0_79 = arith.constant 0 : index
    %c1_80 = arith.constant 1 : index
    %c0_81 = arith.constant 0 : index
    %45 = vector.load %arg6[%c0_79, %c1_80, %c0_81] : memref<1x2x4xf32, #tpu.memory_space<vmem>>, vector<1x1x4xf32>
    tpu.vector_store %arg6[%c0_79, %c1_80, %c0_81], %44 {strides = array<i32>} : memref<1x2x4xf32, #tpu.memory_space<vmem>>, vector<1x1x4xf32>,
    return
  }
  func.func @transform_0(%arg0: i32) -> (i32, i32, i32, i32) {
    %c0_i32 = arith.constant 0 : i32
    %c0_i32_0 = arith.constant 0 : i32
    %c0_i32_1 = arith.constant 0 : i32
    %c0_i32_2 = arith.constant 0 : i32
    return %arg0, %c0_i32, %c0_i32_0, %c0_i32_1 : i32, i32, i32, i32
  }
  func.func @transform_1(%arg0: i32) -> (i32, i32) {
    %c0_i32 = arith.constant 0 : i32
    %c0_i32_0 = arith.constant 0 : i32
    %c0_i32_1 = arith.constant 0 : i32
    return %c0_i32, %c0_i32_0 : i32, i32
  }
  func.func @transform_2(%arg0: i32) -> (i32, i32) {
    %c0_i32 = arith.constant 0 : i32
    %c0_i32_0 = arith.constant 0 : i32
    %c0_i32_1 = arith.constant 0 : i32
    return %c0_i32, %c0_i32_0 : i32, i32
  }
  func.func @transform_3(%arg0: i32) -> (i32, i32) {
    %c0_i32 = arith.constant 0 : i32
    %c0_i32_0 = arith.constant 0 : i32
    %c0_i32_1 = arith.constant 0 : i32
    return %c0_i32, %c0_i32_0 : i32, i32
  }
  func.func @transform_4(%arg0: i32) -> (i32, i32, i32, i32) {
    %c0_i32 = arith.constant 0 : i32
    %c0_i32_0 = arith.constant 0 : i32
    %c0_i32_1 = arith.constant 0 : i32
    %c0_i32_2 = arith.constant 0 : i32
    return %arg0, %c0_i32, %c0_i32_0, %c0_i32_1 : i32, i32, i32, i32
  }
  func.func @transform_5(%arg0: i32) -> (i32, i32, i32) {
    %c0_i32 = arith.constant 0 : i32
    %c0_i32_0 = arith.constant 0 : i32
    %c0_i32_1 = arith.constant 0 : i32
    return %arg0, %c0_i32, %c0_i32_0 : i32, i32, i32
  }
}

module attributes {stable_mosaic.version = 11 : i64} {
  func.func @_conv_stats_kernel(%arg0: i32, %arg1: memref<1x16x16x4xbf16, #tpu.memory_space<vmem>>, %arg2: memref<36x4xbf16, #tpu.memory_space<vmem>>, %arg3: memref<1x4xf32, #tpu.memory_space<vmem>>, %arg4: memref<1x4xf32, #tpu.memory_space<vmem>>, %arg5: memref<1x16x16x4xbf16, #tpu.memory_space<vmem>>, %arg6: memref<1x2x4xf32, #tpu.memory_space<vmem>>, %arg7: memref<18x24x4xbf16, #tpu.memory_space<vmem>>, %arg8: memref<16x16x36xbf16, #tpu.memory_space<vmem>>) attributes {dimension_semantics = [#tpu.dimension_semantics<parallel>], iteration_bounds = array<i64: 2>, scalar_prefetch = 0 : i64, scratch_operands = 2 : i64, tpu.core_type = #tpu.core_type<tc>, window_params = [{transform_indices = @transform_0, window_bounds = array<i64: 1, 16, 16, 4>}, {pipeline_mode = #tpu.pipeline_mode<synchronous>, transform_indices = @transform_1, window_bounds = array<i64: 36, 4>}, {pipeline_mode = #tpu.pipeline_mode<synchronous>, transform_indices = @transform_2, window_bounds = array<i64: 1, 4>}, {pipeline_mode = #tpu.pipeline_mode<synchronous>, transform_indices = @transform_3, window_bounds = array<i64: 1, 4>}, {transform_indices = @transform_4, window_bounds = array<i64: 1, 16, 16, 4>}, {transform_indices = @transform_5, window_bounds = array<i64: 1, 2, 4>}]} {
    %c0 = arith.constant 0 : index
    %c0_0 = arith.constant 0 : index
    %c0_1 = arith.constant 0 : index
    %c0_2 = arith.constant 0 : index
    %0 = vector.load %arg1[%c0, %c0_0, %c0_1, %c0_2] : memref<1x16x16x4xbf16, #tpu.memory_space<vmem>>, vector<1x16x16x4xbf16>
    %1 = vector.shape_cast %0 : vector<1x16x16x4xbf16> to vector<16x16x4xbf16>
    %2 = arith.extf %1 : vector<16x16x4xbf16> to vector<16x16x4xf32>
    %c0_3 = arith.constant 0 : index
    %c0_4 = arith.constant 0 : index
    %3 = vector.load %arg3[%c0_3, %c0_4] : memref<1x4xf32, #tpu.memory_space<vmem>>, vector<1x4xf32>
    %4 = vector.shape_cast %3 : vector<1x4xf32> to vector<1x1x4xf32>
    %5 = vector.broadcast %4 : vector<1x1x4xf32> to vector<16x16x4xf32>
    %6 = arith.mulf %2, %5 : vector<16x16x4xf32>
    %c0_5 = arith.constant 0 : index
    %c0_6 = arith.constant 0 : index
    %7 = vector.load %arg4[%c0_5, %c0_6] : memref<1x4xf32, #tpu.memory_space<vmem>>, vector<1x4xf32>
    %8 = vector.shape_cast %7 : vector<1x4xf32> to vector<1x1x4xf32>
    %9 = vector.broadcast %8 : vector<1x1x4xf32> to vector<16x16x4xf32>
    %10 = arith.addf %6, %9 : vector<16x16x4xf32>
    %cst = arith.constant 0.000000e+00 : f32
    %11 = vector.broadcast %cst : f32 to vector<16x16x4xf32>
    %12 = arith.maximumf %10, %11 : vector<16x16x4xf32>
    %cst_7 = arith.constant 0.000000e+00 : bf16
    %13 = vector.broadcast %cst_7 : bf16 to vector<1x24x4xbf16>
    %c0_8 = arith.constant 0 : index
    %c0_9 = arith.constant 0 : index
    %c0_10 = arith.constant 0 : index
    %14 = vector.load %arg7[%c0_8, %c0_9, %c0_10] : memref<18x24x4xbf16, #tpu.memory_space<vmem>>, vector<1x24x4xbf16>
    tpu.vector_store %arg7[%c0_8, %c0_9, %c0_10], %13 {strides = array<i32>} : memref<18x24x4xbf16, #tpu.memory_space<vmem>>, vector<1x24x4xbf16>,
    %cst_11 = arith.constant 0.000000e+00 : bf16
    %15 = vector.broadcast %cst_11 : bf16 to vector<1x24x4xbf16>
    %c17 = arith.constant 17 : index
    %c0_12 = arith.constant 0 : index
    %c0_13 = arith.constant 0 : index
    %16 = vector.load %arg7[%c17, %c0_12, %c0_13] : memref<18x24x4xbf16, #tpu.memory_space<vmem>>, vector<1x24x4xbf16>
    tpu.vector_store %arg7[%c17, %c0_12, %c0_13], %15 {strides = array<i32>} : memref<18x24x4xbf16, #tpu.memory_space<vmem>>, vector<1x24x4xbf16>,
    %cst_14 = arith.constant 0.000000e+00 : bf16
    %17 = vector.broadcast %cst_14 : bf16 to vector<18x1x4xbf16>
    %c0_15 = arith.constant 0 : index
    %c0_16 = arith.constant 0 : index
    %c0_17 = arith.constant 0 : index
    %18 = vector.load %arg7[%c0_15, %c0_16, %c0_17] : memref<18x24x4xbf16, #tpu.memory_space<vmem>>, vector<18x1x4xbf16>
    tpu.vector_store %arg7[%c0_15, %c0_16, %c0_17], %17 {strides = array<i32>} : memref<18x24x4xbf16, #tpu.memory_space<vmem>>, vector<18x1x4xbf16>,
    %cst_18 = arith.constant 0.000000e+00 : bf16
    %19 = vector.broadcast %cst_18 : bf16 to vector<18x1x4xbf16>
    %c0_19 = arith.constant 0 : index
    %c17_20 = arith.constant 17 : index
    %c0_21 = arith.constant 0 : index
    %20 = vector.load %arg7[%c0_19, %c17_20, %c0_21] : memref<18x24x4xbf16, #tpu.memory_space<vmem>>, vector<18x1x4xbf16>
    tpu.vector_store %arg7[%c0_19, %c17_20, %c0_21], %19 {strides = array<i32>} : memref<18x24x4xbf16, #tpu.memory_space<vmem>>, vector<18x1x4xbf16>,
    %21 = arith.truncf %12 : vector<16x16x4xf32> to vector<16x16x4xbf16>
    %c1 = arith.constant 1 : index
    %c1_22 = arith.constant 1 : index
    %c0_23 = arith.constant 0 : index
    %22 = vector.load %arg7[%c1, %c1_22, %c0_23] : memref<18x24x4xbf16, #tpu.memory_space<vmem>>, vector<16x16x4xbf16>
    tpu.vector_store %arg7[%c1, %c1_22, %c0_23], %21 {strides = array<i32>} : memref<18x24x4xbf16, #tpu.memory_space<vmem>>, vector<16x16x4xbf16>,
    %c0_24 = arith.constant 0 : index
    %c0_25 = arith.constant 0 : index
    %c0_26 = arith.constant 0 : index
    %23 = vector.load %arg7[%c0_24, %c0_25, %c0_26] : memref<18x24x4xbf16, #tpu.memory_space<vmem>>, vector<16x16x4xbf16>
    %c0_27 = arith.constant 0 : index
    %c0_28 = arith.constant 0 : index
    %c0_29 = arith.constant 0 : index
    %24 = vector.load %arg8[%c0_27, %c0_28, %c0_29] : memref<16x16x36xbf16, #tpu.memory_space<vmem>>, vector<16x16x4xbf16>
    tpu.vector_store %arg8[%c0_27, %c0_28, %c0_29], %23 {strides = array<i32>} : memref<16x16x36xbf16, #tpu.memory_space<vmem>>, vector<16x16x4xbf16>,
    %c0_30 = arith.constant 0 : index
    %c1_31 = arith.constant 1 : index
    %c0_32 = arith.constant 0 : index
    %25 = vector.load %arg7[%c0_30, %c1_31, %c0_32] : memref<18x24x4xbf16, #tpu.memory_space<vmem>>, vector<16x16x4xbf16>
    %c0_33 = arith.constant 0 : index
    %c0_34 = arith.constant 0 : index
    %c4 = arith.constant 4 : index
    %26 = vector.load %arg8[%c0_33, %c0_34, %c4] : memref<16x16x36xbf16, #tpu.memory_space<vmem>>, vector<16x16x4xbf16>
    tpu.vector_store %arg8[%c0_33, %c0_34, %c4], %25 {strides = array<i32>} : memref<16x16x36xbf16, #tpu.memory_space<vmem>>, vector<16x16x4xbf16>,
    %c0_35 = arith.constant 0 : index
    %c2 = arith.constant 2 : index
    %c0_36 = arith.constant 0 : index
    %27 = vector.load %arg7[%c0_35, %c2, %c0_36] : memref<18x24x4xbf16, #tpu.memory_space<vmem>>, vector<16x16x4xbf16>
    %c0_37 = arith.constant 0 : index
    %c0_38 = arith.constant 0 : index
    %c8 = arith.constant 8 : index
    %28 = vector.load %arg8[%c0_37, %c0_38, %c8] : memref<16x16x36xbf16, #tpu.memory_space<vmem>>, vector<16x16x4xbf16>
    tpu.vector_store %arg8[%c0_37, %c0_38, %c8], %27 {strides = array<i32>} : memref<16x16x36xbf16, #tpu.memory_space<vmem>>, vector<16x16x4xbf16>,
    %c1_39 = arith.constant 1 : index
    %c0_40 = arith.constant 0 : index
    %c0_41 = arith.constant 0 : index
    %29 = vector.load %arg7[%c1_39, %c0_40, %c0_41] : memref<18x24x4xbf16, #tpu.memory_space<vmem>>, vector<16x16x4xbf16>
    %c0_42 = arith.constant 0 : index
    %c0_43 = arith.constant 0 : index
    %c12 = arith.constant 12 : index
    %30 = vector.load %arg8[%c0_42, %c0_43, %c12] : memref<16x16x36xbf16, #tpu.memory_space<vmem>>, vector<16x16x4xbf16>
    tpu.vector_store %arg8[%c0_42, %c0_43, %c12], %29 {strides = array<i32>} : memref<16x16x36xbf16, #tpu.memory_space<vmem>>, vector<16x16x4xbf16>,
    %c1_44 = arith.constant 1 : index
    %c1_45 = arith.constant 1 : index
    %c0_46 = arith.constant 0 : index
    %31 = vector.load %arg7[%c1_44, %c1_45, %c0_46] : memref<18x24x4xbf16, #tpu.memory_space<vmem>>, vector<16x16x4xbf16>
    %c0_47 = arith.constant 0 : index
    %c0_48 = arith.constant 0 : index
    %c16 = arith.constant 16 : index
    %32 = vector.load %arg8[%c0_47, %c0_48, %c16] : memref<16x16x36xbf16, #tpu.memory_space<vmem>>, vector<16x16x4xbf16>
    tpu.vector_store %arg8[%c0_47, %c0_48, %c16], %31 {strides = array<i32>} : memref<16x16x36xbf16, #tpu.memory_space<vmem>>, vector<16x16x4xbf16>,
    %c1_49 = arith.constant 1 : index
    %c2_50 = arith.constant 2 : index
    %c0_51 = arith.constant 0 : index
    %33 = vector.load %arg7[%c1_49, %c2_50, %c0_51] : memref<18x24x4xbf16, #tpu.memory_space<vmem>>, vector<16x16x4xbf16>
    %c0_52 = arith.constant 0 : index
    %c0_53 = arith.constant 0 : index
    %c20 = arith.constant 20 : index
    %34 = vector.load %arg8[%c0_52, %c0_53, %c20] : memref<16x16x36xbf16, #tpu.memory_space<vmem>>, vector<16x16x4xbf16>
    tpu.vector_store %arg8[%c0_52, %c0_53, %c20], %33 {strides = array<i32>} : memref<16x16x36xbf16, #tpu.memory_space<vmem>>, vector<16x16x4xbf16>,
    %c2_54 = arith.constant 2 : index
    %c0_55 = arith.constant 0 : index
    %c0_56 = arith.constant 0 : index
    %35 = vector.load %arg7[%c2_54, %c0_55, %c0_56] : memref<18x24x4xbf16, #tpu.memory_space<vmem>>, vector<16x16x4xbf16>
    %c0_57 = arith.constant 0 : index
    %c0_58 = arith.constant 0 : index
    %c24 = arith.constant 24 : index
    %36 = vector.load %arg8[%c0_57, %c0_58, %c24] : memref<16x16x36xbf16, #tpu.memory_space<vmem>>, vector<16x16x4xbf16>
    tpu.vector_store %arg8[%c0_57, %c0_58, %c24], %35 {strides = array<i32>} : memref<16x16x36xbf16, #tpu.memory_space<vmem>>, vector<16x16x4xbf16>,
    %c2_59 = arith.constant 2 : index
    %c1_60 = arith.constant 1 : index
    %c0_61 = arith.constant 0 : index
    %37 = vector.load %arg7[%c2_59, %c1_60, %c0_61] : memref<18x24x4xbf16, #tpu.memory_space<vmem>>, vector<16x16x4xbf16>
    %c0_62 = arith.constant 0 : index
    %c0_63 = arith.constant 0 : index
    %c28 = arith.constant 28 : index
    %38 = vector.load %arg8[%c0_62, %c0_63, %c28] : memref<16x16x36xbf16, #tpu.memory_space<vmem>>, vector<16x16x4xbf16>
    tpu.vector_store %arg8[%c0_62, %c0_63, %c28], %37 {strides = array<i32>} : memref<16x16x36xbf16, #tpu.memory_space<vmem>>, vector<16x16x4xbf16>,
    %c2_64 = arith.constant 2 : index
    %c2_65 = arith.constant 2 : index
    %c0_66 = arith.constant 0 : index
    %39 = vector.load %arg7[%c2_64, %c2_65, %c0_66] : memref<18x24x4xbf16, #tpu.memory_space<vmem>>, vector<16x16x4xbf16>
    %c0_67 = arith.constant 0 : index
    %c0_68 = arith.constant 0 : index
    %c32 = arith.constant 32 : index
    %40 = vector.load %arg8[%c0_67, %c0_68, %c32] : memref<16x16x36xbf16, #tpu.memory_space<vmem>>, vector<16x16x4xbf16>
    tpu.vector_store %arg8[%c0_67, %c0_68, %c32], %39 {strides = array<i32>} : memref<16x16x36xbf16, #tpu.memory_space<vmem>>, vector<16x16x4xbf16>,
    %c0_69 = arith.constant 0 : index
    %c0_70 = arith.constant 0 : index
    %c0_71 = arith.constant 0 : index
    %41 = vector.load %arg8[%c0_69, %c0_70, %c0_71] : memref<16x16x36xbf16, #tpu.memory_space<vmem>>, vector<16x16x36xbf16>
    %42 = vector.shape_cast %41 : vector<16x16x36xbf16> to vector<256x36xbf16>
    %c0_72 = arith.constant 0 : index
    %c0_73 = arith.constant 0 : index
    %43 = vector.load %arg2[%c0_72, %c0_73] : memref<36x4xbf16, #tpu.memory_space<vmem>>, vector<36x4xbf16>
    %cst_74 = arith.constant dense<0.000000e+00> : vector<256x4xf32>
    %44 = tpu.matmul %42, %43, %cst_74 {dimension_numbers = #tpu.dot_dimension_numbers<[1], [0], [0], [1], [0, 0, 1, 1], [], []>} : vector<256x36xbf16>, vector<36x4xbf16>, vector<256x4xf32> -> vector<256x4xf32>
    %45 = vector.shape_cast %44 : vector<256x4xf32> to vector<1x16x16x4xf32>
    %46 = arith.truncf %45 : vector<1x16x16x4xf32> to vector<1x16x16x4xbf16>
    %c0_75 = arith.constant 0 : index
    %c0_76 = arith.constant 0 : index
    %c0_77 = arith.constant 0 : index
    %c0_78 = arith.constant 0 : index
    %47 = vector.load %arg5[%c0_75, %c0_76, %c0_77, %c0_78] : memref<1x16x16x4xbf16, #tpu.memory_space<vmem>>, vector<1x16x16x4xbf16>
    tpu.vector_store %arg5[%c0_75, %c0_76, %c0_77, %c0_78], %46 {strides = array<i32>} : memref<1x16x16x4xbf16, #tpu.memory_space<vmem>>, vector<1x16x16x4xbf16>,
    %cst_79 = arith.constant dense<0.000000e+00> : vector<4xf32>
    %48 = vector.multi_reduction <add>, %44, %cst_79 [0] : vector<256x4xf32> to vector<4xf32>
    %49 = vector.shape_cast %48 : vector<4xf32> to vector<1x4xf32>
    %50 = vector.shape_cast %49 : vector<1x4xf32> to vector<1x1x4xf32>
    %c0_80 = arith.constant 0 : index
    %c0_81 = arith.constant 0 : index
    %c0_82 = arith.constant 0 : index
    %51 = vector.load %arg6[%c0_80, %c0_81, %c0_82] : memref<1x2x4xf32, #tpu.memory_space<vmem>>, vector<1x1x4xf32>
    tpu.vector_store %arg6[%c0_80, %c0_81, %c0_82], %50 {strides = array<i32>} : memref<1x2x4xf32, #tpu.memory_space<vmem>>, vector<1x1x4xf32>,
    %52 = arith.mulf %44, %44 : vector<256x4xf32>
    %cst_83 = arith.constant dense<0.000000e+00> : vector<4xf32>
    %53 = vector.multi_reduction <add>, %52, %cst_83 [0] : vector<256x4xf32> to vector<4xf32>
    %54 = vector.shape_cast %53 : vector<4xf32> to vector<1x4xf32>
    %55 = vector.shape_cast %54 : vector<1x4xf32> to vector<1x1x4xf32>
    %c0_84 = arith.constant 0 : index
    %c1_85 = arith.constant 1 : index
    %c0_86 = arith.constant 0 : index
    %56 = vector.load %arg6[%c0_84, %c1_85, %c0_86] : memref<1x2x4xf32, #tpu.memory_space<vmem>>, vector<1x1x4xf32>
    tpu.vector_store %arg6[%c0_84, %c1_85, %c0_86], %55 {strides = array<i32>} : memref<1x2x4xf32, #tpu.memory_space<vmem>>, vector<1x1x4xf32>,
    return
  }
  func.func @transform_0(%arg0: i32) -> (i32, i32, i32, i32) {
    %c0_i32 = arith.constant 0 : i32
    %c0_i32_0 = arith.constant 0 : i32
    %c0_i32_1 = arith.constant 0 : i32
    %c0_i32_2 = arith.constant 0 : i32
    return %arg0, %c0_i32, %c0_i32_0, %c0_i32_1 : i32, i32, i32, i32
  }
  func.func @transform_1(%arg0: i32) -> (i32, i32) {
    %c0_i32 = arith.constant 0 : i32
    %c0_i32_0 = arith.constant 0 : i32
    %c0_i32_1 = arith.constant 0 : i32
    return %c0_i32, %c0_i32_0 : i32, i32
  }
  func.func @transform_2(%arg0: i32) -> (i32, i32) {
    %c0_i32 = arith.constant 0 : i32
    %c0_i32_0 = arith.constant 0 : i32
    %c0_i32_1 = arith.constant 0 : i32
    return %c0_i32, %c0_i32_0 : i32, i32
  }
  func.func @transform_3(%arg0: i32) -> (i32, i32) {
    %c0_i32 = arith.constant 0 : i32
    %c0_i32_0 = arith.constant 0 : i32
    %c0_i32_1 = arith.constant 0 : i32
    return %c0_i32, %c0_i32_0 : i32, i32
  }
  func.func @transform_4(%arg0: i32) -> (i32, i32, i32, i32) {
    %c0_i32 = arith.constant 0 : i32
    %c0_i32_0 = arith.constant 0 : i32
    %c0_i32_1 = arith.constant 0 : i32
    %c0_i32_2 = arith.constant 0 : i32
    return %arg0, %c0_i32, %c0_i32_0, %c0_i32_1 : i32, i32, i32, i32
  }
  func.func @transform_5(%arg0: i32) -> (i32, i32, i32) {
    %c0_i32 = arith.constant 0 : i32
    %c0_i32_0 = arith.constant 0 : i32
    %c0_i32_1 = arith.constant 0 : i32
    return %arg0, %c0_i32, %c0_i32_0 : i32, i32, i32
  }
}

module attributes {stable_mosaic.version = 11 : i64} {
  func.func @_finalize_kernel(%arg0: i32, %arg1: memref<1x16x16x4xbf16, #tpu.memory_space<vmem>>, %arg2: memref<1x16x16x4xf32, #tpu.memory_space<vmem>>, %arg3: memref<1x4xf32, #tpu.memory_space<vmem>>, %arg4: memref<1x4xf32, #tpu.memory_space<vmem>>, %arg5: memref<1x16x16x4xf32, #tpu.memory_space<vmem>>) attributes {dimension_semantics = [#tpu.dimension_semantics<parallel>], iteration_bounds = array<i64: 2>, scalar_prefetch = 0 : i64, scratch_operands = 0 : i64, tpu.core_type = #tpu.core_type<tc>, window_params = [{transform_indices = @transform_0, window_bounds = array<i64: 1, 16, 16, 4>}, {transform_indices = @transform_1, window_bounds = array<i64: 1, 16, 16, 4>}, {pipeline_mode = #tpu.pipeline_mode<synchronous>, transform_indices = @transform_2, window_bounds = array<i64: 1, 4>}, {pipeline_mode = #tpu.pipeline_mode<synchronous>, transform_indices = @transform_3, window_bounds = array<i64: 1, 4>}, {transform_indices = @transform_4, window_bounds = array<i64: 1, 16, 16, 4>}]} {
    %c0 = arith.constant 0 : index
    %c0_0 = arith.constant 0 : index
    %c0_1 = arith.constant 0 : index
    %c0_2 = arith.constant 0 : index
    %0 = vector.load %arg1[%c0, %c0_0, %c0_1, %c0_2] : memref<1x16x16x4xbf16, #tpu.memory_space<vmem>>, vector<1x16x16x4xbf16>
    %1 = arith.extf %0 : vector<1x16x16x4xbf16> to vector<1x16x16x4xf32>
    %c0_3 = arith.constant 0 : index
    %c0_4 = arith.constant 0 : index
    %2 = vector.load %arg3[%c0_3, %c0_4] : memref<1x4xf32, #tpu.memory_space<vmem>>, vector<1x4xf32>
    %3 = vector.shape_cast %2 : vector<1x4xf32> to vector<1x1x1x4xf32>
    %4 = vector.broadcast %3 : vector<1x1x1x4xf32> to vector<1x16x16x4xf32>
    %5 = arith.mulf %1, %4 : vector<1x16x16x4xf32>
    %c0_5 = arith.constant 0 : index
    %c0_6 = arith.constant 0 : index
    %6 = vector.load %arg4[%c0_5, %c0_6] : memref<1x4xf32, #tpu.memory_space<vmem>>, vector<1x4xf32>
    %7 = vector.shape_cast %6 : vector<1x4xf32> to vector<1x1x1x4xf32>
    %8 = vector.broadcast %7 : vector<1x1x1x4xf32> to vector<1x16x16x4xf32>
    %9 = arith.addf %5, %8 : vector<1x16x16x4xf32>
    %c0_7 = arith.constant 0 : index
    %c0_8 = arith.constant 0 : index
    %c0_9 = arith.constant 0 : index
    %c0_10 = arith.constant 0 : index
    %10 = vector.load %arg2[%c0_7, %c0_8, %c0_9, %c0_10] : memref<1x16x16x4xf32, #tpu.memory_space<vmem>>, vector<1x16x16x4xf32>
    %11 = arith.addf %9, %10 : vector<1x16x16x4xf32>
    %cst = arith.constant 0.000000e+00 : f32
    %12 = vector.broadcast %cst : f32 to vector<1x16x16x4xf32>
    %13 = arith.maximumf %11, %12 : vector<1x16x16x4xf32>
    %c0_11 = arith.constant 0 : index
    %c0_12 = arith.constant 0 : index
    %c0_13 = arith.constant 0 : index
    %c0_14 = arith.constant 0 : index
    %14 = vector.load %arg5[%c0_11, %c0_12, %c0_13, %c0_14] : memref<1x16x16x4xf32, #tpu.memory_space<vmem>>, vector<1x16x16x4xf32>
    tpu.vector_store %arg5[%c0_11, %c0_12, %c0_13, %c0_14], %13 {strides = array<i32>} : memref<1x16x16x4xf32, #tpu.memory_space<vmem>>, vector<1x16x16x4xf32>,
    return
  }
  func.func @transform_0(%arg0: i32) -> (i32, i32, i32, i32) {
    %c0_i32 = arith.constant 0 : i32
    %c0_i32_0 = arith.constant 0 : i32
    %c0_i32_1 = arith.constant 0 : i32
    %c0_i32_2 = arith.constant 0 : i32
    return %arg0, %c0_i32, %c0_i32_0, %c0_i32_1 : i32, i32, i32, i32
  }
  func.func @transform_1(%arg0: i32) -> (i32, i32, i32, i32) {
    %c0_i32 = arith.constant 0 : i32
    %c0_i32_0 = arith.constant 0 : i32
    %c0_i32_1 = arith.constant 0 : i32
    %c0_i32_2 = arith.constant 0 : i32
    return %arg0, %c0_i32, %c0_i32_0, %c0_i32_1 : i32, i32, i32, i32
  }
  func.func @transform_2(%arg0: i32) -> (i32, i32) {
    %c0_i32 = arith.constant 0 : i32
    %c0_i32_0 = arith.constant 0 : i32
    %c0_i32_1 = arith.constant 0 : i32
    return %c0_i32, %c0_i32_0 : i32, i32
  }
  func.func @transform_3(%arg0: i32) -> (i32, i32) {
    %c0_i32 = arith.constant 0 : i32
    %c0_i32_0 = arith.constant 0 : i32
    %c0_i32_1 = arith.constant 0 : i32
    return %c0_i32, %c0_i32_0 : i32, i32
  }
  func.func @transform_4(%arg0: i32) -> (i32, i32, i32, i32) {
    %c0_i32 = arith.constant 0 : i32
    %c0_i32_0 = arith.constant 0 : i32
    %c0_i32_1 = arith.constant 0 : i32
    %c0_i32_2 = arith.constant 0 : i32
    return %arg0, %c0_i32, %c0_i32_0, %c0_i32_1 : i32, i32, i32, i32
  }
}

</mosaic_0001>

<bundles_post_ra>
// kernel: basic_block_forward_nhwc.5
= control target key start
LH: loop header
LB: loop body
LE: loop exit
PB: predicated region body
PF: predicated region fallthrough
CT: control target
= control target key end

     0   :  { %s694_s15 = smov 0   ;;  %s914_s0 = inlined_call_operand.vmem [shape: bf16[2,16,16,4], index: 0, kind: input, shape index: {}]   ;;  %s915_s1 = inlined_call_operand.vmem [shape: f32[2,16,16,4], index: 1, kind: input, shape index: {}]   ;;  %s916_s2 = inlined_call_operand.vmem [shape: f32[1,4], index: 2, kind: input, shape index: {}]   ;;  %s917_s3 = inlined_call_operand.vmem [shape: f32[1,4], index: 3, kind: input, shape index: {}]   ;;  %s918_s4 = inlined_call_operand.vmem [shape: f32[2,16,16,4], index: 4, kind: output, shape index: {}]  }
   0x1 LB: > { %s556_s16 = sadd.s32 4294967295, %s667_s15   ;;  %p560_p0 = scmp.ge.s32.totalorder %s667_s15, 1  ;;  %s667_s15 = sphi %s694_s15, %s14_s15  }
   0x2   : > { %p172_p1 = scmp.lt.s32.totalorder %s667_s15, 3 }
   0x4   : > { %p173_p2 = pnand %p560_p0, %p172_p1 }
   0x5   : > { %p203_p3 = scmp.lt.s32.totalorder (!%p173_p2), %s556_s16, 1  ;;  %v715_v1 = vld [vmem:[%s916_s2] ss:$0 sm:$0xff] (!%p173_p2)  ;;  %vm456_vm0 = vcmask (!%p173_p2), 31744  }
   0x6   : > { %176 = sbr.rel (%p173_p2) target bundleno = 60 (0x3c), region = 36  ;;  %v728_v5 = vld [vmem:[%s917_s3] ss:$0 sm:$0xff] (!%p173_p2) }
   0xd   : > { %s920_s16 = smov (!%p203_p3, %s556_s16), 1 }
   0xe   : > { %s571_s17 = sshll.u32 %s920_s16, 7  ;;  %s572_s18 = sshll.u32 %s920_s16, 8 }
   0xf   : > { %s709_s21 = scalar_lea.vmem %s914_s0, %s571_s17  ;;  %s722_s26 = scalar_lea.vmem %s915_s1, %s572_s18 }
  0x10   : > { %v575_v0 = vld [vmem:[%s709_s21] sm:$0xff]   ;;  %v638_v4 = vld [vmem:[%s709_s21 + $0x8] sm:$0xff]   ;;  %v639_v8 = vld [vmem:[%s709_s21 + $0x10] sm:$0xff]   ;;  %s759_s5 = scalar_lea.vmem %s918_s4, %s572_s18 }
  0x11   : > { %v576_v2 = vunpack.c.l.bf16 %v575_v0  ;;  %v577_v3 = vunpack.c.h.bf16 %v575_v0  ;;  %v580_v6 = vunpack.c.l.bf16 %v638_v4  ;;  %v581_v7 = vunpack.c.h.bf16 %v638_v4  ;;  %v640_v13 = vld [vmem:[%s709_s21 + $0x18] sm:$0xff]   ;;  %v360_v14 = vld [vmem:[%s722_s26] sm:$0xff]  ;;  %v361_v15 = vld [vmem:[%s722_s26 + $0x8] sm:$0xff] }
  0x12   : > { %v584_v11 = vunpack.c.l.bf16 %v639_v8  ;;  %v585_v12 = vunpack.c.h.bf16 %v639_v8  ;;  %v588_v18 = vunpack.c.l.bf16 %v640_v13  ;;  %v589_v19 = vunpack.c.h.bf16 %v640_v13  ;;  %v362_v22 = vld [vmem:[%s722_s26 + $0x10] sm:$0xff]  ;;  %v363_v23 = vld [vmem:[%s722_s26 + $0x18] sm:$0xff]  ;;  %v364_v28 = vld [vmem:[%s722_s26 + $0x20] sm:$0xff] }
  0x13   : > { %v289_v9 = vmul.f32 %v576_v2, %v715_v1  ;;  %v290_v10 = vmul.f32 %v577_v3, %v715_v1  ;;  %v291_v16 = vmul.f32 %v580_v6, %v715_v1  ;;  %v292_v17 = vmul.f32 %v581_v7, %v715_v1  ;;  %v365_v29 = vld [vmem:[%s722_s26 + $0x28] sm:$0xff]  ;;  %v366_v36 = vld [vmem:[%s722_s26 + $0x30] sm:$0xff]  ;;  %v367_v37 = vld [vmem:[%s722_s26 + $0x38] sm:$0xff] }
  0x14   : > { %v293_v24 = vmul.f32 %v584_v11, %v715_v1  ;;  %v294_v25 = vmul.f32 %v585_v12, %v715_v1  ;;  %v295_v30 = vmul.f32 %v588_v18, %v715_v1  ;;  %v296_v31 = vmul.f32 %v589_v19, %v715_v1  ;;  %v641_v42 = vld [vmem:[%s709_s21 + $0x20] sm:$0xff]   ;;  %v642_v47 = vld [vmem:[%s709_s21 + $0x28] sm:$0xff]   ;;  %v643_v52 = vld [vmem:[%s709_s21 + $0x30] sm:$0xff]  }
  0x15   : > { %v328_v20 = vadd.f32 %v728_v5, %v289_v9  ;;  %v329_v21 = vadd.f32 %v728_v5, %v290_v10  ;;  %v330_v26 = vadd.f32 %v728_v5, %v291_v16  ;;  %v331_v27 = vadd.f32 %v728_v5, %v292_v17  ;;  %v644_v57 = vld [vmem:[%s709_s21 + $0x38] sm:$0xff]   ;;  %v368_v3 = vld [vmem:[%s722_s26 + $0x40] sm:$0xff]  ;;  %v369_v4 = vld [vmem:[%s722_s26 + $0x48] sm:$0xff] }
  0x16   : > { %v332_v34 = vadd.f32 %v728_v5, %v293_v24  ;;  %v333_v35 = vadd.f32 %v728_v5, %v294_v25  ;;  %v334_v40 = vadd.f32 %v728_v5, %v295_v30  ;;  %v335_v41 = vadd.f32 %v728_v5, %v296_v31  ;;  %v370_v12 = vld [vmem:[%s722_s26 + $0x50] sm:$0xff]  ;;  %v371_v13 = vld [vmem:[%s722_s26 + $0x58] sm:$0xff]  ;;  %v372_v18 = vld [vmem:[%s722_s26 + $0x60] sm:$0xff] }
  0x17   : > { %v392_v32 = vadd.f32 %v360_v14, %v328_v20  ;;  %v393_v33 = vadd.f32 %v361_v15, %v329_v21  ;;  %v394_v38 = vadd.f32 %v362_v22, %v330_v26  ;;  %v395_v39 = vadd.f32 %v363_v23, %v331_v27  ;;  %v373_v19 = vld [vmem:[%s722_s26 + $0x68] sm:$0xff]  ;;  %v374_v26 = vld [vmem:[%s722_s26 + $0x70] sm:$0xff]  ;;  %v375_v27 = vld [vmem:[%s722_s26 + $0x78] sm:$0xff] }
  0x18   : > { %v396_v45 = vadd.f32 %v364_v28, %v332_v34  ;;  %v397_v46 = vadd.f32 %v365_v29, %v333_v35  ;;  %v398_v50 = vadd.f32 %v366_v36, %v334_v40  ;;  %v399_v51 = vadd.f32 %v367_v37, %v335_v41  ;;  %v646_v37 = vld [vmem:[%s709_s21 + $0x48] sm:$0xff]  }
  0x19   : > { %v424_v43 = vmax.f32 %v392_v32, 0.0  ;;  %v425_v44 = vmax.f32 %v393_v33, 0.0  ;;  %v426_v48 = vmax.f32 %v394_v38, 0.0  ;;  %v427_v49 = vmax.f32 %v395_v39, 0.0  ;;  %v645_v32 = vld [vmem:[%s709_s21 + $0x40] sm:$0xff]  }
  0x1a   : > { %v428_v53 = vmax.f32 %v396_v45, 0.0  ;;  %v429_v54 = vmax.f32 %v397_v46, 0.0  ;;  %v592_v55 = vunpack.c.l.bf16 %v641_v42  ;;  %v593_v56 = vunpack.c.h.bf16 %v641_v42  ;;  %v647_v42 = vld [vmem:[%s709_s21 + $0x50] sm:$0xff]  }
  0x1b   : > { %457 = vst.msk [vmem:[%s759_s5] sm:$0xff] %vm456_vm0, %v424_v43  ;;  %458 = vst.msk [vmem:[%s759_s5 + $0x8] sm:$0xff] %vm456_vm0, %v425_v44  ;;  %v430_v58 = vmax.f32 %v398_v50, 0.0  ;;  %v431_v59 = vmax.f32 %v399_v51, 0.0  ;;  %v596_v60 = vunpack.c.l.bf16 %v642_v47  ;;  %v597_v61 = vunpack.c.h.bf16 %v642_v47  ;;  %v648_v47 = vld [vmem:[%s709_s21 + $0x58] sm:$0xff]  }
  0x1c   : > { %459 = vst.msk [vmem:[%s759_s5 + $0x10] sm:$0xff] %vm456_vm0, %v426_v48  ;;  %460 = vst.msk [vmem:[%s759_s5 + $0x18] sm:$0xff] %vm456_vm0, %v427_v49  ;;  %v297_v62 = vmul.f32 %v592_v55, %v715_v1  ;;  %v298_v63 = vmul.f32 %v593_v56, %v715_v1  ;;  %v600_v0 = vunpack.c.l.bf16 %v643_v52  ;;  %v601_v2 = vunpack.c.h.bf16 %v643_v52  ;;  %v376_v56 = vld [vmem:[%s722_s26 + $0x80] sm:$0xff] }
  0x1d   : > { %461 = vst.msk [vmem:[%s759_s5 + $0x20] sm:$0xff] %vm456_vm0, %v428_v53  ;;  %462 = vst.msk [vmem:[%s759_s5 + $0x28] sm:$0xff] %vm456_vm0, %v429_v54  ;;  %v299_v6 = vmul.f32 %v596_v60, %v715_v1  ;;  %v300_v7 = vmul.f32 %v597_v61, %v715_v1  ;;  %v604_v8 = vunpack.c.l.bf16 %v644_v57  ;;  %v605_v9 = vunpack.c.h.bf16 %v644_v57  ;;  %v377_v57 = vld [vmem:[%s722_s26 + $0x88] sm:$0xff] }
  0x1e   : > { %463 = vst.msk [vmem:[%s759_s5 + $0x30] sm:$0xff] %vm456_vm0, %v430_v58  ;;  %464 = vst.msk [vmem:[%s759_s5 + $0x38] sm:$0xff] %vm456_vm0, %v431_v59  ;;  %v336_v10 = vadd.f32 %v728_v5, %v297_v62  ;;  %v337_v11 = vadd.f32 %v728_v5, %v298_v63  ;;  %v301_v14 = vmul.f32 %v600_v0, %v715_v1  ;;  %v608_v45 = vunpack.c.l.bf16 %v645_v32  ;;  %v378_v0 = vld [vmem:[%s722_s26 + $0x90] sm:$0xff] }
  0x1f   : > { %v302_v15 = vmul.f32 %v601_v2, %v715_v1  ;;  %v338_v16 = vadd.f32 %v728_v5, %v299_v6  ;;  %v339_v17 = vadd.f32 %v728_v5, %v300_v7  ;;  %v303_v20 = vmul.f32 %v604_v8, %v715_v1  ;;  %v379_v2 = vld [vmem:[%s722_s26 + $0x98] sm:$0xff]  ;;  %v380_v8 = vld [vmem:[%s722_s26 + $0xa0] sm:$0xff] }
  0x20   : > { %v304_v21 = vmul.f32 %v605_v9, %v715_v1  ;;  %v400_v22 = vadd.f32 %v368_v3, %v336_v10  ;;  %v401_v23 = vadd.f32 %v369_v4, %v337_v11  ;;  %v340_v24 = vadd.f32 %v728_v5, %v301_v14  ;;  %v381_v9 = vld [vmem:[%s722_s26 + $0xa8] sm:$0xff] }
  0x21   : > { %v341_v25 = vadd.f32 %v728_v5, %v302_v15  ;;  %v402_v28 = vadd.f32 %v370_v12, %v338_v16  ;;  %v403_v29 = vadd.f32 %v371_v13, %v339_v17  ;;  %v342_v30 = vadd.f32 %v728_v5, %v303_v20  ;;  %v382_v16 = vld [vmem:[%s722_s26 + $0xb0] sm:$0xff]  ;;  %v383_v17 = vld [vmem:[%s722_s26 + $0xb8] sm:$0xff] }
  0x22   : > { %v343_v31 = vadd.f32 %v728_v5, %v304_v21  ;;  %v432_v33 = vmax.f32 %v400_v22, 0.0  ;;  %v433_v34 = vmax.f32 %v401_v23, 0.0  ;;  %v404_v35 = vadd.f32 %v372_v18, %v340_v24  ;;  %v649_v22 = vld [vmem:[%s709_s21 + $0x60] sm:$0xff]  }
  0x23   : > { %v405_v36 = vadd.f32 %v373_v19, %v341_v25  ;;  %v434_v38 = vmax.f32 %v402_v28, 0.0  ;;  %v435_v39 = vmax.f32 %v403_v29, 0.0  ;;  %v406_v40 = vadd.f32 %v374_v26, %v342_v30 }
  0x24   : > { %v407_v41 = vadd.f32 %v375_v27, %v343_v31  ;;  %465 = vst.msk [vmem:[%s759_s5 + $0x40] sm:$0xff] %vm456_vm0, %v432_v33  ;;  %466 = vst.msk [vmem:[%s759_s5 + $0x48] sm:$0xff] %vm456_vm0, %v433_v34  ;;  %v436_v43 = vmax.f32 %v404_v35, 0.0  ;;  %v609_v46 = vunpack.c.h.bf16 %v645_v32  ;;  %v612_v50 = vunpack.c.l.bf16 %v646_v37  ;;  %v650_v27 = vld [vmem:[%s709_s21 + $0x68] sm:$0xff]   ;;  %v651_v32 = vld [vmem:[%s709_s21 + $0x70] sm:$0xff]  }
  0x25   : > { %v437_v44 = vmax.f32 %v405_v36, 0.0  ;;  %467 = vst.msk [vmem:[%s759_s5 + $0x50] sm:$0xff] %vm456_vm0, %v434_v38  ;;  %468 = vst.msk [vmem:[%s759_s5 + $0x58] sm:$0xff] %vm456_vm0, %v435_v39  ;;  %v438_v48 = vmax.f32 %v406_v40, 0.0  ;;  %v613_v51 = vunpack.c.h.bf16 %v646_v37  ;;  %v305_v52 = vmul.f32 %v608_v45, %v715_v1  ;;  %v652_v37 = vld [vmem:[%s709_s21 + $0x78] sm:$0xff]  }
  0x26   : > { %v439_v49 = vmax.f32 %v407_v41, 0.0  ;;  %469 = vst.msk [vmem:[%s759_s5 + $0x60] sm:$0xff] %vm456_vm0, %v436_v43  ;;  %v306_v53 = vmul.f32 %v609_v46, %v715_v1  ;;  %v616_v54 = vunpack.c.l.bf16 %v647_v42  ;;  %v617_v55 = vunpack.c.h.bf16 %v647_v42  ;;  %v384_v46 = vld [vmem:[%s722_s26 + $0xc0] sm:$0xff] }
  0x27   : > { %470 = vst.msk [vmem:[%s759_s5 + $0x68] sm:$0xff] %vm456_vm0, %v437_v44  ;;  %471 = vst.msk [vmem:[%s759_s5 + $0x70] sm:$0xff] %vm456_vm0, %v438_v48  ;;  %v307_v58 = vmul.f32 %v612_v50, %v715_v1  ;;  %v308_v59 = vmul.f32 %v613_v51, %v715_v1  ;;  %v620_v60 = vunpack.c.l.bf16 %v648_v47  ;;  %v621_v61 = vunpack.c.h.bf16 %v648_v47  ;;  %v385_v47 = vld [vmem:[%s722_s26 + $0xc8] sm:$0xff] }
  0x28   : > { %472 = vst.msk [vmem:[%s759_s5 + $0x78] sm:$0xff] %vm456_vm0, %v439_v49  ;;  %v344_v62 = vadd.f32 %v728_v5, %v305_v52  ;;  %v345_v63 = vadd.f32 %v728_v5, %v306_v53  ;;  %v309_v3 = vmul.f32 %v616_v54, %v715_v1  ;;  %v310_v4 = vmul.f32 %v617_v55, %v715_v1  ;;  %v386_v54 = vld [vmem:[%s722_s26 + $0xd0] sm:$0xff]  ;;  %v387_v55 = vld [vmem:[%s722_s26 + $0xd8] sm:$0xff] }
  0x29   : > { %v346_v6 = vadd.f32 %v728_v5, %v307_v58  ;;  %v347_v7 = vadd.f32 %v728_v5, %v308_v59  ;;  %v311_v10 = vmul.f32 %v620_v60, %v715_v1  ;;  %v312_v11 = vmul.f32 %v621_v61, %v715_v1  ;;  %v388_v60 = vld [vmem:[%s722_s26 + $0xe0] sm:$0xff]  ;;  %v389_v61 = vld [vmem:[%s722_s26 + $0xe8] sm:$0xff] }
  0x2a   : > { %v408_v12 = vadd.f32 %v376_v56, %v344_v62  ;;  %v409_v13 = vadd.f32 %v377_v57, %v345_v63  ;;  %v348_v14 = vadd.f32 %v728_v5, %v309_v3  ;;  %v349_v15 = vadd.f32 %v728_v5, %v310_v4 }
  0x2b   : > { %v410_v18 = vadd.f32 %v378_v0, %v346_v6  ;;  %v411_v19 = vadd.f32 %v379_v2, %v347_v7  ;;  %v350_v20 = vadd.f32 %v728_v5, %v311_v10  ;;  %v351_v21 = vadd.f32 %v728_v5, %v312_v11  ;;  %v390_v6 = vld [vmem:[%s722_s26 + $0xf0] sm:$0xff]  ;;  %v391_v7 = vld [vmem:[%s722_s26 + $0xf8] sm:$0xff] }
  0x2c   : > { %v440_v23 = vmax.f32 %v408_v12, 0.0  ;;  %v441_v24 = vmax.f32 %v409_v13, 0.0  ;;  %v412_v25 = vadd.f32 %v380_v8, %v348_v14  ;;  %v413_v26 = vadd.f32 %v381_v9, %v349_v15 }
  0x2d   : > { %v442_v28 = vmax.f32 %v410_v18, 0.0  ;;  %v443_v29 = vmax.f32 %v411_v19, 0.0  ;;  %v414_v30 = vadd.f32 %v382_v16, %v350_v20  ;;  %v415_v31 = vadd.f32 %v383_v17, %v351_v21 }
  0x2e   : > { %473 = vst.msk [vmem:[%s759_s5 + $0x80] sm:$0xff] %vm456_vm0, %v440_v23  ;;  %474 = vst.msk [vmem:[%s759_s5 + $0x88] sm:$0xff] %vm456_vm0, %v441_v24  ;;  %v444_v33 = vmax.f32 %v412_v25, 0.0  ;;  %v445_v34 = vmax.f32 %v413_v26, 0.0  ;;  %v624_v35 = vunpack.c.l.bf16 %v649_v22  ;;  %v625_v36 = vunpack.c.h.bf16 %v649_v22 }
  0x2f   : > { %475 = vst.msk [vmem:[%s759_s5 + $0x90] sm:$0xff] %vm456_vm0, %v442_v28  ;;  %476 = vst.msk [vmem:[%s759_s5 + $0x98] sm:$0xff] %vm456_vm0, %v443_v29  ;;  %v446_v38 = vmax.f32 %v414_v30, 0.0  ;;  %v447_v39 = vmax.f32 %v415_v31, 0.0  ;;  %v628_v40 = vunpack.c.l.bf16 %v650_v27  ;;  %v629_v41 = vunpack.c.h.bf16 %v650_v27 }
  0x30   : > { %477 = vst.msk [vmem:[%s759_s5 + $0xa0] sm:$0xff] %vm456_vm0, %v444_v33  ;;  %478 = vst.msk [vmem:[%s759_s5 + $0xa8] sm:$0xff] %vm456_vm0, %v445_v34  ;;  %v313_v42 = vmul.f32 %v624_v35, %v715_v1  ;;  %v314_v43 = vmul.f32 %v625_v36, %v715_v1  ;;  %v632_v44 = vunpack.c.l.bf16 %v651_v32  ;;  %v633_v45 = vunpack.c.h.bf16 %v651_v32 }
  0x31   : > { %479 = vst.msk [vmem:[%s759_s5 + $0xb0] sm:$0xff] %vm456_vm0, %v446_v38  ;;  %480 = vst.msk [vmem:[%s759_s5 + $0xb8] sm:$0xff] %vm456_vm0, %v447_v39  ;;  %v315_v48 = vmul.f32 %v628_v40, %v715_v1  ;;  %v316_v49 = vmul.f32 %v629_v41, %v715_v1  ;;  %v636_v50 = vunpack.c.l.bf16 %v652_v37  ;;  %v637_v51 = vunpack.c.h.bf16 %v652_v37 }
  0x32   : > { %v352_v52 = vadd.f32 %v728_v5, %v313_v42  ;;  %v353_v53 = vadd.f32 %v728_v5, %v314_v43  ;;  %v317_v56 = vmul.f32 %v632_v44, %v715_v1  ;;  %v318_v57 = vmul.f32 %v633_v45, %v715_v1 }
  0x33   : > { %v354_v58 = vadd.f32 %v728_v5, %v315_v48  ;;  %v355_v59 = vadd.f32 %v728_v5, %v316_v49  ;;  %v319_v62 = vmul.f32 %v636_v50, %v715_v1  ;;  %v320_v63 = vmul.f32 %v637_v51, %v715_v1 }
  0x34   : > { %v416_v0 = vadd.f32 %v384_v46, %v352_v52  ;;  %v417_v2 = vadd.f32 %v385_v47, %v353_v53  ;;  %v356_v3 = vadd.f32 %v728_v5, %v317_v56  ;;  %v357_v4 = vadd.f32 %v728_v5, %v318_v57 }
  0x35   : > { %v418_v8 = vadd.f32 %v386_v54, %v354_v58  ;;  %v419_v9 = vadd.f32 %v387_v55, %v355_v59  ;;  %v358_v10 = vadd.f32 %v728_v5, %v319_v62  ;;  %v359_v11 = vadd.f32 %v728_v5, %v320_v63 }
  0x36   : > { %v448_v12 = vmax.f32 %v416_v0, 0.0  ;;  %v449_v1 = vmax.f32 %v417_v2, 0.0  ;;  %v420_v13 = vadd.f32 %v388_v60, %v356_v3  ;;  %v421_v14 = vadd.f32 %v389_v61, %v357_v4 }
  0x37   : > { %v450_v15 = vmax.f32 %v418_v8, 0.0  ;;  %v451_v16 = vmax.f32 %v419_v9, 0.0  ;;  %v422_v17 = vadd.f32 %v390_v6, %v358_v10  ;;  %v423_v18 = vadd.f32 %v391_v7, %v359_v11 }
  0x38   : > { %481 = vst.msk [vmem:[%s759_s5 + $0xc0] sm:$0xff] %vm456_vm0, %v448_v12  ;;  %482 = vst.msk [vmem:[%s759_s5 + $0xc8] sm:$0xff] %vm456_vm0, %v449_v1  ;;  %v452_v19 = vmax.f32 %v420_v13, 0.0  ;;  %v453_v20 = vmax.f32 %v421_v14, 0.0 }
  0x39   : > { %483 = vst.msk [vmem:[%s759_s5 + $0xd0] sm:$0xff] %vm456_vm0, %v450_v15  ;;  %484 = vst.msk [vmem:[%s759_s5 + $0xd8] sm:$0xff] %vm456_vm0, %v451_v16  ;;  %v454_v5 = vmax.f32 %v422_v17, 0.0  ;;  %v455_v21 = vmax.f32 %v423_v18, 0.0 }
  0x3a   : > { %485 = vst.msk [vmem:[%s759_s5 + $0xe0] sm:$0xff] %vm456_vm0, %v452_v19  ;;  %486 = vst.msk [vmem:[%s759_s5 + $0xe8] sm:$0xff] %vm456_vm0, %v453_v20 }
  0x3b   : > { %487 = vst.msk [vmem:[%s759_s5 + $0xf0] sm:$0xff] %vm456_vm0, %v454_v5  ;;  %488 = vst.msk [vmem:[%s759_s5 + $0xf8] sm:$0xff] %vm456_vm0, %v455_v21 }
  0x3c PF: > { %s14_s15 = sadd.s32 1, %s667_s15  }
  0x3d   : > { %p11_p4 = scmp.ge.s32.totalorder %s14_s15, 4  }
  0x3f   :  { %13 = sbr.rel (!%p11_p4) target bundleno = 1 (0x1), region = 69 }

// kernel: basic_block_forward_nhwc.3
= control target key start
LH: loop header
LB: loop body
LE: loop exit
PB: predicated region body
PF: predicated region fallthrough
CT: control target
= control target key end

     0   :  { %s5033_s18 = smov 0   ;;  %s6024_s0 = inlined_call_operand.vmem [shape: f32[2,16,16,4], index: 0, kind: input, shape index: {}]   ;;  %s6025_s1 = inlined_call_operand.vmem [shape: bf16[36,4], index: 1, kind: input, shape index: {}]   ;;  %s6026_s2 = inlined_call_operand.vmem [shape: f32[1,4], index: 2, kind: input, shape index: {}]   ;;  %s6027_s3 = inlined_call_operand.vmem [shape: f32[1,4], index: 3, kind: input, shape index: {}]   ;;  %s6028_s4 = inlined_call_operand.vmem [shape: bf16[2,16,16,4], index: 4, kind: output, shape index: {0}]   ;;  %s6029_s5 = inlined_call_operand.vmem [shape: f32[2,2,4], index: 5, kind: output, shape index: {1}]  }
   0x1 LB: > { %s4260_s2 = sadd.s32 4294967295, %s4992_s18   ;;  %p4264_p0 = scmp.ge.s32.totalorder %s4992_s18, 1  ;;  %s4992_s18 = sphi %s5033_s18, %s16_s18  }
   0x2   : > { %p190_p1 = scmp.lt.s32.totalorder %s4992_s18, 3 }
   0x4   : > { %p191_p2 = pnand %p4264_p0, %p190_p1 }
   0x5   : > { %p222_p3 = scmp.lt.s32.totalorder (!%p191_p2), %s4260_s2, 1  ;;  %vm269_vm0 = vcmask (!%p191_p2), 27648   ;;  %vm6030_vm1 = vcmask (!%p191_p2), 24576   ;;  %vm278_vm2 = vsmask.f32 (!%p191_p2), 256  ;;  %v4994_v4 = vmov (!%p191_p2), 0  }
   0x6   : > { %194 = sbr.rel (%p191_p2) target bundleno = 686 (0x2ae), region = 36  ;;  %vm5043_vm3 = vmand (!%p191_p2), %vm6030_vm1, %vm278_vm2  ;;  %v283_v1 = vld [vmem:[#allocation2 + $0xc] sm:$0x1] (!%p191_p2)  ;;  %vm334_vm4 = vsmask.f32 (!%p191_p2), 7938  ;;  %vm1678_vm9 = vcmask (!%p191_p2), 1046528  }
   0x7   : > { %v284_v2 = vsel (!%p191_p2), %vm5043_vm3, 0, %v283_v1  ;;  %v286_v3 = vld [vmem:[#allocation2 + $0x18] sm:$0x1] (!%p191_p2)  ;;  %270 = vst.msk [vmem:[#allocation2] sm:$0xf] (!%p191_p2), %vm269_vm0, %v4994_v4  ;;  %vm5062_vm5 = vmand (!%p191_p2), %vm6030_vm1, %vm334_vm4  ;;  %s4995_s22 = smov (!%p191_p2), 8  }
   0x8   : > { %285 = vst [vmem:[#allocation2 + $0xc] sm:$0x1] (!%p191_p2), %v284_v2  ;;  %271 = vst.msk [vmem:[#allocation2 + $0x4] sm:$0xf] (!%p191_p2), %vm269_vm0, %v4994_v4  ;;  %v287_v5 = vsel (!%p191_p2), %vm5043_vm3, 0, %v286_v3  ;;  %s4996_s23 = smov (!%p191_p2), 12  }
   0x9   : > { %272 = vst.msk [vmem:[#allocation2 + $0x8] sm:$0xf] (!%p191_p2), %vm269_vm0, %v4994_v4  ;;  %274 = vst.msk [vmem:[#allocation2 + $0xcc] sm:$0xf] (!%p191_p2), %vm269_vm0, %v4994_v4  ;;  %v289_v7 = vld [vmem:[#allocation2 + $0x24] sm:$0x1] (!%p191_p2) }
   0xa   : > { %275 = vst.msk [vmem:[#allocation2 + $0xd0] sm:$0xf] (!%p191_p2), %vm269_vm0, %v4994_v4  ;;  %276 = vst.msk [vmem:[#allocation2 + $0xd4] sm:$0xf] (!%p191_p2), %vm269_vm0, %v4994_v4  ;;  %v339_v8 = vld [vmem:[#allocation2 + $0x14] sm:$0x1] (!%p191_p2) }
   0xb   : > { %288 = vst [vmem:[#allocation2 + $0x18] sm:$0x1] (!%p191_p2), %v287_v5  ;;  %v290_v9 = vsel (!%p191_p2), %vm5043_vm3, 0, %v289_v7  ;;  %v340_v10 = vsel (!%p191_p2), %vm5062_vm5, 0, %v339_v8  ;;  %v342_v11 = vld [vmem:[#allocation2 + $0x20] sm:$0x1] (!%p191_p2)  ;;  %vm5094_vm8 = vmand (!%p191_p2), %vm269_vm0, %vm334_vm4 }
   0xc   : > { %291 = vst [vmem:[#allocation2 + $0x24] sm:$0x1] (!%p191_p2), %v290_v9  ;;  %341 = vst [vmem:[#allocation2 + $0x14] sm:$0x1] (!%p191_p2), %v340_v10  ;;  %v343_v15 = vsel (!%p191_p2), %vm5062_vm5, 0, %v342_v11  ;;  %s4997_s24 = smov (!%p191_p2), 24  }
   0xd   : > { %s6076_s2 = smov (!%p222_p3, %s4260_s2), 1  ;;  %344 = vst [vmem:[#allocation2 + $0x20] sm:$0x1] %v343_v15  ;;  %vm486_vm6 = vsmask.f32 4368  ;;  %s4998_s25 = smov 4  }
   0xe   : > { %s4595_s3 = sshll.u32 %s6076_s2, 8  ;;  %vm5086_vm7 = vmor %vm278_vm2, %vm486_vm6  ;;  %v280_v46 = vld [vmem:[#allocation2] sm:$0x1]  ;;  %v345_v5 = vld [vmem:[#allocation2 + $0x2c] sm:$0x1]  ;;  %s4999_s26 = smov 20  }
   0xf   : > { %s5069_s21 = scalar_lea.vmem %s6024_s0, %s4595_s3  ;;  %v811_v28 = vld [vmem:[#allocation2 + $0xc] sm:$0xf]  ;;  %v5098_v37 = vld [vmem:[#allocation2] sm:$0xfe]   ;;  %v281_v50 = vsel %vm5043_vm3, 0, %v280_v46  ;;  %s5000_s27 = smov 32  }
  0x10   : > { %v237_v12 = vld [vmem:[%s5069_s21] sm:$0xff]  ;;  %v238_v13 = vld [vmem:[%s5069_s21 + $0x8] sm:$0xff]  ;;  %v239_v14 = vld [vmem:[%s5069_s21 + $0x10] sm:$0xff]  ;;  %v1679_v47 = vrot.slane %v5098_v37, 1  ;;  %282 = vst [vmem:[#allocation2] sm:$0x1] %v281_v50 }
  0x11   : > { %v4597_v16 = vpack.c.bf16 %v237_v12, %v237_v12  ;;  %v4598_v17 = vpack.c.bf16 %v238_v13, %v238_v13  ;;  %v240_v18 = vld [vmem:[%s5069_s21 + $0x18] sm:$0xff]  ;;  %v4599_v19 = vpack.c.bf16 %v239_v14, %v239_v14  ;;  %v241_v20 = vld [vmem:[%s5069_s21 + $0x20] sm:$0xff]  ;;  %v242_v21 = vld [vmem:[%s5069_s21 + $0x28] sm:$0xff]  ;;  %vm1244_vm10 = vsmask.f32 7424  ;;  %s5001_s28 = smov 16  }
  0x12   : > { %v4600_v22 = vpack.c.bf16 %v240_v18, %v240_v18  ;;  %v4601_v23 = vpack.c.bf16 %v241_v20, %v241_v20  ;;  %v336_v29 = vld [vmem:[#allocation2 + $0x8] sm:$0x1]  ;;  %v5083_v30 = vpack.c.bf16 %v242_v21, %v242_v21  ;;  %v243_v51 = vld [vmem:[%s5069_s21 + $0x30] sm:$0xff]  ;;  %v818_v54 = vld [vmem:[#allocation2 + $0x18] sm:$0xf]  ;;  %s5002_s29 = smov 28  }
  0x13   : > { %v489_v24 = vshrl.u32 %v4597_v16, 16  ;;  %v492_v25 = vshll.u32 %v4597_v16, 16  ;;  %v497_v26 = vshrl.u32 %v4598_v17, 16  ;;  %v500_v27 = vshll.u32 %v4598_v17, 16  ;;  %v815_v57 = vld [vmem:[#allocation2 + $0x14] sm:$0x1] }
  0x14   : > { %v337_v34 = vsel %vm5062_vm5, 0, %v336_v29  ;;  %v506_v35 = vshrl.u32 %v4599_v19, 16  ;;  %v509_v38 = vshll.u32 %v4599_v19, 16  ;;  %v514_v39 = vshrl.u32 %v4600_v22, 16  ;;  %v825_v62 = vld [vmem:[#allocation2 + $0x24] sm:$0xf] }
  0x15   : > { %v491_v32 = vrot.slane %v489_v24, 7  ;;  %v499_v33 = vrot.slane %v497_v26, 7  ;;  %338 = vst [vmem:[#allocation2 + $0x8] sm:$0x1] %v337_v34  ;;  %v517_v40 = vshll.u32 %v4600_v22, 16  ;;  %v523_v41 = vshrl.u32 %v4601_v23, 16 }
  0x16   : > { %v508_v48 = vrot.slane %v506_v35, 7  ;;  %v516_v49 = vrot.slane %v514_v39, 7  ;;  %v526_v56 = vshll.u32 %v4601_v23, 16  ;;  %v822_v63 = vld [vmem:[#allocation2 + $0x20] sm:$0x1]  ;;  %v531_v3 = vshrl.u32 %v5083_v30, 16 }
  0x17   : > { %v494_v42 = vor.u32 %v492_v25, %v491_v32  ;;  %v495_v43 = vrot.slane %v491_v32, 4  ;;  %v502_v44 = vor.u32 %v500_v27, %v499_v33  ;;  %v504_v45 = vrot.slane %v499_v33, 4  ;;  %v292_v11 = vld [vmem:[#allocation2 + $0x30] sm:$0x1]  ;;  %v4748_v21 = vld [vmem:[#allocation2] sm:$0xff]   ;;  %s4596_s11 = sshll.u32 %s6076_s2, 7 }
  0x18   : > { %v525_v55 = vrot.slane %v523_v41, 7  ;;  %v511_v58 = vor.u32 %v509_v38, %v508_v48  ;;  %v512_v59 = vrot.slane %v508_v48, 4  ;;  %v519_v60 = vor.u32 %v517_v40, %v516_v49  ;;  %s5864_s14 = scalar_lea.vmem %s6028_s4, %s4596_s11  ;;  %s4269_s15 = sshll.u32 %s6076_s2, 1 }
  0x19   : > { %v503_v52 = vsel %vm5086_vm7, %v495_v43, %v502_v44  ;;  %v812_v53 = vsel %vm5094_vm8, %v494_v42, %v811_v28  ;;  %v521_v61 = vrot.slane %v516_v49, 4  ;;  %v534_v4 = vshll.u32 %v5083_v30, 16  ;;  %s235_s3 = scalar_lea.vmem %s6029_s5, %s4269_s15 }
  0x1a   : > { %813 = vst [vmem:[#allocation2 + $0xc] sm:$0xf] %v812_v53  ;;  %814 = vst.msk [vmem:[#allocation2 + $0x10] sm:$0xf] %vm269_vm0, %v503_v52  ;;  %v528_v1 = vor.u32 %v526_v56, %v525_v55  ;;  %v529_v2 = vrot.slane %v525_v55, 4  ;;  %v520_v7 = vsel %vm5086_vm7, %v512_v59, %v519_v60  ;;  %v819_v8 = vsel %vm5094_vm8, %v511_v58, %v818_v54 }
  0x1b   : > { %v816_v9 = vsel %vm5043_vm3, %v504_v45, %v815_v57  ;;  %v823_v10 = vsel %vm5043_vm3, %v521_v61, %v822_v63  ;;  %820 = vst [vmem:[#allocation2 + $0x18] sm:$0xf] %v819_v8  ;;  %821 = vst.msk [vmem:[#allocation2 + $0x1c] sm:$0xf] %vm269_vm0, %v520_v7  ;;  %v5120_v13 = vrot.slane %v531_v3, 7  ;;  %v5124_v15 = vpack.c.bf16 %v243_v51, %v243_v51 }
  0x1c   : > { %v4745_v12 = vld [vmem:[#allocation2 + $0x8] ss:$0 sps:$4 sm:$0x11]   ;;  %v826_v14 = vsel %vm5094_vm8, %v528_v1, %v825_v62  ;;  %817 = vst [vmem:[#allocation2 + $0x14] sm:$0x1] %v816_v9  ;;  %v346_v17 = vsel %vm5062_vm5, 0, %v345_v5 }
  0x1d   : > { %824 = vst [vmem:[#allocation2 + $0x20] sm:$0x1] %v823_v10  ;;  %v4749_v16 = vld [vmem:[#allocation2 + $0x8] ss:$0 sps:$4 sm:$0x11]   ;;  %v1680_v18 = vrot.slane %v4745_v12, 1  ;;  %v536_v19 = vor.u32 %v534_v4, %v5120_v13 }
  0x1e   : > { %827 = vst [vmem:[#allocation2 + $0x24] sm:$0xf] %v826_v14  ;;  %347 = vst [vmem:[#allocation2 + $0x2c] sm:$0x1] %v346_v17  ;;  %v293_v20 = vsel %vm5043_vm3, 0, %v292_v11  ;;  %v1253_v22 = vshll.u32 %v4749_v16, 16 }
  0x1f   : > { %v538_v23 = vrot.slane %v5120_v13, 4  ;;  %294 = vst [vmem:[#allocation2 + $0x30] sm:$0x1] %v293_v20  ;;  %v1681_v25 = vsel %vm1678_vm9, %v1679_v47, %v1680_v18  ;;  %v537_v26 = vsel %vm5086_vm7, %v529_v2, %v536_v19  ;;  %v540_v27 = vshrl.u32 %v5124_v15, 16  ;;  %v244_v16 = vld [vmem:[%s5069_s21 + $0x38] sm:$0xff] }
  0x20   : > { %1727 = vrot.lane.b32.xlu1 %v1681_v25, %s4995_s22  ;;  %v1246_v28 = vshrl.u32 %v4748_v21, 16  ;;  %v1248_v29 = vshll.u32 %v4748_v21, 16  ;;  %v1255_v30 = vrot.slane %v1253_v22, 1  ;;  %828 = vst.msk [vmem:[#allocation2 + $0x28] sm:$0xf] %vm269_vm0, %v537_v26  ;;  %v543_v32 = vshll.u32 %v5124_v15, 16 }
  0x21   : > { %v4743_v24 = vld [vmem:[#allocation2 + $0xc] sm:$0xff]   ;;  %vm1051_vm11 = vcmask 31744   ;;  %vm1485_vm12 = vcmask 64544   ;;  %vm6032_vm13 = vcmask 97344   ;;  %vm6031_vm14 = vcmask 130144  }
  0x22   : > { %1904 = vrot.lane.b32.xlu0 %v4743_v24, %s4996_s23  ;;  %v4751_v33 = vld [vmem:[#allocation2 + $0xc] sm:$0xfe]   ;;  %v4746_v34 = vld [vmem:[#allocation2 + $0x18] sm:$0xff]   ;;  %v1250_v35 = vrot.slane %v1248_v29, 1  ;;  %vm2385_vm15 = vcmask 162944   ;;  %vm2674_vm2 = vcmask 195744  }
  0x23   : > { %v4763_v37 = vld [vmem:[#allocation2 + $0xc] sm:$0xff]   ;;  %v4747_v38 = vld [vmem:[#allocation2 + $0x18] sm:$0xff]   ;;  %v2578_v39 = vrot.slane %v4751_v33, 1  ;;  %v4752_v41 = vld [vmem:[#allocation2 + $0x14] ss:$0 sps:$4 sm:$0x11]  }
  0x24   : > { %v1251_v40 = vor.u32 %v1250_v35, %v1246_v28  ;;  %1906 = vrot.lane.b32.xlu1 %v4747_v38, %s4996_s23  ;;  %v4761_v42 = vld [vmem:[#allocation2 + $0x18] sm:$0xff]   ;;  %v4753_v44 = vld [vmem:[#allocation2 + $0xc] sm:$0xfe]   ;;  %v4754_v45 = vld [vmem:[#allocation2 + $0x14] ss:$0 sps:$4 sm:$0x11]  }
  0x25   : > { %v1258_v46 = vshrl.u32 %v4763_v37, 16  ;;  %v2579_v48 = vrot.slane %v4752_v41, 1  ;;  %v1682_v49 = vrot.slane %v4753_v44, 1  ;;  %v1683_v50 = vrot.slane %v4754_v45, 1  ;;  %v4755_v51 = vld [vmem:[#allocation2 + $0x18] sm:$0xfe]  }
  0x26   : > { %2804 = vrot.lane.b32.xlu0 %v4746_v34, %s4997_s24  ;;  %v1256_v43 = vsel %vm1244_vm10, %v1251_v40, %v1255_v30  ;;  %v4756_v52 = vld [vmem:[#allocation2 + $0x20] ss:$0 sps:$4 sm:$0x11]   ;;  %v2158_v53 = vshrl.u32 %v4761_v42, 16  ;;  %v3478_v56 = vrot.slane %v4755_v51, 1  ;;  %v2160_v62 = vshll.u32 %v4761_v42, 16 }
  0x27   : > { %v4750_v47 = vld [vmem:[#allocation2 + $0x24] sm:$0xff]   ;;  %v2580_v54 = vsel %vm1678_vm9, %v2578_v39, %v2579_v48  ;;  %v1684_v55 = vsel %vm1678_vm9, %v1682_v49, %v1683_v50  ;;  %v3479_v57 = vrot.slane %v4756_v52, 1  ;;  %v4757_v58 = vld [vmem:[#allocation2 + $0x18] sm:$0xfe]   ;;  %v829_v59 = vld [vmem:[#allocation2 + $0x2c] sm:$0x1] }
  0x28   : > { %2806 = vrot.lane.b32.xlu1 %v4750_v47, %s4997_s24  ;;  %v4758_v60 = vld [vmem:[#allocation2 + $0x20] ss:$0 sps:$4 sm:$0x11]   ;;  %v830_v61 = vsel %vm5043_vm3, %v538_v23, %v829_v59  ;;  %v2581_v63 = vrot.slane %v4757_v58, 1  ;;  %v4759_v1 = vld [vmem:[#allocation2 + $0x24] sm:$0xfe]  }
  0x29   : > { %831 = vst [vmem:[#allocation2 + $0x2c] sm:$0x1] %v830_v61  ;;  %v1260_v2 = vshll.u32 %v4763_v37, 16  ;;  %v3480_v3 = vsel %vm1678_vm9, %v3478_v56, %v3479_v57  ;;  %v2582_v4 = vrot.slane %v4758_v60, 1  ;;  %v2162_v5 = vrot.slane %v2160_v62, 1  ;;  %v4765_v14 = vld [vmem:[#allocation2 + $0x24] sm:$0xff]  }
  0x2a   : > { %1437 = vrot.lane.b32.xlu0 %v1256_v43, %s4998_s25  ;;  %v3481_v7 = vrot.slane %v4759_v1, 1  ;;  %v4762_v8 = vld [vmem:[#allocation2 + $0x20] ss:$0 sps:$4 sm:$0x11]   ;;  %v3058_v19 = vshrl.u32 %v4765_v14, 16  ;;  %v4767_v20 = vld [vmem:[#allocation2 + $0xc] sm:$0xff]   ;;  %v5158_v37 = vpack.c.bf16 %v244_v16, %v244_v16 }
  0x2b   : > { %v2583_v9 = vsel %vm1678_vm9, %v2581_v63, %v2582_v4  ;;  %v2163_v10 = vor.u32 %v2162_v5, %v2158_v53  ;;  %v2165_v11 = vshll.u32 %v4762_v8, 16  ;;  %v4764_v12 = vld [vmem:[#allocation2 + $0x14] ss:$0 sps:$4 sm:$0x11]   ;;  %v1262_v13 = vrot.slane %v1260_v2, 1  ;;  %v4769_v41 = vld [vmem:[#allocation2 + $0x18] sm:$0xff]  }
  0x2c   : > { %1729 = vrot.lane.b32.xlu1 %v1684_v55, %s4995_s22  ;;  %v1265_v18 = vshll.u32 %v4764_v12, 16  ;;  %v3060_v22 = vshll.u32 %v4765_v14, 16  ;;  %v2146_v30 = vshrl.u32 %v4767_v20, 16  ;;  %v2148_v33 = vshll.u32 %v4767_v20, 16  ;;  %v4771_v45 = vld [vmem:[#allocation2 + $0x18] sm:$0xff]   ;;  %v4773_v53 = vld [vmem:[#allocation2 + $0x24] sm:$0xff]  }
  0x2d   : > { %v2167_v17 = vrot.slane %v2165_v11, 1  ;;  %v1263_v24 = vor.u32 %v1262_v13, %v1258_v46  ;;  %v4768_v35 = vld [vmem:[#allocation2 + $0x14] ss:$0 sps:$4 sm:$0x11]   ;;  %v1270_v48 = vshrl.u32 %v4769_v41, 16  ;;  %v1272_v49 = vshll.u32 %v4769_v41, 16 }
  0x2e   : > { %2626 = vrot.lane.b32.xlu0 %v2580_v54, %s4999_s26  ;;  %v1267_v25 = vrot.slane %v1265_v18, 1  ;;  %v3062_v29 = vrot.slane %v3060_v22, 1  ;;  %v2150_v40 = vrot.slane %v2148_v33, 1  ;;  %v2153_v43 = vshll.u32 %v4768_v35, 16  ;;  %v4775_v11 = vld [vmem:[#allocation2 + $0x18] sm:$0xfe]  }
  0x2f   : > { %v2168_v23 = vsel %vm1244_vm10, %v2163_v10, %v2167_v17  ;;  %v4770_v44 = vld [vmem:[#allocation2 + $0x20] ss:$0 sps:$4 sm:$0x11]   ;;  %v548_v54 = vshrl.u32 %v5158_v37, 16  ;;  %v1274_v55 = vrot.slane %v1272_v49, 1  ;;  %v3046_v57 = vshrl.u32 %v4771_v45, 16 }
  0x30   : > { %2628 = vrot.lane.b32.xlu1 %v2583_v9, %s4999_s26  ;;  %v4760_v21 = vld [vmem:[#allocation2 + $0x2c] ss:$0 sps:$4 sm:$0x11]   ;;  %v3063_v39 = vor.u32 %v3062_v29, %v3058_v19  ;;  %v1268_v46 = vsel %vm1244_vm10, %v1263_v24, %v1267_v25  ;;  %v2151_v47 = vor.u32 %v2150_v40, %v2146_v30  ;;  %v2155_v51 = vrot.slane %v2153_v43, 1  ;;  %v245_v13 = vld [vmem:[%s5069_s21 + $0x40] sm:$0xff] }
  0x31   : > { %v4766_v26 = vld [vmem:[#allocation2 + $0x2c] ss:$0 sps:$4 sm:$0x11]   ;;  %v3482_v28 = vrot.slane %v4760_v21, 1  ;;  %v1277_v52 = vshll.u32 %v4770_v44, 16  ;;  %v3048_v58 = vshll.u32 %v4771_v45, 16  ;;  %v1275_v62 = vor.u32 %v1274_v55, %v1270_v48 }
  0x32   : > { %3526 = vrot.lane.b32.xlu0 %v3480_v3, %s5000_s27  ;;  %v3065_v34 = vshll.u32 %v4766_v26, 16  ;;  %v4772_v56 = vld [vmem:[#allocation2 + $0x20] ss:$0 sps:$4 sm:$0x11]   ;;  %v2156_v59 = vsel %vm1244_vm10, %v2151_v47, %v2155_v51  ;;  %v1282_v61 = vshrl.u32 %v4773_v53, 16  ;;  %v1284_v2 = vshll.u32 %v4773_v53, 16 }
  0x33   : > { %v3483_v38 = vsel %vm1678_vm9, %v3481_v7, %v3482_v28  ;;  %v1279_v60 = vrot.slane %v1277_v52, 1  ;;  %v3050_v63 = vrot.slane %v3048_v58, 1  ;;  %v3053_v1 = vshll.u32 %v4772_v56, 16  ;;  %v4774_v3 = vld [vmem:[#allocation2 + $0x2c] ss:$0 sps:$4 sm:$0x11]  }
  0x34   : > { %2339 = vrot.lane.b32.xlu1 %v2168_v23, %s5001_s28  ;;  %v3067_v42 = vrot.slane %v3065_v34, 1  ;;  %v542_v4 = vrot.slane %v540_v27, 7  ;;  %v1286_v9 = vrot.slane %v1284_v2, 1  ;;  %v1289_v10 = vshll.u32 %v4774_v3, 16  ;;  %v4781_v27 = vld [vmem:[#allocation2 + $0x24] sm:$0xff]   ;;  %v248_v3 = vld [vmem:[%s5069_s21 + $0x58] sm:$0xff] }
  0x35   : > { %v1280_v5 = vsel %vm1244_vm10, %v1275_v62, %v1279_v60  ;;  %v3051_v7 = vor.u32 %v3050_v63, %v3046_v57  ;;  %v3055_v8 = vrot.slane %v3053_v1, 1  ;;  %v4776_v12 = vld [vmem:[#allocation2 + $0x20] ss:$0 sps:$4 sm:$0x11]   ;;  %v246_v18 = vld [vmem:[%s5069_s21 + $0x48] sm:$0xff]  ;;  %v1685_v20 = vrot.slane %v4775_v11, 1 }
  0x36   : > { %3528 = vrot.lane.b32.xlu0 %v3483_v38, %s5000_s27  ;;  %v3068_v50 = vsel %vm1244_vm10, %v3063_v39, %v3067_v42  ;;  %v1287_v16 = vor.u32 %v1286_v9, %v1282_v61  ;;  %v545_v17 = vor.u32 %v543_v32, %v542_v4  ;;  %v1291_v19 = vrot.slane %v1289_v10, 1  ;;  %v4777_v22 = vld [vmem:[#allocation2 + $0x24] sm:$0xfe]   ;;  %v348_v24 = vld [vmem:[#allocation2 + $0x38] sm:$0x1]  ;;  %v247_v39 = vld [vmem:[%s5069_s21 + $0x50] sm:$0xff] }
  0x37   : > { %v3056_v14 = vsel %vm1244_vm10, %v3051_v7, %v3055_v8  ;;  %v1686_v21 = vrot.slane %v4776_v12, 1  ;;  %v546_v23 = vrot.slane %v542_v4, 4  ;;  %v4778_v25 = vld [vmem:[#allocation2 + $0x2c] ss:$0 sps:$4 sm:$0x11]   ;;  %v5178_v26 = vrot.slane %v548_v54, 7 }
  0x38   : > { %3239 = vrot.lane.b32.xlu1 %v3068_v50, %s5002_s29  ;;  %v295_v28 = vld [vmem:[#allocation2 + $0x3c] sm:$0x1]  ;;  %v1292_v29 = vsel %vm1244_vm10, %v1287_v16, %v1291_v19  ;;  %v1688_v30 = vrot.slane %v4777_v22, 1  ;;  %v551_v15 = vshll.u32 %v5158_v37, 16  ;;  %v832_v32 = vld [vmem:[#allocation2 + $0x30] sm:$0xf]  ;;  %v4605_v38 = vpack.c.bf16 %v245_v13, %v245_v13 }
  0x39   : > { %v1687_v33 = vsel %vm1678_vm9, %v1685_v20, %v1686_v21  ;;  %v1689_v34 = vrot.slane %v4778_v25, 1  ;;  %v833_v35 = vsel %vm5094_vm8, %v545_v17, %v832_v32  ;;  %v4779_v40 = vld [vmem:[#allocation2 + $0x24] sm:$0xff]   ;;  %v4782_v42 = vld [vmem:[#allocation2 + $0x2c] ss:$0 sps:$4 sm:$0x11]   ;;  %v2170_v43 = vshrl.u32 %v4781_v27, 16 }
  0x3a   : > { %1439 = vrot.lane.b32.xlu0 %v1268_v46, %s4998_s25  ;;  %v553_v41 = vor.u32 %v551_v15, %v5178_v26  ;;  %834 = vst [vmem:[#allocation2 + $0x30] sm:$0xf] %v833_v35  ;;  %v4606_v44 = vpack.c.bf16 %v246_v18, %v246_v18  ;;  %v351_v45 = vld [vmem:[#allocation2 + $0x44] sm:$0x1]  ;;  %v2172_v46 = vshll.u32 %v4781_v27, 16  ;;  %v349_v47 = vsel %vm5062_vm5, 0, %v348_v24 }
  0x3b   : > { %v1690_v37 = vsel %vm1678_vm9, %v1688_v30, %v1689_v34  ;;  %v298_v48 = vld [vmem:[#allocation2 + $0x48] sm:$0x1]  ;;  %v2177_v50 = vshll.u32 %v4782_v42, 16  ;;  %350 = vst [vmem:[#allocation2 + $0x38] sm:$0x1] %v349_v47  ;;  %v296_v52 = vsel %vm5043_vm3, 0, %v295_v28  ;;  %v5197_v53 = vpack.c.bf16 %v247_v39, %v247_v39 }
  0x3c   : > { %1441 = vrot.lane.b32.xlu1 %v1280_v5, %s4998_s25  ;;  %v554_v49 = vsel %vm5086_vm7, %v546_v23, %v553_v41  ;;  %v4785_v51 = vld [vmem:[#allocation2 + $0x24] sm:$0xfe]   ;;  %v555_v54 = vrot.slane %v5178_v26, 4  ;;  %v2174_v55 = vrot.slane %v2172_v46, 1  ;;  %297 = vst [vmem:[#allocation2 + $0x3c] sm:$0x1] %v296_v52  ;;  %v4608_v12 = vpack.c.bf16 %v248_v3, %v248_v3 }
  0x3d   : > { %835 = vst.msk [vmem:[#allocation2 + $0x34] sm:$0xf] %vm269_vm0, %v554_v49  ;;  %v4786_v56 = vld [vmem:[#allocation2 + $0x2c] ss:$0 sps:$4 sm:$0x11]   ;;  %v557_v57 = vshrl.u32 %v4605_v38, 16 }
  0x3e   : > { %2337 = vrot.lane.b32.xlu0 %v2156_v59, %s5001_s28  ;;  %v2179_v58 = vrot.slane %v2177_v50, 1  ;;  %v560_v59 = vshll.u32 %v4605_v38, 16  ;;  %v565_v60 = vshrl.u32 %v4606_v44, 16  ;;  %v568_v61 = vshll.u32 %v4606_v44, 16 }
  0x3f   : > { %v2175_v62 = vor.u32 %v2174_v55, %v2170_v43  ;;  %v2584_v63 = vrot.slane %v4785_v51, 1  ;;  %v559_v1 = vrot.slane %v557_v57, 7  ;;  %v352_v2 = vsel %vm5062_vm5, 0, %v351_v45 }
  0x40   : > { %1443 = vrot.lane.b32.xlu1 %v1292_v29, %s4998_s25  ;;  %v2585_v4 = vrot.slane %v4786_v56, 1  ;;  %v567_v5 = vrot.slane %v565_v60, 7  ;;  %353 = vst [vmem:[#allocation2 + $0x44] sm:$0x1] %v352_v2  ;;  %v299_v7 = vsel %vm5043_vm3, 0, %v298_v48  ;;  %v574_v8 = vshrl.u32 %v5197_v53, 16 }
  0x41   : > { %v2180_v9 = vsel %vm1244_vm10, %v2175_v62, %v2179_v58  ;;  %300 = vst [vmem:[#allocation2 + $0x48] sm:$0x1] %v299_v7  ;;  %v563_v10 = vrot.slane %v559_v1, 4  ;;  %v582_v24 = vshrl.u32 %v4608_v12, 16  ;;  %v577_v30 = vshll.u32 %v5197_v53, 16 }
  0x42   : > { %3237 = vrot.lane.b32.xlu0 %v3056_v14, %s5002_s29  ;;  %v570_v11 = vor.u32 %v568_v61, %v567_v5  ;;  %v836_v13 = vld [vmem:[#allocation2 + $0x38] sm:$0x1]  ;;  %v562_v14 = vor.u32 %v560_v59, %v559_v1  ;;  %v572_v18 = vrot.slane %v567_v5, 4  ;;  %v2586_v20 = vsel %vm1678_vm9, %v2584_v63, %v2585_v4 }
  0x43   : > { %v837_v17 = vsel %vm5043_vm3, %v555_v54, %v836_v13  ;;  %v5217_v22 = vrot.slane %v574_v8, 7  ;;  %v839_v23 = vld [vmem:[#allocation2 + $0x3c] sm:$0xf]  ;;  %v5229_v41 = vrot.slane %v582_v24, 7  ;;  %v585_v46 = vshll.u32 %v4608_v12, 16 }
  0x44   : > { %1733 = vrot.lane.b32.xlu1 %v1690_v37, %s4995_s22  ;;  %v4780_v16 = vld [vmem:[#allocation2 + $0x30] sm:$0xff]   ;;  %v571_v27 = vsel %vm5086_vm7, %v563_v10, %v570_v11  ;;  %838 = vst [vmem:[#allocation2 + $0x38] sm:$0x1] %v837_v17  ;;  %v840_v28 = vsel %vm5094_vm8, %v562_v14, %v839_v23  ;;  %v249_v17 = vld [vmem:[%s5069_s21 + $0x60] sm:$0xff]  ;;  %vm2852_vm4 = vcmask 228544   ;;  %vm3285_vm6 = vcmask 261344  }
  0x45   : > { %v4783_v19 = vld [vmem:[#allocation2 + $0x30] sm:$0xff]   ;;  %842 = vst.msk [vmem:[#allocation2 + $0x40] sm:$0xf] %vm269_vm0, %v571_v27  ;;  %841 = vst [vmem:[#allocation2 + $0x3c] sm:$0xf] %v840_v28  ;;  %v580_v39 = vrot.slane %v5217_v22, 4  ;;  %v587_v54 = vor.u32 %v585_v46, %v5229_v41 }
  0x46   : > { %1731 = vrot.lane.b32.xlu0 %v1687_v33, %s4995_s22  ;;  %v4787_v21 = vld [vmem:[#allocation2 + $0x30] sm:$0xfe]   ;;  %v2184_v25 = vshll.u32 %v4783_v19, 16  ;;  %v2182_v33 = vshrl.u32 %v4783_v19, 16  ;;  %vm6033_vm1 = vcmask 294144  }
  0x47   : > { %v4789_v26 = vld [vmem:[#allocation2 + $0x30] sm:$0xff]   ;;  %v843_v15 = vld [vmem:[#allocation2 + $0x44] sm:$0x1]  ;;  %v2587_v42 = vrot.slane %v4787_v21, 1  ;;  %v588_v59 = vsel %vm5086_vm7, %v580_v39, %v587_v54 }
  0x48   : > { %1910 = vrot.lane.b32.xlu1 %v4780_v16, %s4996_s23  ;;  %v4791_v29 = vld [vmem:[#allocation2 + $0x30] sm:$0xff]   ;;  %v844_v35 = vsel %vm5043_vm3, %v572_v18, %v843_v15  ;;  %849 = vst.msk [vmem:[#allocation2 + $0x4c] sm:$0xf] %vm269_vm0, %v588_v59 }
  0x49   : > { %v4795_v32 = vld [vmem:[#allocation2 + $0x30] sm:$0xfe]   ;;  %v3072_v34 = vshll.u32 %v4791_v29, 16  ;;  %845 = vst [vmem:[#allocation2 + $0x44] sm:$0x1] %v844_v35  ;;  %v3070_v43 = vshrl.u32 %v4791_v29, 16 }
  0x4a   : > { %1908 = vrot.lane.b32.xlu0 %v4779_v40, %s4996_s23  ;;  %v5226_v38 = vld [vmem:[#allocation2 + $0x30] sm:$0xff]   ;;  %v2186_v40 = vrot.slane %v2184_v25, 1  ;;  %v3484_v44 = vrot.slane %v4795_v32, 1  ;;  %v250_v35 = vld [vmem:[%s5069_s21 + $0x68] sm:$0xff] }
  0x4b   : > { %v1296_v45 = vshll.u32 %v5226_v38, 16  ;;  %v4784_v37 = vld [vmem:[#allocation2 + $0x38] ss:$0 sps:$4 sm:$0x11]   ;;  %v3074_v48 = vrot.slane %v3072_v34, 1  ;;  %v1294_v52 = vshrl.u32 %v5226_v38, 16 }
  0x4c   : > { %v4788_v47 = vld [vmem:[#allocation2 + $0x38] ss:$0 sps:$4 sm:$0x11]   ;;  %v5233_v49 = vld [vmem:[#allocation2 + $0x30] sm:$0xfe]   ;;  %v2187_v50 = vor.u32 %v2186_v40, %v2182_v33  ;;  %v2189_v51 = vshll.u32 %v4784_v37, 16 }
  0x4d   : > { %v2588_v55 = vrot.slane %v4788_v47, 1  ;;  %v1298_v56 = vrot.slane %v1296_v45, 1  ;;  %v4792_v58 = vld [vmem:[#allocation2 + $0x38] ss:$0 sps:$4 sm:$0x11]   ;;  %v4793_v60 = vld [vmem:[#allocation2 + $0x3c] sm:$0xff]   ;;  %v3075_v63 = vor.u32 %v3074_v48, %v3070_v43 }
  0x4e   : > { %2341 = vrot.lane.b32.xlu0 %v2180_v9, %s5001_s28  ;;  %v2191_v57 = vrot.slane %v2189_v51, 1  ;;  %v3077_v1 = vshll.u32 %v4792_v58, 16  ;;  %v4796_v2 = vld [vmem:[#allocation2 + $0x38] ss:$0 sps:$4 sm:$0x11]   ;;  %v3084_v3 = vshll.u32 %v4793_v60, 16 }
  0x4f   : > { %v4801_v5 = vld [vmem:[#allocation2 + $0x3c] sm:$0xff]   ;;  %v1691_v7 = vrot.slane %v5233_v49, 1  ;;  %v2589_v8 = vsel %vm1678_vm9, %v2587_v42, %v2588_v55  ;;  %v3082_v10 = vshrl.u32 %v4793_v60, 16  ;;  %v3485_v11 = vrot.slane %v4796_v2, 1  ;;  %v354_v21 = vld [vmem:[#allocation2 + $0x50] sm:$0x1] }
  0x50   : > { %v4794_v61 = vld [vmem:[#allocation2 + $0x44] ss:$0 sps:$4 sm:$0x11]   ;;  %v2192_v62 = vsel %vm1244_vm10, %v2187_v50, %v2191_v57  ;;  %v3079_v9 = vrot.slane %v3077_v1, 1  ;;  %v4790_v13 = vld [vmem:[#allocation2 + $0x3c] sm:$0xff]   ;;  %v3086_v14 = vrot.slane %v3084_v3, 1  ;;  %v4609_v42 = vpack.c.bf16 %v249_v17, %v249_v17 }
  0x51   : > { %2343 = vrot.lane.b32.xlu1 %v2192_v62, %s5001_s28  ;;  %v3089_v4 = vshll.u32 %v4794_v61, 16  ;;  %v4798_v12 = vld [vmem:[#allocation2 + $0x38] ss:$0 sps:$4 sm:$0x11]   ;;  %v4799_v19 = vld [vmem:[#allocation2 + $0x3c] sm:$0xfe]   ;;  %v1299_v43 = vor.u32 %v1298_v56, %v1294_v52  ;;  %v4610_v56 = vpack.c.bf16 %v250_v35, %v250_v35 }
  0x52   : > { %2630 = vrot.lane.b32.xlu0 %v2586_v20, %s4999_s26  ;;  %v3080_v27 = vsel %vm1244_vm10, %v3075_v63, %v3079_v9  ;;  %v1301_v18 = vshll.u32 %v4798_v12, 16  ;;  %v1306_v20 = vshrl.u32 %v4801_v5, 16  ;;  %v4800_v23 = vld [vmem:[#allocation2 + $0x44] ss:$0 sps:$4 sm:$0x11]   ;;  %v1308_v24 = vshll.u32 %v4801_v5, 16 }
  0x53   : > { %v3091_v16 = vrot.slane %v3089_v4, 1  ;;  %v3087_v25 = vor.u32 %v3086_v14, %v3082_v10  ;;  %v3487_v29 = vrot.slane %v4799_v19, 1  ;;  %v3488_v15 = vrot.slane %v4800_v23, 1  ;;  %v4802_v32 = vld [vmem:[#allocation2 + $0x44] ss:$0 sps:$4 sm:$0x11]  }
  0x54   : > { %v1303_v28 = vrot.slane %v1301_v18, 1  ;;  %v1310_v33 = vrot.slane %v1308_v24, 1  ;;  %v589_v34 = vrot.slane %v5229_v41, 4  ;;  %v4804_v38 = vld [vmem:[#allocation2 + $0x38] ss:$0 sps:$4 sm:$0x11]  }
  0x55   : > { %2632 = vrot.lane.b32.xlu1 %v2589_v8, %s4999_s26  ;;  %v4809_v39 = vld [vmem:[#allocation2 + $0x3c] sm:$0xff]   ;;  %v301_v40 = vld [vmem:[#allocation2 + $0x54] sm:$0x1]  ;;  %v1313_v45 = vshll.u32 %v4802_v32, 16  ;;  %v355_v37 = vsel %vm5062_vm5, 0, %v354_v21  ;;  %v3092_v41 = vsel %vm1244_vm10, %v3087_v25, %v3091_v16  ;;  %v3489_v46 = vsel %vm1678_vm9, %v3487_v29, %v3488_v15 }
  0x56   : > { %2808 = vrot.lane.b32.xlu0 %v4789_v26, %s4997_s24  ;;  %v3486_v26 = vsel %vm1678_vm9, %v3484_v44, %v3485_v11  ;;  %v579_v44 = vor.u32 %v577_v30, %v5217_v22  ;;  %v1692_v47 = vrot.slane %v4804_v38, 1  ;;  %v4805_v48 = vld [vmem:[#allocation2 + $0x3c] sm:$0xfe]   ;;  %v2194_v49 = vshrl.u32 %v4809_v39, 16  ;;  %356 = vst [vmem:[#allocation2 + $0x50] sm:$0x1] %v355_v37 }
  0x57   : > { %v1315_v50 = vrot.slane %v1313_v45, 1  ;;  %v4806_v51 = vld [vmem:[#allocation2 + $0x44] ss:$0 sps:$4 sm:$0x11]   ;;  %v1694_v54 = vrot.slane %v4805_v48, 1  ;;  %v2196_v55 = vshll.u32 %v4809_v39, 16  ;;  %v1304_v53 = vsel %vm1244_vm10, %v1299_v43, %v1303_v28 }
  0x58   : > { %v846_v52 = vld [vmem:[#allocation2 + $0x48] sm:$0xf]  ;;  %v1695_v22 = vrot.slane %v4806_v51, 1  ;;  %v302_v57 = vsel %vm5043_vm3, 0, %v301_v40  ;;  %v1311_v58 = vor.u32 %v1310_v33, %v1306_v20  ;;  %v1693_v59 = vsel %vm1678_vm9, %v1691_v7, %v1692_v47  ;;  %v251_v62 = vld [vmem:[%s5069_s21 + $0x70] sm:$0xff]  ;;  %v4807_v63 = vld [vmem:[#allocation2 + $0x3c] sm:$0xff]  }
  0x59   : > { %2810 = vrot.lane.b32.xlu1 %v4790_v13, %s4997_s24  ;;  %v847_v30 = vsel %vm5094_vm8, %v579_v44, %v846_v52  ;;  %v2198_v60 = vrot.slane %v2196_v55, 1  ;;  %303 = vst [vmem:[#allocation2 + $0x54] sm:$0x1] %v302_v57  ;;  %v591_v61 = vshrl.u32 %v4609_v42, 16  ;;  %v594_v2 = vshll.u32 %v4609_v42, 16 }
  0x5a   : > { %3241 = vrot.lane.b32.xlu0 %v3080_v27, %s5002_s29  ;;  %848 = vst [vmem:[#allocation2 + $0x48] sm:$0xf] %v847_v30  ;;  %v4810_v1 = vld [vmem:[#allocation2 + $0x44] ss:$0 sps:$4 sm:$0x11]   ;;  %v1316_v10 = vsel %vm1244_vm10, %v1311_v58, %v1315_v50  ;;  %v599_v13 = vshrl.u32 %v4610_v56, 16  ;;  %v5274_v16 = vpack.c.bf16 %v251_v62, %v251_v62  ;;  %v1696_v20 = vsel %vm1678_vm9, %v1694_v54, %v1695_v22 }
  0x5b   : > { %v357_v3 = vld [vmem:[#allocation2 + $0x5c] sm:$0x1]  ;;  %v2201_v4 = vshll.u32 %v4810_v1, 16  ;;  %v4813_v8 = vld [vmem:[#allocation2 + $0x3c] sm:$0xfe]   ;;  %v593_v9 = vrot.slane %v591_v61, 7  ;;  %v2199_v7 = vor.u32 %v2198_v60, %v2194_v49 }
  0x5c   : > { %v4814_v12 = vld [vmem:[#allocation2 + $0x44] ss:$0 sps:$4 sm:$0x11]   ;;  %v601_v27 = vrot.slane %v599_v13, 7  ;;  %v602_v18 = vshll.u32 %v4610_v56, 16  ;;  %v358_v19 = vsel %vm5062_vm5, 0, %v357_v3 }
  0x5d   : > { %3243 = vrot.lane.b32.xlu1 %v3092_v41, %s5002_s29  ;;  %v850_v5 = vld [vmem:[#allocation2 + $0x50] sm:$0x1]  ;;  %v2203_v14 = vrot.slane %v2201_v4, 1  ;;  %v597_v17 = vrot.slane %v593_v9, 4  ;;  %v596_v21 = vor.u32 %v594_v2, %v593_v9  ;;  %359 = vst [vmem:[#allocation2 + $0x5c] sm:$0x1] %v358_v19 }
  0x5e   : > { %3530 = vrot.lane.b32.xlu0 %v3486_v26, %s5000_s27  ;;  %v851_v11 = vsel %vm5043_vm3, %v589_v34, %v850_v5  ;;  %v2590_v25 = vrot.slane %v4813_v8, 1  ;;  %v2591_v26 = vrot.slane %v4814_v12, 1  ;;  %v604_v28 = vor.u32 %v602_v18, %v601_v27 }
  0x5f   : > { %852 = vst [vmem:[#allocation2 + $0x50] sm:$0x1] %v851_v11  ;;  %v2204_v23 = vsel %vm1244_vm10, %v2199_v7, %v2203_v14  ;;  %v608_v38 = vshrl.u32 %v5274_v16, 16  ;;  %v606_v39 = vrot.slane %v601_v27, 4 }
  0x60   : > { %v853_v15 = vld [vmem:[#allocation2 + $0x54] sm:$0xf]  ;;  %v605_v35 = vsel %vm5086_vm7, %v597_v17, %v604_v28  ;;  %v2592_v44 = vsel %vm1678_vm9, %v2590_v25, %v2591_v26 }
  0x61   : > { %1445 = vrot.lane.b32.xlu1 %v1304_v53, %s4998_s25  ;;  %v4811_v24 = vld [vmem:[#allocation2 + $0x48] sm:$0xff]   ;;  %v854_v40 = vsel %vm5094_vm8, %v596_v21, %v853_v15  ;;  %856 = vst.msk [vmem:[#allocation2 + $0x58] sm:$0xf] %vm269_vm0, %v605_v35  ;;  %v5296_v61 = vrot.slane %v608_v38, 7 }
  0x62   : > { %3532 = vrot.lane.b32.xlu0 %v3489_v46, %s5000_s27  ;;  %v4815_v29 = vld [vmem:[#allocation2 + $0x48] sm:$0xfe]   ;;  %v2206_v33 = vshrl.u32 %v4811_v24, 16  ;;  %v2208_v34 = vshll.u32 %v4811_v24, 16  ;;  %855 = vst [vmem:[#allocation2 + $0x54] sm:$0xf] %v854_v40 }
  0x63   : > { %v4808_v32 = vld [vmem:[#allocation2 + $0x48] sm:$0xff]   ;;  %v2593_v41 = vrot.slane %v4815_v29, 1  ;;  %v252_v29 = vld [vmem:[%s5069_s21 + $0x78] sm:$0xff] }
  0x64   : > { %v4819_v42 = vld [vmem:[#allocation2 + $0x48] sm:$0xff]   ;;  %v2210_v45 = vrot.slane %v2208_v34, 1  ;;  %v857_v52 = vld [vmem:[#allocation2 + $0x5c] sm:$0x1] }
  0x65   : > { %1447 = vrot.lane.b32.xlu1 %v1316_v10, %s4998_s25  ;;  %v4817_v46 = vld [vmem:[#allocation2 + $0x48] sm:$0xff]   ;;  %v3094_v51 = vshrl.u32 %v4819_v42, 16  ;;  %v3096_v54 = vshll.u32 %v4819_v42, 16  ;;  %v858_v22 = vsel %vm5043_vm3, %v606_v39, %v857_v52 }
  0x66   : > { %1735 = vrot.lane.b32.xlu0 %v1693_v59, %s4995_s22  ;;  %v4812_v43 = vld [vmem:[#allocation2 + $0x50] ss:$0 sps:$4 sm:$0x11]   ;;  %v4823_v47 = vld [vmem:[#allocation2 + $0x48] sm:$0xfe]   ;;  %v2211_v48 = vor.u32 %v2210_v45, %v2206_v33 }
  0x67   : > { %v4816_v37 = vld [vmem:[#allocation2 + $0x50] ss:$0 sps:$4 sm:$0x11]   ;;  %v2213_v49 = vshll.u32 %v4812_v43, 16  ;;  %v3098_v57 = vrot.slane %v3096_v54, 1  ;;  %v4825_v58 = vld [vmem:[#allocation2 + $0x48] sm:$0xff]  }
  0x68   : > { %v4820_v50 = vld [vmem:[#allocation2 + $0x50] ss:$0 sps:$4 sm:$0x11]   ;;  %v2594_v56 = vrot.slane %v4816_v37, 1  ;;  %859 = vst [vmem:[#allocation2 + $0x5c] sm:$0x1] %v858_v22 }
  0x69   : > { %1737 = vrot.lane.b32.xlu1 %v1696_v20, %s4995_s22  ;;  %v2215_v55 = vrot.slane %v2213_v49, 1  ;;  %v3101_v53 = vshll.u32 %v4820_v50, 16  ;;  %v4824_v30 = vld [vmem:[#allocation2 + $0x50] ss:$0 sps:$4 sm:$0x11]   ;;  %v3099_v62 = vor.u32 %v3098_v57, %v3094_v51  ;;  %v4821_v3 = vld [vmem:[#allocation2 + $0x54] sm:$0xff]  }
  0x6a   : > { %1912 = vrot.lane.b32.xlu0 %v4807_v63, %s4996_s23  ;;  %v3490_v63 = vrot.slane %v4823_v47, 1  ;;  %v3491_v1 = vrot.slane %v4824_v30, 1  ;;  %v2595_v2 = vsel %vm1678_vm9, %v2593_v41, %v2594_v56  ;;  %v4826_v4 = vld [vmem:[#allocation2 + $0x50] ss:$0 sps:$4 sm:$0x11]   ;;  %v4818_v5 = vld [vmem:[#allocation2 + $0x54] sm:$0xff]  }
  0x6b   : > { %v2216_v59 = vsel %vm1244_vm10, %v2211_v48, %v2215_v55  ;;  %v3103_v60 = vrot.slane %v3101_v53, 1  ;;  %v1320_v9 = vshll.u32 %v4825_v58, 16  ;;  %v4829_v10 = vld [vmem:[#allocation2 + $0x54] sm:$0xff]   ;;  %v3106_v7 = vshrl.u32 %v4821_v3, 16  ;;  %v4831_v40 = vld [vmem:[#allocation2 + $0x48] sm:$0xfe]  }
  0x6c   : > { %v3108_v11 = vshll.u32 %v4821_v3, 16  ;;  %v1318_v12 = vshrl.u32 %v4825_v58, 16  ;;  %v1325_v13 = vshll.u32 %v4826_v4, 16  ;;  %v4827_v14 = vld [vmem:[#allocation2 + $0x54] sm:$0xfe]   ;;  %v1330_v27 = vshrl.u32 %v4829_v10, 16 }
  0x6d   : > { %1914 = vrot.lane.b32.xlu1 %v4808_v32, %s4996_s23  ;;  %v3104_v8 = vsel %vm1244_vm10, %v3099_v62, %v3103_v60  ;;  %v1322_v17 = vrot.slane %v1320_v9, 1  ;;  %v3492_v20 = vsel %vm1678_vm9, %v3490_v63, %v3491_v1  ;;  %v3493_v26 = vrot.slane %v4827_v14, 1  ;;  %v4832_v42 = vld [vmem:[#allocation2 + $0x50] ss:$0 sps:$4 sm:$0x11]   ;;  %v4837_v43 = vld [vmem:[#allocation2 + $0x54] sm:$0xff]  }
  0x6e   : > { %2345 = vrot.lane.b32.xlu0 %v2204_v23, %s5001_s28  ;;  %v3110_v19 = vrot.slane %v3108_v11, 1  ;;  %v1327_v21 = vrot.slane %v1325_v13, 1  ;;  %v1332_v28 = vshll.u32 %v4829_v10, 16  ;;  %v1697_v41 = vrot.slane %v4831_v40, 1  ;;  %v4833_v47 = vld [vmem:[#allocation2 + $0x54] sm:$0xfe]  }
  0x6f   : > { %v4822_v18 = vld [vmem:[#allocation2 + $0x5c] ss:$0 sps:$4 sm:$0x11]   ;;  %v1323_v34 = vor.u32 %v1322_v17, %v1318_v12  ;;  %v611_v48 = vshll.u32 %v5274_v16, 16  ;;  %v614_v54 = vrot.slane %v5296_v61, 4  ;;  %v1700_v55 = vrot.slane %v4833_v47, 1 }
  0x70   : > { %v4828_v23 = vld [vmem:[#allocation2 + $0x5c] ss:$0 sps:$4 sm:$0x11]   ;;  %v3111_v24 = vor.u32 %v3110_v19, %v3106_v7  ;;  %v3113_v25 = vshll.u32 %v4822_v18, 16  ;;  %v1334_v35 = vrot.slane %v1332_v28, 1  ;;  %v4835_v56 = vld [vmem:[#allocation2 + $0x54] sm:$0xff]  }
  0x71   : > { %2347 = vrot.lane.b32.xlu1 %v2216_v59, %s5001_s28  ;;  %v3494_v15 = vrot.slane %v4828_v23, 1  ;;  %v4830_v32 = vld [vmem:[#allocation2 + $0x5c] ss:$0 sps:$4 sm:$0x11]   ;;  %v1328_v49 = vsel %vm1244_vm10, %v1323_v34, %v1327_v21  ;;  %v304_v53 = vld [vmem:[#allocation2 + $0x60] sm:$0x1]  ;;  %v613_v14 = vor.u32 %v611_v48, %v5296_v61 }
  0x72   : > { %2634 = vrot.lane.b32.xlu0 %v2592_v44, %s4999_s26  ;;  %v3115_v33 = vrot.slane %v3113_v25, 1  ;;  %v1337_v39 = vshll.u32 %v4830_v32, 16  ;;  %v4612_v44 = vpack.c.bf16 %v252_v29, %v252_v29  ;;  %v1335_v50 = vor.u32 %v1334_v35, %v1330_v27  ;;  %v4834_v51 = vld [vmem:[#allocation2 + $0x5c] ss:$0 sps:$4 sm:$0x11]   ;;  %v253_v22 = vld [vmem:[%s5069_s21 + $0x80] sm:$0xff] }
  0x73   : > { %v3495_v38 = vsel %vm1678_vm9, %v3493_v26, %v3494_v15  ;;  %v1701_v30 = vrot.slane %v4834_v51, 1  ;;  %v305_v57 = vsel %vm5043_vm3, 0, %v304_v53  ;;  %v2218_v16 = vshrl.u32 %v4837_v43, 16  ;;  %v4838_v1 = vld [vmem:[#allocation2 + $0x5c] ss:$0 sps:$4 sm:$0x11]  }
  0x74   : > { %v3116_v45 = vsel %vm1244_vm10, %v3111_v24, %v3115_v33  ;;  %v1339_v37 = vrot.slane %v1337_v39, 1  ;;  %v616_v58 = vshrl.u32 %v4612_v44, 16  ;;  %v619_v59 = vshll.u32 %v4612_v44, 16  ;;  %306 = vst [vmem:[#allocation2 + $0x60] sm:$0x1] %v305_v57  ;;  %v254_v18 = vld [vmem:[%s5069_s21 + $0x88] sm:$0xff] }
  0x75   : > { %2636 = vrot.lane.b32.xlu1 %v2595_v2, %s4999_s26  ;;  %v2220_v60 = vshll.u32 %v4837_v43, 16  ;;  %v360_v2 = vld [vmem:[#allocation2 + $0x68] sm:$0x1]  ;;  %v2225_v7 = vshll.u32 %v4838_v1, 16  ;;  %v4841_v11 = vld [vmem:[#allocation2 + $0x54] sm:$0xfe]   ;;  %v1702_v13 = vsel %vm1678_vm9, %v1700_v55, %v1701_v30  ;;  %v4614_v61 = vpack.c.bf16 %v254_v18, %v254_v18 }
  0x76   : > { %2812 = vrot.lane.b32.xlu0 %v4817_v46, %s4997_s24  ;;  %v1698_v46 = vrot.slane %v4832_v42, 1  ;;  %v1340_v62 = vsel %vm1244_vm10, %v1335_v50, %v1339_v37  ;;  %v5322_v63 = vrot.slane %v616_v58, 7  ;;  %v361_v4 = vsel %vm5062_vm5, 0, %v360_v2  ;;  %v4842_v27 = vld [vmem:[#allocation2 + $0x5c] ss:$0 sps:$4 sm:$0x11]  }
  0x77   : > { %v2222_v3 = vrot.slane %v2220_v60, 1  ;;  %362 = vst [vmem:[#allocation2 + $0x68] sm:$0x1] %v361_v4  ;;  %v307_v19 = vld [vmem:[#allocation2 + $0x6c] sm:$0x1]  ;;  %v2227_v21 = vrot.slane %v2225_v7, 1 }
  0x78   : > { %v1699_v52 = vsel %vm1678_vm9, %v1697_v41, %v1698_v46  ;;  %v621_v9 = vor.u32 %v619_v59, %v5322_v63  ;;  %v623_v10 = vrot.slane %v5322_v63, 4  ;;  %v2596_v23 = vrot.slane %v4841_v11, 1  ;;  %v363_v25 = vld [vmem:[#allocation2 + $0x74] sm:$0x1]  ;;  %v4851_v26 = vld [vmem:[#allocation2] sm:$0xff]   ;;  %v256_v37 = vld [vmem:[%s5069_s21 + $0x98] sm:$0xff] }
  0x79   : > { %2814 = vrot.lane.b32.xlu1 %v4818_v5, %s4997_s24  ;;  %v2223_v17 = vor.u32 %v2222_v3, %v2218_v16  ;;  %v308_v24 = vsel %vm5043_vm3, 0, %v307_v19  ;;  %v2597_v28 = vrot.slane %v4842_v27, 1  ;;  %v255_v32 = vld [vmem:[%s5069_s21 + $0x90] sm:$0xff]  ;;  %v364_v39 = vsel %vm5062_vm5, 0, %v363_v25  ;;  %1052 = vst.msk [vmem:[#allocation3] sm:$0xff] %vm1051_vm11, %v4851_v26  ;;  %v4871_v30 = vld [vmem:[#allocation2 + $0x18] sm:$0xff]  }
  0x7a   : > { %3245 = vrot.lane.b32.xlu0 %v3104_v8, %s5002_s29  ;;  %v4613_v8 = vpack.c.bf16 %v253_v22, %v253_v22  ;;  %309 = vst [vmem:[#allocation2 + $0x6c] sm:$0x1] %v308_v24  ;;  %v5350_v40 = vpack.c.bf16 %v255_v32, %v255_v32  ;;  %v633_v44 = vshrl.u32 %v4614_v61, 16  ;;  %365 = vst [vmem:[#allocation2 + $0x74] sm:$0x1] %v364_v39  ;;  %v4866_v46 = vld [vmem:[#allocation2 + $0xc] sm:$0xff]  }
  0x7b   : > { %v860_v33 = vld [vmem:[#allocation2 + $0x60] sm:$0xf]  ;;  %v2228_v34 = vsel %vm1244_vm10, %v2223_v17, %v2227_v21  ;;  %v2598_v43 = vsel %vm1678_vm9, %v2596_v23, %v2597_v28  ;;  %v310_v41 = vld [vmem:[#allocation2 + $0x78] sm:$0x1]  ;;  %v636_v47 = vshll.u32 %v4614_v61, 16  ;;  %1053 = vst.msk [vmem:[#allocation3 + $0x8] sm:$0xff] %vm1051_vm11, %v4866_v46 }
  0x7c   : > { %v625_v29 = vshrl.u32 %v4613_v8, 16  ;;  %v628_v15 = vshll.u32 %v4613_v8, 16  ;;  %v861_v42 = vsel %vm5094_vm8, %v613_v14, %v860_v33  ;;  %v311_v48 = vsel %vm5043_vm3, 0, %v310_v41  ;;  %v4874_v60 = vld [vmem:[%s6025_s1] sm:$0xff]   ;;  %1054 = vst.msk [vmem:[#allocation3 + $0x10] sm:$0xff] %vm1051_vm11, %v4871_v30 }
  0x7d   : > { %3247 = vrot.lane.b32.xlu1 %v3116_v45, %s5002_s29  ;;  %862 = vst [vmem:[#allocation2 + $0x60] sm:$0xf] %v861_v42  ;;  %v635_v51 = vrot.slane %v633_v44, 7  ;;  %312 = vst [vmem:[#allocation2 + $0x78] sm:$0x1] %v311_v48  ;;  %v642_v22 = vshrl.u32 %v5350_v40, 16  ;;  %4680 = vmatprep.subr.bf16.mxu0 %v4874_v60 }
  0x7e   : > { %3534 = vrot.lane.b32.xlu0 %v3492_v20, %s5000_s27  ;;  %v622_v20 = vsel %vm5086_vm7, %v614_v54, %v621_v9  ;;  %v627_v45 = vrot.slane %v625_v29, 7  ;;  %v4616_v54 = vpack.c.bf16 %v256_v37, %v256_v37  ;;  %4718 = vmatprep.subr.bf16.mxu1 %v4874_v60 }
  0x7f   : > { %863 = vst.msk [vmem:[#allocation2 + $0x64] sm:$0xf] %vm269_vm0, %v622_v20  ;;  %v638_v57 = vor.u32 %v636_v47, %v635_v51  ;;  %v640_v58 = vrot.slane %v635_v51, 4  ;;  %4681 = vmatpush3.bf16.msra.mxu0 %v4874_v60  ;;  %4721 = vmatpush3.bf16.msra.mxu1 %v4874_v60  ;;  %v5388_v9 = vrot.slane %v642_v22, 7  ;;  %v645_v47 = vshll.u32 %v5350_v40, 16 }
  0x80   : > { %v631_v50 = vrot.slane %v627_v45, 4  ;;  %v630_v55 = vor.u32 %v628_v15, %v627_v45  ;;  %v650_v59 = vshrl.u32 %v4616_v54, 16  ;;  %v653_v16 = vshll.u32 %v4616_v54, 16 }
  0x81   : > { %1449 = vrot.lane.b32.xlu1 %v1328_v49, %s4998_s25  ;;  %v864_v49 = vld [vmem:[#allocation2 + $0x68] sm:$0x1]  ;;  %v867_v63 = vld [vmem:[#allocation2 + $0x6c] sm:$0xf]  ;;  %v871_v2 = vld [vmem:[#allocation2 + $0x74] sm:$0x1] }
  0x82   : > { %3536 = vrot.lane.b32.xlu0 %v3495_v38, %s5000_s27  ;;  %v868_v1 = vsel %vm5094_vm8, %v630_v55, %v867_v63  ;;  %v872_v8 = vsel %vm5043_vm3, %v640_v58, %v871_v2  ;;  %v5390_v11 = vrot.slane %v650_v59, 7 }
  0x83   : > { %869 = vst [vmem:[#allocation2 + $0x6c] sm:$0xf] %v868_v1  ;;  %873 = vst [vmem:[#allocation2 + $0x74] sm:$0x1] %v872_v8 }
  0x84   : > { %v655_v18 = vor.u32 %v653_v16, %v5390_v11 }
  0x85   : > { %1451 = vrot.lane.b32.xlu1 %v1340_v62, %s4998_s25  ;;  %v639_v62 = vsel %vm5086_vm7, %v631_v50, %v638_v57 }
  0x86   : > { %1739 = vrot.lane.b32.xlu0 %v1699_v52, %s4995_s22  ;;  %v865_v52 = vsel %vm5043_vm3, %v623_v10, %v864_v49  ;;  %870 = vst.msk [vmem:[#allocation2 + $0x70] sm:$0xf] %vm269_vm0, %v639_v62  ;;  %v4839_v10 = vld [vmem:[#allocation2 + $0x60] sm:$0xff]  }
  0x87   : > { %866 = vst [vmem:[#allocation2 + $0x68] sm:$0x1] %v865_v52  ;;  %v4843_v7 = vld [vmem:[#allocation2 + $0x60] sm:$0xfe]   ;;  %v2230_v17 = vshrl.u32 %v4839_v10, 16  ;;  %v2232_v19 = vshll.u32 %v4839_v10, 16 }
  0x88   : > { %v2599_v23 = vrot.slane %v4843_v7, 1  ;;  %v4847_v24 = vld [vmem:[#allocation2 + $0x60] sm:$0xff]  }
  0x89   : > { %1741 = vrot.lane.b32.xlu1 %v1702_v13, %s4995_s22  ;;  %v648_v13 = vrot.slane %v5388_v9, 4  ;;  %v2234_v28 = vrot.slane %v2232_v19, 1  ;;  %v4854_v61 = vld [vmem:[#allocation2 + $0x60] sm:$0xff]   ;;  %v3118_v32 = vshrl.u32 %v4847_v24, 16  ;;  %v3120_v33 = vshll.u32 %v4847_v24, 16 }
  0x8a   : > { %1916 = vrot.lane.b32.xlu0 %v4835_v56, %s4996_s23  ;;  %v4850_v44 = vld [vmem:[#allocation2 + $0x74] ss:$0 sps:$4 sm:$0x11]   ;;  %v4852_v51 = vld [vmem:[#allocation2 + $0x60] sm:$0xfe]   ;;  %v1344_v30 = vshll.u32 %v4854_v61, 16 }
  0x8b   : > { %v656_v26 = vsel %vm5086_vm7, %v648_v13, %v655_v18  ;;  %v3122_v45 = vrot.slane %v3120_v33, 1  ;;  %v3137_v50 = vshll.u32 %v4850_v44, 16  ;;  %v3496_v58 = vrot.slane %v4852_v51, 1  ;;  %v4857_v13 = vld [vmem:[#allocation2 + $0x74] ss:$0 sps:$4 sm:$0x11]  }
  0x8c   : > { %877 = vst.msk [vmem:[#allocation2 + $0x7c] sm:$0xf] %vm269_vm0, %v656_v26  ;;  %v1342_v59 = vshrl.u32 %v4854_v61, 16  ;;  %v1346_v1 = vrot.slane %v1344_v30, 1  ;;  %v3500_v18 = vrot.slane %v4857_v13, 1  ;;  %v4877_v30 = vld [vmem:[#allocation2 + $0x24] sm:$0xff]  }
  0x8d   : > { %v4849_v42 = vld [vmem:[#allocation2 + $0x6c] sm:$0xff]   ;;  %v3123_v48 = vor.u32 %v3122_v45, %v3118_v32  ;;  %v3139_v60 = vrot.slane %v3137_v50, 1  ;;  %v4859_v19 = vld [vmem:[#allocation2 + $0x74] ss:$0 sps:$4 sm:$0x11]   ;;  %1055 = vst.msk [vmem:[#allocation3 + $0x18] sm:$0xff] %vm1051_vm11, %v4877_v30 }
  0x8e   : > { %2349 = vrot.lane.b32.xlu0 %v2228_v34, %s5001_s28  ;;  %v4840_v14 = vld [vmem:[#allocation2 + $0x68] ss:$0 sps:$4 sm:$0x11]   ;;  %v2235_v34 = vor.u32 %v2234_v28, %v2230_v17  ;;  %v3132_v46 = vshll.u32 %v4849_v42, 16  ;;  %v3130_v49 = vshrl.u32 %v4849_v42, 16  ;;  %v4846_v57 = vld [vmem:[#allocation2 + $0x6c] sm:$0xff]   ;;  %v1347_v28 = vor.u32 %v1346_v1, %v1342_v59 }
  0x8f   : > { %v4844_v20 = vld [vmem:[#allocation2 + $0x68] ss:$0 sps:$4 sm:$0x11]   ;;  %v2237_v21 = vshll.u32 %v4840_v14, 16  ;;  %v4858_v16 = vld [vmem:[#allocation2 + $0x6c] sm:$0xff]   ;;  %v1361_v61 = vshll.u32 %v4859_v19, 16 }
  0x90   : > { %v2600_v15 = vrot.slane %v4844_v20, 1  ;;  %v4848_v39 = vld [vmem:[#allocation2 + $0x68] ss:$0 sps:$4 sm:$0x11]   ;;  %v366_v42 = vld [vmem:[#allocation2 + $0x80] sm:$0x1] }
  0x91   : > { %v2239_v29 = vrot.slane %v2237_v21, 1  ;;  %v3125_v41 = vshll.u32 %v4848_v39, 16  ;;  %v4853_v22 = vld [vmem:[#allocation2 + $0x68] ss:$0 sps:$4 sm:$0x11]   ;;  %v1354_v21 = vshrl.u32 %v4858_v16, 16  ;;  %v647_v39 = vor.u32 %v645_v47, %v5388_v9 }
  0x92   : > { %v5326_v5 = vpop.permute.xlu1 %1727  ;;  %2638 = vrot.lane.b32.xlu0 %v2598_v43, %s4999_s26  ;;  %v2601_v52 = vsel %vm1678_vm9, %v2599_v23, %v2600_v15  ;;  %v3497_v62 = vrot.slane %v4853_v22, 1  ;;  %v4855_v63 = vld [vmem:[#allocation2 + $0x68] ss:$0 sps:$4 sm:$0x11]   ;;  %v1356_v23 = vshll.u32 %v4858_v16, 16  ;;  %v657_v15 = vrot.slane %v5390_v11, 4 }
  0x93   : > { %v2240_v37 = vsel %vm1244_vm10, %v2235_v34, %v2239_v29  ;;  %v3127_v55 = vrot.slane %v3125_v41, 1  ;;  %v1349_v7 = vshll.u32 %v4855_v63, 16  ;;  %v4860_v29 = vld [vmem:[#allocation2 + $0x60] sm:$0xfe]   ;;  %v1363_v33 = vrot.slane %v1361_v61, 1  ;;  %v4867_v47 = vld [vmem:[#allocation2 + $0x6c] sm:$0xff]  }
  0x94   : > { %v5330_v12 = vpop.permute.xlu0 %1904  ;;  %v3498_v10 = vsel %vm1678_vm9, %v3496_v58, %v3497_v62  ;;  %v4861_v32 = vld [vmem:[#allocation2 + $0x68] ss:$0 sps:$4 sm:$0x11]   ;;  %v1703_v34 = vrot.slane %v4860_v29, 1  ;;  %v4862_v44 = vld [vmem:[#allocation2 + $0x6c] sm:$0xfe]  }
  0x95   : > { %v3128_v40 = vsel %vm1244_vm10, %v3123_v48, %v3127_v55  ;;  %v1351_v14 = vrot.slane %v1349_v7, 1  ;;  %v1704_v45 = vrot.slane %v4861_v32, 1  ;;  %v367_v22 = vsel %vm5062_vm5, 0, %v366_v42  ;;  %v4868_v59 = vld [vmem:[#allocation2 + $0x74] ss:$0 sps:$4 sm:$0x11]  }
  0x96   : > { %v5346_v38 = vpop.permute.xlu1 %1906  ;;  %v2242_v16 = vshrl.u32 %v4867_v47, 16  ;;  %368 = vst [vmem:[#allocation2 + $0x80] sm:$0x1] %v367_v22  ;;  %v257_v62 = vld [vmem:[%s5069_s21 + $0xa0] sm:$0xff] }
  0x97   : > { %v1705_v51 = vsel %vm1678_vm9, %v1703_v34, %v1704_v45 }
  0x98   : > { %v5344_v35 = vpop.permute.xlu0 %2804 }
  0x9a   : > { %v5364_v53 = vpop.permute.xlu1 %2806 }
  0x9c   : > { %v1438_v56 = vpop.permute.xlu0 %1437 }
  0x9d   : > { %1486 = vst.msk [vmem:[#allocation3] sm:$0xff] %vm1485_vm12, %v1438_v56  ;;  %v3134_v56 = vrot.slane %v3132_v46, 1  ;;  %v1352_v46 = vsel %vm1244_vm10, %v1347_v28, %v1351_v14 }
  0x9e   : > { %1776 = vst.msk [vmem:[#allocation3] sm:$0xff] %vm6032_vm13, %v5326_v5  ;;  %v5384_v4 = vpop.permute.xlu1 %1729  ;;  %v4836_v5 = vld [vmem:[#allocation2 + $0x60] sm:$0xff]  }
  0x9f   : > { %1953 = vst.msk [vmem:[#allocation3] sm:$0xff] %vm6031_vm14, %v5330_v12  ;;  %1918 = vrot.lane.b32.xlu1 %v4836_v5, %s4996_s23  ;;  %v4845_v12 = vld [vmem:[#allocation2 + $0x60] sm:$0xff]   ;;  %v3135_v5 = vor.u32 %v3134_v56, %v3130_v49  ;;  %v874_v49 = vld [vmem:[#allocation2 + $0x78] sm:$0xf]  ;;  %v4864_v56 = vld [vmem:[#allocation2 + $0x6c] sm:$0xff]  }
  0xa0   : > { %v5382_v3 = vpop.permute.xlu0 %2626  ;;  %2816 = vrot.lane.b32.xlu0 %v4845_v12, %s4997_s24  ;;  %v4856_v12 = vld [vmem:[#allocation2 + $0x6c] sm:$0xfe]   ;;  %v875_v9 = vsel %vm5094_vm8, %v647_v39, %v874_v49 }
  0xa1   : > { %v3499_v17 = vrot.slane %v4856_v12, 1  ;;  %v3140_v20 = vsel %vm1244_vm10, %v3135_v5, %v3139_v60  ;;  %876 = vst [vmem:[#allocation2 + $0x78] sm:$0xf] %v875_v9 }
  0xa2   : > { %v5394_v27 = vpop.permute.xlu1 %2628 }
  0xa3   : > { %2351 = vrot.lane.b32.xlu1 %v2240_v37, %s5001_s28  ;;  %v4863_v37 = vld [vmem:[#allocation2 + $0x74] ss:$0 sps:$4 sm:$0x11]  }
  0xa4   : > { %v5398_v25 = vpop.permute.xlu0 %3526  ;;  %3249 = vrot.lane.b32.xlu0 %v3128_v40, %s5002_s29  ;;  %v1707_v55 = vrot.slane %v4863_v37, 1  ;;  %v2244_v40 = vshll.u32 %v4867_v47, 16 }
  0xa6   : > { %v5403_v43 = vpop.permute.xlu1 %2339 }
  0xa7   : > { %2640 = vrot.lane.b32.xlu1 %v2601_v52, %s4999_s26  ;;  %v1706_v52 = vrot.slane %v4862_v44, 1 }
  0xa8   : > { %v5408_v54 = vpop.permute.xlu0 %3528  ;;  %3538 = vrot.lane.b32.xlu0 %v3498_v10, %s5000_s27  ;;  %v4617_v10 = vpack.c.bf16 %v257_v62, %v257_v62  ;;  %v4865_v12 = vld [vmem:[#allocation2 + $0x78] sm:$0xff]  }
  0xa9   : > { %v1708_v1 = vsel %vm1678_vm9, %v1706_v52, %v1707_v55  ;;  %v4881_v39 = vld [vmem:[#allocation2 + $0x78] sm:$0xff]  }
  0xaa   : > { %v5412_v2 = vpop.permute.xlu1 %3239  ;;  %v659_v14 = vshrl.u32 %v4617_v10, 16  ;;  %v662_v19 = vshll.u32 %v4617_v10, 16  ;;  %v3142_v37 = vshrl.u32 %v4881_v39, 16 }
  0xab   : > { %2818 = vrot.lane.b32.xlu1 %v4846_v57, %s4997_s24 }
  0xac   : > { %v1440_v8 = vpop.permute.xlu0 %1439  ;;  %v661_v61 = vrot.slane %v659_v14, 7 }
  0xad   : > { %1487 = vst.msk [vmem:[#allocation3 + $0x8] sm:$0xff] %vm1485_vm12, %v1440_v8  ;;  %v258_v8 = vld [vmem:[%s5069_s21 + $0xa8] sm:$0xff] }
  0xae   : > { %1777 = vst.msk [vmem:[#allocation3 + $0x8] sm:$0xff] %vm6032_vm13, %v5384_v4  ;;  %v1442_v26 = vpop.permute.xlu1 %1441  ;;  %v3501_v4 = vsel %vm1678_vm9, %v3499_v17, %v3500_v18  ;;  %v878_v17 = vld [vmem:[#allocation2 + $0x80] sm:$0x1]  ;;  %v4869_v18 = vld [vmem:[#allocation2 + $0x78] sm:$0xff]  }
  0xaf   : > { %1954 = vst.msk [vmem:[#allocation3 + $0x8] sm:$0xff] %vm6031_vm14, %v5346_v38  ;;  %v1358_v38 = vrot.slane %v1356_v23, 1  ;;  %3251 = vrot.lane.b32.xlu1 %v3140_v20, %s5002_s29  ;;  %3540 = vrot.lane.b32.xlu0 %v3501_v4, %s5000_s27  ;;  %v2256_v28 = vshll.u32 %v4869_v18, 16  ;;  %v4878_v4 = vld [vmem:[#allocation2 + $0x78] sm:$0xff]  }
  0xb0   : > { %v2338_v24 = vpop.permute.xlu0 %2337  ;;  %1488 = vst.msk [vmem:[#allocation3 + $0x10] sm:$0xff] %vm1485_vm12, %v1442_v26  ;;  %v2254_v26 = vshrl.u32 %v4869_v18, 16  ;;  %v259_v18 = vld [vmem:[%s5069_s21 + $0xb0] sm:$0xff] }
  0xb1   : > { %v1359_v48 = vor.u32 %v1358_v38, %v1354_v21  ;;  %2387 = vst.msk [vmem:[#allocation3 + $0x8] sm:$0xff] %vm2385_vm15, %v5403_v43  ;;  %2386 = vst.msk [vmem:[#allocation3] sm:$0xff] %vm2385_vm15, %v2338_v24  ;;  %v4879_v43 = vld [vmem:[%s6025_s1 + $0x8] sm:$0xff]   ;;  %v879_v21 = vsel %vm5043_vm3, %v657_v15, %v878_v17  ;;  %v5479_v24 = vld [vmem:[#allocation2 + $0x78] sm:$0xfe]   ;;  %v2258_v11 = vrot.slane %v2256_v28, 1 }
  0xb2   : > { %v1444_v50 = vpop.permute.xlu1 %1443  ;;  %2676 = vst.msk [vmem:[#allocation3 + $0x8] sm:$0xff] %vm2674_vm2, %v5394_v27  ;;  %2675 = vst.msk [vmem:[#allocation3] sm:$0xff] %vm2674_vm2, %v5382_v3  ;;  %v2246_v3 = vrot.slane %v2244_v40, 1  ;;  %v2249_v27 = vshll.u32 %v4868_v59, 16  ;;  %4682 = vmatprep.subr.bf16.mxu0 %v4879_v43  ;;  %4719 = vmatprep.subr.bf16.mxu1 %v4879_v43  ;;  %v2605_v38 = vrot.slane %v5479_v24, 1  ;;  %v5522_v24 = vpack.c.bf16 %v259_v18, %v259_v18  ;;  %v4904_v28 = vld [vmem:[#allocation2 + $0x30] sm:$0xff]  }
  0xb3   : > { %1453 = vrot.lane.b32.xlu1 %v1352_v46, %s4998_s25  ;;  %1743 = vrot.lane.b32.xlu0 %v1705_v51, %s4995_s22  ;;  %v1364_v58 = vsel %vm1244_vm10, %v1359_v48, %v1363_v33  ;;  %2854 = vst.msk [vmem:[#allocation3 + $0x8] sm:$0xff] %vm2852_vm4, %v5364_v53  ;;  %2853 = vst.msk [vmem:[#allocation3] sm:$0xff] %vm2852_vm4, %v5344_v35  ;;  %v4872_v35 = vld [vmem:[#allocation2 + $0x6c] sm:$0xfe]   ;;  %v313_v15 = vld [vmem:[#allocation2 + $0x84] sm:$0x1] }
  0xb4   : > { %v3238_v41 = vpop.permute.xlu0 %3237  ;;  %3287 = vst.msk [vmem:[#allocation3 + $0x8] sm:$0xff] %vm3285_vm6, %v5412_v2  ;;  %v4873_v53 = vld [vmem:[#allocation2 + $0x74] ss:$0 sps:$4 sm:$0x11]   ;;  %v2247_v2 = vor.u32 %v2246_v3, %v2242_v16  ;;  %v2251_v5 = vrot.slane %v2249_v27, 1  ;;  %4683 = vmatpush3.bf16.msra.mxu0 %v4879_v43  ;;  %4722 = vmatpush3.bf16.msra.mxu1 %v4879_v43  ;;  %v665_v33 = vrot.slane %v661_v61, 4 }
  0xb5   : > { %3286 = vst.msk [vmem:[#allocation3] sm:$0xff] %vm3285_vm6, %v3238_v41  ;;  %v2603_v7 = vrot.slane %v4873_v53, 1  ;;  %880 = vst [vmem:[#allocation2 + $0x80] sm:$0x1] %v879_v21  ;;  %v314_v45 = vsel %vm5043_vm3, 0, %v313_v15  ;;  %v3144_v41 = vshll.u32 %v4881_v39, 16 }
  0xb6   : > { %v1734_v60 = vpop.permute.xlu1 %1733  ;;  %1489 = vst.msk [vmem:[#allocation3 + $0x18] sm:$0xff] %vm1485_vm12, %v1444_v50  ;;  %v2252_v13 = vsel %vm1244_vm10, %v2247_v2, %v2251_v5  ;;  %315 = vst [vmem:[#allocation2 + $0x84] sm:$0x1] %v314_v45  ;;  %v4883_v50 = vld [vmem:[%s6025_s1 + $0x10] ss:$0 sps:$4 sm:$0x33]  }
  0xb7   : > { %1455 = vrot.lane.b32.xlu1 %v1364_v58, %s4998_s25  ;;  %1920 = vrot.lane.b32.xlu0 %v4864_v56, %s4996_s23  ;;  %3576 = vst.msk [vmem:[#allocation3 + $0x8] sm:$0xff] %vm6033_vm1, %v5408_v54  ;;  %3575 = vst.msk [vmem:[#allocation3] sm:$0xff] %vm6033_vm1, %v5398_v25  ;;  %v2602_v54 = vrot.slane %v4872_v35, 1  ;;  %v4618_v25 = vpack.c.bf16 %v258_v8, %v258_v8  ;;  %v369_v51 = vld [vmem:[#allocation2 + $0x8c] sm:$0x1]  ;;  %v3146_v52 = vrot.slane %v3144_v41, 1 }
  0xb8   : > { %v1732_v57 = vpop.permute.xlu0 %1731  ;;  %1779 = vst.msk [vmem:[#allocation3 + $0x18] sm:$0xff] %vm6032_vm13, %v1734_v60  ;;  %v370_v55 = vsel %vm5062_vm5, 0, %v369_v51  ;;  %v2259_v58 = vor.u32 %v2258_v11, %v2254_v26  ;;  %v4886_v43 = vld [vmem:[#allocation2 + $0x78] sm:$0xfe]  }
  0xb9   : > { %1778 = vst.msk [vmem:[#allocation3 + $0x10] sm:$0xff] %vm6032_vm13, %v1732_v57  ;;  %v2604_v23 = vsel %vm1678_vm9, %v2602_v54, %v2603_v7  ;;  %v667_v32 = vshrl.u32 %v4618_v25, 16  ;;  %v670_v34 = vshll.u32 %v4618_v25, 16  ;;  %371 = vst [vmem:[#allocation2 + $0x8c] sm:$0x1] %v370_v55  ;;  %v664_v57 = vor.u32 %v662_v19, %v661_v61  ;;  %v5503_v60 = vld [vmem:[#allocation2 + $0x78] sm:$0xff]  }
  0xba   : > { %v1911_v29 = vpop.permute.xlu1 %1910  ;;  %vm3627_vm13 = vcmask 293888   ;;  %v3147_v35 = vor.u32 %v3146_v52, %v3142_v37  ;;  %v1368_v17 = vshll.u32 %v5503_v60, 16  ;;  %v1366_v21 = vshrl.u32 %v5503_v60, 16  ;;  %1056 = vst.msk [vmem:[#allocation3 + $0x20] sm:$0xff] %vm1051_vm11, %v4904_v28  ;;  %v372_v28 = vld [vmem:[#allocation2 + $0x98] sm:$0x1] }
  0xbb   : > { %1745 = vrot.lane.b32.xlu1 %v1708_v1, %s4995_s22  ;;  %2353 = vrot.lane.b32.xlu0 %v2252_v13, %s5001_s28  ;;  %1956 = vst.msk [vmem:[#allocation3 + $0x18] sm:$0xff] %vm6031_vm14, %v1911_v29  ;;  %v669_v44 = vrot.slane %v667_v32, 7  ;;  %v3502_v1 = vrot.slane %v4886_v43, 1 }
  0xbc   : > { %v1909_v63 = vpop.permute.xlu0 %1908  ;;  %v4870_v9 = vld [vmem:[#allocation2 + $0x80] ss:$0 sps:$4 sm:$0x11]   ;;  %v1370_v61 = vrot.slane %v1368_v17, 1 }
  0xbd   : > { %1955 = vst.msk [vmem:[#allocation3 + $0x10] sm:$0xff] %vm6031_vm14, %v1909_v63  ;;  %vm3676_vm14 = vcmask 1041408   ;;  %v672_v48 = vor.u32 %v670_v34, %v669_v44  ;;  %v674_v49 = vrot.slane %v669_v44, 4  ;;  %v4876_v30 = vld [vmem:[#allocation2 + $0x80] ss:$0 sps:$4 sm:$0x11]  }
  0xbe   : > { %v3591_v46 = vld [vmem:[#allocation3] sm:$0xff]  ;;  %4724 = vmatprep.subr.msk.bf16.mxu0 %vm3676_vm14, %v4883_v50  ;;  %v3678_v22 = vsel %vm3676_vm14, %v4883_v50, 0  ;;  %4725 = vmatprep.subr.msk.bf16.mxu1 %vm3676_vm14, %v4883_v50  ;;  %v2261_v59 = vshll.u32 %v4870_v9, 16  ;;  %v4882_v16 = vld [vmem:[#allocation2 + $0x80] ss:$0 sps:$4 sm:$0x11]  }
  0xbf   : > { %1922 = vrot.lane.b32.xlu1 %v4865_v12, %s4996_s23  ;;  %2642 = vrot.lane.b32.xlu0 %v2604_v23, %s4999_s26  ;;  %v673_v47 = vsel %vm5086_vm7, %v665_v33, %v672_v48  ;;  %v2606_v40 = vrot.slane %v4876_v30, 1  ;;  %v881_v27 = vld [vmem:[#allocation2 + $0x84] sm:$0xf]  ;;  %v3149_v53 = vshll.u32 %v4882_v16, 16  ;;  %v676_v34 = vshrl.u32 %v5522_v24, 16  ;;  %v260_v44 = vld [vmem:[%s5069_s21 + $0xb8] sm:$0xff] }
  0xc0   : > { %v2342_v20 = vpop.permute.xlu0 %2341  ;;  %884 = vst.msk [vmem:[#allocation2 + $0x88] sm:$0xf] %vm269_vm0, %v673_v47  ;;  %4685 = vmatpush3.bf16.msra.mxu0 %v3678_v22  ;;  %4723 = vmatpush3.bf16.msra.mxu1 %v3678_v22  ;;  %v2263_v3 = vrot.slane %v2261_v59, 1  ;;  %v882_v62 = vsel %vm5094_vm8, %v664_v57, %v881_v27  ;;  %v4887_v63 = vld [vmem:[#allocation2 + $0x80] ss:$0 sps:$4 sm:$0x11]  }
  0xc1   : > { %2388 = vst.msk [vmem:[#allocation3 + $0x10] sm:$0xff] %vm2385_vm15, %v2342_v20  ;;  %4686 = vmatprep.mubr.msk.bf16.mxu0 %vm3627_vm13, %v3591_v46  ;;  %883 = vst [vmem:[#allocation2 + $0x84] sm:$0xf] %v882_v62  ;;  %v3151_v5 = vrot.slane %v3149_v53, 1  ;;  %v885_v54 = vld [vmem:[#allocation2 + $0x8c] sm:$0x1]  ;;  %v2607_v13 = vsel %vm1678_vm9, %v2605_v38, %v2606_v40  ;;  %v4620_v40 = vpack.c.bf16 %v260_v44, %v260_v44 }
  0xc2   : > { %v2264_v2 = vsel %vm1244_vm10, %v2259_v58, %v2263_v3  ;;  %v4889_v8 = vld [vmem:[#allocation2 + $0x80] ss:$0 sps:$4 sm:$0x11]   ;;  %v3503_v7 = vrot.slane %v4887_v63, 1  ;;  %v886_v14 = vsel %vm5043_vm3, %v674_v49, %v885_v54  ;;  %v5534_v30 = vrot.slane %v676_v34, 7 }
  0xc3   : > { %2820 = vrot.lane.b32.xlu0 %v4878_v4, %s4997_s24  ;;  %v2344_v10 = vpop.permute.xlu1 %2343  ;;  %2355 = vrot.lane.b32.xlu1 %v2264_v2, %s5001_s28  ;;  %v3592_v12 = vld [vmem:[#allocation3 + $0x8] sm:$0xff]  ;;  %v3152_v25 = vsel %vm1244_vm10, %v3147_v35, %v3151_v5  ;;  %887 = vst [vmem:[#allocation2 + $0x8c] sm:$0x1] %v886_v14  ;;  %v1373_v19 = vshll.u32 %v4889_v8, 16  ;;  %v4894_v4 = vld [vmem:[#allocation2 + $0x78] sm:$0xfe]   ;;  %v1371_v58 = vor.u32 %v1370_v61, %v1366_v21 }
  0xc4   : > { %v2631_v42 = vpop.permute.xlu0 %2630  ;;  %2389 = vst.msk [vmem:[#allocation3 + $0x18] sm:$0xff] %vm2385_vm15, %v2344_v10  ;;  %4687 = vmatmul.mubr.msk.bf16.vlgmr.msra.gmra.mrb[0].mxu0 %vm3627_vm13, %v3592_v12  ;;  %v3504_v20 = vsel %vm1678_vm9, %v3502_v1, %v3503_v7  ;;  %v4895_v29 = vld [vmem:[#allocation2 + $0x80] ss:$0 sps:$4 sm:$0x11]   ;;  %v1709_v45 = vrot.slane %v4894_v4, 1  ;;  %v679_v1 = vshll.u32 %v5522_v24, 16 }
  0xc5   : > { %2677 = vst.msk [vmem:[#allocation3 + $0x10] sm:$0xff] %vm2674_vm2, %v2631_v42  ;;  %v1375_v32 = vrot.slane %v1373_v19, 1  ;;  %v1710_v52 = vrot.slane %v4895_v29, 1  ;;  %v316_v63 = vld [vmem:[#allocation2 + $0x90] sm:$0x1]  ;;  %v682_v12 = vrot.slane %v5534_v30, 4 }
  0xc6   : > { %v317_v7 = vsel %vm5043_vm3, 0, %v316_v63  ;;  %v684_v14 = vshrl.u32 %v4620_v40, 16  ;;  %v687_v17 = vshll.u32 %v4620_v40, 16  ;;  %vm6042_vm14 = vcmask 97344   ;;  %v261_v24 = vld [vmem:[%s5069_s21 + $0xc0] sm:$0xff]  ;;  %v262_v61 = vld [vmem:[%s5069_s21 + $0xc8] sm:$0xff] }
  0xc7   : > { %3253 = vrot.lane.b32.xlu0 %v3152_v25, %s5002_s29  ;;  %v2633_v23 = vpop.permute.xlu1 %2632  ;;  %2644 = vrot.lane.b32.xlu1 %v2607_v13, %s4999_s26  ;;  %v1711_v35 = vsel %vm1678_vm9, %v1709_v45, %v1710_v52  ;;  %v4909_v13 = vld [vmem:[#allocation2 + $0x3c] sm:$0xff]   ;;  %318 = vst [vmem:[#allocation2 + $0x90] sm:$0x1] %v317_v7  ;;  %v1376_v18 = vsel %vm1244_vm10, %v1371_v58, %v1375_v32  ;;  %v373_v32 = vsel %vm5062_vm5, 0, %v372_v28 }
  0xc8   : > { %v2809_v56 = vpop.permute.xlu0 %2808  ;;  %2678 = vst.msk [vmem:[#allocation3 + $0x18] sm:$0xff] %vm2674_vm2, %v2633_v23  ;;  %v4880_v38 = vld [vmem:[#allocation2 + $0x84] sm:$0xff]   ;;  %v5561_v29 = vpack.c.bf16 %v261_v24, %v261_v24  ;;  %374 = vst [vmem:[#allocation2 + $0x98] sm:$0x1] %v373_v32  ;;  %v319_v40 = vld [vmem:[#allocation2 + $0x9c] sm:$0x1] }
  0xc9   : > { %2855 = vst.msk [vmem:[#allocation3 + $0x10] sm:$0xff] %vm2852_vm4, %v2809_v56  ;;  %v4884_v11 = vld [vmem:[#allocation2 + $0x84] sm:$0xff]  }
  0xca   : > { %v4890_v15 = vld [vmem:[#allocation2 + $0x84] sm:$0xfe]   ;;  %v4885_v37 = vld [vmem:[#allocation2 + $0x8c] ss:$0 sps:$4 sm:$0x11]   ;;  %v3154_v41 = vshrl.u32 %v4884_v11, 16 }
  0xcb   : > { %3542 = vrot.lane.b32.xlu0 %v3504_v20, %s5000_s27  ;;  %v2811_v33 = vpop.permute.xlu1 %2810  ;;  %2822 = vrot.lane.b32.xlu1 %v4880_v38, %s4997_s24  ;;  %v4892_v42 = vld [vmem:[#allocation2 + $0x84] sm:$0xff]   ;;  %v3156_v46 = vshll.u32 %v4884_v11, 16  ;;  %v4891_v48 = vld [vmem:[#allocation2 + $0x8c] ss:$0 sps:$4 sm:$0x11]   ;;  %v3161_v49 = vshll.u32 %v4885_v37, 16 }
  0xcc   : > { %v3242_v26 = vpop.permute.xlu0 %3241  ;;  %2856 = vst.msk [vmem:[#allocation3 + $0x18] sm:$0xff] %vm2852_vm4, %v2811_v33  ;;  %v3505_v50 = vrot.slane %v4890_v15, 1  ;;  %v1380_v51 = vshll.u32 %v4892_v42, 16  ;;  %v3506_v47 = vrot.slane %v4891_v48, 1  ;;  %v1378_v59 = vshrl.u32 %v4892_v42, 16  ;;  %v4900_v2 = vld [vmem:[#allocation2 + $0x84] sm:$0xff]  }
  0xcd   : > { %3288 = vst.msk [vmem:[#allocation3 + $0x10] sm:$0xff] %vm3285_vm6, %v3242_v26  ;;  %v3158_v9 = vrot.slane %v3156_v46, 1  ;;  %v4893_v22 = vld [vmem:[#allocation2 + $0x8c] ss:$0 sps:$4 sm:$0x11]   ;;  %v3163_v57 = vrot.slane %v3161_v49, 1  ;;  %v4622_v33 = vpack.c.bf16 %v262_v61, %v262_v61  ;;  %v681_v42 = vor.u32 %v679_v1, %v5534_v30 }
  0xce   : > { %v5537_v16 = vld [vmem:[#allocation2 + $0x84] sm:$0xfe]   ;;  %v3507_v60 = vsel %vm1678_vm9, %v3505_v50, %v3506_v47  ;;  %v1382_v3 = vrot.slane %v1380_v51, 1  ;;  %v1385_v27 = vshll.u32 %v4893_v22, 16  ;;  %v2266_v21 = vshrl.u32 %v4900_v2, 16  ;;  %1057 = vst.msk [vmem:[#allocation3 + $0x28] sm:$0xff] %vm1051_vm11, %v4909_v13 }
  0xcf   : > { %v3244_v55 = vpop.permute.xlu1 %3243  ;;  %v3159_v43 = vor.u32 %v3158_v9, %v3154_v41  ;;  %3544 = vrot.lane.b32.xlu0 %v3507_v60, %s5000_s27  ;;  %v5543_v53 = vld [vmem:[#allocation2 + $0x8c] ss:$0 sps:$4 sm:$0x11]   ;;  %v1712_v62 = vrot.slane %v5537_v16, 1  ;;  %v4898_v25 = vld [vmem:[#allocation2 + $0x84] sm:$0xff]   ;;  %v2268_v23 = vshll.u32 %v4900_v2, 16 }
  0xd0   : > { %v3531_v39 = vpop.permute.xlu0 %3530  ;;  %3289 = vst.msk [vmem:[#allocation3 + $0x18] sm:$0xff] %vm3285_vm6, %v3244_v55  ;;  %v1387_v54 = vrot.slane %v1385_v27, 1  ;;  %v1383_v19 = vor.u32 %v1382_v3, %v1378_v59  ;;  %v4901_v20 = vld [vmem:[#allocation2 + $0x8c] ss:$0 sps:$4 sm:$0x11]   ;;  %v5558_v26 = vrot.slane %v684_v14, 7 }
  0xd1   : > { %3577 = vst.msk [vmem:[#allocation3 + $0x10] sm:$0xff] %vm6033_vm1, %v3531_v39  ;;  %v3164_v10 = vsel %vm1244_vm10, %v3159_v43, %v3163_v57  ;;  %v2270_v11 = vrot.slane %v2268_v23, 1  ;;  %v2273_v15 = vshll.u32 %v4901_v20, 16  ;;  %v1713_v39 = vrot.slane %v5543_v53, 1  ;;  %v4905_v49 = vld [vmem:[#allocation2 + $0x84] sm:$0xfe]  }
  0xd2   : > { %3255 = vrot.lane.b32.xlu1 %v3164_v10, %s5002_s29  ;;  %v689_v45 = vor.u32 %v687_v17, %v5558_v26  ;;  %v693_v44 = vshrl.u32 %v5561_v29, 16  ;;  %v1388_v37 = vsel %vm1244_vm10, %v1383_v19, %v1387_v54  ;;  %v691_v41 = vrot.slane %v5558_v26, 4  ;;  %v4906_v51 = vld [vmem:[#allocation2 + $0x8c] ss:$0 sps:$4 sm:$0x11]  }
  0xd3   : > { %v1446_v5 = vpop.permute.xlu1 %1445  ;;  %1747 = vrot.lane.b32.xlu0 %v1711_v35, %s4995_s22  ;;  %v2271_v46 = vor.u32 %v2270_v11, %v2266_v21  ;;  %v2275_v48 = vrot.slane %v2273_v15, 1  ;;  %v888_v9 = vld [vmem:[#allocation2 + $0x90] sm:$0xf]  ;;  %v2608_v22 = vrot.slane %v4905_v49, 1  ;;  %v701_v30 = vshrl.u32 %v4622_v33, 16  ;;  %v4934_v21 = vld [vmem:[#allocation2 + $0x48] sm:$0xff]  }
  0xd4   : > { %v3533_v56 = vpop.permute.xlu0 %3532  ;;  %1490 = vst.msk [vmem:[#allocation3 + $0x20] sm:$0xff] %vm1485_vm12, %v1446_v5  ;;  %v690_v50 = vsel %vm5086_vm7, %v682_v12, %v689_v45  ;;  %v695_v52 = vrot.slane %v693_v44, 7  ;;  %v1714_v57 = vsel %vm1678_vm9, %v1712_v62, %v1713_v39  ;;  %v889_v58 = vsel %vm5094_vm8, %v681_v42, %v888_v9  ;;  %v375_v60 = vld [vmem:[#allocation2 + $0xa4] sm:$0x1]  ;;  %v263_v62 = vld [vmem:[%s5069_s21 + $0xd0] sm:$0xff]  ;;  %v264_v5 = vld [vmem:[%s5069_s21 + $0xd8] sm:$0xff] }
  0xd5   : > { %3578 = vst.msk [vmem:[#allocation3 + $0x18] sm:$0xff] %vm6033_vm1, %v3533_v56  ;;  %v2276_v47 = vsel %vm1244_vm10, %v2271_v46, %v2275_v48  ;;  %v2609_v59 = vrot.slane %v4906_v51, 1  ;;  %890 = vst [vmem:[#allocation2 + $0x90] sm:$0xf] %v889_v58  ;;  %v320_v3 = vsel %vm5043_vm3, 0, %v319_v40  ;;  %v5590_v27 = vrot.slane %v701_v30, 7 }
  0xd6   : > { %1457 = vrot.lane.b32.xlu1 %v1376_v18, %s4998_s25  ;;  %891 = vst.msk [vmem:[#allocation2 + $0x94] sm:$0xf] %vm269_vm0, %v690_v50  ;;  %v699_v43 = vrot.slane %v695_v52, 4  ;;  %v704_v35 = vshll.u32 %v4622_v33, 16  ;;  %v376_v16 = vsel %vm5062_vm5, 0, %v375_v60  ;;  %v696_v63 = vshll.u32 %v5561_v29, 16 }
  0xd7   : > { %v1448_v4 = vpop.permute.xlu1 %1447  ;;  %1924 = vrot.lane.b32.xlu0 %v4898_v25, %s4996_s23  ;;  %321 = vst [vmem:[#allocation2 + $0x9c] sm:$0x1] %v320_v3  ;;  %377 = vst [vmem:[#allocation2 + $0xa4] sm:$0x1] %v376_v16  ;;  %v5599_v10 = vpack.c.bf16 %v263_v62, %v263_v62  ;;  %v378_v54 = vld [vmem:[#allocation2 + $0xb0] sm:$0x1]  ;;  %v2610_v12 = vsel %vm1678_vm9, %v2608_v22, %v2609_v59  ;;  %v4624_v14 = vpack.c.bf16 %v264_v5, %v264_v5 }
  0xd8   : > { %v1736_v8 = vpop.permute.xlu0 %1735  ;;  %1491 = vst.msk [vmem:[#allocation3 + $0x28] sm:$0xff] %vm1485_vm12, %v1448_v4  ;;  %v3593_v34 = vld [vmem:[#allocation3 + $0x10] sm:$0xff]  ;;  %v892_v7 = vld [vmem:[#allocation2 + $0x98] sm:$0x1]  ;;  %v706_v13 = vor.u32 %v704_v35, %v5590_v27  ;;  %v708_v18 = vrot.slane %v5590_v27, 4  ;;  %v379_v20 = vsel %vm5062_vm5, 0, %v378_v54  ;;  %v698_v61 = vor.u32 %v696_v63, %v695_v52 }
  0xd9   : > { %1780 = vst.msk [vmem:[#allocation3 + $0x20] sm:$0xff] %vm6042_vm14, %v1736_v8  ;;  %vm6043_vm14 = vcmask 130144   ;;  %4690 = vmatprep.mubr.msk.bf16.mxu0 %vm3627_vm13, %v3593_v34  ;;  %v322_v8 = vld [vmem:[#allocation2 + $0xa8] sm:$0x1]  ;;  %v893_v17 = vsel %vm5043_vm3, %v691_v41, %v892_v7  ;;  %v710_v19 = vshrl.u32 %v5599_v10, 16  ;;  %v718_v24 = vshrl.u32 %v4624_v14, 16 }
  0xda   : > { %1459 = vrot.lane.b32.xlu1 %v1388_v37, %s4998_s25  ;;  %v323_v25 = vsel %vm5043_vm3, 0, %v322_v8  ;;  %894 = vst [vmem:[#allocation2 + $0x98] sm:$0x1] %v893_v17  ;;  %v707_v23 = vsel %vm5086_vm7, %v699_v43, %v706_v13  ;;  %v721_v26 = vshll.u32 %v4624_v14, 16  ;;  %380 = vst [vmem:[#allocation2 + $0xb0] sm:$0x1] %v379_v20 }
  0xdb   : > { %v1738_v55 = vpop.permute.xlu1 %1737  ;;  %2357 = vrot.lane.b32.xlu0 %v2276_v47, %s5001_s28  ;;  %324 = vst [vmem:[#allocation2 + $0xa8] sm:$0x1] %v323_v25  ;;  %898 = vst.msk [vmem:[#allocation2 + $0xa0] sm:$0xf] %vm269_vm0, %v707_v23  ;;  %v5623_v32 = vrot.slane %v718_v24, 7  ;;  %v713_v48 = vshll.u32 %v5599_v10, 16 }
  0xdc   : > { %v1913_v38 = vpop.permute.xlu0 %1912  ;;  %v3594_v53 = vld [vmem:[#allocation3 + $0x18] sm:$0xff]  ;;  %1058 = vst.msk [vmem:[#allocation3 + $0x30] sm:$0xff] %vm1051_vm11, %v4934_v21 }
  0xdd   : > { %1957 = vst.msk [vmem:[#allocation3 + $0x20] sm:$0xff] %vm6043_vm14, %v1913_v38  ;;  %vm6044_vm14 = vcmask 97344   ;;  %4691 = vmatmul.mubr.msk.bf16.gmra.mrb[4].mxu0 %vm3627_vm13, %v3594_v53  ;;  %v4899_v29 = vld [vmem:[#allocation2 + $0x90] sm:$0xff]   ;;  %v5621_v38 = vrot.slane %v710_v19, 7  ;;  %v723_v51 = vor.u32 %v721_v26, %v5623_v32 }
  0xde   : > { %1781 = vst.msk [vmem:[#allocation3 + $0x28] sm:$0xff] %vm6044_vm14, %v1738_v55  ;;  %vm6045_vm14 = vcmask 130144   ;;  %1749 = vrot.lane.b32.xlu1 %v1714_v57, %s4995_s22  ;;  %v4902_v11 = vld [vmem:[#allocation2 + $0x90] sm:$0xff]   ;;  %v895_v34 = vld [vmem:[#allocation2 + $0x9c] sm:$0xf] }
  0xdf   : > { %v1915_v1 = vpop.permute.xlu1 %1914  ;;  %2646 = vrot.lane.b32.xlu0 %v2610_v12, %s4999_s26  ;;  %v4907_v15 = vld [vmem:[#allocation2 + $0x90] sm:$0xfe]   ;;  %v716_v42 = vrot.slane %v5621_v38, 4  ;;  %v2278_v44 = vshrl.u32 %v4902_v11, 16  ;;  %v2280_v37 = vshll.u32 %v4902_v11, 16  ;;  %v896_v41 = vsel %vm5094_vm8, %v698_v61, %v895_v34 }
  0xe0   : > { %v2346_v56 = vpop.permute.xlu0 %2345  ;;  %1958 = vst.msk [vmem:[#allocation3 + $0x28] sm:$0xff] %vm6045_vm14, %v1915_v1  ;;  %v4910_v33 = vld [vmem:[#allocation2 + $0x90] sm:$0xff]   ;;  %897 = vst [vmem:[#allocation2 + $0x9c] sm:$0xf] %v896_v41  ;;  %v2611_v9 = vrot.slane %v4907_v15, 1  ;;  %vm6046_vm14 = vcmask 97344  }
  0xe1   : > { %2390 = vst.msk [vmem:[#allocation3 + $0x20] sm:$0xff] %vm2385_vm15, %v2346_v56  ;;  %v4912_v46 = vld [vmem:[#allocation2 + $0x90] sm:$0xff]   ;;  %v4903_v49 = vld [vmem:[#allocation2 + $0x98] ss:$0 sps:$4 sm:$0x11]   ;;  %v2282_v52 = vrot.slane %v2280_v37, 1  ;;  %v724_v22 = vsel %vm5086_vm7, %v716_v42, %v723_v51 }
  0xe2   : > { %1926 = vrot.lane.b32.xlu1 %v4899_v29, %s4996_s23  ;;  %v5633_v50 = vld [vmem:[#allocation2 + $0x90] sm:$0xff]   ;;  %v4908_v55 = vld [vmem:[#allocation2 + $0x98] ss:$0 sps:$4 sm:$0x11]   ;;  %v2285_v56 = vshll.u32 %v4903_v49, 16  ;;  %v3166_v40 = vshrl.u32 %v4912_v46, 16 }
  0xe3   : > { %v2348_v28 = vpop.permute.xlu1 %2347  ;;  %2824 = vrot.lane.b32.xlu0 %v4910_v33, %s4997_s24  ;;  %v2283_v57 = vor.u32 %v2282_v52, %v2278_v44  ;;  %v2612_v58 = vrot.slane %v4908_v55, 1  ;;  %v4913_v59 = vld [vmem:[#allocation2 + $0x98] ss:$0 sps:$4 sm:$0x11]   ;;  %v3168_v43 = vshll.u32 %v4912_v46, 16  ;;  %v1392_v27 = vshll.u32 %v5633_v50, 16 }
  0xe4   : > { %v2635_v2 = vpop.permute.xlu0 %2634  ;;  %2391 = vst.msk [vmem:[#allocation3 + $0x28] sm:$0xff] %vm2385_vm15, %v2348_v28  ;;  %v2287_v60 = vrot.slane %v2285_v56, 1  ;;  %v899_v3 = vld [vmem:[#allocation2 + $0xa4] sm:$0x1]  ;;  %v3173_v16 = vshll.u32 %v4913_v59, 16 }
  0xe5   : > { %2679 = vst.msk [vmem:[#allocation3 + $0x20] sm:$0xff] %vm2674_vm2, %v2635_v2  ;;  %v3170_v35 = vrot.slane %v3168_v43, 1  ;;  %v900_v53 = vsel %vm5043_vm3, %v708_v18, %v899_v3  ;;  %v4916_v63 = vld [vmem:[#allocation2 + $0x90] sm:$0xfe]   ;;  %v1390_v2 = vshrl.u32 %v5633_v50, 16  ;;  %v1394_v12 = vrot.slane %v1392_v27, 1 }
  0xe6   : > { %905 = vst.msk [vmem:[#allocation2 + $0xac] sm:$0xf] %vm269_vm0, %v724_v22  ;;  %v2288_v62 = vsel %vm1244_vm10, %v2283_v57, %v2287_v60  ;;  %901 = vst [vmem:[#allocation2 + $0xa4] sm:$0x1] %v900_v53  ;;  %v3175_v7 = vrot.slane %v3173_v16, 1  ;;  %v2613_v13 = vsel %vm1678_vm9, %v2611_v9, %v2612_v58  ;;  %v3508_v14 = vrot.slane %v4916_v63, 1 }
  0xe7   : > { %v2637_v39 = vpop.permute.xlu1 %2636  ;;  %v4917_v1 = vld [vmem:[#allocation2 + $0x98] ss:$0 sps:$4 sm:$0x11]   ;;  %2359 = vrot.lane.b32.xlu1 %v2288_v62, %s5001_s28  ;;  %v3171_v54 = vor.u32 %v3170_v35, %v3166_v40  ;;  %v4914_v25 = vld [vmem:[#allocation2 + $0x9c] sm:$0xff]   ;;  %v1395_v55 = vor.u32 %v1394_v12, %v1390_v2  ;;  %v4924_v9 = vld [vmem:[#allocation2 + $0x90] sm:$0xfe]  }
  0xe8   : > { %v2813_v4 = vpop.permute.xlu0 %2812  ;;  %2680 = vst.msk [vmem:[#allocation3 + $0x28] sm:$0xff] %vm2674_vm2, %v2637_v39  ;;  %v3509_v17 = vrot.slane %v4917_v1, 1  ;;  %v4922_v18 = vld [vmem:[#allocation2 + $0x9c] sm:$0xff]   ;;  %v3178_v21 = vshrl.u32 %v4914_v25, 16  ;;  %v3180_v23 = vshll.u32 %v4914_v25, 16  ;;  %v1715_v43 = vrot.slane %v4924_v9, 1 }
  0xe9   : > { %2857 = vst.msk [vmem:[#allocation3 + $0x20] sm:$0xff] %vm2852_vm4, %v2813_v4  ;;  %v3176_v19 = vsel %vm1244_vm10, %v3171_v54, %v3175_v7  ;;  %v4911_v20 = vld [vmem:[#allocation2 + $0x9c] sm:$0xff]   ;;  %v4919_v24 = vld [vmem:[#allocation2 + $0x98] ss:$0 sps:$4 sm:$0x11]   ;;  %v1402_v15 = vshrl.u32 %v4922_v18, 16 }
  0xea   : > { %3257 = vrot.lane.b32.xlu0 %v3176_v19, %s5002_s29  ;;  %v3510_v4 = vsel %vm1678_vm9, %v3508_v14, %v3509_v17  ;;  %v4920_v61 = vld [vmem:[#allocation2 + $0x9c] sm:$0xfe]   ;;  %v3182_v29 = vrot.slane %v3180_v23, 1  ;;  %v1397_v11 = vshll.u32 %v4919_v24, 16  ;;  %v1404_v33 = vshll.u32 %v4922_v18, 16  ;;  %v4939_v14 = vld [vmem:[#allocation2 + $0x54] sm:$0xff]  }
  0xeb   : > { %v2815_v47 = vpop.permute.xlu1 %2814  ;;  %2648 = vrot.lane.b32.xlu1 %v2613_v13, %s4999_s26  ;;  %v3511_v39 = vrot.slane %v4920_v61, 1  ;;  %v4925_v22 = vld [vmem:[#allocation2 + $0x98] ss:$0 sps:$4 sm:$0x11]   ;;  %v4930_v57 = vld [vmem:[#allocation2 + $0x9c] sm:$0xff]   ;;  %v725_v7 = vrot.slane %v5623_v32, 4 }
  0xec   : > { %v3246_v45 = vpop.permute.xlu0 %3245  ;;  %2858 = vst.msk [vmem:[#allocation3 + $0x28] sm:$0xff] %vm2852_vm4, %v2815_v47  ;;  %v1399_v42 = vrot.slane %v1397_v11, 1  ;;  %v3183_v37 = vor.u32 %v3182_v29, %v3178_v21  ;;  %v1406_v50 = vrot.slane %v1404_v33, 1  ;;  %v1716_v60 = vrot.slane %v4925_v22, 1  ;;  %v4926_v3 = vld [vmem:[#allocation2 + $0x9c] sm:$0xfe]  }
  0xed   : > { %3290 = vst.msk [vmem:[#allocation3 + $0x20] sm:$0xff] %vm3285_vm6, %v3246_v45  ;;  %v4915_v34 = vld [vmem:[#allocation2 + $0xa4] ss:$0 sps:$4 sm:$0x11]   ;;  %v4928_v10 = vld [vmem:[#allocation2 + $0x9c] sm:$0xff]   ;;  %v1718_v53 = vrot.slane %v4926_v3, 1 }
  0xee   : > { %3546 = vrot.lane.b32.xlu0 %v3510_v4, %s5000_s27  ;;  %v4921_v45 = vld [vmem:[#allocation2 + $0xa4] ss:$0 sps:$4 sm:$0x11]   ;;  %v3185_v41 = vshll.u32 %v4915_v34, 16  ;;  %v1400_v35 = vsel %vm1244_vm10, %v1395_v55, %v1399_v42  ;;  %v1407_v16 = vor.u32 %v1406_v50, %v1402_v15  ;;  %v906_v12 = vld [vmem:[#allocation2 + $0xb0] sm:$0x1] }
  0xef   : > { %v3248_v5 = vpop.permute.xlu1 %3247  ;;  %2826 = vrot.lane.b32.xlu1 %v4911_v20, %s4997_s24  ;;  %v4923_v46 = vld [vmem:[#allocation2 + $0xa4] ss:$0 sps:$4 sm:$0x11]   ;;  %v3512_v49 = vrot.slane %v4921_v45, 1  ;;  %v907_v18 = vsel %vm5043_vm3, %v725_v7, %v906_v12  ;;  %v4935_v21 = vld [vmem:[#allocation2 + $0x9c] sm:$0xfe]  }
  0xf0   : > { %v3535_v30 = vpop.permute.xlu0 %3534  ;;  %3291 = vst.msk [vmem:[#allocation3 + $0x28] sm:$0xff] %vm3285_vm6, %v3248_v5  ;;  %v3187_v52 = vrot.slane %v3185_v41, 1  ;;  %v1409_v56 = vshll.u32 %v4923_v46, 16  ;;  %v4927_v27 = vld [vmem:[#allocation2 + $0xa4] ss:$0 sps:$4 sm:$0x11]  }
  0xf1   : > { %3579 = vst.msk [vmem:[#allocation3 + $0x20] sm:$0xff] %vm6033_vm1, %v3535_v30  ;;  %v3513_v47 = vsel %vm1678_vm9, %v3511_v39, %v3512_v49  ;;  %v715_v30 = vor.u32 %v713_v48, %v5621_v38  ;;  %v902_v38 = vld [vmem:[#allocation2 + $0xa8] sm:$0xf]  ;;  %v1717_v48 = vsel %vm1678_vm9, %v1715_v43, %v1716_v60  ;;  %v1719_v62 = vrot.slane %v4927_v27, 1  ;;  %v265_v19 = vld [vmem:[%s5069_s21 + $0xe0] sm:$0xff] }
  0xf2   : > { %v3188_v59 = vsel %vm1244_vm10, %v3183_v37, %v3187_v52  ;;  %3548 = vrot.lane.b32.xlu0 %v3513_v47, %s5000_s27  ;;  %v1411_v40 = vrot.slane %v1409_v56, 1  ;;  %v2290_v5 = vshrl.u32 %v4930_v57, 16  ;;  %v4931_v54 = vld [vmem:[#allocation2 + $0xa4] ss:$0 sps:$4 sm:$0x11]   ;;  %1059 = vst.msk [vmem:[#allocation3 + $0x38] sm:$0xff] %vm1051_vm11, %v4939_v14  ;;  %v4625_v32 = vpack.c.bf16 %v265_v19, %v265_v19 }
  0xf3   : > { %v1450_v26 = vpop.permute.xlu1 %1449  ;;  %3259 = vrot.lane.b32.xlu1 %v3188_v59, %s5002_s29  ;;  %v903_v63 = vsel %vm5094_vm8, %v715_v30, %v902_v38  ;;  %v2297_v17 = vshll.u32 %v4931_v54, 16  ;;  %908 = vst [vmem:[#allocation2 + $0xb0] sm:$0x1] %v907_v18  ;;  %v4936_v23 = vld [vmem:[#allocation2 + $0xa4] ss:$0 sps:$4 sm:$0x11]   ;;  %v1720_v29 = vsel %vm1678_vm9, %v1718_v53, %v1719_v62 }
  0xf4   : > { %v3537_v8 = vpop.permute.xlu0 %3536  ;;  %1492 = vst.msk [vmem:[#allocation3 + $0x30] sm:$0xff] %vm1485_vm12, %v1450_v26  ;;  %904 = vst [vmem:[#allocation2 + $0xa8] sm:$0xf] %v903_v63  ;;  %v1412_v13 = vsel %vm1244_vm10, %v1407_v16, %v1411_v40  ;;  %v266_v24 = vld [vmem:[%s5069_s21 + $0xe8] sm:$0xff]  ;;  %v2614_v11 = vrot.slane %v4935_v21, 1  ;;  %v2615_v15 = vrot.slane %v4936_v23, 1 }
  0xf5   : > { %3580 = vst.msk [vmem:[#allocation3 + $0x28] sm:$0xff] %vm6033_vm1, %v3537_v8  ;;  %vm6047_vm1 = vcmask 130144   ;;  %v2292_v8 = vshll.u32 %v4930_v57, 16  ;;  %v2299_v26 = vrot.slane %v2297_v17, 1  ;;  %v325_v33 = vld [vmem:[#allocation2 + $0xb4] sm:$0x1] }
  0xf6   : > { %1751 = vrot.lane.b32.xlu0 %v1717_v48, %s4995_s22  ;;  %v727_v34 = vshrl.u32 %v4625_v32, 16  ;;  %v326_v42 = vsel %vm5043_vm3, 0, %v325_v33  ;;  %v730_v46 = vshll.u32 %v4625_v32, 16  ;;  %v2616_v49 = vsel %vm1678_vm9, %v2614_v11, %v2615_v15  ;;  %v4964_v33 = vld [vmem:[#allocation2 + $0x60] sm:$0xff]  }
  0xf7   : > { %v1452_v51 = vpop.permute.xlu1 %1451  ;;  %1461 = vrot.lane.b32.xlu1 %v1400_v35, %s4998_s25  ;;  %v2294_v25 = vrot.slane %v2292_v8, 1  ;;  %327 = vst [vmem:[#allocation2 + $0xb4] sm:$0x1] %v326_v42  ;;  %1060 = vst.msk [vmem:[#allocation3 + $0x40] sm:$0xff] %vm1051_vm11, %v4964_v33 }
  0xf8   : > { %v1740_v28 = vpop.permute.xlu0 %1739  ;;  %1493 = vst.msk [vmem:[#allocation3 + $0x38] sm:$0xff] %vm1485_vm12, %v1452_v51  ;;  %v3595_v4 = vld [vmem:[#allocation3 + $0x20] sm:$0xff]  ;;  %v729_v41 = vrot.slane %v727_v34, 7 }
  0xf9   : > { %1782 = vst.msk [vmem:[#allocation3 + $0x30] sm:$0xff] %vm6046_vm14, %v1740_v28  ;;  %v2295_v20 = vor.u32 %v2294_v25, %v2290_v5  ;;  %v4626_v28 = vpack.c.bf16 %v266_v24, %v266_v24  ;;  %4694 = vmatprep.mubr.msk.bf16.mxu0 %vm3627_vm13, %v3595_v4 }
  0xfa   : > { %1928 = vrot.lane.b32.xlu0 %v4928_v10, %s4996_s23  ;;  %v4933_v30 = vld [vmem:[#allocation2 + $0xb0] ss:$0 sps:$4 sm:$0x11]   ;;  %v733_v57 = vrot.slane %v729_v41, 4  ;;  %v732_v40 = vor.u32 %v730_v46, %v729_v41  ;;  %v268_v41 = vld [vmem:[%s5069_s21 + $0xf8] sm:$0xff] }
  0xfb   : > { %v1742_v1 = vpop.permute.xlu1 %1741  ;;  %1463 = vrot.lane.b32.xlu1 %v1412_v13, %s4998_s25  ;;  %v2300_v39 = vsel %vm1244_vm10, %v2295_v20, %v2299_v26  ;;  %v4932_v37 = vld [vmem:[#allocation2 + $0xa8] sm:$0xff]   ;;  %v735_v51 = vshrl.u32 %v4626_v28, 16  ;;  %v738_v52 = vshll.u32 %v4626_v28, 16  ;;  %v4938_v59 = vld [vmem:[#allocation2 + $0xb0] ss:$0 sps:$4 sm:$0x11]  }
  0xfc   : > { %v1917_v44 = vpop.permute.xlu0 %1916  ;;  %v4937_v50 = vld [vmem:[#allocation2 + $0xa8] sm:$0xfe]   ;;  %v2302_v55 = vshrl.u32 %v4932_v37, 16  ;;  %v2304_v56 = vshll.u32 %v4932_v37, 16  ;;  %v3596_v22 = vld [vmem:[#allocation3 + $0x28] sm:$0xff]  ;;  %v2309_v43 = vshll.u32 %v4933_v30, 16 }
  0xfd   : > { %1959 = vst.msk [vmem:[#allocation3 + $0x30] sm:$0xff] %vm6047_vm1, %v1917_v44  ;;  %vm6048_vm1 = vmmov %vm6046_vm14  ;;  %vm6049_vm14 = vcmask 130144   ;;  %v4929_v44 = vld [vmem:[#allocation2 + $0xa8] sm:$0xff]   ;;  %4695 = vmatmul.mubr.msk.bf16.gmra.mrb[8].mxu0 %vm3627_vm13, %v3596_v22  ;;  %v5698_v60 = vrot.slane %v735_v51, 7  ;;  %v2617_v27 = vrot.slane %v4937_v50, 1  ;;  %v2618_v53 = vrot.slane %v4938_v59, 1 }
  0xfe   : > { %1783 = vst.msk [vmem:[#allocation3 + $0x38] sm:$0xff] %vm6048_vm1, %v1742_v1  ;;  %2361 = vrot.lane.b32.xlu0 %v2300_v39, %s5001_s28  ;;  %v4940_v9 = vld [vmem:[#allocation2 + $0xa8] sm:$0xff]   ;;  %v4943_v35 = vld [vmem:[#allocation2 + $0xb0] ss:$0 sps:$4 sm:$0x11]   ;;  %v2311_v48 = vrot.slane %v2309_v43, 1  ;;  %v4628_v22 = vpack.c.bf16 %v268_v41, %v268_v41 }
  0xff   : > { %1753 = vrot.lane.b32.xlu1 %v1720_v29, %s4995_s22  ;;  %v4942_v47 = vld [vmem:[#allocation2 + $0xa8] sm:$0xff]   ;;  %v740_v62 = vor.u32 %v738_v52, %v5698_v60  ;;  %v909_v63 = vld [vmem:[#allocation2 + $0xb4] sm:$0xf]  ;;  %v381_v1 = vld [vmem:[#allocation2 + $0xbc] sm:$0x1]  ;;  %v3197_v8 = vshll.u32 %v4943_v35, 16  ;;  %v2619_v20 = vsel %vm1678_vm9, %v2617_v27, %v2618_v53 }
 0x100   : > { %v2350_v58 = vpop.permute.xlu0 %2349  ;;  %v3190_v16 = vshrl.u32 %v4942_v47, 16  ;;  %v3192_v10 = vshll.u32 %v4942_v47, 16  ;;  %v382_v12 = vsel %vm5062_vm5, 0, %v381_v1  ;;  %v4946_v13 = vld [vmem:[#allocation2 + $0xa8] sm:$0xfe]   ;;  %v267_v28 = vld [vmem:[%s5069_s21 + $0xf0] sm:$0xff] }
 0x101   : > { %2392 = vst.msk [vmem:[#allocation3 + $0x30] sm:$0xff] %vm2385_vm15, %v2350_v58  ;;  %v2306_v58 = vrot.slane %v2304_v56, 1  ;;  %v741_v7 = vsel %vm5086_vm7, %v733_v57, %v740_v62  ;;  %v3199_v14 = vrot.slane %v3197_v8, 1  ;;  %383 = vst [vmem:[#allocation2 + $0xbc] sm:$0x1] %v382_v12  ;;  %v3514_v21 = vrot.slane %v4946_v13, 1 }
 0x102   : > { %2650 = vrot.lane.b32.xlu0 %v2616_v49, %s4999_s26  ;;  %v3194_v5 = vrot.slane %v3192_v10, 1  ;;  %912 = vst.msk [vmem:[#allocation2 + $0xb8] sm:$0xf] %vm269_vm0, %v741_v7  ;;  %v4947_v17 = vld [vmem:[#allocation2 + $0xb0] ss:$0 sps:$4 sm:$0x11]   ;;  %v4627_v4 = vpack.c.bf16 %v267_v28, %v267_v28 }
 0x103   : > { %1930 = vrot.lane.b32.xlu1 %v4929_v44, %s4996_s23  ;;  %v2307_v3 = vor.u32 %v2306_v58, %v2302_v55  ;;  %v5713_v23 = vld [vmem:[#allocation2 + $0xa8] sm:$0xff]   ;;  %v3515_v32 = vrot.slane %v4947_v17, 1  ;;  %v4949_v26 = vld [vmem:[#allocation2 + $0xb0] ss:$0 sps:$4 sm:$0x11]   ;;  %vm6050_vm1 = vcmask 294144  }
 0x104   : > { %v2639_v2 = vpop.permute.xlu0 %2638  ;;  %v3195_v25 = vor.u32 %v3194_v5, %v3190_v16  ;;  %v1414_v34 = vshrl.u32 %v5713_v23, 16  ;;  %v1416_v39 = vshll.u32 %v5713_v23, 16  ;;  %v5725_v42 = vld [vmem:[#allocation2 + $0xa8] sm:$0xfe]   ;;  %v1421_v44 = vshll.u32 %v4949_v26, 16 }
 0x105   : > { %2681 = vst.msk [vmem:[#allocation3 + $0x30] sm:$0xff] %vm2674_vm2, %v2639_v2  ;;  %v910_v2 = vsel %vm5094_vm8, %v732_v40, %v909_v63  ;;  %v2312_v54 = vsel %vm1244_vm10, %v2307_v3, %v2311_v48  ;;  %v3516_v29 = vsel %vm1678_vm9, %v3514_v21, %v3515_v32  ;;  %v5729_v37 = vld [vmem:[#allocation2 + $0xb0] ss:$0 sps:$4 sm:$0x11]   ;;  %v744_v50 = vshrl.u32 %v4627_v4, 16 }
 0x106   : > { %2828 = vrot.lane.b32.xlu0 %v4940_v9, %s4997_s24  ;;  %911 = vst [vmem:[#allocation2 + $0xb4] sm:$0xf] %v910_v2  ;;  %v3200_v24 = vsel %vm1244_vm10, %v3195_v25, %v3199_v14  ;;  %v1418_v57 = vrot.slane %v1416_v39, 1  ;;  %v5740_v58 = vrot.slane %v1421_v44, 1  ;;  %v1721_v40 = vrot.slane %v5725_v42, 1  ;;  %v4969_v8 = vld [vmem:[#allocation2 + $0x6c] sm:$0xff]  }
 0x107   : > { %2363 = vrot.lane.b32.xlu1 %v2312_v54, %s5001_s28  ;;  %v746_v43 = vrot.slane %v744_v50, 7  ;;  %v1722_v35 = vrot.slane %v5729_v37, 1  ;;  %v752_v48 = vshrl.u32 %v4628_v22, 16  ;;  %v755_v2 = vshll.u32 %v4628_v22, 16  ;;  %v384_v5 = vld [vmem:[#allocation2 + $0xc8] sm:$0x1] }
 0x108   : > { %v913_v49 = vld [vmem:[#allocation2 + $0xbc] sm:$0x1]  ;;  %v385_v7 = vsel %vm5062_vm5, 0, %v384_v5  ;;  %1061 = vst.msk [vmem:[#allocation3 + $0x48] sm:$0xff] %vm1051_vm11, %v4969_v8 }
 0x109   : > { %v750_v63 = vrot.slane %v746_v43, 4  ;;  %v754_v1 = vrot.slane %v752_v48, 7  ;;  %386 = vst [vmem:[#allocation2 + $0xc8] sm:$0x1] %v385_v7  ;;  %v1723_v36 = vsel %vm1678_vm9, %v1721_v40, %v1722_v35  ;;  %v4980_v8 = vld [vmem:[#allocation2 + $0x78] sm:$0xff]  }
 0x10a   : > { %3261 = vrot.lane.b32.xlu0 %v3200_v24, %s5002_s29  ;;  %1062 = vst.msk [vmem:[#allocation3 + $0x50] sm:$0xff] %vm1051_vm11, %v4980_v8 }
 0x10b   : > { %2652 = vrot.lane.b32.xlu1 %v2619_v20, %s4999_s26  ;;  %v757_v17 = vor.u32 %v755_v2, %v754_v1 }
 0x10d   : > { %v4941_v46 = vld [vmem:[#allocation2 + $0xb4] sm:$0xff]   ;;  %v758_v28 = vsel %vm5086_vm7, %v750_v63, %v757_v17 }
 0x10e   : > { %3550 = vrot.lane.b32.xlu0 %v3516_v29, %s5000_s27  ;;  %v4944_v52 = vld [vmem:[#allocation2 + $0xb4] sm:$0xff]   ;;  %919 = vst.msk [vmem:[#allocation2 + $0xc4] sm:$0xf] %vm269_vm0, %v758_v28 }
 0x10f   : > { %2830 = vrot.lane.b32.xlu1 %v4941_v46, %s4997_s24  ;;  %v4950_v47 = vld [vmem:[#allocation2 + $0xb4] sm:$0xfe]   ;;  %v3204_v30 = vshll.u32 %v4944_v52, 16  ;;  %v759_v46 = vrot.slane %v754_v1, 4 }
 0x110   : > { %v5742_v59 = vld [vmem:[#allocation2 + $0xb4] sm:$0xff]   ;;  %v3517_v27 = vrot.slane %v4950_v47, 1 }
 0x111   : > { %v1919_v61 = vpop.permute.xlu1 %1918  ;;  %v3206_v3 = vrot.slane %v3204_v30, 1  ;;  %v1426_v53 = vshrl.u32 %v5742_v59, 16  ;;  %v1428_v62 = vshll.u32 %v5742_v59, 16  ;;  %v5756_v26 = vld [vmem:[#allocation2 + $0xb4] sm:$0xfe]  }
 0x112   : > { %1960 = vst.msk [vmem:[#allocation3 + $0x38] sm:$0xff] %vm6049_vm14, %v1919_v61  ;;  %v2817_v45 = vpop.permute.xlu0 %2816  ;;  %v742_v61 = vrot.slane %v5698_v60, 4  ;;  %vm6051_vm14 = vmmov %vm6050_vm1  ;;  %v3202_v60 = vshrl.u32 %v4944_v52, 16  ;;  %v1724_v30 = vrot.slane %v5756_v26, 1  ;;  %v387_v26 = vld [vmem:[#allocation2 + $0xd4] sm:$0x1] }
 0x113   : > { %2859 = vst.msk [vmem:[#allocation3 + $0x30] sm:$0xff] %vm2852_vm4, %v2817_v45  ;;  %v328_v45 = vld [vmem:[#allocation2 + $0xc0] sm:$0x1]  ;;  %v1430_v32 = vrot.slane %v1428_v62, 1 }
 0x114   : > { %v914_v51 = vsel %vm5043_vm3, %v742_v61, %v913_v49  ;;  %v329_v55 = vsel %vm5043_vm3, 0, %v328_v45  ;;  %v1419_v61 = vor.u32 %v1418_v57, %v1414_v34 }
 0x115   : > { %v2352_v38 = vpop.permute.xlu1 %2351  ;;  %915 = vst [vmem:[#allocation2 + $0xbc] sm:$0x1] %v914_v51  ;;  %330 = vst [vmem:[#allocation2 + $0xc0] sm:$0x1] %v329_v55  ;;  %v1431_v52 = vor.u32 %v1430_v32, %v1426_v53  ;;  %v4958_v55 = vld [vmem:[#allocation2 + $0xb4] sm:$0xff]  }
 0x116   : > { %2393 = vst.msk [vmem:[#allocation3 + $0x38] sm:$0xff] %vm2385_vm15, %v2352_v38  ;;  %v3250_v19 = vpop.permute.xlu0 %3249  ;;  %v747_v38 = vshll.u32 %v4627_v4, 16  ;;  %v1424_v51 = vsel %vm1244_vm10, %v1419_v61, %v5740_v58  ;;  %v331_v58 = vld [vmem:[#allocation2 + $0xcc] sm:$0x1] }
 0x117   : > { %3292 = vst.msk [vmem:[#allocation3 + $0x30] sm:$0xff] %vm3285_vm6, %v3250_v19  ;;  %v3207_v19 = vor.u32 %v3206_v3, %v3202_v60 }
 0x118   : > { %v749_v14 = vor.u32 %v747_v38, %v746_v43 }
 0x119   : > { %v2641_v18 = vpop.permute.xlu1 %2640 }
 0x11a   : > { %2682 = vst.msk [vmem:[#allocation3 + $0x38] sm:$0xff] %vm2674_vm2, %v2641_v18  ;;  %v3539_v15 = vpop.permute.xlu0 %3538  ;;  %v4960_v18 = vld [vmem:[#allocation2 + $0xb4] sm:$0xff]  }
 0x11b   : > { %3581 = vst.msk [vmem:[#allocation3 + $0x30] sm:$0xff] %vm6050_vm1, %v3539_v15  ;;  %vm6052_vm1 = vcmask 97344   ;;  %v2314_v37 = vshrl.u32 %v4960_v18, 16  ;;  %v2316_v31 = vshll.u32 %v4960_v18, 16 }
 0x11c   : > { %v4945_v54 = vld [vmem:[#allocation2 + $0xbc] ss:$0 sps:$4 sm:$0x11]   ;;  %v916_v15 = vld [vmem:[#allocation2 + $0xc0] sm:$0xf]  ;;  %vm6054_vm7 = vmmov %vm6052_vm1 }
 0x11d   : > { %v2819_v11 = vpop.permute.xlu1 %2818  ;;  %v4951_v25 = vld [vmem:[#allocation2 + $0xbc] ss:$0 sps:$4 sm:$0x11]   ;;  %v3209_v20 = vshll.u32 %v4945_v54, 16  ;;  %v917_v45 = vsel %vm5094_vm8, %v749_v14, %v916_v15  ;;  %v2318_v49 = vrot.slane %v2316_v31, 1  ;;  %v4981_v15 = vld [vmem:[#allocation2 + $0x84] sm:$0xff]  }
 0x11e   : > { %2860 = vst.msk [vmem:[#allocation3 + $0x38] sm:$0xff] %vm2852_vm4, %v2819_v11  ;;  %v4953_v21 = vld [vmem:[#allocation2 + $0xbc] ss:$0 sps:$4 sm:$0x11]   ;;  %v3518_v24 = vrot.slane %v4951_v25, 1 }
 0x11f   : > { %v3211_v4 = vrot.slane %v3209_v20, 1  ;;  %v1433_v29 = vshll.u32 %v4953_v21, 16  ;;  %v4957_v11 = vld [vmem:[#allocation2 + $0xbc] ss:$0 sps:$4 sm:$0x11]   ;;  %v2319_v60 = vor.u32 %v2318_v49, %v2314_v37  ;;  %1063 = vst.msk [vmem:[#allocation3 + $0x58] sm:$0xff] %vm1051_vm11, %v4981_v15 }
 0x120   : > { %v3519_v42 = vsel %vm1678_vm9, %v3517_v27, %v3518_v24  ;;  %v4961_v44 = vld [vmem:[#allocation2 + $0xbc] ss:$0 sps:$4 sm:$0x11]   ;;  %918 = vst [vmem:[#allocation2 + $0xc0] sm:$0xf] %v917_v45  ;;  %v1725_v40 = vrot.slane %v4957_v11, 1 }
 0x121   : > { %v3252_v56 = vpop.permute.xlu1 %3251  ;;  %v3541_v9 = vpop.permute.xlu0 %3540  ;;  %v3212_v23 = vsel %vm1244_vm10, %v3207_v19, %v3211_v4  ;;  %3552 = vrot.lane.b32.xlu0 %v3519_v42, %s5000_s27  ;;  %v1435_v34 = vrot.slane %v1433_v29, 1  ;;  %v2321_v50 = vshll.u32 %v4961_v44, 16  ;;  %v4966_v59 = vld [vmem:[#allocation2 + $0xbc] ss:$0 sps:$4 sm:$0x11]   ;;  %v332_v27 = vsel %vm5043_vm3, 0, %v331_v58 }
 0x122   : > { %3293 = vst.msk [vmem:[#allocation3 + $0x38] sm:$0xff] %vm3285_vm6, %v3252_v56  ;;  %v3597_v41 = vld [vmem:[#allocation3 + $0x30] sm:$0xff]  ;;  %3263 = vrot.lane.b32.xlu1 %v3212_v23, %s5002_s29  ;;  %333 = vst [vmem:[#allocation2 + $0xcc] sm:$0x1] %v332_v27  ;;  %v2621_v48 = vrot.slane %v4966_v59, 1  ;;  %v1726_v0 = vsel %vm1678_vm9, %v1724_v30, %v1725_v40  ;;  %v388_v29 = vsel %vm5062_vm5, 0, %v387_v26 }
 0x123   : > { %3582 = vst.msk [vmem:[#allocation3 + $0x38] sm:$0xff] %vm6051_vm14, %v3541_v9  ;;  %vm6053_vm14 = vcmask 130144   ;;  %4698 = vmatprep.mubr.msk.bf16.mxu0 %vm3627_vm13, %v3597_v41  ;;  %v920_v56 = vld [vmem:[#allocation2 + $0xc8] sm:$0x1]  ;;  %v4965_v9 = vld [vmem:[#allocation2 + $0xb4] sm:$0xfe]   ;;  %v1436_v35 = vsel %vm1244_vm10, %v1431_v52, %v1435_v34 }
 0x124   : > { %v921_v57 = vsel %vm5043_vm3, %v759_v46, %v920_v56  ;;  %vm6055_vm8 = vmmov %vm6053_vm14  ;;  %v2323_v3 = vrot.slane %v2321_v50, 1  ;;  %v2620_v38 = vrot.slane %v4965_v9, 1  ;;  %389 = vst [vmem:[#allocation2 + $0xd4] sm:$0x1] %v388_v29  ;;  %v4982_v41 = vld [vmem:[#allocation2 + $0x90] sm:$0xff]   ;;  %vm6056_vm3 = vcmask 294144  }
 0x125   : > { %v1454_v16 = vpop.permute.xlu1 %1453  ;;  %v1744_v10 = vpop.permute.xlu0 %1743  ;;  %1755 = vrot.lane.b32.xlu0 %v1723_v36, %s4995_s22  ;;  %922 = vst [vmem:[#allocation2 + $0xc8] sm:$0x1] %v921_v57  ;;  %1064 = vst.msk [vmem:[#allocation3 + $0x60] sm:$0xff] %vm1051_vm11, %v4982_v41  ;;  %v4983_v36 = vld [vmem:[#allocation2 + $0x9c] sm:$0xff]   ;;  %v4985_v9 = vld [vmem:[#allocation2 + $0xb4] sm:$0xff]  }
 0x126   : > { %1494 = vst.msk [vmem:[#allocation3 + $0x40] sm:$0xff] %vm1485_vm12, %v1454_v16  ;;  %1465 = vrot.lane.b32.xlu1 %v1424_v51, %s4998_s25  ;;  %v2324_v53 = vsel %vm1244_vm10, %v2319_v60, %v2323_v3  ;;  %v2622_v25 = vsel %vm1678_vm9, %v2620_v38, %v2621_v48  ;;  %v4984_v51 = vld [vmem:[#allocation2 + $0xa8] sm:$0xff]   ;;  %vm6057_vm5 = vmmov %vm6056_vm3 }
 0x127   : > { %1784 = vst.msk [vmem:[#allocation3 + $0x40] sm:$0xff] %vm6052_vm1, %v1744_v10  ;;  %v4962_v10 = vld [vmem:[#allocation2 + $0xc0] sm:$0xff]  }
 0x128   : > { %v4967_v62 = vld [vmem:[#allocation2 + $0xc0] sm:$0xfe]   ;;  %v2326_v63 = vshrl.u32 %v4962_v10, 16  ;;  %v2328_v1 = vshll.u32 %v4962_v10, 16  ;;  %1065 = vst.msk [vmem:[#allocation3 + $0x68] sm:$0xff] %vm1051_vm11, %v4983_v36  ;;  %1066 = vst.msk [vmem:[#allocation3 + $0x70] sm:$0xff] %vm1051_vm11, %v4984_v51 }
 0x129   : > { %v1456_v12 = vpop.permute.xlu1 %1455  ;;  %v1921_v13 = vpop.permute.xlu0 %1920  ;;  %1932 = vrot.lane.b32.xlu0 %v4958_v55, %s4996_s23  ;;  %v4972_v2 = vld [vmem:[#allocation2 + $0xc0] sm:$0xff]   ;;  %v2623_v17 = vrot.slane %v4967_v62, 1  ;;  %v4974_v28 = vld [vmem:[#allocation2 + $0xcc] sm:$0xff]   ;;  %1067 = vst.msk [vmem:[#allocation3 + $0x78] sm:$0xff] %vm1051_vm11, %v4985_v9 }
 0x12a   : > { %1961 = vst.msk [vmem:[#allocation3 + $0x40] sm:$0xff] %vm6053_vm14, %v1921_v13  ;;  %v3598_v43 = vld [vmem:[#allocation3 + $0x38] sm:$0xff]  ;;  %1467 = vrot.lane.b32.xlu1 %v1436_v35, %s4998_s25  ;;  %v2330_v54 = vrot.slane %v2328_v1, 1  ;;  %v4970_v18 = vld [vmem:[#allocation2 + $0xc0] sm:$0xff]   ;;  %v3214_v20 = vshrl.u32 %v4972_v2, 16  ;;  %v3216_v21 = vshll.u32 %v4972_v2, 16  ;;  %vm6060_vm14 = vmmov %vm6055_vm8 }
 0x12b   : > { %1495 = vst.msk [vmem:[#allocation3 + $0x48] sm:$0xff] %vm1485_vm12, %v1456_v12  ;;  %4699 = vmatmul.mubr.msk.bf16.gmra.mrb[12].mxu0 %vm3627_vm13, %v3598_v43  ;;  %v4959_v12 = vld [vmem:[#allocation2 + $0xc0] sm:$0xff]   ;;  %v3226_v23 = vshrl.u32 %v4974_v28, 16  ;;  %v4971_v30 = vld [vmem:[#allocation2 + $0xcc] sm:$0xff]  }
 0x12c   : > { %v4963_v5 = vld [vmem:[#allocation2 + $0xc8] ss:$0 sps:$4 sm:$0x11]   ;;  %v2331_v14 = vor.u32 %v2330_v54, %v2326_v63  ;;  %v3218_v4 = vrot.slane %v3216_v21, 1  ;;  %v4976_v37 = vld [vmem:[#allocation2 + $0xc0] sm:$0xfe]  }
 0x12d   : > { %v1746_v33 = vpop.permute.xlu1 %1745  ;;  %v2354_v39 = vpop.permute.xlu0 %2353  ;;  %2365 = vrot.lane.b32.xlu0 %v2324_v53, %s5001_s28  ;;  %v4968_v7 = vld [vmem:[#allocation2 + $0xc8] ss:$0 sps:$4 sm:$0x11]   ;;  %v2333_v13 = vshll.u32 %v4963_v5, 16  ;;  %v3520_v34 = vrot.slane %v4976_v37, 1 }
 0x12e   : > { %1785 = vst.msk [vmem:[#allocation3 + $0x48] sm:$0xff] %vm6054_vm7, %v1746_v33  ;;  %1757 = vrot.lane.b32.xlu1 %v1726_v0, %s4995_s22  ;;  %v4973_v19 = vld [vmem:[#allocation2 + $0xc8] ss:$0 sps:$4 sm:$0x11]   ;;  %v2624_v33 = vrot.slane %v4968_v7, 1  ;;  %v3219_v45 = vor.u32 %v3218_v4, %v3214_v20  ;;  %vm6061_vm7 = vmmov %vm6056_vm3 }
 0x12f   : > { %2394 = vst.msk [vmem:[#allocation3 + $0x40] sm:$0xff] %vm2385_vm15, %v2354_v39  ;;  %v2335_v32 = vrot.slane %v2333_v13, 1  ;;  %v3221_v61 = vshll.u32 %v4973_v19, 16  ;;  %v3228_v39 = vshll.u32 %v4974_v28, 16 }
 0x130   : > { %v4977_v6 = vld [vmem:[#allocation2 + $0xc8] ss:$0 sps:$4 sm:$0x11]   ;;  %v2625_v52 = vsel %vm1678_vm9, %v2623_v17, %v2624_v33  ;;  %v4979_v59 = vld [vmem:[#allocation2 + $0xd4] ss:$0 sps:$4 sm:$0x11]  }
 0x131   : > { %v1923_v47 = vpop.permute.xlu1 %1922  ;;  %v2643_v22 = vpop.permute.xlu0 %2642  ;;  %2654 = vrot.lane.b32.xlu0 %v2622_v25, %s4999_s26  ;;  %v2336_v42 = vsel %vm1244_vm10, %v2331_v14, %v2335_v32  ;;  %v3223_v44 = vrot.slane %v3221_v61, 1  ;;  %v3521_v50 = vrot.slane %v4977_v6, 1  ;;  %v3230_v55 = vrot.slane %v3228_v39, 1 }
 0x132   : > { %1962 = vst.msk [vmem:[#allocation3 + $0x48] sm:$0xff] %vm6055_vm8, %v1923_v47  ;;  %1934 = vrot.lane.b32.xlu1 %v4959_v12, %s4996_s23  ;;  %v4975_v47 = vld [vmem:[#allocation2 + $0xd4] ss:$0 sps:$4 sm:$0x11]  }
 0x133   : > { %2683 = vst.msk [vmem:[#allocation3 + $0x40] sm:$0xff] %vm2674_vm2, %v2643_v22  ;;  %v3224_v49 = vsel %vm1244_vm10, %v3219_v45, %v3223_v44  ;;  %v4978_v22 = vld [vmem:[#allocation2 + $0xcc] sm:$0xfe]   ;;  %v3522_v57 = vsel %vm1678_vm9, %v3520_v34, %v3521_v50  ;;  %v3231_v40 = vor.u32 %v3230_v55, %v3226_v23  ;;  %v3233_v58 = vshll.u32 %v4975_v47, 16 }
 0x134   : > { %v3523_v35 = vrot.slane %v4978_v22, 1 }
 0x135   : > { %v2821_v16 = vpop.permute.xlu0 %2820  ;;  %v2356_v24 = vpop.permute.xlu1 %2355  ;;  %2832 = vrot.lane.b32.xlu0 %v4970_v18, %s4997_s24  ;;  %v3235_v43 = vrot.slane %v3233_v58, 1 }
 0x136   : > { %2861 = vst.msk [vmem:[#allocation3 + $0x40] sm:$0xff] %vm2852_vm4, %v2821_v16  ;;  %2367 = vrot.lane.b32.xlu1 %v2336_v42, %s5001_s28  ;;  %v3524_v16 = vrot.slane %v4979_v59, 1 }
 0x137   : > { %2395 = vst.msk [vmem:[#allocation3 + $0x48] sm:$0xff] %vm2385_vm15, %v2356_v24  ;;  %v3236_v27 = vsel %vm1244_vm10, %v3231_v40, %v3235_v43  ;;  %vm6058_vm10 = vmmov %vm6055_vm8 }
 0x138   : > { %v3525_v48 = vsel %vm1678_vm9, %v3523_v35, %v3524_v16  ;;  %vm6059_vm9 = vmmov %vm6052_vm1 }
 0x139   : > { %v3254_v11 = vpop.permute.xlu0 %3253  ;;  %v2645_v31 = vpop.permute.xlu1 %2644  ;;  %3265 = vrot.lane.b32.xlu0 %v3224_v49, %s5002_s29  ;;  %vm6062_vm8 = vmmov %vm6056_vm3 }
 0x13a   : > { %3294 = vst.msk [vmem:[#allocation3 + $0x40] sm:$0xff] %vm3285_vm6, %v3254_v11  ;;  %2656 = vrot.lane.b32.xlu1 %v2625_v52, %s4999_s26 }
 0x13b   : > { %2684 = vst.msk [vmem:[#allocation3 + $0x48] sm:$0xff] %vm2674_vm2, %v2645_v31 }
 0x13d   : > { %v3543_v46 = vpop.permute.xlu0 %3542  ;;  %v2823_v56 = vpop.permute.xlu1 %2822  ;;  %3554 = vrot.lane.b32.xlu0 %v3522_v57, %s5000_s27 }
 0x13e   : > { %3583 = vst.msk [vmem:[#allocation3 + $0x40] sm:$0xff] %vm6056_vm3, %v3543_v46  ;;  %2834 = vrot.lane.b32.xlu1 %v4971_v30, %s4997_s24  ;;  %vm6063_vm3 = vmmov %vm6052_vm1 }
 0x13f   : > { %2862 = vst.msk [vmem:[#allocation3 + $0x48] sm:$0xff] %vm2852_vm4, %v2823_v56 }
 0x141   : > { %v3545_v3 = vpop.permute.xlu0 %3544 }
 0x142   : > { %3267 = vrot.lane.b32.xlu1 %v3236_v27, %s5002_s29 }
 0x144   : > { %v3256_v10 = vpop.permute.xlu1 %3255 }
 0x145   : > { %v3599_v60 = vld [vmem:[#allocation3 + $0x40] sm:$0xff]  ;;  %3295 = vst.msk [vmem:[#allocation3 + $0x48] sm:$0xff] %vm3285_vm6, %v3256_v10  ;;  %v1748_v38 = vpop.permute.xlu0 %1747 }
 0x146   : > { %4702 = vmatprep.mubr.msk.bf16.mxu1 %vm3627_vm13, %v3599_v60  ;;  %3584 = vst.msk [vmem:[#allocation3 + $0x48] sm:$0xff] %vm6057_vm5, %v3545_v3  ;;  %3556 = vrot.lane.b32.xlu1 %v3525_v48, %s5000_s27  ;;  %vm6064_vm5 = vmmov %vm6058_vm10 }
 0x148   : > { %v1458_v53 = vpop.permute.xlu1 %1457 }
 0x149   : > { %1496 = vst.msk [vmem:[#allocation3 + $0x50] sm:$0xff] %vm1485_vm12, %v1458_v53  ;;  %v1925_v62 = vpop.permute.xlu0 %1924 }
 0x14a   : > { %1786 = vst.msk [vmem:[#allocation3 + $0x50] sm:$0xff] %vm6052_vm1, %v1748_v38 }
 0x14b   : > { %1963 = vst.msk [vmem:[#allocation3 + $0x50] sm:$0xff] %vm6058_vm10, %v1925_v62  ;;  %vm6065_vm10 = vmmov %vm6064_vm5 }
 0x14c   : > { %v1460_v0 = vpop.permute.xlu1 %1459 }
 0x14d   : > { %1497 = vst.msk [vmem:[#allocation3 + $0x58] sm:$0xff] %vm1485_vm12, %v1460_v0  ;;  %v3600_v63 = vld [vmem:[#allocation3 + $0x48] sm:$0xff]  ;;  %v2358_v1 = vpop.permute.xlu0 %2357 }
 0x14e   : > { %4703 = vmatmul.mubr.msk.bf16.vlgmr.msra.gmra.mrb[0].mxu1 %vm3627_vm13, %v3600_v63  ;;  %2396 = vst.msk [vmem:[#allocation3 + $0x50] sm:$0xff] %vm2385_vm15, %v2358_v1 }
 0x150   : > { %v1750_v2 = vpop.permute.xlu1 %1749 }
 0x151   : > { %1787 = vst.msk [vmem:[#allocation3 + $0x58] sm:$0xff] %vm6059_vm9, %v1750_v2  ;;  %v2647_v5 = vpop.permute.xlu0 %2646  ;;  %vm6066_vm9 = vmmov %vm6061_vm7 }
 0x152   : > { %2685 = vst.msk [vmem:[#allocation3 + $0x50] sm:$0xff] %vm2674_vm2, %v2647_v5 }
 0x154   : > { %v1927_v8 = vpop.permute.xlu1 %1926 }
 0x155   : > { %1964 = vst.msk [vmem:[#allocation3 + $0x58] sm:$0xff] %vm6060_vm14, %v1927_v8  ;;  %v2825_v54 = vpop.permute.xlu0 %2824  ;;  %vm6067_vm14 = vmmov %vm6061_vm7 }
 0x156   : > { %2863 = vst.msk [vmem:[#allocation3 + $0x50] sm:$0xff] %vm2852_vm4, %v2825_v54 }
 0x159   : > { %v2360_v7 = vpop.permute.xlu1 %2359 }
 0x15a   : > { %2397 = vst.msk [vmem:[#allocation3 + $0x58] sm:$0xff] %vm2385_vm15, %v2360_v7 }
 0x15c   : > { %v3258_v12 = vpop.permute.xlu0 %3257 }
 0x15d   : > { %v2649_v13 = vpop.permute.xlu1 %2648  ;;  %3296 = vst.msk [vmem:[#allocation3 + $0x50] sm:$0xff] %vm3285_vm6, %v3258_v12 }
 0x15e   : > { %2686 = vst.msk [vmem:[#allocation3 + $0x58] sm:$0xff] %vm2674_vm2, %v2649_v13 }
 0x160   : > { %v3547_v25 = vpop.permute.xlu0 %3546 }
 0x161   : > { %v2827_v14 = vpop.permute.xlu1 %2826  ;;  %3585 = vst.msk [vmem:[#allocation3 + $0x50] sm:$0xff] %vm6061_vm7, %v3547_v25  ;;  %vm6068_vm7 = vmmov %vm6052_vm1 }
 0x162   : > { %2864 = vst.msk [vmem:[#allocation3 + $0x58] sm:$0xff] %vm2852_vm4, %v2827_v14 }
 0x164   : > { %v3549_v17 = vpop.permute.xlu0 %3548 }
 0x165   : > { %v3260_v18 = vpop.permute.xlu1 %3259 }
 0x166   : > { %3297 = vst.msk [vmem:[#allocation3 + $0x58] sm:$0xff] %vm3285_vm6, %v3260_v18 }
 0x167   : > { %3586 = vst.msk [vmem:[#allocation3 + $0x58] sm:$0xff] %vm6062_vm8, %v3549_v17  ;;  %vm6069_vm8 = vmmov %vm6064_vm5 }
 0x168   : > { %v3601_v19 = vld [vmem:[#allocation3 + $0x50] sm:$0xff]  ;;  %v1752_v20 = vpop.permute.xlu0 %1751 }
 0x169   : > { %4706 = vmatprep.mubr.msk.bf16.mxu1 %vm3627_vm13, %v3601_v19  ;;  %v1462_v21 = vpop.permute.xlu1 %1461 }
 0x16a   : > { %1498 = vst.msk [vmem:[#allocation3 + $0x60] sm:$0xff] %vm1485_vm12, %v1462_v21 }
 0x16b   : > { %1788 = vst.msk [vmem:[#allocation3 + $0x60] sm:$0xff] %vm6063_vm3, %v1752_v20  ;;  %vm6070_vm3 = vmmov %vm6052_vm1 }
 0x16c   : > { %v1929_v24 = vpop.permute.xlu0 %1928 }
 0x16d   : > { %v1464_v32 = vpop.permute.xlu1 %1463  ;;  %1965 = vst.msk [vmem:[#allocation3 + $0x60] sm:$0xff] %vm6064_vm5, %v1929_v24 }
 0x16e   : > { %1499 = vst.msk [vmem:[#allocation3 + $0x68] sm:$0xff] %vm1485_vm12, %v1464_v32  ;;  %v3602_v26 = vld [vmem:[#allocation3 + $0x58] sm:$0xff] }
 0x16f   : > { %4707 = vmatmul.mubr.msk.bf16.gmra.mrb[4].mxu1 %vm3627_vm13, %v3602_v26 }
 0x170   : > { %v2362_v28 = vpop.permute.xlu0 %2361 }
 0x171   : > { %v1754_v4 = vpop.permute.xlu1 %1753  ;;  %2398 = vst.msk [vmem:[#allocation3 + $0x60] sm:$0xff] %vm2385_vm15, %v2362_v28 }
 0x172   : > { %1789 = vst.msk [vmem:[#allocation3 + $0x68] sm:$0xff] %vm6052_vm1, %v1754_v4 }
 0x174   : > { %v2651_v61 = vpop.permute.xlu0 %2650 }
 0x175   : > { %v1931_v29 = vpop.permute.xlu1 %1930  ;;  %2687 = vst.msk [vmem:[#allocation3 + $0x60] sm:$0xff] %vm2674_vm2, %v2651_v61 }
 0x176   : > { %1966 = vst.msk [vmem:[#allocation3 + $0x68] sm:$0xff] %vm6065_vm10, %v1931_v29 }
 0x178   : > { %v2829_v11 = vpop.permute.xlu0 %2828 }
 0x179   : > { %2865 = vst.msk [vmem:[#allocation3 + $0x60] sm:$0xff] %vm2852_vm4, %v2829_v11  ;;  %v2364_v15 = vpop.permute.xlu1 %2363 }
 0x17a   : > { %2399 = vst.msk [vmem:[#allocation3 + $0x68] sm:$0xff] %vm2385_vm15, %v2364_v15 }
 0x17c   : > { %v3262_v33 = vpop.permute.xlu0 %3261 }
 0x17d   : > { %v2653_v39 = vpop.permute.xlu1 %2652  ;;  %3298 = vst.msk [vmem:[#allocation3 + $0x60] sm:$0xff] %vm3285_vm6, %v3262_v33 }
 0x17e   : > { %2688 = vst.msk [vmem:[#allocation3 + $0x68] sm:$0xff] %vm2674_vm2, %v2653_v39 }
 0x180   : > { %v3551_v42 = vpop.permute.xlu0 %3550 }
 0x181   : > { %3587 = vst.msk [vmem:[#allocation3 + $0x60] sm:$0xff] %vm6066_vm9, %v3551_v42  ;;  %v2831_v45 = vpop.permute.xlu1 %2830 }
 0x182   : > { %2866 = vst.msk [vmem:[#allocation3 + $0x68] sm:$0xff] %vm2852_vm4, %v2831_v45 }
 0x188   : > { %v3603_v44 = vld [vmem:[#allocation3 + $0x60] sm:$0xff] }
 0x189   : > { %4710 = vmatprep.mubr.msk.bf16.mxu1 %vm3627_vm13, %v3603_v44 }
 0x193   : > { %v3553_v6 = vpop.permute.xlu0 %3552 }
 0x194   : > { %v3264_v36 = vpop.permute.xlu1 %3263 }
 0x195   : > { %3299 = vst.msk [vmem:[#allocation3 + $0x68] sm:$0xff] %vm3285_vm6, %v3264_v36 }
 0x196   : > { %3588 = vst.msk [vmem:[#allocation3 + $0x68] sm:$0xff] %vm6067_vm14, %v3553_v6 }
 0x197   : > { %v4688_v37 = vpop.f32.mrb[0].mxu0  ;;  %v1756_v22 = vpop.permute.xlu0 %1755 }
 0x198   : > { %v4631_v31 = vpack.c.bf16 %v4688_v37, %v4688_v37  ;;  %v3714_v41 = vpop.f32.mrb[1].mxu0  ;;  %v4074_v49 = vmul.f32 %v4688_v37, %v4688_v37  ;;  %v4004_v30 = vsel %vm1051_vm11, %v4688_v37, 0.0  ;;  %v1466_v58 = vpop.permute.xlu1 %1465 }
 0x199   : > { %v4629_v23 = vpack.c.bf16 %v3714_v41, %v3714_v41  ;;  %v4072_v34 = vmul.f32 %v3714_v41, %v3714_v41  ;;  %v4689_v46 = vpop.f32.mrb[2].mxu0  ;;  %v4001_v52 = vsel %vm1051_vm11, %v3714_v41, 0.0  ;;  %1500 = vst.msk [vmem:[#allocation3 + $0x70] sm:$0xff] %vm1485_vm12, %v1466_v58 }
 0x19a   : > { %3971 = vst.msk [vmem:[%s5864_s14 + $0x8] sm:$0xf] %vm269_vm0, %v4631_v31  ;;  %v4632_v50 = vpack.c.bf16 %v4689_v46, %v4689_v46  ;;  %v3717_v51 = vpop.f32.mrb[3].mxu0  ;;  %v4075_v59 = vmul.f32 %v4689_v46, %v4689_v46  ;;  %v4107_v3 = vsel %vm1051_vm11, %v4074_v49, 0.0  ;;  %v4006_v27 = vsel %vm1051_vm11, %v4689_v46, 0.0 }
 0x19b   : > { %3969 = vst.msk [vmem:[%s5864_s14] sm:$0xf] %vm269_vm0, %v4629_v23  ;;  %v4630_v55 = vpack.c.bf16 %v3717_v51, %v3717_v51  ;;  %v4002_v56 = vsel %vm1051_vm11, %v3717_v51, 0.0  ;;  %v4073_v9 = vmul.f32 %v3717_v51, %v3717_v51  ;;  %v4104_v57 = vsel %vm1051_vm11, %v4072_v34, 0.0  ;;  %v1933_v10 = vpop.permute.xlu0 %1932 }
 0x19c   : > { %3972 = vst.msk [vmem:[%s5864_s14 + $0xc] sm:$0xf] %vm269_vm0, %v4632_v50  ;;  %v4003_v47 = vadd.f32 %v4002_v56, %v4001_v52  ;;  %v4109_v38 = vsel %vm1051_vm11, %v4075_v59, 0.0  ;;  %v1468_v48 = vpop.permute.xlu1 %1467 }
 0x19d   : > { %3970 = vst.msk [vmem:[%s5864_s14 + $0x4] sm:$0xf] %vm269_vm0, %v4630_v55  ;;  %v4105_v40 = vsel %vm1051_vm11, %v4073_v9, 0.0  ;;  %v3604_v62 = vld [vmem:[#allocation3 + $0x68] sm:$0xff] }
 0x19e   : > { %v4005_v43 = vadd.f32 %v4004_v30, %v4003_v47  ;;  %v4106_v60 = vadd.f32 %v4105_v40, %v4104_v57  ;;  %1790 = vst.msk [vmem:[#allocation3 + $0x70] sm:$0xff] %vm6068_vm7, %v1756_v22  ;;  %4711 = vmatmul.mubr.msk.bf16.gmra.mrb[8].mxu1 %vm3627_vm13, %v3604_v62 }
 0x19f   : > { %1967 = vst.msk [vmem:[#allocation3 + $0x70] sm:$0xff] %vm6069_vm8, %v1933_v10  ;;  %v2366_v0 = vpop.permute.xlu0 %2365 }
 0x1a0   : > { %v4108_v35 = vadd.f32 %v4107_v3, %v4106_v60  ;;  %v4007_v16 = vadd.f32 %v4006_v27, %v4005_v43  ;;  %1501 = vst.msk [vmem:[#allocation3 + $0x78] sm:$0xff] %vm1485_vm12, %v1468_v48  ;;  %v1758_v63 = vpop.permute.xlu1 %1757  ;;  %vm6071_vm12 = vmmov %vm6066_vm9 }
 0x1a1   : > { %2400 = vst.msk [vmem:[#allocation3 + $0x70] sm:$0xff] %vm2385_vm15, %v2366_v0 }
 0x1a2   : > { %v4110_v53 = vadd.f32 %v4109_v38, %v4108_v35  ;;  %1791 = vst.msk [vmem:[#allocation3 + $0x78] sm:$0xff] %vm6070_vm3, %v1758_v63 }
 0x1a3   : > { %v2655_v1 = vpop.permute.xlu0 %2654 }
 0x1a4   : > { %v1935_v2 = vpop.permute.xlu1 %1934  ;;  %2689 = vst.msk [vmem:[#allocation3 + $0x70] sm:$0xff] %vm2674_vm2, %v2655_v1 }
 0x1a5   : > { %1968 = vst.msk [vmem:[#allocation3 + $0x78] sm:$0xff] %vm6064_vm5, %v1935_v2 }
 0x1a7   : > { %v2833_v5 = vpop.permute.xlu0 %2832 }
 0x1a8   : > { %v2368_v8 = vpop.permute.xlu1 %2367  ;;  %2867 = vst.msk [vmem:[#allocation3 + $0x70] sm:$0xff] %vm2852_vm4, %v2833_v5 }
 0x1a9   : > { %2401 = vst.msk [vmem:[#allocation3 + $0x78] sm:$0xff] %vm2385_vm15, %v2368_v8  ;;  %vm6072_vm15 = vmmov %vm6066_vm9 }
 0x1ab   : > { %v3266_v54 = vpop.permute.xlu0 %3265 }
 0x1ac   : > { %v2657_v12 = vpop.permute.xlu1 %2656  ;;  %3300 = vst.msk [vmem:[#allocation3 + $0x70] sm:$0xff] %vm3285_vm6, %v3266_v54 }
 0x1ad   : > { %2690 = vst.msk [vmem:[#allocation3 + $0x78] sm:$0xff] %vm2674_vm2, %v2657_v12 }
 0x1af   : > { %v3555_v32 = vpop.permute.xlu0 %3554 }
 0x1b0   : > { %v4692_v7 = vpop.f32.mrb[4].mxu0  ;;  %v2835_v61 = vpop.permute.xlu1 %2834  ;;  %3589 = vst.msk [vmem:[#allocation3 + $0x70] sm:$0xff] %vm6071_vm12, %v3555_v32 }
 0x1b1   : > { %v4635_v13 = vpack.c.bf16 %v4692_v7, %v4692_v7  ;;  %v3730_v25 = vpop.f32.mrb[5].mxu0  ;;  %v4078_v29 = vmul.f32 %v4692_v7, %v4692_v7  ;;  %2868 = vst.msk [vmem:[#allocation3 + $0x78] sm:$0xff] %vm2852_vm4, %v2835_v61  ;;  %v4012_v39 = vsel %vm1051_vm11, %v4692_v7, 0.0 }
 0x1b2   : > { %v4633_v14 = vpack.c.bf16 %v3730_v25, %v3730_v25  ;;  %v4008_v17 = vsel %vm1051_vm11, %v3730_v25, 0.0  ;;  %v4076_v18 = vmul.f32 %v3730_v25, %v3730_v25  ;;  %v4693_v19 = vpop.f32.mrb[6].mxu0 }
 0x1b3   : > { %3975 = vst.msk [vmem:[%s5864_s14 + $0x18] sm:$0xf] %vm269_vm0, %v4635_v13  ;;  %v4009_v20 = vadd.f32 %v4008_v17, %v4007_v16  ;;  %v4636_v21 = vpack.c.bf16 %v4693_v19, %v4693_v19  ;;  %v3733_v24 = vpop.f32.mrb[7].mxu0  ;;  %v4079_v42 = vmul.f32 %v4693_v19, %v4693_v19  ;;  %v4014_v37 = vsel %vm1051_vm11, %v4693_v19, 0.0 }
 0x1b4   : > { %3973 = vst.msk [vmem:[%s5864_s14 + $0x10] sm:$0xf] %vm269_vm0, %v4633_v14  ;;  %v4111_v26 = vsel %vm1051_vm11, %v4076_v18, 0.0  ;;  %v4634_v28 = vpack.c.bf16 %v3733_v24, %v3733_v24  ;;  %v4010_v4 = vsel %vm1051_vm11, %v3733_v24, 0.0  ;;  %v4077_v33 = vmul.f32 %v3733_v24, %v3733_v24  ;;  %v3268_v41 = vpop.permute.xlu1 %3267 }
 0x1b5   : > { %v4112_v11 = vadd.f32 %v4111_v26, %v4110_v53  ;;  %3976 = vst.msk [vmem:[%s5864_s14 + $0x1c] sm:$0xf] %vm269_vm0, %v4636_v21  ;;  %v4011_v15 = vadd.f32 %v4010_v4, %v4009_v20  ;;  %v4115_v6 = vsel %vm1051_vm11, %v4078_v29, 0.0  ;;  %v4117_v46 = vsel %vm1051_vm11, %v4079_v42, 0.0 }
 0x1b6   : > { %3974 = vst.msk [vmem:[%s5864_s14 + $0x14] sm:$0xf] %vm269_vm0, %v4634_v28  ;;  %v4113_v44 = vsel %vm1051_vm11, %v4077_v33, 0.0 }
 0x1b7   : > { %v4013_v45 = vadd.f32 %v4012_v39, %v4011_v15  ;;  %v4114_v31 = vadd.f32 %v4113_v44, %v4112_v11  ;;  %3301 = vst.msk [vmem:[#allocation3 + $0x78] sm:$0xff] %vm3285_vm6, %v3268_v41  ;;  %v3605_v36 = vld [vmem:[#allocation3 + $0x70] sm:$0xff] }
 0x1b8   : > { %v3557_v50 = vpop.permute.xlu1 %3556  ;;  %4714 = vmatprep.mubr.msk.bf16.mxu1 %vm3627_vm13, %v3605_v36 }
 0x1b9   : > { %v4015_v23 = vadd.f32 %v4014_v37, %v4013_v45  ;;  %v4116_v34 = vadd.f32 %v4115_v6, %v4114_v31  ;;  %3590 = vst.msk [vmem:[#allocation3 + $0x78] sm:$0xff] %vm6072_vm15, %v3557_v50 }
 0x1bb   : > { %v4118_v49 = vadd.f32 %v4117_v46, %v4116_v34 }
 0x1c0   : > { %v3606_v51 = vld [vmem:[#allocation3 + $0x78] sm:$0xff] }
 0x1c1   : > { %4715 = vmatmul.mubr.msk.bf16.gmra.mrb[12].mxu1 %vm3627_vm13, %v3606_v51 }
 0x1d0   : > { %v4696_v52 = vpop.f32.mrb[8].mxu0 }
 0x1d1   : > { %v4639_v55 = vpack.c.bf16 %v4696_v52, %v4696_v52  ;;  %v3746_v56 = vpop.f32.mrb[9].mxu0  ;;  %v4082_v3 = vmul.f32 %v4696_v52, %v4696_v52  ;;  %v4020_v10 = vsel %vm1051_vm11, %v4696_v52, 0.0 }
 0x1d2   : > { %v4637_v9 = vpack.c.bf16 %v3746_v56, %v3746_v56  ;;  %v4016_v47 = vsel %vm1051_vm11, %v3746_v56, 0.0  ;;  %v4080_v22 = vmul.f32 %v3746_v56, %v3746_v56  ;;  %v4697_v30 = vpop.f32.mrb[10].mxu0 }
 0x1d3   : > { %3979 = vst.msk [vmem:[%s5864_s14 + $0x28] sm:$0xf] %vm269_vm0, %v4639_v55  ;;  %v4017_v57 = vadd.f32 %v4016_v47, %v4015_v23  ;;  %v4640_v59 = vpack.c.bf16 %v4697_v30, %v4697_v30  ;;  %v3749_v40 = vpop.f32.mrb[11].mxu0  ;;  %v4083_v38 = vmul.f32 %v4697_v30, %v4697_v30  ;;  %v4022_v62 = vsel %vm1051_vm11, %v4697_v30, 0.0 }
 0x1d4   : > { %3977 = vst.msk [vmem:[%s5864_s14 + $0x20] sm:$0xf] %vm269_vm0, %v4637_v9  ;;  %v4119_v58 = vsel %vm1051_vm11, %v4080_v22, 0.0  ;;  %v4638_v43 = vpack.c.bf16 %v3749_v40, %v3749_v40  ;;  %v4018_v60 = vsel %vm1051_vm11, %v3749_v40, 0.0  ;;  %v4081_v16 = vmul.f32 %v3749_v40, %v3749_v40 }
 0x1d5   : > { %v4120_v27 = vadd.f32 %v4119_v58, %v4118_v49  ;;  %3980 = vst.msk [vmem:[%s5864_s14 + $0x2c] sm:$0xf] %vm269_vm0, %v4640_v59  ;;  %v4019_v35 = vadd.f32 %v4018_v60, %v4017_v57  ;;  %v4123_v63 = vsel %vm1051_vm11, %v4082_v3, 0.0  ;;  %v4125_v5 = vsel %vm1051_vm11, %v4083_v38, 0.0 }
 0x1d6   : > { %3978 = vst.msk [vmem:[%s5864_s14 + $0x24] sm:$0xf] %vm269_vm0, %v4638_v43  ;;  %v4121_v53 = vsel %vm1051_vm11, %v4081_v16, 0.0 }
 0x1d7   : > { %v4021_v48 = vadd.f32 %v4020_v10, %v4019_v35  ;;  %v4122_v0 = vadd.f32 %v4121_v53, %v4120_v27 }
 0x1d9   : > { %v4023_v1 = vadd.f32 %v4022_v62, %v4021_v48  ;;  %v4124_v2 = vadd.f32 %v4123_v63, %v4122_v0 }
 0x1db   : > { %v4126_v8 = vadd.f32 %v4125_v5, %v4124_v2 }
 0x1fe   : > { %v4700_v54 = vpop.f32.mrb[12].mxu0 }
 0x1ff   : > { %v4643_v7 = vpack.c.bf16 %v4700_v54, %v4700_v54  ;;  %v3762_v12 = vpop.f32.mrb[13].mxu0  ;;  %v4086_v26 = vmul.f32 %v4700_v54, %v4700_v54  ;;  %v4028_v29 = vsel %vm1051_vm11, %v4700_v54, 0.0 }
 0x200   : > { %v4641_v13 = vpack.c.bf16 %v3762_v12, %v3762_v12  ;;  %v4024_v25 = vsel %vm1051_vm11, %v3762_v12, 0.0  ;;  %v4084_v14 = vmul.f32 %v3762_v12, %v3762_v12  ;;  %v4701_v17 = vpop.f32.mrb[14].mxu0 }
 0x201   : > { %3983 = vst.msk [vmem:[%s5864_s14 + $0x38] sm:$0xf] %vm269_vm0, %v4643_v7  ;;  %v4025_v18 = vadd.f32 %v4024_v25, %v4023_v1  ;;  %v4644_v19 = vpack.c.bf16 %v4701_v17, %v4701_v17  ;;  %v3765_v20 = vpop.f32.mrb[15].mxu0  ;;  %v4087_v11 = vmul.f32 %v4701_v17, %v4701_v17  ;;  %v4030_v39 = vsel %vm1051_vm11, %v4701_v17, 0.0 }
 0x202   : > { %3981 = vst.msk [vmem:[%s5864_s14 + $0x30] sm:$0xf] %vm269_vm0, %v4641_v13  ;;  %v4127_v21 = vsel %vm1051_vm11, %v4084_v14, 0.0  ;;  %v4642_v24 = vpack.c.bf16 %v3765_v20, %v3765_v20  ;;  %v4026_v32 = vsel %vm1051_vm11, %v3765_v20, 0.0  ;;  %v4085_v61 = vmul.f32 %v3765_v20, %v3765_v20 }
 0x203   : > { %v4128_v28 = vadd.f32 %v4127_v21, %v4126_v8  ;;  %3984 = vst.msk [vmem:[%s5864_s14 + $0x3c] sm:$0xf] %vm269_vm0, %v4644_v19  ;;  %v4027_v4 = vadd.f32 %v4026_v32, %v4025_v18  ;;  %v4131_v45 = vsel %vm1051_vm11, %v4086_v26, 0.0  ;;  %v4133_v31 = vsel %vm1051_vm11, %v4087_v11, 0.0 }
 0x204   : > { %3982 = vst.msk [vmem:[%s5864_s14 + $0x34] sm:$0xf] %vm269_vm0, %v4642_v24  ;;  %v4129_v33 = vsel %vm1051_vm11, %v4085_v61, 0.0 }
 0x205   : > { %v4029_v15 = vadd.f32 %v4028_v29, %v4027_v4  ;;  %v4130_v42 = vadd.f32 %v4129_v33, %v4128_v28 }
 0x207   : > { %v4031_v44 = vadd.f32 %v4030_v39, %v4029_v15  ;;  %v4132_v37 = vadd.f32 %v4131_v45, %v4130_v42 }
 0x209   : > { %v4134_v41 = vadd.f32 %v4133_v31, %v4132_v37 }
 0x221   : > { %v4704_v6 = vpop.f32.mrb[0].mxu1 }
 0x222   : > { %v4647_v23 = vpack.c.bf16 %v4704_v6, %v4704_v6  ;;  %v3778_v34 = vpop.f32.mrb[1].mxu1  ;;  %v4090_v22 = vmul.f32 %v4704_v6, %v4704_v6  ;;  %v4036_v40 = vsel %vm1051_vm11, %v4704_v6, 0.0 }
 0x223   : > { %v4645_v46 = vpack.c.bf16 %v3778_v34, %v3778_v34  ;;  %v4032_v36 = vsel %vm1051_vm11, %v3778_v34, 0.0  ;;  %v4088_v49 = vmul.f32 %v3778_v34, %v3778_v34  ;;  %v4705_v50 = vpop.f32.mrb[2].mxu1 }
 0x224   : > { %3987 = vst.msk [vmem:[%s5864_s14 + $0x48] sm:$0xf] %vm269_vm0, %v4647_v23  ;;  %v4033_v51 = vadd.f32 %v4032_v36, %v4031_v44  ;;  %v4648_v52 = vpack.c.bf16 %v4705_v50, %v4705_v50  ;;  %v3781_v55 = vpop.f32.mrb[3].mxu1  ;;  %v4091_v58 = vmul.f32 %v4705_v50, %v4705_v50  ;;  %v4038_v3 = vsel %vm1051_vm11, %v4705_v50, 0.0 }
 0x225   : > { %3985 = vst.msk [vmem:[%s5864_s14 + $0x40] sm:$0xf] %vm269_vm0, %v4645_v46  ;;  %v4135_v56 = vsel %vm1051_vm11, %v4088_v49, 0.0  ;;  %v4646_v9 = vpack.c.bf16 %v3781_v55, %v3781_v55  ;;  %v4034_v47 = vsel %vm1051_vm11, %v3781_v55, 0.0  ;;  %v4089_v59 = vmul.f32 %v3781_v55, %v3781_v55 }
 0x226   : > { %v4136_v30 = vadd.f32 %v4135_v56, %v4134_v41  ;;  %3988 = vst.msk [vmem:[%s5864_s14 + $0x4c] sm:$0xf] %vm269_vm0, %v4648_v52  ;;  %v4035_v57 = vadd.f32 %v4034_v47, %v4033_v51  ;;  %v4139_v35 = vsel %vm1051_vm11, %v4090_v22, 0.0  ;;  %v4141_v38 = vsel %vm1051_vm11, %v4091_v58, 0.0 }
 0x227   : > { %3986 = vst.msk [vmem:[%s5864_s14 + $0x44] sm:$0xf] %vm269_vm0, %v4646_v9  ;;  %v4137_v60 = vsel %vm1051_vm11, %v4089_v59, 0.0 }
 0x228   : > { %v4037_v43 = vadd.f32 %v4036_v40, %v4035_v57  ;;  %v4138_v27 = vadd.f32 %v4137_v60, %v4136_v30 }
 0x22a   : > { %v4039_v16 = vadd.f32 %v4038_v3, %v4037_v43  ;;  %v4140_v10 = vadd.f32 %v4139_v35, %v4138_v27 }
 0x22c   : > { %v4142_v48 = vadd.f32 %v4141_v38, %v4140_v10 }
 0x242   : > { %v4708_v53 = vpop.f32.mrb[4].mxu1 }
 0x243   : > { %v4651_v62 = vpack.c.bf16 %v4708_v53, %v4708_v53  ;;  %v3794_v0 = vpop.f32.mrb[5].mxu1  ;;  %v4094_v14 = vmul.f32 %v4708_v53, %v4708_v53  ;;  %v4044_v20 = vsel %vm1051_vm11, %v4708_v53, 0.0 }
 0x244   : > { %v4649_v63 = vpack.c.bf16 %v3794_v0, %v3794_v0  ;;  %v4040_v1 = vsel %vm1051_vm11, %v3794_v0, 0.0  ;;  %v4092_v2 = vmul.f32 %v3794_v0, %v3794_v0  ;;  %v4709_v5 = vpop.f32.mrb[6].mxu1 }
 0x245   : > { %3991 = vst.msk [vmem:[%s5864_s14 + $0x58] sm:$0xf] %vm269_vm0, %v4651_v62  ;;  %v4041_v8 = vadd.f32 %v4040_v1, %v4039_v16  ;;  %v4652_v54 = vpack.c.bf16 %v4709_v5, %v4709_v5  ;;  %v3797_v7 = vpop.f32.mrb[7].mxu1  ;;  %v4095_v21 = vmul.f32 %v4709_v5, %v4709_v5  ;;  %v4046_v26 = vsel %vm1051_vm11, %v4709_v5, 0.0 }
 0x246   : > { %3989 = vst.msk [vmem:[%s5864_s14 + $0x50] sm:$0xf] %vm269_vm0, %v4649_v63  ;;  %v4143_v12 = vsel %vm1051_vm11, %v4092_v2, 0.0  ;;  %v4650_v13 = vpack.c.bf16 %v3797_v7, %v3797_v7  ;;  %v4042_v25 = vsel %vm1051_vm11, %v3797_v7, 0.0  ;;  %v4093_v19 = vmul.f32 %v3797_v7, %v3797_v7 }
 0x247   : > { %v4144_v17 = vadd.f32 %v4143_v12, %v4142_v48  ;;  %3992 = vst.msk [vmem:[%s5864_s14 + $0x5c] sm:$0xf] %vm269_vm0, %v4652_v54  ;;  %v4043_v18 = vadd.f32 %v4042_v25, %v4041_v8  ;;  %v4147_v4 = vsel %vm1051_vm11, %v4094_v14, 0.0  ;;  %v4149_v11 = vsel %vm1051_vm11, %v4095_v21, 0.0 }
 0x248   : > { %3990 = vst.msk [vmem:[%s5864_s14 + $0x54] sm:$0xf] %vm269_vm0, %v4650_v13  ;;  %v4145_v32 = vsel %vm1051_vm11, %v4093_v19, 0.0 }
 0x249   : > { %v4045_v24 = vadd.f32 %v4044_v20, %v4043_v18  ;;  %v4146_v28 = vadd.f32 %v4145_v32, %v4144_v17 }
 0x24b   : > { %v4047_v61 = vadd.f32 %v4046_v26, %v4045_v24  ;;  %v4148_v29 = vadd.f32 %v4147_v4, %v4146_v28 }
 0x24d   : > { %v4150_v15 = vadd.f32 %v4149_v11, %v4148_v29 }
 0x271   : > { %v4712_v33 = vpop.f32.mrb[8].mxu1 }
 0x272   : > { %v4655_v39 = vpack.c.bf16 %v4712_v33, %v4712_v33  ;;  %v3810_v42 = vpop.f32.mrb[9].mxu1  ;;  %v4098_v49 = vmul.f32 %v4712_v33, %v4712_v33  ;;  %v4052_v55 = vsel %vm1051_vm11, %v4712_v33, 0.0 }
 0x273   : > { %v4653_v45 = vpack.c.bf16 %v3810_v42, %v3810_v42  ;;  %v4048_v44 = vsel %vm1051_vm11, %v3810_v42, 0.0  ;;  %v4096_v37 = vmul.f32 %v3810_v42, %v3810_v42  ;;  %v4713_v31 = vpop.f32.mrb[10].mxu1 }
 0x274   : > { %3995 = vst.msk [vmem:[%s5864_s14 + $0x68] sm:$0xf] %vm269_vm0, %v4655_v39  ;;  %v4049_v41 = vadd.f32 %v4048_v44, %v4047_v61  ;;  %v4656_v6 = vpack.c.bf16 %v4713_v31, %v4713_v31  ;;  %v3813_v23 = vpop.f32.mrb[11].mxu1  ;;  %v4099_v56 = vmul.f32 %v4713_v31, %v4713_v31  ;;  %v4054_v22 = vsel %vm1051_vm11, %v4713_v31, 0.0 }
 0x275   : > { %3993 = vst.msk [vmem:[%s5864_s14 + $0x60] sm:$0xf] %vm269_vm0, %v4653_v45  ;;  %v4151_v34 = vsel %vm1051_vm11, %v4096_v37, 0.0  ;;  %v4654_v46 = vpack.c.bf16 %v3813_v23, %v3813_v23  ;;  %v4050_v36 = vsel %vm1051_vm11, %v3813_v23, 0.0  ;;  %v4097_v52 = vmul.f32 %v3813_v23, %v3813_v23 }
 0x276   : > { %v4152_v50 = vadd.f32 %v4151_v34, %v4150_v15  ;;  %3996 = vst.msk [vmem:[%s5864_s14 + $0x6c] sm:$0xf] %vm269_vm0, %v4656_v6  ;;  %v4051_v51 = vadd.f32 %v4050_v36, %v4049_v41  ;;  %v4155_v57 = vsel %vm1051_vm11, %v4098_v49, 0.0  ;;  %v4157_v58 = vsel %vm1051_vm11, %v4099_v56, 0.0 }
 0x277   : > { %3994 = vst.msk [vmem:[%s5864_s14 + $0x64] sm:$0xf] %vm269_vm0, %v4654_v46  ;;  %v4153_v47 = vsel %vm1051_vm11, %v4097_v52, 0.0 }
 0x278   : > { %v4053_v9 = vadd.f32 %v4052_v55, %v4051_v51  ;;  %v4154_v30 = vadd.f32 %v4153_v47, %v4152_v50 }
 0x27a   : > { %v4055_v59 = vadd.f32 %v4054_v22, %v4053_v9  ;;  %v4156_v40 = vadd.f32 %v4155_v57, %v4154_v30 }
 0x27c   : > { %v4158_v43 = vadd.f32 %v4157_v58, %v4156_v40 }
 0x294   : > { %v4716_v60 = vpop.f32.mrb[12].mxu1 }
 0x295   : > { %v4659_v3 = vpack.c.bf16 %v4716_v60, %v4716_v60  ;;  %v3826_v27 = vpop.f32.mrb[13].mxu1  ;;  %v4102_v2 = vmul.f32 %v4716_v60, %v4716_v60  ;;  %v4060_v7 = vsel %vm1051_vm11, %v4716_v60, 0.0 }
 0x296   : > { %v4657_v35 = vpack.c.bf16 %v3826_v27, %v3826_v27  ;;  %v4056_v16 = vsel %vm1051_vm11, %v3826_v27, 0.0  ;;  %v4100_v10 = vmul.f32 %v3826_v27, %v3826_v27  ;;  %v4717_v38 = vpop.f32.mrb[14].mxu1 }
 0x297   : > { %3999 = vst.msk [vmem:[%s5864_s14 + $0x78] sm:$0xf] %vm269_vm0, %v4659_v3  ;;  %v4057_v48 = vadd.f32 %v4056_v16, %v4055_v59  ;;  %v4660_v53 = vpack.c.bf16 %v4717_v38, %v4717_v38  ;;  %v3829_v62 = vpop.f32.mrb[15].mxu1  ;;  %v4103_v12 = vmul.f32 %v4717_v38, %v4717_v38  ;;  %v4062_v14 = vsel %vm1051_vm11, %v4717_v38, 0.0 }
 0x298   : > { %3997 = vst.msk [vmem:[%s5864_s14 + $0x70] sm:$0xf] %vm269_vm0, %v4657_v35  ;;  %v4159_v0 = vsel %vm1051_vm11, %v4100_v10, 0.0  ;;  %v4658_v63 = vpack.c.bf16 %v3829_v62, %v3829_v62  ;;  %v4058_v1 = vsel %vm1051_vm11, %v3829_v62, 0.0  ;;  %v4101_v54 = vmul.f32 %v3829_v62, %v3829_v62 }
 0x299   : > { %v4160_v5 = vadd.f32 %v4159_v0, %v4158_v43  ;;  %4000 = vst.msk [vmem:[%s5864_s14 + $0x7c] sm:$0xf] %vm269_vm0, %v4660_v53  ;;  %v4059_v8 = vadd.f32 %v4058_v1, %v4057_v48  ;;  %v4163_v18 = vsel %vm1051_vm11, %v4102_v2, 0.0  ;;  %v4165_v21 = vsel %vm1051_vm11, %v4103_v12, 0.0 }
 0x29a   : > { %3998 = vst.msk [vmem:[%s5864_s14 + $0x74] sm:$0xf] %vm269_vm0, %v4658_v63  ;;  %v4161_v25 = vsel %vm1051_vm11, %v4101_v54, 0.0  ;;  %vm6073_vm0 = vcmask 24576  }
 0x29b   : > { %v4061_v13 = vadd.f32 %v4060_v7, %v4059_v8  ;;  %v4162_v17 = vadd.f32 %v4161_v25, %v4160_v5  ;;  %vm6074_vm11 = vmmov %vm6073_vm0 }
 0x29d   : > { %v4063_v19 = vadd.f32 %v4062_v14, %v4061_v13  ;;  %v4164_v20 = vadd.f32 %v4163_v18, %v4162_v17 }
 0x29f   : > { %v4064_v24 = vrot.slane %v4063_v19, 4  ;;  %v4166_v32 = vadd.f32 %v4165_v21, %v4164_v20 }
 0x2a1   : > { %v4065_v26 = vadd.f32 %v4064_v24, %v4063_v19  ;;  %v4167_v28 = vrot.slane %v4166_v32, 4 }
 0x2a3   : > { %v4066_v4 = vrot.slane %v4065_v26, 2  ;;  %v4168_v61 = vadd.f32 %v4167_v28, %v4166_v32 }
 0x2a5   : > { %v4067_v29 = vadd.f32 %v4066_v4, %v4065_v26  ;;  %v4169_v11 = vrot.slane %v4168_v61, 2 }
 0x2a7   : > { %v4068_v15 = vrot.slane %v4067_v29, 1  ;;  %v4170_v33 = vadd.f32 %v4169_v11, %v4168_v61 }
 0x2a9   : > { %v4069_v39 = vadd.f32 %v4068_v15, %v4067_v29  ;;  %v4171_v42 = vrot.slane %v4170_v33, 1 }
 0x2ab   : > { %4071 = vst.msk [vmem:[%s235_s3] sm:$0x1] %vm6073_vm0, %v4069_v39  ;;  %v4172_v45 = vadd.f32 %v4171_v42, %v4170_v33 }
 0x2ad   : > { %4173 = vst.msk [vmem:[%s235_s3 + $0x1] sm:$0x1] %vm6074_vm11, %v4172_v45 }
 0x2ae PF: > { %s16_s18 = sadd.s32 1, %s4992_s18  }
 0x2af   : > { %p13_p4 = scmp.ge.s32.totalorder %s16_s18, 4  }
 0x2b1   :  { %15 = sbr.rel (!%p13_p4) target bundleno = 1 (0x1), region = 81 }

// kernel: basic_block_forward_nhwc.4
= control target key start
LH: loop header
LB: loop body
LE: loop exit
PB: predicated region body
PF: predicated region fallthrough
CT: control target
= control target key end

     0   :  { %s5262_s18 = smov 0   ;;  %s6323_s0 = inlined_call_operand.vmem [shape: bf16[2,16,16,4], index: 0, kind: input, shape index: {}]   ;;  %s6324_s1 = inlined_call_operand.vmem [shape: bf16[36,4], index: 1, kind: input, shape index: {}]   ;;  %s6325_s2 = inlined_call_operand.vmem [shape: f32[1,4], index: 2, kind: input, shape index: {}]   ;;  %s6326_s3 = inlined_call_operand.vmem [shape: f32[1,4], index: 3, kind: input, shape index: {}]   ;;  %s6327_s4 = inlined_call_operand.vmem [shape: bf16[2,16,16,4], index: 4, kind: output, shape index: {0}]   ;;  %s6328_s5 = inlined_call_operand.vmem [shape: f32[2,2,4], index: 5, kind: output, shape index: {1}]  }
   0x1 LB: > { %s4402_s19 = sadd.s32 4294967295, %s5221_s18   ;;  %p4406_p0 = scmp.ge.s32.totalorder %s5221_s18, 1  ;;  %s5221_s18 = sphi %s5262_s18, %s16_s18  }
   0x2   : > { %p190_p1 = scmp.lt.s32.totalorder %s5221_s18, 3 }
   0x4   : > { %p191_p2 = pnand %p4406_p0, %p190_p1 }
   0x5   : > { %vm6331_vm0 = vcmask (!%p191_p2), 27648   ;;  %vm6329_vm1 = vcmask (!%p191_p2), 24576   ;;  %vm420_vm2 = vsmask.f32 (!%p191_p2), 256  ;;  %v5223_v0 = vmov (!%p191_p2), 0   ;;  %p222_p3 = scmp.lt.s32.totalorder (!%p191_p2), %s4402_s19, 1 }
   0x6   : > { %194 = sbr.rel (%p191_p2) target bundleno = 695 (0x2b7), region = 36  ;;  %412 = vst.msk [vmem:[#allocation2] sm:$0xf] (!%p191_p2), %vm6331_vm0, %v5223_v0  ;;  %413 = vst.msk [vmem:[#allocation2 + $0x4] sm:$0xf] (!%p191_p2), %vm6331_vm0, %v5223_v0  ;;  %vm1820_vm6 = vcmask (!%p191_p2), 1046528  }
   0x7   : > { %414 = vst.msk [vmem:[#allocation2 + $0x8] sm:$0xf] (!%p191_p2), %vm6331_vm0, %v5223_v0  ;;  %416 = vst.msk [vmem:[#allocation2 + $0xcc] sm:$0xf] (!%p191_p2), %vm6331_vm0, %v5223_v0  ;;  %vm476_vm3 = vsmask.f32 (!%p191_p2), 7938 }
   0x8   : > { %417 = vst.msk [vmem:[#allocation2 + $0xd0] sm:$0xf] (!%p191_p2), %vm6331_vm0, %v5223_v0  ;;  %418 = vst.msk [vmem:[#allocation2 + $0xd4] sm:$0xf] (!%p191_p2), %vm6331_vm0, %v5223_v0  ;;  %v428_v2 = vld [vmem:[#allocation2 + $0x18] sm:$0x1] (!%p191_p2) }
   0x9   : > { %vm5278_vm4 = vmand (!%p191_p2), %vm6329_vm1, %vm420_vm2  ;;  %v425_v3 = vld [vmem:[#allocation2 + $0xc] sm:$0x1] (!%p191_p2)  ;;  %v431_v6 = vld [vmem:[#allocation2 + $0x24] sm:$0x1] (!%p191_p2)  ;;  %vm628_vm7 = vsmask.f32 (!%p191_p2), 4368 }
   0xa   : > { %v429_v4 = vsel (!%p191_p2), %vm5278_vm4, 0, %v428_v2  ;;  %v426_v5 = vsel (!%p191_p2), %vm5278_vm4, 0, %v425_v3  ;;  %vm5290_vm5 = vmand (!%p191_p2), %vm6329_vm1, %vm476_vm3  ;;  %v432_v8 = vsel (!%p191_p2), %vm5278_vm4, 0, %v431_v6  ;;  %v434_v9 = vld [vmem:[#allocation2 + $0x30] sm:$0x1] (!%p191_p2)  ;;  %s5224_s28 = smov (!%p191_p2), 8  }
   0xb   : > { %430 = vst [vmem:[#allocation2 + $0x18] sm:$0x1] (!%p191_p2), %v429_v4  ;;  %427 = vst [vmem:[#allocation2 + $0xc] sm:$0x1] (!%p191_p2), %v426_v5  ;;  %v481_v10 = vld [vmem:[#allocation2 + $0x14] sm:$0x1] (!%p191_p2) }
   0xc   : > { %433 = vst [vmem:[#allocation2 + $0x24] sm:$0x1] (!%p191_p2), %v432_v8  ;;  %v435_v11 = vsel (!%p191_p2), %vm5278_vm4, 0, %v434_v9  ;;  %v482_v12 = vsel (!%p191_p2), %vm5290_vm5, 0, %v481_v10  ;;  %v484_v13 = vld [vmem:[#allocation2 + $0x20] sm:$0x1] (!%p191_p2)  ;;  %vm5350_vm9 = vmand (!%p191_p2), %vm6331_vm0, %vm476_vm3 }
   0xd   : > { %s6472_s19 = smov (!%p222_p3, %s4402_s19), 1  ;;  %436 = vst [vmem:[#allocation2 + $0x30] sm:$0x1] %v435_v11  ;;  %483 = vst [vmem:[#allocation2 + $0x14] sm:$0x1] %v482_v12  ;;  %v485_v14 = vsel %vm5290_vm5, 0, %v484_v13 }
   0xe   : > { %s4739_s20 = sshll.u32 %s6472_s19, 7  ;;  %v478_v15 = vld [vmem:[#allocation2 + $0x8] sm:$0x1]  ;;  %486 = vst [vmem:[#allocation2 + $0x20] sm:$0x1] %v485_v14  ;;  %vm5356_vm10 = vmor %vm420_vm2, %vm628_vm7  ;;  %s5225_s29 = smov 4  }
   0xf   : > { %s5306_s23 = scalar_lea.vmem %s6323_s0, %s4739_s20  ;;  %v479_v16 = vsel %vm5290_vm5, 0, %v478_v15  ;;  %v422_v17 = vld [vmem:[#allocation2] sm:$0x1]  ;;  %v4966_v30 = vld [vmem:[#allocation2] sm:$0xfe]   ;;  %s5226_s30 = smov 12  }
  0x10   : > { %v4869_v18 = vld [vmem:[%s5306_s23 + $0x8] sm:$0xff]   ;;  %v5316_v19 = vld [vmem:[%s6325_s2] ss:$0 sm:$0xff]  ;;  %480 = vst [vmem:[#allocation2 + $0x8] sm:$0x1] %v479_v16  ;;  %v423_v20 = vsel %vm5278_vm4, 0, %v422_v17 }
  0x11   : > { %v4811_v21 = vunpack.c.l.bf16 %v4869_v18  ;;  %v4812_v22 = vunpack.c.h.bf16 %v4869_v18  ;;  %v4806_v23 = vld [vmem:[%s5306_s23] sm:$0xff]   ;;  %v4870_v24 = vld [vmem:[%s5306_s23 + $0x10] sm:$0xff]   ;;  %424 = vst [vmem:[#allocation2] sm:$0x1] %v423_v20  ;;  %v4871_v29 = vld [vmem:[%s5306_s23 + $0x18] sm:$0xff]   ;;  %v1821_v47 = vrot.slane %v4966_v30, 1 }
  0x12   : > { %v5325_v25 = vld [vmem:[%s6326_s3] ss:$0 sm:$0xff]  ;;  %v4807_v26 = vunpack.c.l.bf16 %v4806_v23  ;;  %v4808_v27 = vunpack.c.h.bf16 %v4806_v23  ;;  %v4815_v28 = vunpack.c.l.bf16 %v4870_v24  ;;  %v4816_v33 = vunpack.c.h.bf16 %v4870_v24  ;;  %v960_v10 = vld [vmem:[#allocation2 + $0x18] sm:$0xf]  ;;  %v953_v20 = vld [vmem:[#allocation2 + $0xc] sm:$0xf] }
  0x13   : > { %v310_v31 = vmul.f32 %v4811_v21, %v5316_v19  ;;  %v311_v32 = vmul.f32 %v4812_v22, %v5316_v19  ;;  %v4819_v34 = vunpack.c.l.bf16 %v4871_v29  ;;  %v4820_v38 = vunpack.c.h.bf16 %v4871_v29  ;;  %s5227_s6 = smov 24   ;;  %s5228_s7 = smov 20  }
  0x14   : > { %v308_v35 = vmul.f32 %v4807_v26, %v5316_v19  ;;  %v309_v36 = vmul.f32 %v4808_v27, %v5316_v19  ;;  %v312_v37 = vmul.f32 %v4815_v28, %v5316_v19  ;;  %v313_v41 = vmul.f32 %v4816_v33, %v5316_v19  ;;  %s5229_s8 = smov 32   ;;  %s5230_s9 = smov 16  }
  0x15   : > { %v349_v39 = vadd.f32 %v5325_v25, %v310_v31  ;;  %v350_v40 = vadd.f32 %v5325_v25, %v311_v32  ;;  %v314_v42 = vmul.f32 %v4819_v34, %v5316_v19  ;;  %vm1386_vm8 = vsmask.f32 7424  ;;  %v964_v32 = vld [vmem:[#allocation2 + $0x20] sm:$0x1]  ;;  %s5231_s10 = smov 28  }
  0x16   : > { %v347_v43 = vadd.f32 %v5325_v25, %v308_v35  ;;  %v348_v44 = vadd.f32 %v5325_v25, %v309_v36  ;;  %v351_v45 = vadd.f32 %v5325_v25, %v312_v37  ;;  %v315_v46 = vmul.f32 %v4820_v38, %v5316_v19 }
  0x17   : > { %v381_v48 = vmax.f32 %v349_v39, 0.0  ;;  %v382_v49 = vmax.f32 %v350_v40, 0.0  ;;  %v352_v50 = vadd.f32 %v5325_v25, %v313_v41  ;;  %v4967_v51 = vld [vmem:[#allocation2 + $0x8] ss:$0 sps:$4 sm:$0x11]   ;;  %v5343_v53 = vadd.f32 %v5325_v25, %v314_v42 }
  0x18   : > { %v379_v52 = vmax.f32 %v347_v43, 0.0  ;;  %v4968_v54 = vld [vmem:[#allocation2] sm:$0xff]   ;;  %v380_v57 = vmax.f32 %v348_v44, 0.0  ;;  %v354_v58 = vadd.f32 %v5325_v25, %v315_v46  ;;  %v1822_v59 = vrot.slane %v4967_v51, 1 }
  0x19   : > { %v4743_v55 = vpack.c.bf16 %v381_v48, %v381_v48  ;;  %v4744_v56 = vpack.c.bf16 %v382_v49, %v382_v49  ;;  %v4969_v60 = vld [vmem:[#allocation2 + $0x8] ss:$0 sps:$4 sm:$0x11]   ;;  %v383_v62 = vmax.f32 %v351_v45, 0.0  ;;  %v384_v63 = vmax.f32 %v352_v50, 0.0 }
  0x1a   : > { %v4741_v61 = vpack.c.bf16 %v379_v52, %v379_v52  ;;  %v1388_v0 = vshrl.u32 %v4968_v54, 16  ;;  %v1390_v2 = vshll.u32 %v4968_v54, 16  ;;  %v1823_v5 = vsel %vm1820_vm6, %v1821_v47, %v1822_v59  ;;  %v967_v50 = vld [vmem:[#allocation2 + $0x24] sm:$0xf]  ;;  %v957_v54 = vld [vmem:[#allocation2 + $0x14] sm:$0x1] }
  0x1b   : > { %v648_v3 = vshrl.u32 %v4743_v55, 16  ;;  %v651_v4 = vshll.u32 %v4743_v55, 16  ;;  %v1395_v6 = vshll.u32 %v4969_v60, 16  ;;  %v656_v8 = vshrl.u32 %v4744_v56, 16  ;;  %1869 = vrot.lane.b32.xlu1 %v1823_v5, %s5224_s28 }
  0x1c   : > { %v659_v9 = vshll.u32 %v4744_v56, 16  ;;  %v1392_v11 = vrot.slane %v1390_v2, 1  ;;  %v4742_v13 = vpack.c.bf16 %v380_v57, %v380_v57  ;;  %v631_v14 = vshrl.u32 %v4741_v61, 16 }
  0x1d   : > { %v650_v12 = vrot.slane %v648_v3, 7  ;;  %v1397_v15 = vrot.slane %v1395_v6, 1  ;;  %v658_v16 = vrot.slane %v656_v8, 7  ;;  %v634_v18 = vshll.u32 %v4741_v61, 16  ;;  %v974_v3 = vld [vmem:[#allocation2 + $0x30] sm:$0xf] }
  0x1e   : > { %v4745_v21 = vpack.c.bf16 %v383_v62, %v383_v62  ;;  %v1393_v22 = vor.u32 %v1392_v11, %v1388_v0  ;;  %v633_v27 = vrot.slane %v631_v14, 7  ;;  %v639_v30 = vshrl.u32 %v4742_v13, 16 }
  0x1f   : > { %v653_v24 = vor.u32 %v651_v4, %v650_v12  ;;  %v654_v26 = vrot.slane %v650_v12, 4  ;;  %v661_v28 = vor.u32 %v659_v9, %v658_v16  ;;  %v663_v29 = vrot.slane %v658_v16, 4 }
  0x20   : > { %v642_v31 = vshll.u32 %v4742_v13, 16  ;;  %v1398_v33 = vsel %vm1386_vm8, %v1393_v22, %v1397_v15  ;;  %v636_v35 = vor.u32 %v634_v18, %v633_v27  ;;  %v637_v36 = vrot.slane %v633_v27, 4 }
  0x21   : > { %v961_v34 = vsel %vm5350_vm9, %v653_v24, %v960_v10  ;;  %1579 = vrot.lane.b32.xlu0 %v1398_v33, %s5225_s29  ;;  %v662_v37 = vsel %vm5356_vm10, %v654_v26, %v661_v28  ;;  %v641_v38 = vrot.slane %v639_v30, 7  ;;  %v4746_v39 = vpack.c.bf16 %v384_v63, %v384_v63  ;;  %v487_v63 = vld [vmem:[#allocation2 + $0x2c] sm:$0x1] }
  0x22   : > { %962 = vst [vmem:[#allocation2 + $0x18] sm:$0xf] %v961_v34  ;;  %v665_v40 = vshrl.u32 %v4745_v21, 16  ;;  %963 = vst.msk [vmem:[#allocation2 + $0x1c] sm:$0xf] %vm6331_vm0, %v662_v37  ;;  %v954_v41 = vsel %vm5350_vm9, %v636_v35, %v953_v20  ;;  %v668_v42 = vshll.u32 %v4745_v21, 16  ;;  %v965_v55 = vsel %vm5278_vm4, %v663_v29, %v964_v32 }
  0x23   : > { %v385_v43 = vmax.f32 %v5343_v53, 0.0  ;;  %v386_v44 = vmax.f32 %v354_v58, 0.0  ;;  %v644_v45 = vor.u32 %v642_v31, %v641_v38  ;;  %v646_v46 = vrot.slane %v641_v38, 4  ;;  %955 = vst [vmem:[#allocation2 + $0xc] sm:$0xf] %v954_v41 }
  0x24   : > { %v667_v47 = vrot.slane %v665_v40, 7  ;;  %v673_v48 = vshrl.u32 %v4746_v39, 16  ;;  %v676_v49 = vshll.u32 %v4746_v39, 16  ;;  %966 = vst [vmem:[#allocation2 + $0x20] sm:$0x1] %v965_v55  ;;  %v488_v10 = vsel %vm5290_vm5, 0, %v487_v63 }
  0x25   : > { %v4747_v51 = vpack.c.bf16 %v385_v43, %v385_v43  ;;  %v4748_v52 = vpack.c.bf16 %v386_v44, %v386_v44  ;;  %v645_v56 = vsel %vm5356_vm10, %v637_v36, %v644_v45  ;;  %v958_v4 = vsel %vm5278_vm4, %v646_v46, %v957_v54  ;;  %489 = vst [vmem:[#allocation2 + $0x2c] sm:$0x1] %v488_v10 }
  0x26   : > { %v670_v57 = vor.u32 %v668_v42, %v667_v47  ;;  %v671_v59 = vrot.slane %v667_v47, 4  ;;  %v5374_v53 = vrot.slane %v673_v48, 7  ;;  %956 = vst.msk [vmem:[#allocation2 + $0x10] sm:$0xf] %vm6331_vm0, %v645_v56  ;;  %959 = vst [vmem:[#allocation2 + $0x14] sm:$0x1] %v958_v4 }
  0x27   : > { %v682_v58 = vshrl.u32 %v4747_v51, 16  ;;  %v685_v60 = vshll.u32 %v4747_v51, 16  ;;  %v690_v61 = vshrl.u32 %v4748_v52, 16  ;;  %v693_v62 = vshll.u32 %v4748_v52, 16 }
  0x28   : > { %v678_v0 = vor.u32 %v676_v49, %v5374_v53  ;;  %v968_v2 = vsel %vm5350_vm9, %v670_v57, %v967_v50  ;;  %v680_v11 = vrot.slane %v5374_v53, 4  ;;  %vm6330_vm11 = vcmask 31744  }
  0x29   : > { %969 = vst [vmem:[#allocation2 + $0x24] sm:$0xf] %v968_v2  ;;  %v684_v5 = vrot.slane %v682_v58, 7  ;;  %v5382_v6 = vrot.slane %v690_v61, 7  ;;  %v4970_v8 = vld [vmem:[#allocation2 + $0x18] sm:$0xff]   ;;  %vm1627_vm12 = vcmask 64544  }
  0x2a   : > { %v679_v9 = vsel %vm5356_vm10, %v671_v59, %v678_v0  ;;  %v5391_v15 = vld [vmem:[#allocation2 + $0x18] sm:$0xff]   ;;  %2048 = vrot.lane.b32.xlu1 %v4970_v8, %s5226_s30  ;;  %vm1917_vm13 = vcmask 97344   ;;  %vm2094_vm14 = vcmask 130144   ;;  %vm2527_vm15 = vcmask 162944  }
  0x2b   : > { %970 = vst.msk [vmem:[#allocation2 + $0x28] sm:$0xf] %vm6331_vm0, %v679_v9  ;;  %v687_v12 = vor.u32 %v685_v60, %v684_v5  ;;  %v688_v13 = vrot.slane %v684_v5, 4  ;;  %v695_v14 = vor.u32 %v693_v62, %v5382_v6  ;;  %v4980_v20 = vld [vmem:[#allocation2 + $0x18] sm:$0xfe]   ;;  %v2300_v24 = vshrl.u32 %v5391_v15, 16 }
  0x2c   : > { %v4973_v22 = vld [vmem:[#allocation2 + $0x18] sm:$0xff]   ;;  %v3620_v35 = vrot.slane %v4980_v20, 1  ;;  %v4981_v36 = vld [vmem:[#allocation2 + $0x20] ss:$0 sps:$4 sm:$0x11]   ;;  %v2302_v37 = vshll.u32 %v5391_v15, 16 }
  0x2d   : > { %v696_v16 = vsel %vm5356_vm10, %v688_v13, %v695_v14  ;;  %v975_v18 = vsel %vm5350_vm9, %v687_v12, %v974_v3  ;;  %v4971_v21 = vld [vmem:[#allocation2 + $0xc] sm:$0xff]   ;;  %v4977_v28 = vld [vmem:[#allocation2 + $0x14] ss:$0 sps:$4 sm:$0x11]   ;;  %v3621_v40 = vrot.slane %v4981_v36, 1  ;;  %v5417_v5 = vld [vmem:[%s5306_s23 + $0x20] sm:$0xff]  }
  0x2e   : > { %976 = vst [vmem:[#allocation2 + $0x30] sm:$0xf] %v975_v18  ;;  %977 = vst.msk [vmem:[#allocation2 + $0x34] sm:$0xf] %vm6331_vm0, %v696_v16  ;;  %v4976_v26 = vld [vmem:[#allocation2 + $0xc] sm:$0xfe]   ;;  %2046 = vrot.lane.b32.xlu0 %v4971_v21, %s5226_s30 }
  0x2f   : > { %v4978_v27 = vld [vmem:[#allocation2 + $0xc] sm:$0xfe]   ;;  %v2720_v29 = vrot.slane %v4976_v26, 1  ;;  %v2721_v33 = vrot.slane %v4977_v28, 1  ;;  %v2304_v41 = vrot.slane %v2302_v37, 1  ;;  %v3622_v53 = vsel %vm1820_vm6, %v3620_v35, %v3621_v40  ;;  %v4996_v21 = vld [vmem:[#allocation2 + $0x18] sm:$0xff]  }
  0x30   : > { %v1824_v31 = vrot.slane %v4978_v27, 1  ;;  %v4979_v34 = vld [vmem:[#allocation2 + $0x14] ss:$0 sps:$4 sm:$0x11]   ;;  %v4982_v42 = vld [vmem:[#allocation2 + $0x18] sm:$0xfe]   ;;  %v4823_v28 = vunpack.c.l.bf16 %v5417_v5 }
  0x31   : > { %v1825_v39 = vrot.slane %v4979_v34, 1  ;;  %v4983_v43 = vld [vmem:[#allocation2 + $0x20] ss:$0 sps:$4 sm:$0x11]   ;;  %v2722_v45 = vsel %vm1820_vm6, %v2720_v29, %v2721_v33  ;;  %v971_v46 = vld [vmem:[#allocation2 + $0x2c] sm:$0x1]  ;;  %v2305_v13 = vor.u32 %v2304_v41, %v2300_v24 }
  0x32   : > { %v4972_v30 = vld [vmem:[#allocation2 + $0x24] sm:$0xff]   ;;  %2946 = vrot.lane.b32.xlu0 %v4973_v22, %s5227_s6  ;;  %v2723_v48 = vrot.slane %v4982_v42, 1  ;;  %v2724_v49 = vrot.slane %v4983_v43, 1  ;;  %v972_v50 = vsel %vm5278_vm4, %v680_v11, %v971_v46  ;;  %v4988_v57 = vld [vmem:[#allocation2 + $0x18] sm:$0xfe]   ;;  %v4994_v4 = vld [vmem:[#allocation2 + $0xc] sm:$0xff]   ;;  %v4824_v43 = vunpack.c.h.bf16 %v5417_v5 }
  0x33   : > { %v4975_v32 = vld [vmem:[#allocation2 + $0x24] sm:$0xff]   ;;  %2948 = vrot.lane.b32.xlu1 %v4972_v30, %s5227_s6  ;;  %v1826_v47 = vsel %vm1820_vm6, %v1824_v31, %v1825_v39  ;;  %973 = vst [vmem:[#allocation2 + $0x2c] sm:$0x1] %v972_v50  ;;  %v4989_v59 = vld [vmem:[#allocation2 + $0x20] ss:$0 sps:$4 sm:$0x11]  }
  0x34   : > { %v4992_v44 = vld [vmem:[#allocation2 + $0x24] sm:$0xff]   ;;  %v2725_v58 = vsel %vm1820_vm6, %v2723_v48, %v2724_v49  ;;  %v1827_v60 = vrot.slane %v4988_v57, 1  ;;  %v1828_v61 = vrot.slane %v4989_v59, 1  ;;  %v4991_v62 = vld [vmem:[#allocation2 + $0x20] ss:$0 sps:$4 sm:$0x11]  }
  0x35   : > { %v4974_v38 = vld [vmem:[#allocation2 + $0x30] sm:$0xff]   ;;  %v4984_v51 = vld [vmem:[#allocation2 + $0x24] sm:$0xfe]   ;;  %v3200_v55 = vshrl.u32 %v4992_v44, 16  ;;  %v3202_v63 = vshll.u32 %v4992_v44, 16  ;;  %v2307_v0 = vshll.u32 %v4991_v62, 16 }
  0x36   : > { %2050 = vrot.lane.b32.xlu0 %v4975_v32, %s5226_s30  ;;  %v4986_v52 = vld [vmem:[#allocation2 + $0x24] sm:$0xfe]   ;;  %v3623_v54 = vrot.slane %v4984_v51, 1  ;;  %v4995_v14 = vld [vmem:[#allocation2 + $0x14] ss:$0 sps:$4 sm:$0x11]   ;;  %v1829_v24 = vsel %vm1820_vm6, %v1827_v60, %v1828_v61 }
  0x37   : > { %2052 = vrot.lane.b32.xlu1 %v4974_v38, %s5226_s30  ;;  %v1830_v56 = vrot.slane %v4986_v52, 1  ;;  %v3204_v2 = vrot.slane %v3202_v63, 1  ;;  %v2309_v9 = vrot.slane %v2307_v0, 1  ;;  %v1400_v15 = vshrl.u32 %v4994_v4, 16  ;;  %v4998_v37 = vld [vmem:[#allocation2 + $0xc] sm:$0xff]   ;;  %v5000_v42 = vld [vmem:[#allocation2 + $0x24] sm:$0xff]  }
  0x38   : > { %v1402_v16 = vshll.u32 %v4994_v4, 16  ;;  %v1407_v27 = vshll.u32 %v4995_v14, 16  ;;  %v4997_v30 = vld [vmem:[#allocation2 + $0x20] ss:$0 sps:$4 sm:$0x11]   ;;  %v1412_v31 = vshrl.u32 %v4996_v21, 16 }
  0x39   : > { %v1414_v32 = vshll.u32 %v4996_v21, 16  ;;  %v2310_v33 = vsel %vm1386_vm8, %v2305_v13, %v2309_v9  ;;  %v3205_v34 = vor.u32 %v3204_v2, %v3200_v55  ;;  %v5427_v38 = vld [vmem:[%s5306_s23 + $0x28] sm:$0xff]   ;;  %v1419_v40 = vshll.u32 %v4997_v30, 16  ;;  %v4999_v41 = vld [vmem:[#allocation2 + $0x14] ss:$0 sps:$4 sm:$0x11]  }
  0x3a   : > { %2768 = vrot.lane.b32.xlu0 %v2722_v45, %s5228_s7  ;;  %v4985_v3 = vld [vmem:[#allocation2 + $0x2c] ss:$0 sps:$4 sm:$0x11]   ;;  %v1404_v26 = vrot.slane %v1402_v16, 1  ;;  %v1409_v36 = vrot.slane %v1407_v27, 1  ;;  %v2288_v45 = vshrl.u32 %v4998_v37, 16  ;;  %v4827_v61 = vunpack.c.l.bf16 %v5427_v38 }
  0x3b   : > { %1871 = vrot.lane.b32.xlu1 %v1826_v47, %s5224_s28  ;;  %v4987_v8 = vld [vmem:[#allocation2 + $0x2c] ss:$0 sps:$4 sm:$0x11]   ;;  %v3624_v10 = vrot.slane %v4985_v3, 1  ;;  %v1416_v39 = vrot.slane %v1414_v32, 1  ;;  %v2290_v46 = vshll.u32 %v4998_v37, 16  ;;  %v316_v47 = vmul.f32 %v4823_v28, %v5316_v19 }
  0x3c   : > { %v4993_v11 = vld [vmem:[#allocation2 + $0x2c] ss:$0 sps:$4 sm:$0x11]   ;;  %v1831_v12 = vrot.slane %v4987_v8, 1  ;;  %v1405_v35 = vor.u32 %v1404_v26, %v1400_v15  ;;  %v1421_v49 = vrot.slane %v1419_v40, 1  ;;  %v2295_v50 = vshll.u32 %v4999_v41, 16 }
  0x3d   : > { %v3625_v18 = vsel %vm1820_vm6, %v3623_v54, %v3624_v10  ;;  %v3207_v20 = vshll.u32 %v4993_v11, 16  ;;  %v1417_v48 = vor.u32 %v1416_v39, %v1412_v31  ;;  %v1424_v51 = vshrl.u32 %v5000_v42, 16  ;;  %v5002_v52 = vld [vmem:[#allocation2 + $0x18] sm:$0xff]   ;;  %v5004_v59 = vld [vmem:[#allocation2 + $0x24] sm:$0xff]   ;;  %v5449_v30 = vld [vmem:[#allocation2 + $0x30] sm:$0xff]  }
  0x3e   : > { %3668 = vrot.lane.b32.xlu0 %v3622_v53, %s5229_s8  ;;  %v1832_v22 = vsel %vm1820_vm6, %v1830_v56, %v1831_v12  ;;  %v1410_v44 = vsel %vm1386_vm8, %v1405_v35, %v1409_v36  ;;  %v2292_v55 = vrot.slane %v2290_v46, 1  ;;  %v5001_v56 = vld [vmem:[#allocation2 + $0x2c] ss:$0 sps:$4 sm:$0x11]   ;;  %v1426_v57 = vshll.u32 %v5000_v42, 16 }
  0x3f   : > { %2770 = vrot.lane.b32.xlu1 %v2725_v58, %s5228_s7  ;;  %v3209_v29 = vrot.slane %v3207_v20, 1  ;;  %v490_v53 = vld [vmem:[#allocation2 + $0x38] sm:$0x1]  ;;  %v2297_v58 = vrot.slane %v2295_v50, 1  ;;  %v3188_v60 = vshrl.u32 %v5002_v52, 16  ;;  %v1431_v0 = vshll.u32 %v5001_v56, 16 }
  0x40   : > { %v2293_v62 = vor.u32 %v2292_v55, %v2288_v45  ;;  %v1428_v63 = vrot.slane %v1426_v57, 1  ;;  %v3190_v2 = vshll.u32 %v5002_v52, 16  ;;  %v1422_v3 = vsel %vm1386_vm8, %v1417_v48, %v1421_v49  ;;  %v5003_v4 = vld [vmem:[#allocation2 + $0x20] ss:$0 sps:$4 sm:$0x11]   ;;  %v5014_v55 = vld [vmem:[#allocation2 + $0x30] sm:$0xff]  }
  0x41   : > { %v3210_v54 = vsel %vm1386_vm8, %v3205_v34, %v3209_v29  ;;  %v2312_v5 = vshrl.u32 %v5004_v59, 16  ;;  %v317_v8 = vmul.f32 %v4824_v43, %v5316_v19  ;;  %v355_v9 = vadd.f32 %v5325_v25, %v316_v47  ;;  %v5005_v15 = vld [vmem:[#allocation2 + $0x2c] ss:$0 sps:$4 sm:$0x11]   ;;  %v5008_v37 = vld [vmem:[#allocation2 + $0x24] sm:$0xfe]  }
  0x42   : > { %3670 = vrot.lane.b32.xlu0 %v3625_v18, %s5229_s8  ;;  %v2298_v10 = vsel %vm1386_vm8, %v2293_v62, %v2297_v58  ;;  %v1429_v11 = vor.u32 %v1428_v63, %v1424_v51  ;;  %v1433_v12 = vrot.slane %v1431_v0, 1  ;;  %v3192_v13 = vrot.slane %v3190_v2, 1  ;;  %v493_v39 = vld [vmem:[#allocation2 + $0x44] sm:$0x1]  ;;  %v5459_v47 = vld [vmem:[#allocation2 + $0x30] sm:$0xfe]  }
  0x43   : > { %1875 = vrot.lane.b32.xlu1 %v1832_v22, %s5224_s28  ;;  %v3195_v14 = vshll.u32 %v5003_v4, 16  ;;  %v2314_v16 = vshll.u32 %v5004_v59, 16  ;;  %v491_v18 = vsel %vm5290_vm5, 0, %v490_v53  ;;  %v4828_v21 = vunpack.c.h.bf16 %v5427_v38  ;;  %v4874_v22 = vld [vmem:[%s5306_s23 + $0x30] sm:$0xff]  }
  0x44   : > { %v3193_v20 = vor.u32 %v3192_v13, %v3188_v60  ;;  %492 = vst [vmem:[#allocation2 + $0x38] sm:$0x1] %v491_v18  ;;  %v2319_v28 = vshll.u32 %v5005_v15, 16  ;;  %v1434_v29 = vsel %vm1386_vm8, %v1429_v11, %v1433_v12  ;;  %v356_v31 = vadd.f32 %v5325_v25, %v317_v8  ;;  %v5009_v38 = vld [vmem:[#allocation2 + $0x2c] ss:$0 sps:$4 sm:$0x11]  }
  0x45   : > { %v3197_v26 = vrot.slane %v3195_v14, 1  ;;  %v2316_v27 = vrot.slane %v2314_v16, 1  ;;  %v387_v32 = vmax.f32 %v355_v9, 0.0  ;;  %v4831_v40 = vunpack.c.l.bf16 %v4874_v22  ;;  %v496_v62 = vld [vmem:[#allocation2 + $0x50] sm:$0x1] }
  0x46   : > { %1873 = vrot.lane.b32.xlu0 %v1829_v24, %s5224_s28  ;;  %v437_v24 = vld [vmem:[#allocation2 + $0x3c] sm:$0x1]  ;;  %v2321_v36 = vrot.slane %v2319_v28, 1  ;;  %v697_v41 = vrot.slane %v5382_v6, 4  ;;  %v319_v43 = vmul.f32 %v4828_v21, %v5316_v19  ;;  %v2726_v45 = vrot.slane %v5008_v37, 1  ;;  %v5012_v8 = vld [vmem:[#allocation2 + $0x30] sm:$0xff]  }
  0x47   : > { %2481 = vrot.lane.b32.xlu1 %v2310_v33, %s5230_s9  ;;  %v318_v33 = vmul.f32 %v4827_v61, %v5316_v19  ;;  %v3198_v34 = vsel %vm1386_vm8, %v3193_v20, %v3197_v26  ;;  %v2317_v35 = vor.u32 %v2316_v27, %v2312_v5  ;;  %v4749_v42 = vpack.c.bf16 %v387_v32, %v387_v32  ;;  %v440_v61 = vld [vmem:[#allocation2 + $0x48] sm:$0x1]  ;;  %v5476_v11 = vld [vmem:[#allocation2 + $0x30] sm:$0xff]  }
  0x48   : > { %v2727_v46 = vrot.slane %v5009_v38, 1  ;;  %v4832_v48 = vunpack.c.h.bf16 %v4874_v22  ;;  %v2326_v49 = vshll.u32 %v5449_v30, 16  ;;  %v388_v50 = vmax.f32 %v356_v31, 0.0  ;;  %v5485_v22 = vld [vmem:[#allocation2 + $0x30] sm:$0xfe]  }
  0x49   : > { %v438_v6 = vsel %vm5278_vm4, 0, %v437_v24  ;;  %v699_v51 = vshrl.u32 %v4749_v42, 16  ;;  %v357_v56 = vadd.f32 %v5325_v25, %v318_v33  ;;  %v320_v57 = vmul.f32 %v4831_v40, %v5316_v19 }
  0x4a   : > { %1581 = vrot.lane.b32.xlu0 %v1410_v44, %s5225_s29  ;;  %v2322_v44 = vsel %vm1386_vm8, %v2317_v35, %v2321_v36  ;;  %439 = vst [vmem:[#allocation2 + $0x3c] sm:$0x1] %v438_v6  ;;  %v4750_v53 = vpack.c.bf16 %v388_v50, %v388_v50  ;;  %v494_v60 = vsel %vm5290_vm5, 0, %v493_v39  ;;  %v2324_v63 = vshrl.u32 %v5449_v30, 16 }
  0x4b   : > { %3381 = vrot.lane.b32.xlu1 %v3210_v54, %s5231_s10  ;;  %v978_v52 = vld [vmem:[#allocation2 + $0x38] sm:$0x1]  ;;  %v702_v54 = vshll.u32 %v4749_v42, 16  ;;  %v701_v58 = vrot.slane %v699_v51, 7  ;;  %v2728_v0 = vsel %vm1820_vm6, %v2726_v45, %v2727_v46  ;;  %v3214_v2 = vshll.u32 %v5014_v55, 16 }
  0x4c   : > { %v979_v59 = vsel %vm5278_vm4, %v697_v41, %v978_v52  ;;  %495 = vst [vmem:[#allocation2 + $0x44] sm:$0x1] %v494_v60  ;;  %v358_v4 = vadd.f32 %v5325_v25, %v319_v43  ;;  %v2328_v5 = vrot.slane %v2326_v49, 1  ;;  %v707_v9 = vshrl.u32 %v4750_v53, 16 }
  0x4d   : > { %980 = vst [vmem:[#allocation2 + $0x38] sm:$0x1] %v979_v59  ;;  %v321_v12 = vmul.f32 %v4832_v48, %v5316_v19  ;;  %v2729_v13 = vrot.slane %v5459_v47, 1  ;;  %v704_v14 = vor.u32 %v702_v54, %v701_v58  ;;  %v3212_v15 = vshrl.u32 %v5014_v55, 16 }
  0x4e   : > { %2479 = vrot.lane.b32.xlu0 %v2298_v10, %s5230_s9  ;;  %v710_v10 = vshll.u32 %v4750_v53, 16  ;;  %v5481_v16 = vadd.f32 %v5325_v25, %v320_v57  ;;  %v705_v18 = vrot.slane %v701_v58, 4  ;;  %v709_v20 = vrot.slane %v707_v9, 7 }
  0x4f   : > { %1583 = vrot.lane.b32.xlu1 %v1422_v3, %s5225_s29  ;;  %v5473_v3 = vld [vmem:[#allocation2 + $0x30] sm:$0xfe]   ;;  %v1438_v21 = vshll.u32 %v5476_v11, 16  ;;  %v389_v26 = vmax.f32 %v357_v56, 0.0  ;;  %v3216_v27 = vrot.slane %v3214_v2, 1  ;;  %v441_v19 = vsel %vm5278_vm4, 0, %v440_v61 }
  0x50   : > { %v3626_v28 = vrot.slane %v5473_v3, 1  ;;  %v497_v24 = vsel %vm5290_vm5, 0, %v496_v62  ;;  %v714_v30 = vrot.slane %v709_v20, 4  ;;  %v1436_v32 = vshrl.u32 %v5476_v11, 16  ;;  %442 = vst [vmem:[#allocation2 + $0x48] sm:$0x1] %v441_v19 }
  0x51   : > { %v981_v31 = vld [vmem:[#allocation2 + $0x3c] sm:$0xf]  ;;  %v390_v33 = vmax.f32 %v358_v4, 0.0  ;;  %498 = vst [vmem:[#allocation2 + $0x50] sm:$0x1] %v497_v24  ;;  %v1440_v35 = vrot.slane %v1438_v21, 1  ;;  %v4751_v37 = vpack.c.bf16 %v389_v26, %v389_v26  ;;  %v5502_v43 = vadd.f32 %v5325_v25, %v321_v12 }
  0x52   : > { %3379 = vrot.lane.b32.xlu0 %v3198_v34, %s5231_s10  ;;  %v982_v34 = vsel %vm5350_vm9, %v704_v14, %v981_v31  ;;  %v1833_v36 = vrot.slane %v5485_v22, 1  ;;  %v391_v40 = vmax.f32 %v5481_v16, 0.0  ;;  %v3217_v48 = vor.u32 %v3216_v27, %v3212_v15 }
  0x53   : > { %1585 = vrot.lane.b32.xlu1 %v1434_v29, %s5225_s29  ;;  %v712_v29 = vor.u32 %v710_v10, %v709_v20  ;;  %983 = vst [vmem:[#allocation2 + $0x3c] sm:$0xf] %v982_v34  ;;  %v716_v42 = vshrl.u32 %v4751_v37, 16  ;;  %v985_v49 = vld [vmem:[#allocation2 + $0x44] sm:$0x1]  ;;  %v4752_v50 = vpack.c.bf16 %v390_v33, %v390_v33  ;;  %v719_v56 = vshll.u32 %v4751_v37, 16 }
  0x54   : > { %v5007_v38 = vld [vmem:[#allocation2 + $0x38] ss:$0 sps:$4 sm:$0x11]   ;;  %v986_v54 = vsel %vm5278_vm4, %v714_v30, %v985_v49  ;;  %v392_v25 = vmax.f32 %v5502_v43, 0.0  ;;  %v4753_v22 = vpack.c.bf16 %v391_v40, %v391_v40  ;;  %vm2816_vm2 = vcmask 195744  }
  0x55   : > { %v713_v39 = vsel %vm5356_vm10, %v705_v18, %v712_v29  ;;  %v5011_v41 = vld [vmem:[#allocation2 + $0x38] ss:$0 sps:$4 sm:$0x11]   ;;  %v2331_v45 = vshll.u32 %v5007_v38, 16  ;;  %v5504_v6 = vrot.slane %v716_v42, 7  ;;  %v724_v3 = vshrl.u32 %v4752_v50, 16 }
  0x56   : > { %2483 = vrot.lane.b32.xlu0 %v2322_v44, %s5230_s9  ;;  %984 = vst.msk [vmem:[#allocation2 + $0x40] sm:$0xf] %vm6331_vm0, %v713_v39  ;;  %v2329_v44 = vor.u32 %v2328_v5, %v2324_v63  ;;  %v5015_v46 = vld [vmem:[#allocation2 + $0x38] ss:$0 sps:$4 sm:$0x11]   ;;  %v2730_v47 = vrot.slane %v5011_v41, 1  ;;  %v1441_v29 = vor.u32 %v1440_v35, %v1436_v32 }
  0x57   : > { %v2333_v51 = vrot.slane %v2331_v45, 1  ;;  %v3219_v52 = vshll.u32 %v5015_v46, 16  ;;  %v5019_v55 = vld [vmem:[#allocation2 + $0x38] ss:$0 sps:$4 sm:$0x11]   ;;  %v721_v60 = vor.u32 %v719_v56, %v5504_v6  ;;  %v727_v4 = vshll.u32 %v4752_v50, 16 }
  0x58   : > { %987 = vst [vmem:[#allocation2 + $0x44] sm:$0x1] %v986_v54  ;;  %v5021_v57 = vld [vmem:[#allocation2 + $0x38] ss:$0 sps:$4 sm:$0x11]   ;;  %v3627_v58 = vrot.slane %v5019_v55, 1  ;;  %v2731_v62 = vsel %vm1820_vm6, %v2729_v13, %v2730_v47 }
  0x59   : > { %v2334_v59 = vsel %vm1386_vm8, %v2329_v44, %v2333_v51  ;;  %v3221_v53 = vrot.slane %v3219_v52, 1  ;;  %v988_v61 = vld [vmem:[#allocation2 + $0x48] sm:$0xf]  ;;  %v1443_v63 = vshll.u32 %v5021_v57, 16  ;;  %v726_v41 = vrot.slane %v724_v3, 7  ;;  %v4875_v3 = vld [vmem:[%s5306_s23 + $0x38] sm:$0xff]  }
  0x5a   : > { %2772 = vrot.lane.b32.xlu0 %v2728_v0, %s5228_s7  ;;  %2485 = vrot.lane.b32.xlu1 %v2334_v59, %s5230_s9  ;;  %v722_v0 = vrot.slane %v5504_v6, 4  ;;  %v989_v5 = vsel %vm5350_vm9, %v721_v60, %v988_v61  ;;  %v3628_v12 = vsel %vm1820_vm6, %v3626_v28, %v3627_v58  ;;  %v5027_v20 = vld [vmem:[#allocation2 + $0x38] ss:$0 sps:$4 sm:$0x11]   ;;  %v443_v51 = vld [vmem:[#allocation2 + $0x54] sm:$0x1]  ;;  %v4754_v58 = vpack.c.bf16 %v392_v25, %v392_v25 }
  0x5b   : > { %v3222_v2 = vsel %vm1386_vm8, %v3217_v48, %v3221_v53  ;;  %v1445_v10 = vrot.slane %v1443_v63, 1  ;;  %990 = vst [vmem:[#allocation2 + $0x48] sm:$0xf] %v989_v5  ;;  %v1834_v39 = vrot.slane %v5027_v20, 1  ;;  %v729_v35 = vor.u32 %v727_v4, %v726_v41  ;;  %v499_v60 = vld [vmem:[#allocation2 + $0x5c] sm:$0x1] }
  0x5c   : > { %v731_v6 = vrot.slane %v726_v41, 4  ;;  %v733_v25 = vshrl.u32 %v4753_v22, 16  ;;  %vm2994_vm3 = vcmask 228544   ;;  %vm6333_vm7 = vcmask 261344  }
  0x5d   : > { %v5016_v9 = vld [vmem:[#allocation2 + $0x3c] sm:$0xff]   ;;  %v1446_v48 = vsel %vm1386_vm8, %v1441_v29, %v1445_v10  ;;  %v1835_v49 = vsel %vm1820_vm6, %v1833_v36, %v1834_v39  ;;  %v730_v56 = vsel %vm5356_vm10, %v722_v0, %v729_v35  ;;  %v992_v36 = vld [vmem:[#allocation2 + $0x50] sm:$0x1]  ;;  %v741_v10 = vshrl.u32 %v4754_v58, 16 }
  0x5e   : > { %2950 = vrot.lane.b32.xlu0 %v5012_v8, %s5227_s6  ;;  %v5013_v8 = vld [vmem:[#allocation2 + $0x3c] sm:$0xff]   ;;  %2774 = vrot.lane.b32.xlu1 %v2731_v62, %s5228_s7  ;;  %v3224_v13 = vshrl.u32 %v5016_v9, 16  ;;  %v3226_v15 = vshll.u32 %v5016_v9, 16  ;;  %991 = vst.msk [vmem:[#allocation2 + $0x4c] sm:$0xf] %vm6331_vm0, %v730_v56  ;;  %v993_v63 = vsel %vm5278_vm4, %v731_v6, %v992_v36  ;;  %v736_v9 = vshll.u32 %v4753_v22, 16 }
  0x5f   : > { %v5022_v14 = vld [vmem:[#allocation2 + $0x3c] sm:$0xfe]   ;;  %v5017_v21 = vld [vmem:[#allocation2 + $0x44] ss:$0 sps:$4 sm:$0x11]   ;;  %vm6332_vm1 = vcmask 294144  }
  0x60   : > { %v5024_v18 = vld [vmem:[#allocation2 + $0x3c] sm:$0xff]   ;;  %v3629_v26 = vrot.slane %v5022_v14, 1  ;;  %v3228_v27 = vrot.slane %v3226_v15, 1  ;;  %v5023_v19 = vld [vmem:[#allocation2 + $0x44] ss:$0 sps:$4 sm:$0x11]  }
  0x61   : > { %v3231_v24 = vshll.u32 %v5017_v21, 16  ;;  %v5025_v30 = vld [vmem:[#allocation2 + $0x44] ss:$0 sps:$4 sm:$0x11]   ;;  %v3630_v31 = vrot.slane %v5023_v19, 1  ;;  %v1448_v33 = vshrl.u32 %v5024_v18, 16 }
  0x62   : > { %3383 = vrot.lane.b32.xlu0 %v3222_v2, %s5231_s10  ;;  %2952 = vrot.lane.b32.xlu1 %v5013_v8, %s5227_s6  ;;  %v3229_v28 = vor.u32 %v3228_v27, %v3224_v13  ;;  %v1450_v34 = vshll.u32 %v5024_v18, 16  ;;  %v1455_v38 = vshll.u32 %v5025_v30, 16  ;;  %v5028_v45 = vld [vmem:[#allocation2 + $0x3c] sm:$0xfe]   ;;  %994 = vst [vmem:[#allocation2 + $0x50] sm:$0x1] %v993_v63 }
  0x63   : > { %v3233_v37 = vrot.slane %v3231_v24, 1  ;;  %v3631_v42 = vsel %vm1820_vm6, %v3629_v26, %v3630_v31  ;;  %v5032_v46 = vld [vmem:[#allocation2 + $0x3c] sm:$0xff]   ;;  %v5029_v32 = vld [vmem:[#allocation2 + $0x44] ss:$0 sps:$4 sm:$0x11]   ;;  %v1836_v50 = vrot.slane %v5028_v45, 1  ;;  %v4835_v24 = vunpack.c.l.bf16 %v4875_v3 }
  0x64   : > { %v1452_v44 = vrot.slane %v1450_v34, 1  ;;  %v1457_v11 = vrot.slane %v1455_v38, 1  ;;  %v1837_v54 = vrot.slane %v5029_v32, 1  ;;  %v5030_v55 = vld [vmem:[#allocation2 + $0x3c] sm:$0xff]   ;;  %v2336_v57 = vshrl.u32 %v5032_v46, 16 }
  0x65   : > { %v3234_v47 = vsel %vm1386_vm8, %v3229_v28, %v3233_v37  ;;  %v5033_v59 = vld [vmem:[#allocation2 + $0x44] ss:$0 sps:$4 sm:$0x11]   ;;  %v2338_v53 = vshll.u32 %v5032_v46, 16  ;;  %v5036_v16 = vld [vmem:[#allocation2 + $0x3c] sm:$0xfe]  }
  0x66   : > { %3672 = vrot.lane.b32.xlu0 %v3628_v12, %s5229_s8  ;;  %3385 = vrot.lane.b32.xlu1 %v3234_v47, %s5231_s10  ;;  %v1453_v52 = vor.u32 %v1452_v44, %v1448_v33  ;;  %v2343_v62 = vshll.u32 %v5033_v59, 16  ;;  %v5037_v40 = vld [vmem:[#allocation2 + $0x44] ss:$0 sps:$4 sm:$0x11]   ;;  %v444_v2 = vsel %vm5278_vm4, 0, %v443_v51  ;;  %v2732_v5 = vrot.slane %v5036_v16, 1 }
  0x67   : > { %v2340_v61 = vrot.slane %v2338_v53, 1  ;;  %445 = vst [vmem:[#allocation2 + $0x54] sm:$0x1] %v444_v2  ;;  %v2733_v8 = vrot.slane %v5037_v40, 1  ;;  %v735_v14 = vrot.slane %v733_v25, 7  ;;  %v744_v13 = vshll.u32 %v4754_v58, 16 }
  0x68   : > { %v1458_v0 = vsel %vm1386_vm8, %v1453_v52, %v1457_v11  ;;  %v2345_v4 = vrot.slane %v2343_v62, 1  ;;  %v500_v15 = vsel %vm5290_vm5, 0, %v499_v60  ;;  %v5103_v18 = vld [vmem:[%s6324_s1] sm:$0xff]   ;;  %v1838_v20 = vsel %vm1820_vm6, %v1836_v50, %v1837_v54  ;;  %v5034_v26 = vld [vmem:[#allocation2 + $0x48] sm:$0xff]  }
  0x69   : > { %v2341_v43 = vor.u32 %v2340_v61, %v2336_v57  ;;  %v743_v21 = vrot.slane %v741_v10, 7  ;;  %501 = vst [vmem:[#allocation2 + $0x5c] sm:$0x1] %v500_v15  ;;  %v5038_v27 = vld [vmem:[#allocation2 + $0x48] sm:$0xfe]   ;;  %v739_v19 = vrot.slane %v735_v14, 4  ;;  %4903 = vmatprep.subr.bf16.mxu0 %v5103_v18  ;;  %4941 = vmatprep.subr.bf16.mxu1 %v5103_v18  ;;  %v738_v30 = vor.u32 %v736_v9, %v735_v14 }
  0x6a   : > { %3674 = vrot.lane.b32.xlu0 %v3631_v42, %s5229_s8  ;;  %1587 = vrot.lane.b32.xlu1 %v1446_v48, %s5225_s29  ;;  %v5031_v29 = vld [vmem:[#allocation2 + $0x48] sm:$0xff]   ;;  %v4836_v33 = vunpack.c.h.bf16 %v4875_v3  ;;  %v5035_v34 = vld [vmem:[#allocation2 + $0x50] ss:$0 sps:$4 sm:$0x11]   ;;  %v2348_v37 = vshrl.u32 %v5034_v26, 16  ;;  %v2734_v38 = vsel %vm1820_vm6, %v2732_v5, %v2733_v8  ;;  %v2350_v39 = vshll.u32 %v5034_v26, 16 }
  0x6b   : > { %v2346_v12 = vsel %vm1386_vm8, %v2341_v43, %v2345_v4  ;;  %v746_v28 = vor.u32 %v744_v13, %v743_v21  ;;  %v748_v31 = vrot.slane %v743_v21, 4  ;;  %4904 = vmatpush3.bf16.msra.mxu0 %v5103_v18  ;;  %4944 = vmatpush3.bf16.msra.mxu1 %v5103_v18  ;;  %v5039_v41 = vld [vmem:[#allocation2 + $0x50] ss:$0 sps:$4 sm:$0x11]   ;;  %v5040_v42 = vld [vmem:[#allocation2 + $0x48] sm:$0xff]   ;;  %v2355_v45 = vshll.u32 %v5035_v34, 16 }
  0x6c   : > { %v2735_v46 = vrot.slane %v5038_v27, 1  ;;  %v5567_v11 = vld [vmem:[%s6325_s2] ss:$0 sm:$0xff]  ;;  %v2352_v35 = vrot.slane %v2350_v39, 1  ;;  %v2736_v48 = vrot.slane %v5039_v41, 1  ;;  %v5042_v50 = vld [vmem:[#allocation2 + $0x48] sm:$0xff]  }
  0x6d   : > { %v747_v44 = vsel %vm5356_vm10, %v739_v19, %v746_v28  ;;  %v322_v32 = vmul.f32 %v5567_v11, %v4835_v24  ;;  %v5043_v6 = vld [vmem:[#allocation2 + $0x50] ss:$0 sps:$4 sm:$0x11]   ;;  %v323_v51 = vmul.f32 %v5567_v11, %v4836_v33  ;;  %v2357_v52 = vrot.slane %v2355_v45, 1  ;;  %v5046_v53 = vld [vmem:[#allocation2 + $0x48] sm:$0xfe]  }
  0x6e   : > { %1877 = vrot.lane.b32.xlu0 %v1835_v49, %s5224_s28  ;;  %1589 = vrot.lane.b32.xlu1 %v1458_v0, %s5225_s29  ;;  %v995_v47 = vld [vmem:[#allocation2 + $0x54] sm:$0xf]  ;;  %998 = vst.msk [vmem:[#allocation2 + $0x58] sm:$0xf] %vm6331_vm0, %v747_v44  ;;  %v2353_v56 = vor.u32 %v2352_v35, %v2348_v37  ;;  %v3236_v57 = vshrl.u32 %v5042_v50, 16  ;;  %v3238_v59 = vshll.u32 %v5042_v50, 16  ;;  %v2737_v25 = vsel %vm1820_vm6, %v2735_v46, %v2736_v48 }
  0x6f   : > { %v996_v49 = vsel %vm5350_vm9, %v738_v30, %v995_v47  ;;  %v3243_v22 = vshll.u32 %v5043_v6, 16  ;;  %v5047_v58 = vld [vmem:[#allocation2 + $0x50] ss:$0 sps:$4 sm:$0x11]   ;;  %v5580_v60 = vld [vmem:[%s6326_s3] ss:$0 sm:$0xff] }
  0x70   : > { %997 = vst [vmem:[#allocation2 + $0x54] sm:$0xf] %v996_v49  ;;  %v999_v54 = vld [vmem:[#allocation2 + $0x5c] sm:$0x1]  ;;  %v361_v61 = vadd.f32 %v5580_v60, %v322_v32  ;;  %v2358_v62 = vsel %vm1386_vm8, %v2353_v56, %v2357_v52  ;;  %v3240_v63 = vrot.slane %v3238_v59, 1  ;;  %v362_v0 = vadd.f32 %v5580_v60, %v323_v51  ;;  %v4876_v16 = vld [vmem:[%s5306_s23 + $0x40] sm:$0xff]  }
  0x71   : > { %v1000_v36 = vsel %vm5278_vm4, %v748_v31, %v999_v54  ;;  %v3245_v40 = vrot.slane %v3243_v22, 1  ;;  %v3632_v2 = vrot.slane %v5046_v53, 1  ;;  %v3633_v3 = vrot.slane %v5047_v58, 1  ;;  %v5049_v43 = vld [vmem:[#allocation2 + $0x50] ss:$0 sps:$4 sm:$0x11]  }
  0x72   : > { %2054 = vrot.lane.b32.xlu0 %v5030_v55, %s5226_s30  ;;  %1879 = vrot.lane.b32.xlu1 %v1838_v20, %s5224_s28  ;;  %v5048_v55 = vld [vmem:[#allocation2 + $0x48] sm:$0xff]   ;;  %1001 = vst [vmem:[#allocation2 + $0x5c] sm:$0x1] %v1000_v36  ;;  %v446_v4 = vld [vmem:[#allocation2 + $0x60] sm:$0x1]  ;;  %v3241_v5 = vor.u32 %v3240_v63, %v3236_v57  ;;  %v1467_v10 = vshll.u32 %v5049_v43, 16  ;;  %v4839_v20 = vunpack.c.l.bf16 %v4876_v16  ;;  %v4840_v34 = vunpack.c.h.bf16 %v4876_v16 }
  0x73   : > { %v1460_v8 = vshrl.u32 %v5048_v55, 16  ;;  %v1462_v9 = vshll.u32 %v5048_v55, 16  ;;  %v4877_v14 = vld [vmem:[%s5306_s23 + $0x48] sm:$0xff]   ;;  %v394_v18 = vmax.f32 %v362_v0, 0.0  ;;  %v3634_v19 = vsel %vm1820_vm6, %v3632_v2, %v3633_v3 }
  0x74   : > { %v3246_v15 = vsel %vm1386_vm8, %v3241_v5, %v3245_v40  ;;  %v324_v37 = vmul.f32 %v5567_v11, %v4839_v20  ;;  %v1469_v41 = vrot.slane %v1467_v10, 1  ;;  %v4844_v35 = vunpack.c.h.bf16 %v4877_v14  ;;  %v5054_v55 = vld [vmem:[#allocation2 + $0x48] sm:$0xfe]   ;;  %v5055_v56 = vld [vmem:[#allocation2 + $0x50] ss:$0 sps:$4 sm:$0x11]  }
  0x75   : > { %v1464_v26 = vrot.slane %v1462_v9, 1  ;;  %v4756_v57 = vpack.c.bf16 %v394_v18, %v394_v18  ;;  %v325_v59 = vmul.f32 %v5567_v11, %v4840_v34  ;;  %v1839_v58 = vrot.slane %v5054_v55, 1  ;;  %v502_v3 = vld [vmem:[#allocation2 + $0x68] sm:$0x1]  ;;  %v5068_v18 = vld [vmem:[#allocation2] sm:$0xff]   ;;  %v5097_v20 = vld [vmem:[#allocation2 + $0xc] sm:$0xff]  }
  0x76   : > { %2487 = vrot.lane.b32.xlu0 %v2346_v12, %s5230_s9  ;;  %2056 = vrot.lane.b32.xlu1 %v5031_v29, %s5226_s30  ;;  %v393_v12 = vmax.f32 %v361_v61, 0.0  ;;  %v447_v29 = vsel %vm5278_vm4, 0, %v446_v4  ;;  %v1840_v61 = vrot.slane %v5055_v56, 1  ;;  %v5607_v43 = vadd.f32 %v5580_v60, %v324_v37  ;;  %v449_v34 = vld [vmem:[#allocation2 + $0x6c] sm:$0x1]  ;;  %1194 = vst.msk [vmem:[#allocation3] sm:$0xff] %vm6330_vm11, %v5068_v18 }
  0x77   : > { %v5041_v13 = vld [vmem:[#allocation2 + $0x54] sm:$0xff]   ;;  %448 = vst [vmem:[#allocation2 + $0x60] sm:$0x1] %v447_v29  ;;  %v1465_v49 = vor.u32 %v1464_v26, %v1460_v8  ;;  %v327_v4 = vmul.f32 %v5567_v11, %v4844_v35  ;;  %1195 = vst.msk [vmem:[#allocation3 + $0x8] sm:$0xff] %vm6330_vm11, %v5097_v20 }
  0x78   : > { %v5044_v21 = vld [vmem:[#allocation2 + $0x54] sm:$0xff]   ;;  %v4755_v6 = vpack.c.bf16 %v393_v12, %v393_v12  ;;  %v1841_v5 = vsel %vm1820_vm6, %v1839_v58, %v1840_v61 }
  0x79   : > { %v5050_v27 = vld [vmem:[#allocation2 + $0x54] sm:$0xfe]   ;;  %v5045_v30 = vld [vmem:[#allocation2 + $0x5c] ss:$0 sps:$4 sm:$0x11]   ;;  %v3248_v28 = vshrl.u32 %v5044_v21, 16  ;;  %v1470_v0 = vsel %vm1386_vm8, %v1465_v49, %v1469_v41  ;;  %v5620_v37 = vadd.f32 %v5580_v60, %v327_v4 }
  0x7a   : > { %2776 = vrot.lane.b32.xlu0 %v2734_v38, %s5228_s7  ;;  %2489 = vrot.lane.b32.xlu1 %v2358_v62, %s5230_s9  ;;  %v5052_v24 = vld [vmem:[#allocation2 + $0x54] sm:$0xff]   ;;  %v3250_v31 = vshll.u32 %v5044_v21, 16  ;;  %v5051_v33 = vld [vmem:[#allocation2 + $0x5c] ss:$0 sps:$4 sm:$0x11]   ;;  %v4843_v38 = vunpack.c.l.bf16 %v4877_v14  ;;  %v3255_v39 = vshll.u32 %v5045_v30, 16 }
  0x7b   : > { %v1474_v44 = vshll.u32 %v5052_v24, 16  ;;  %v3636_v46 = vrot.slane %v5051_v33, 1  ;;  %v5053_v47 = vld [vmem:[#allocation2 + $0x5c] ss:$0 sps:$4 sm:$0x11]   ;;  %v1472_v32 = vshrl.u32 %v5052_v24, 16  ;;  %v364_v24 = vadd.f32 %v5580_v60, %v325_v59 }
  0x7c   : > { %v3252_v45 = vrot.slane %v3250_v31, 1  ;;  %v3257_v48 = vrot.slane %v3255_v39, 1  ;;  %v1479_v54 = vshll.u32 %v5053_v47, 16  ;;  %v326_v53 = vmul.f32 %v5567_v11, %v4843_v38  ;;  %v5056_v62 = vld [vmem:[#allocation2 + $0x54] sm:$0xfe]   ;;  %v5106_v38 = vld [vmem:[#allocation2 + $0x24] sm:$0xff]  }
  0x7d   : > { %v1476_v50 = vrot.slane %v1474_v44, 1  ;;  %v5060_v63 = vld [vmem:[#allocation2 + $0x54] sm:$0xff]   ;;  %v5057_v16 = vld [vmem:[#allocation2 + $0x5c] ss:$0 sps:$4 sm:$0x11]   ;;  %v750_v2 = vshrl.u32 %v4755_v6, 16 }
  0x7e   : > { %2954 = vrot.lane.b32.xlu0 %v5040_v42, %s5227_s6  ;;  %2778 = vrot.lane.b32.xlu1 %v2737_v25, %s5228_s7  ;;  %v3635_v42 = vrot.slane %v5050_v27, 1  ;;  %v3253_v51 = vor.u32 %v3252_v45, %v3248_v28  ;;  %v1481_v36 = vrot.slane %v1479_v54, 1  ;;  %v5058_v40 = vld [vmem:[#allocation2 + $0x54] sm:$0xff]   ;;  %v1842_v8 = vrot.slane %v5056_v62, 1  ;;  %v1002_v10 = vld [vmem:[#allocation2 + $0x60] sm:$0xf] }
  0x7f   : > { %v1477_v25 = vor.u32 %v1476_v50, %v1472_v32  ;;  %v753_v9 = vshll.u32 %v4755_v6, 16  ;;  %v1843_v12 = vrot.slane %v5057_v16, 1  ;;  %v752_v14 = vrot.slane %v750_v2, 7  ;;  %v5100_v21 = vld [vmem:[#allocation2 + $0x18] sm:$0xff]   ;;  %1197 = vst.msk [vmem:[#allocation3 + $0x18] sm:$0xff] %vm6330_vm11, %v5106_v38  ;;  %v5109_v59 = vld [vmem:[%s6324_s1 + $0x8] sm:$0xff]  }
  0x80   : > { %v3637_v52 = vsel %vm1820_vm6, %v3635_v42, %v3636_v46  ;;  %v3258_v22 = vsel %vm1386_vm8, %v3253_v51, %v3257_v48  ;;  %v2360_v26 = vshrl.u32 %v5060_v63, 16  ;;  %v2362_v27 = vshll.u32 %v5060_v63, 16  ;;  %v5061_v33 = vld [vmem:[#allocation2 + $0x5c] ss:$0 sps:$4 sm:$0x11]   ;;  %1196 = vst.msk [vmem:[#allocation3 + $0x10] sm:$0xff] %vm6330_vm11, %v5100_v21  ;;  %4905 = vmatprep.subr.bf16.mxu0 %v5109_v59  ;;  %4942 = vmatprep.subr.bf16.mxu1 %v5109_v59 }
  0x81   : > { %v5614_v29 = vadd.f32 %v5580_v60, %v326_v53  ;;  %v755_v30 = vor.u32 %v753_v9, %v752_v14  ;;  %v756_v28 = vrot.slane %v752_v14, 4  ;;  %v1482_v39 = vsel %vm1386_vm8, %v1477_v25, %v1481_v36  ;;  %v505_v46 = vld [vmem:[#allocation2 + $0x74] sm:$0x1]  ;;  %v5064_v49 = vld [vmem:[#allocation2 + $0x54] sm:$0xfe]   ;;  %4906 = vmatpush3.bf16.msra.mxu0 %v5109_v59  ;;  %4945 = vmatpush3.bf16.msra.mxu1 %v5109_v59 }
  0x82   : > { %3387 = vrot.lane.b32.xlu0 %v3246_v15, %s5231_s10  ;;  %2956 = vrot.lane.b32.xlu1 %v5041_v13, %s5227_s6  ;;  %v758_v13 = vshrl.u32 %v4756_v57, 16  ;;  %v761_v15 = vshll.u32 %v4756_v57, 16  ;;  %v1844_v41 = vsel %vm1820_vm6, %v1842_v8, %v1843_v12  ;;  %v2364_v42 = vrot.slane %v2362_v27, 1  ;;  %v5065_v6 = vld [vmem:[#allocation2 + $0x5c] ss:$0 sps:$4 sm:$0x11]  }
  0x83   : > { %v503_v44 = vsel %vm5290_vm5, 0, %v502_v3  ;;  %v1003_v35 = vsel %vm5350_vm9, %v755_v30, %v1002_v10  ;;  %v2367_v48 = vshll.u32 %v5061_v33, 16  ;;  %v395_v51 = vmax.f32 %v5607_v43, 0.0  ;;  %v5127_v43 = vld [vmem:[#allocation2 + $0x30] sm:$0xff]  }
  0x84   : > { %v5617_v31 = vrot.slane %v758_v13, 7  ;;  %504 = vst [vmem:[#allocation2 + $0x68] sm:$0x1] %v503_v44  ;;  %1004 = vst [vmem:[#allocation2 + $0x60] sm:$0xf] %v1003_v35  ;;  %v2365_v50 = vor.u32 %v2364_v42, %v2360_v26  ;;  %v2738_v56 = vrot.slane %v5064_v49, 1 }
  0x85   : > { %v2369_v55 = vrot.slane %v2367_v48, 1  ;;  %v396_v57 = vmax.f32 %v364_v24, 0.0  ;;  %v2739_v53 = vrot.slane %v5065_v6, 1  ;;  %v4757_v36 = vpack.c.bf16 %v395_v51, %v395_v51  ;;  %1198 = vst.msk [vmem:[#allocation3 + $0x20] sm:$0xff] %vm6330_vm11, %v5127_v43 }
  0x86   : > { %3676 = vrot.lane.b32.xlu0 %v3634_v19, %s5229_s8  ;;  %3389 = vrot.lane.b32.xlu1 %v3258_v22, %s5231_s10  ;;  %v763_v47 = vor.u32 %v761_v15, %v5617_v31  ;;  %v765_v32 = vrot.slane %v5617_v31, 4  ;;  %v450_v22 = vsel %vm5278_vm4, 0, %v449_v34  ;;  %v506_v63 = vsel %vm5290_vm5, 0, %v505_v46  ;;  %v5132_v15 = vld [vmem:[#allocation2 + $0x3c] sm:$0xff]  }
  0x87   : > { %v2370_v61 = vsel %vm1386_vm8, %v2365_v50, %v2369_v55  ;;  %451 = vst [vmem:[#allocation2 + $0x6c] sm:$0x1] %v450_v22  ;;  %v4758_v62 = vpack.c.bf16 %v396_v57, %v396_v57  ;;  %v2740_v16 = vsel %vm1820_vm6, %v2738_v56, %v2739_v53  ;;  %507 = vst [vmem:[#allocation2 + $0x74] sm:$0x1] %v506_v63  ;;  %v397_v3 = vmax.f32 %v5614_v29, 0.0 }
  0x88   : > { %v764_v54 = vsel %vm5356_vm10, %v756_v28, %v763_v47  ;;  %v770_v4 = vshll.u32 %v4757_v36, 16  ;;  %v398_v12 = vmax.f32 %v5620_v37, 0.0  ;;  %1199 = vst.msk [vmem:[#allocation3 + $0x28] sm:$0xff] %vm6330_vm11, %v5132_v15  ;;  %v4878_v15 = vld [vmem:[%s5306_s23 + $0x50] sm:$0xff]   ;;  %vm3818_vm11 = vcmask 1041408  }
  0x89   : > { %1005 = vst.msk [vmem:[#allocation2 + $0x64] sm:$0xf] %vm6331_vm0, %v764_v54  ;;  %v775_v25 = vshrl.u32 %v4758_v62, 16  ;;  %v5660_v14 = vpack.c.bf16 %v397_v3, %v397_v3 }
  0x8a   : > { %3678 = vrot.lane.b32.xlu0 %v3637_v52, %s5229_s8  ;;  %1591 = vrot.lane.b32.xlu1 %v1470_v0, %s5225_s29  ;;  %v452_v52 = vld [vmem:[#allocation2 + $0x78] sm:$0x1]  ;;  %v508_v0 = vld [vmem:[#allocation2 + $0x80] sm:$0x1] }
  0x8b   : > { %v453_v8 = vsel %vm5278_vm4, 0, %v452_v52  ;;  %v1006_v9 = vld [vmem:[#allocation2 + $0x68] sm:$0x1]  ;;  %v509_v13 = vsel %vm5290_vm5, 0, %v508_v0  ;;  %v777_v21 = vrot.slane %v775_v25, 7  ;;  %v784_v29 = vshrl.u32 %v5660_v14, 16 }
  0x8c   : > { %454 = vst [vmem:[#allocation2 + $0x78] sm:$0x1] %v453_v8  ;;  %v1007_v18 = vsel %vm5278_vm4, %v765_v32, %v1006_v9  ;;  %510 = vst [vmem:[#allocation2 + $0x80] sm:$0x1] %v509_v13  ;;  %v787_v63 = vshll.u32 %v5660_v14, 16 }
  0x8d   : > { %v1870_v19 = vpop.permute.xlu1 %1869  ;;  %1008 = vst [vmem:[#allocation2 + $0x68] sm:$0x1] %v1007_v18  ;;  %v782_v33 = vrot.slane %v777_v21, 4 }
  0x8e   : > { %1881 = vrot.lane.b32.xlu0 %v1841_v5, %s5224_s28  ;;  %1593 = vrot.lane.b32.xlu1 %v1482_v39, %s5225_s29  ;;  %v778_v5 = vshll.u32 %v4758_v62, 16  ;;  %v1009_v38 = vld [vmem:[#allocation2 + $0x6c] sm:$0xf]  ;;  %v5675_v39 = vrot.slane %v784_v29, 7  ;;  %v1013_v48 = vld [vmem:[#allocation2 + $0x74] sm:$0x1] }
  0x8f   : > { %v1014_v51 = vsel %vm5278_vm4, %v782_v33, %v1013_v48  ;;  %v4847_v48 = vunpack.c.l.bf16 %v4878_v15 }
  0x90   : > { %v5062_v30 = vld [vmem:[#allocation2 + $0x60] sm:$0xff]   ;;  %v780_v31 = vor.u32 %v778_v5, %v777_v21  ;;  %1015 = vst [vmem:[#allocation2 + $0x74] sm:$0x1] %v1014_v51  ;;  %v4848_v51 = vunpack.c.h.bf16 %v4878_v15 }
  0x91   : > { %v5066_v28 = vld [vmem:[#allocation2 + $0x60] sm:$0xfe]   ;;  %v2374_v42 = vshll.u32 %v5062_v30, 16 }
  0x92   : > { %2058 = vrot.lane.b32.xlu0 %v5058_v40, %s5226_s30  ;;  %v767_v40 = vshrl.u32 %v4757_v36, 16  ;;  %1883 = vrot.lane.b32.xlu1 %v1844_v41, %s5224_s28  ;;  %v5069_v34 = vld [vmem:[#allocation2 + $0x60] sm:$0xff]   ;;  %v2372_v41 = vshrl.u32 %v5062_v30, 16  ;;  %v2741_v44 = vrot.slane %v5066_v28, 1  ;;  %v329_v37 = vmul.f32 %v5567_v11, %v4848_v51 }
  0x93   : > { %v1580_v45 = vpop.permute.xlu0 %1579  ;;  %v5071_v46 = vld [vmem:[#allocation2 + $0x60] sm:$0xff]   ;;  %v2376_v49 = vrot.slane %v2374_v42, 1 }
  0x94   : > { %1628 = vst.msk [vmem:[#allocation3] sm:$0xff] %vm1627_vm12, %v1580_v45  ;;  %v769_v10 = vrot.slane %v767_v40, 7  ;;  %v3260_v50 = vshrl.u32 %v5071_v46, 16  ;;  %v3262_v6 = vshll.u32 %v5071_v46, 16  ;;  %v5075_v52 = vld [vmem:[#allocation2 + $0x60] sm:$0xfe]  }
  0x95   : > { %1918 = vst.msk [vmem:[#allocation3] sm:$0xff] %vm1917_vm13, %v1870_v19  ;;  %v5059_v19 = vld [vmem:[#allocation2 + $0x60] sm:$0xff]   ;;  %v5063_v54 = vld [vmem:[#allocation2 + $0x68] ss:$0 sps:$4 sm:$0x11]   ;;  %v2377_v22 = vor.u32 %v2376_v49, %v2372_v41  ;;  %v3638_v3 = vrot.slane %v5075_v52, 1 }
  0x96   : > { %2491 = vrot.lane.b32.xlu0 %v2370_v61, %s5230_s9  ;;  %v773_v20 = vrot.slane %v769_v10, 4  ;;  %v772_v24 = vor.u32 %v770_v4, %v769_v10  ;;  %2060 = vrot.lane.b32.xlu1 %v5059_v19, %s5226_s30  ;;  %v5077_v55 = vld [vmem:[#allocation2 + $0x60] sm:$0xff]   ;;  %v5067_v56 = vld [vmem:[#allocation2 + $0x68] ss:$0 sps:$4 sm:$0x11]   ;;  %v3264_v57 = vrot.slane %v3262_v6, 1 }
  0x97   : > { %v2379_v36 = vshll.u32 %v5063_v54, 16  ;;  %v5072_v61 = vld [vmem:[#allocation2 + $0x68] ss:$0 sps:$4 sm:$0x11]   ;;  %v1486_v8 = vshll.u32 %v5077_v55, 16 }
  0x98   : > { %v781_v45 = vsel %vm5356_vm10, %v773_v20, %v780_v31  ;;  %v1010_v35 = vsel %vm5350_vm9, %v772_v24, %v1009_v38  ;;  %v5076_v62 = vld [vmem:[#allocation2 + $0x68] ss:$0 sps:$4 sm:$0x11]   ;;  %v3265_v40 = vor.u32 %v3264_v57, %v3260_v50  ;;  %v5074_v13 = vld [vmem:[#allocation2 + $0x74] ss:$0 sps:$4 sm:$0x11]   ;;  %v4760_v57 = vpack.c.bf16 %v398_v12, %v398_v12 }
  0x99   : > { %1012 = vst.msk [vmem:[#allocation2 + $0x70] sm:$0xf] %vm6331_vm0, %v781_v45  ;;  %1011 = vst [vmem:[#allocation2 + $0x6c] sm:$0xf] %v1010_v35  ;;  %v2381_v0 = vrot.slane %v2379_v36, 1  ;;  %v3639_v43 = vrot.slane %v5076_v62, 1 }
  0x9a   : > { %2780 = vrot.lane.b32.xlu0 %v2740_v16, %s5228_s7  ;;  %v2742_v16 = vrot.slane %v5067_v56, 1  ;;  %v1484_v20 = vshrl.u32 %v5077_v55, 16  ;;  %v3279_v30 = vshll.u32 %v5074_v13, 16  ;;  %v5078_v28 = vld [vmem:[#allocation2 + $0x68] ss:$0 sps:$4 sm:$0x11]  }
  0x9b   : > { %v2382_v25 = vsel %vm1386_vm8, %v2377_v22, %v2381_v0  ;;  %v3640_v31 = vsel %vm1820_vm6, %v3638_v3, %v3639_v43  ;;  %v1488_v38 = vrot.slane %v1486_v8, 1  ;;  %v1491_v41 = vshll.u32 %v5078_v28, 16  ;;  %v5080_v45 = vld [vmem:[#allocation2 + $0x74] ss:$0 sps:$4 sm:$0x11]  }
  0x9c   : > { %v5646_v58 = vpop.permute.xlu1 %2048  ;;  %2493 = vrot.lane.b32.xlu1 %v2382_v25, %s5230_s9  ;;  %v2743_v14 = vsel %vm1820_vm6, %v2741_v44, %v2742_v16  ;;  %v3642_v54 = vrot.slane %v5080_v45, 1  ;;  %v5082_v55 = vld [vmem:[#allocation2 + $0x74] ss:$0 sps:$4 sm:$0x11]   ;;  %v5083_v16 = vld [vmem:[#allocation2 + $0x60] sm:$0xfe]   ;;  %v789_v3 = vor.u32 %v787_v63, %v5675_v39  ;;  %v328_v43 = vmul.f32 %v5567_v11, %v4847_v48 }
  0x9d   : > { %v1493_v52 = vrot.slane %v1491_v41, 1  ;;  %v1503_v0 = vshll.u32 %v5082_v55, 16  ;;  %v1845_v25 = vrot.slane %v5083_v16, 1  ;;  %v5727_v15 = vld [vmem:[#allocation2 + $0x74] ss:$0 sps:$4 sm:$0x11]  }
  0x9e   : > { %2958 = vrot.lane.b32.xlu0 %v5069_v34, %s5227_s6  ;;  %v3281_v34 = vrot.slane %v3279_v30, 1  ;;  %v455_v41 = vld [vmem:[#allocation2 + $0x84] sm:$0x1] }
  0x9f   : > { %v1505_v12 = vrot.slane %v1503_v0, 1 }
  0xa0   : > { %v2047_v2 = vpop.permute.xlu0 %2046  ;;  %v5073_v10 = vld [vmem:[#allocation2 + $0x6c] sm:$0xff]   ;;  %2782 = vrot.lane.b32.xlu1 %v2743_v14, %s5228_s7 }
  0xa1   : > { %2095 = vst.msk [vmem:[#allocation3] sm:$0xff] %vm2094_vm14, %v2047_v2  ;;  %v3267_v2 = vshll.u32 %v5072_v61, 16  ;;  %v5081_v21 = vld [vmem:[#allocation2 + $0x6c] sm:$0xff]   ;;  %v3272_v24 = vshrl.u32 %v5073_v10, 16  ;;  %v3274_v29 = vshll.u32 %v5073_v10, 16  ;;  %v1489_v61 = vor.u32 %v1488_v38, %v1484_v20 }
  0xa2   : > { %v5070_v19 = vld [vmem:[#allocation2 + $0x6c] sm:$0xff]   ;;  %v1498_v46 = vshll.u32 %v5081_v21, 16  ;;  %v1496_v6 = vshrl.u32 %v5081_v21, 16  ;;  %v790_v10 = vrot.slane %v5675_v39, 4  ;;  %v1849_v39 = vrot.slane %v5727_v15, 1 }
  0xa3   : > { %v3269_v5 = vrot.slane %v3267_v2, 1  ;;  %v3276_v33 = vrot.slane %v3274_v29, 1  ;;  %v5079_v42 = vld [vmem:[#allocation2 + $0x6c] sm:$0xfe]   ;;  %v1494_v63 = vsel %vm1386_vm8, %v1489_v61, %v1493_v52  ;;  %v368_v38 = vadd.f32 %v5580_v60, %v329_v37 }
  0xa4   : > { %v5670_v27 = vpop.permute.xlu0 %2946  ;;  %v3641_v50 = vrot.slane %v5079_v42, 1  ;;  %v1500_v56 = vrot.slane %v1498_v46, 1  ;;  %2960 = vrot.lane.b32.xlu1 %v5070_v19, %s5227_s6  ;;  %v5723_v8 = vld [vmem:[#allocation2 + $0x6c] sm:$0xfe]   ;;  %v795_v19 = vshll.u32 %v4760_v57, 16 }
  0xa5   : > { %v5668_v26 = vpop.permute.xlu1 %2948  ;;  %v3270_v18 = vsel %vm1386_vm8, %v3265_v40, %v3269_v5  ;;  %v3277_v49 = vor.u32 %v3276_v33, %v3272_v24  ;;  %v5084_v40 = vld [vmem:[#allocation2 + $0x68] ss:$0 sps:$4 sm:$0x11]   ;;  %v5087_v14 = vld [vmem:[#allocation2 + $0x6c] sm:$0xff]   ;;  %v1848_v11 = vrot.slane %v5723_v8, 1 }
  0xa6   : > { %3391 = vrot.lane.b32.xlu0 %v3270_v18, %s5231_s10  ;;  %v3643_v62 = vsel %vm1820_vm6, %v3641_v50, %v3642_v54  ;;  %v1846_v5 = vrot.slane %v5084_v40, 1  ;;  %v1501_v13 = vor.u32 %v1500_v56, %v1496_v6  ;;  %v792_v18 = vshrl.u32 %v4760_v57, 16  ;;  %v1016_v24 = vld [vmem:[#allocation2 + $0x78] sm:$0xf]  ;;  %v511_v42 = vld [vmem:[#allocation2 + $0x8c] sm:$0x1] }
  0xa7   : > { %v3282_v36 = vsel %vm1386_vm8, %v3277_v49, %v3281_v34  ;;  %v1017_v28 = vsel %vm5350_vm9, %v789_v3, %v1016_v24  ;;  %v5090_v33 = vld [vmem:[#allocation2 + $0x74] ss:$0 sps:$4 sm:$0x11]   ;;  %v367_v34 = vadd.f32 %v5580_v60, %v328_v43  ;;  %v1020_v49 = vld [vmem:[#allocation2 + $0x80] sm:$0x1] }
  0xa8   : > { %v5681_v32 = vpop.permute.xlu0 %2050  ;;  %3393 = vrot.lane.b32.xlu1 %v3282_v36, %s5231_s10  ;;  %v1847_v21 = vsel %vm1820_vm6, %v1845_v25, %v1846_v5  ;;  %v794_v30 = vrot.slane %v792_v18, 7  ;;  %1018 = vst [vmem:[#allocation2 + $0x78] sm:$0xf] %v1017_v28  ;;  %v1506_v45 = vsel %vm1386_vm8, %v1501_v13, %v1505_v12  ;;  %v5093_v54 = vld [vmem:[#allocation2 + $0x6c] sm:$0xfe]   ;;  %v456_v36 = vsel %vm5278_vm4, 0, %v455_v41 }
  0xa9   : > { %v5679_v47 = vpop.permute.xlu1 %2052  ;;  %v5094_v56 = vld [vmem:[#allocation2 + $0x74] ss:$0 sps:$4 sm:$0x11]   ;;  %v399_v57 = vmax.f32 %v367_v34, 0.0  ;;  %457 = vst [vmem:[#allocation2 + $0x84] sm:$0x1] %v456_v36 }
  0xaa   : > { %3680 = vrot.lane.b32.xlu0 %v3640_v31, %s5229_s8  ;;  %v5089_v31 = vld [vmem:[#allocation2 + $0x6c] sm:$0xff]   ;;  %v797_v46 = vor.u32 %v795_v19, %v794_v30  ;;  %v799_v48 = vrot.slane %v794_v30, 4  ;;  %v2745_v0 = vrot.slane %v5094_v56, 1  ;;  %v5820_v56 = vld [vmem:[%s6326_s3] ss:$0 sm:$0xff] }
  0xab   : > { %v2384_v50 = vshrl.u32 %v5089_v31, 16  ;;  %v2386_v6 = vshll.u32 %v5089_v31, 16  ;;  %v4761_v16 = vpack.c.bf16 %v399_v57, %v399_v57 }
  0xac   : > { %v5689_v59 = vpop.permute.xlu0 %2768  ;;  %1595 = vrot.lane.b32.xlu1 %v1494_v63, %s5225_s29  ;;  %v798_v51 = vsel %vm5356_vm10, %v790_v10, %v797_v46  ;;  %v1021_v52 = vsel %vm5278_vm4, %v799_v48, %v1020_v49 }
  0xad   : > { %v5691_v53 = vpop.permute.xlu1 %1871  ;;  %1019 = vst.msk [vmem:[#allocation2 + $0x7c] sm:$0xf] %vm6331_vm0, %v798_v51  ;;  %1022 = vst [vmem:[#allocation2 + $0x80] sm:$0x1] %v1021_v52  ;;  %v801_v43 = vshrl.u32 %v4761_v16, 16  ;;  %v804_v37 = vshll.u32 %v4761_v16, 16 }
  0xae   : > { %3682 = vrot.lane.b32.xlu0 %v3643_v62, %s5229_s8 }
  0xb0   : > { %v5694_v4 = vpop.permute.xlu0 %3668  ;;  %1597 = vrot.lane.b32.xlu1 %v1506_v45, %s5225_s29  ;;  %v1023_v45 = vld [vmem:[#allocation2 + $0x84] sm:$0xf] }
  0xb1   : > { %v5697_v9 = vpop.permute.xlu1 %2770 }
  0xb2   : > { %1885 = vrot.lane.b32.xlu0 %v1847_v21, %s5224_s28 }
  0xb4   : > { %v5706_v44 = vpop.permute.xlu0 %3670  ;;  %v5088_v10 = vld [vmem:[#allocation2 + $0x78] sm:$0xff]  }
  0xb5   : > { %v5708_v35 = vpop.permute.xlu1 %1875  ;;  %v5091_v15 = vld [vmem:[#allocation2 + $0x78] sm:$0xff]  }
  0xb6   : > { %2062 = vrot.lane.b32.xlu0 %v5087_v14, %s5226_s30  ;;  %v5092_v14 = vld [vmem:[#allocation2 + $0x80] ss:$0 sps:$4 sm:$0x11]   ;;  %v2398_v19 = vshll.u32 %v5091_v15, 16  ;;  %v5098_v30 = vld [vmem:[#allocation2 + $0x78] sm:$0xff]  }
  0xb7   : > { %v2403_v24 = vshll.u32 %v5092_v14, 16  ;;  %v5101_v46 = vld [vmem:[#allocation2 + $0x78] sm:$0xff]  }
  0xb8   : > { %v5715_v22 = vpop.permute.xlu0 %1873  ;;  %v3284_v51 = vshrl.u32 %v5101_v46, 16  ;;  %v3286_v52 = vshll.u32 %v5101_v46, 16  ;;  %v5117_v14 = vld [vmem:[#allocation2 + $0x78] sm:$0xfe]  }
  0xb9   : > { %v2482_v2 = vpop.permute.xlu1 %2481  ;;  %v2405_v41 = vrot.slane %v2403_v24, 1 }
  0xbc   : > { %v1582_v20 = vpop.permute.xlu0 %1581 }
  0xbd   : > { %v3382_v29 = vpop.permute.xlu1 %3381  ;;  %1629 = vst.msk [vmem:[#allocation3 + $0x8] sm:$0xff] %vm1627_vm12, %v1582_v20 }
  0xbe   : > { %1919 = vst.msk [vmem:[#allocation3 + $0x8] sm:$0xff] %vm1917_vm13, %v5691_v53 }
  0xbf   : > { %2096 = vst.msk [vmem:[#allocation3 + $0x8] sm:$0xff] %vm2094_vm14, %v5646_v58  ;;  %v2391_v58 = vshll.u32 %v5090_v33, 16  ;;  %v5804_v33 = vld [vmem:[%s6325_s2] ss:$0 sm:$0xff] }
  0xc0   : > { %2529 = vst.msk [vmem:[#allocation3 + $0x8] sm:$0xff] %vm2527_vm15, %v2482_v2  ;;  %v2480_v53 = vpop.permute.xlu0 %2479 }
  0xc1   : > { %2818 = vst.msk [vmem:[#allocation3 + $0x8] sm:$0xff] %vm2816_vm2, %v5697_v9  ;;  %v1584_v60 = vpop.permute.xlu1 %1583  ;;  %v2388_v9 = vrot.slane %v2386_v6, 1  ;;  %v2393_v55 = vrot.slane %v2391_v58, 1 }
  0xc2   : > { %2528 = vst.msk [vmem:[#allocation3] sm:$0xff] %vm2527_vm15, %v2480_v53 }
  0xc3   : > { %2996 = vst.msk [vmem:[#allocation3 + $0x8] sm:$0xff] %vm2994_vm3, %v5668_v26  ;;  %v2744_v26 = vrot.slane %v5093_v54, 1  ;;  %v2389_v62 = vor.u32 %v2388_v9, %v2384_v50  ;;  %v5110_v54 = vld [vmem:[#allocation2 + $0x78] sm:$0xff]  }
  0xc4   : > { %1630 = vst.msk [vmem:[#allocation3 + $0x10] sm:$0xff] %vm1627_vm12, %v1584_v60  ;;  %v3380_v61 = vpop.permute.xlu0 %3379  ;;  %v5102_v60 = vld [vmem:[#allocation2 + $0x80] ss:$0 sps:$4 sm:$0x11]  }
  0xc5   : > { %2817 = vst.msk [vmem:[#allocation3] sm:$0xff] %vm2816_vm2, %v5689_v59  ;;  %v400_v59 = vmax.f32 %v368_v38, 0.0  ;;  %v1586_v40 = vpop.permute.xlu1 %1585  ;;  %v2394_v3 = vsel %vm1386_vm8, %v2389_v62, %v2393_v55  ;;  %v2746_v8 = vsel %vm1820_vm6, %v2744_v26, %v2745_v0  ;;  %v2400_v38 = vrot.slane %v2398_v19, 1  ;;  %v5107_v55 = vld [vmem:[#allocation2 + $0x78] sm:$0xfe]  }
  0xc6   : > { %3429 = vst.msk [vmem:[#allocation3 + $0x8] sm:$0xff] %vm6333_vm7, %v3382_v29  ;;  %2495 = vrot.lane.b32.xlu0 %v2394_v3, %s5230_s9  ;;  %v5096_v29 = vld [vmem:[#allocation2 + $0x80] ss:$0 sps:$4 sm:$0x11]   ;;  %v3291_v36 = vshll.u32 %v5102_v60, 16  ;;  %v1510_v62 = vshll.u32 %v5110_v54, 16 }
  0xc7   : > { %1920 = vst.msk [vmem:[#allocation3 + $0x10] sm:$0xff] %vm1917_vm13, %v5715_v22  ;;  %v512_v22 = vsel %vm5290_vm5, 0, %v511_v42  ;;  %v4762_v2 = vpack.c.bf16 %v400_v59, %v400_v59  ;;  %v2748_v42 = vrot.slane %v5096_v29, 1  ;;  %v3288_v59 = vrot.slane %v3286_v52, 1 }
  0xc8   : > { %2995 = vst.msk [vmem:[#allocation3] sm:$0xff] %vm2994_vm3, %v5670_v27  ;;  %v1850_v27 = vsel %vm1820_vm6, %v1848_v11, %v1849_v39  ;;  %513 = vst [vmem:[#allocation2 + $0x8c] sm:$0x1] %v512_v22  ;;  %v2484_v5 = vpop.permute.xlu0 %2483  ;;  %v2396_v11 = vshrl.u32 %v5091_v15, 16 }
  0xc9   : > { %3718 = vst.msk [vmem:[#allocation3 + $0x8] sm:$0xff] %vm6332_vm1, %v5706_v44  ;;  %v5779_v44 = vld [vmem:[%s6324_s1 + $0x10] ss:$0 sps:$4 sm:$0x33]   ;;  %1887 = vrot.lane.b32.xlu1 %v1850_v27, %s5224_s28  ;;  %v809_v12 = vshrl.u32 %v4762_v2, 16  ;;  %v812_v25 = vshll.u32 %v4762_v2, 16  ;;  %v3289_v16 = vor.u32 %v3288_v59, %v3284_v51 }
  0xca   : > { %2097 = vst.msk [vmem:[#allocation3 + $0x10] sm:$0xff] %vm2094_vm14, %v5681_v32  ;;  %v4879_v32 = vld [vmem:[%s5306_s23 + $0x58] sm:$0xff]   ;;  %4947 = vmatprep.subr.msk.bf16.mxu0 %vm3818_vm11, %v5779_v44  ;;  %4948 = vmatprep.subr.msk.bf16.mxu1 %vm3818_vm11, %v5779_v44  ;;  %v2401_v58 = vor.u32 %v2400_v38, %v2396_v11  ;;  %v5108_v22 = vld [vmem:[#allocation2 + $0x80] ss:$0 sps:$4 sm:$0x11]   ;;  %v3644_v27 = vrot.slane %v5107_v55, 1 }
  0xcb   : > { %3428 = vst.msk [vmem:[#allocation3] sm:$0xff] %vm6333_vm7, %v3380_v61  ;;  %v811_v13 = vrot.slane %v809_v12, 7  ;;  %2784 = vrot.lane.b32.xlu0 %v2746_v8, %s5228_s7  ;;  %v4852_v21 = vunpack.c.h.bf16 %v4879_v32  ;;  %v5111_v2 = vld [vmem:[#allocation2 + $0x80] ss:$0 sps:$4 sm:$0x11]   ;;  %v3820_v3 = vsel %vm3818_vm11, %v5779_v44, 0 }
  0xcc   : > { %1631 = vst.msk [vmem:[#allocation3 + $0x18] sm:$0xff] %vm1627_vm12, %v1586_v40  ;;  %v2773_v63 = vpop.permute.xlu0 %2772  ;;  %v2406_v26 = vsel %vm1386_vm8, %v2401_v58, %v2405_v41  ;;  %v3293_v40 = vrot.slane %v3291_v36, 1  ;;  %4908 = vmatpush3.bf16.msra.mxu0 %v3820_v3  ;;  %4946 = vmatpush3.bf16.msra.mxu1 %v3820_v3  ;;  %v1515_v8 = vshll.u32 %v5111_v2, 16  ;;  %vm6342_vm11 = vcmask 31744  }
  0xcd   : > { %3717 = vst.msk [vmem:[#allocation3] sm:$0xff] %vm6332_vm1, %v5694_v4  ;;  %v803_v4 = vrot.slane %v801_v43, 7  ;;  %2064 = vrot.lane.b32.xlu1 %v5088_v10, %s5226_s30  ;;  %v814_v20 = vor.u32 %v812_v25, %v811_v13  ;;  %v816_v31 = vrot.slane %v811_v13, 4  ;;  %v331_v6 = vmul.f32 %v5804_v33, %v4852_v21 }
  0xce   : > { %1921 = vst.msk [vmem:[#allocation3 + $0x18] sm:$0xff] %vm1917_vm13, %v5708_v35  ;;  %v4851_v35 = vunpack.c.l.bf16 %v4879_v32  ;;  %v3645_v32 = vrot.slane %v5108_v22, 1  ;;  %v3294_v12 = vsel %vm1386_vm8, %v3289_v16, %v3293_v40  ;;  %v1508_v25 = vshrl.u32 %v5110_v54, 16 }
  0xcf   : > { %2098 = vst.msk [vmem:[#allocation3 + $0x18] sm:$0xff] %vm2094_vm14, %v5679_v47  ;;  %v5095_v47 = vld [vmem:[#allocation2 + $0x78] sm:$0xfe]   ;;  %v806_v18 = vor.u32 %v804_v37, %v803_v4  ;;  %v807_v28 = vrot.slane %v803_v4, 4  ;;  %2962 = vrot.lane.b32.xlu0 %v5098_v30, %s5227_s6  ;;  %v1027_v53 = vld [vmem:[#allocation2 + $0x8c] sm:$0x1]  ;;  %v370_v0 = vadd.f32 %v5820_v56, %v331_v6  ;;  %v2486_v4 = vpop.permute.xlu1 %2485 }
  0xd0   : > { %2530 = vst.msk [vmem:[#allocation3 + $0x10] sm:$0xff] %vm2527_vm15, %v2484_v5  ;;  %v2747_v39 = vrot.slane %v5095_v47, 1  ;;  %v330_v34 = vmul.f32 %v5804_v33, %v4851_v35  ;;  %v2951_v50 = vpop.permute.xlu0 %2950  ;;  %v1028_v9 = vsel %vm5278_vm4, %v816_v31, %v1027_v53  ;;  %v1512_v5 = vrot.slane %v1510_v62, 1  ;;  %2531 = vst.msk [vmem:[#allocation3 + $0x18] sm:$0xff] %vm2527_vm15, %v2486_v4  ;;  %v3734_v6 = vld [vmem:[#allocation3 + $0x8] sm:$0xff] }
  0xd1   : > { %2819 = vst.msk [vmem:[#allocation3 + $0x10] sm:$0xff] %vm2816_vm2, %v2773_v63  ;;  %v815_v48 = vsel %vm5356_vm10, %v807_v28, %v814_v20  ;;  %v1024_v49 = vsel %vm5350_vm9, %v806_v18, %v1023_v45  ;;  %1029 = vst [vmem:[#allocation2 + $0x8c] sm:$0x1] %v1028_v9  ;;  %2497 = vrot.lane.b32.xlu1 %v2406_v26, %s5230_s9  ;;  %v402_v44 = vmax.f32 %v370_v0, 0.0  ;;  %v1517_v15 = vrot.slane %v1515_v8, 1  ;;  %v4880_v8 = vld [vmem:[%s5306_s23 + $0x60] sm:$0xff]  }
  0xd2   : > { %1025 = vst [vmem:[#allocation2 + $0x84] sm:$0xf] %v1024_v49  ;;  %1026 = vst.msk [vmem:[#allocation2 + $0x88] sm:$0xf] %vm6331_vm0, %v815_v48  ;;  %v5823_v57 = vadd.f32 %v5820_v56, %v330_v34  ;;  %vm3769_vm0 = vcmask 293888   ;;  %v2749_v61 = vsel %vm1820_vm6, %v2747_v39, %v2748_v42  ;;  %v3646_v35 = vsel %vm1820_vm6, %v3644_v27, %v3645_v32 }
  0xd3   : > { %2997 = vst.msk [vmem:[#allocation3 + $0x10] sm:$0xff] %vm2994_vm3, %v2951_v50  ;;  %3395 = vrot.lane.b32.xlu0 %v3294_v12, %s5231_s10  ;;  %v5118_v63 = vld [vmem:[#allocation2 + $0x80] ss:$0 sps:$4 sm:$0x11]   ;;  %v2775_v19 = vpop.permute.xlu1 %2774  ;;  %v1513_v38 = vor.u32 %v1512_v5, %v1508_v25  ;;  %v1851_v49 = vrot.slane %v5117_v14, 1  ;;  %v4764_v60 = vpack.c.bf16 %v402_v44, %v402_v44  ;;  %v4856_v14 = vunpack.c.h.bf16 %v4880_v8 }
  0xd4   : > { %v3733_v43 = vld [vmem:[#allocation3] sm:$0xff]  ;;  %v401_v37 = vmax.f32 %v5823_v57, 0.0  ;;  %v3384_v47 = vpop.permute.xlu0 %3383  ;;  %2820 = vst.msk [vmem:[#allocation3 + $0x18] sm:$0xff] %vm2816_vm2, %v2775_v19  ;;  %v1852_v50 = vrot.slane %v5118_v63, 1  ;;  %v458_v62 = vld [vmem:[#allocation2 + $0x90] sm:$0x1] }
  0xd5   : > { %4909 = vmatprep.mubr.msk.bf16.mxu0 %vm3769_vm0, %v3733_v43  ;;  %2786 = vrot.lane.b32.xlu1 %v2749_v61, %s5228_s7  ;;  %3430 = vst.msk [vmem:[#allocation3 + $0x10] sm:$0xff] %vm6333_vm7, %v3384_v47  ;;  %v1518_v57 = vsel %vm1386_vm8, %v1513_v38, %v1517_v15  ;;  %v459_v32 = vsel %vm5278_vm4, 0, %v458_v62  ;;  %v826_v43 = vshrl.u32 %v4764_v60, 16  ;;  %v4855_v15 = vunpack.c.l.bf16 %v4880_v8 }
  0xd6   : > { %v4763_v58 = vpack.c.bf16 %v401_v37, %v401_v37  ;;  %4910 = vmatmul.mubr.msk.bf16.vlgmr.msra.gmra.mrb[0].mxu0 %vm3769_vm0, %v3734_v6  ;;  %v1853_v61 = vsel %vm1820_vm6, %v1851_v49, %v1852_v50  ;;  %460 = vst [vmem:[#allocation2 + $0x90] sm:$0x1] %v459_v32  ;;  %v829_v37 = vshll.u32 %v4764_v60, 16 }
  0xd7   : > { %3684 = vrot.lane.b32.xlu0 %v3646_v35, %s5229_s8  ;;  %v2953_v53 = vpop.permute.xlu1 %2952  ;;  %v5859_v44 = vrot.slane %v826_v43, 7 }
  0xd8   : > { %v5105_v18 = vld [vmem:[#allocation2 + $0x8c] ss:$0 sps:$4 sm:$0x11]   ;;  %v3673_v31 = vpop.permute.xlu0 %3672  ;;  %2998 = vst.msk [vmem:[#allocation3 + $0x18] sm:$0xff] %vm2994_vm3, %v2953_v53  ;;  %v818_v2 = vshrl.u32 %v4763_v58, 16  ;;  %v821_v3 = vshll.u32 %v4763_v58, 16 }
  0xd9   : > { %v5099_v10 = vld [vmem:[#allocation2 + $0x84] sm:$0xff]   ;;  %v3303_v24 = vshll.u32 %v5105_v18, 16  ;;  %v5113_v28 = vld [vmem:[#allocation2 + $0x8c] ss:$0 sps:$4 sm:$0x11]   ;;  %3719 = vst.msk [vmem:[#allocation3 + $0x10] sm:$0xff] %vm6332_vm1, %v3673_v31  ;;  %v831_v19 = vor.u32 %v829_v37, %v5859_v44  ;;  %v332_v31 = vmul.f32 %v5804_v33, %v4855_v15 }
  0xda   : > { %v5104_v13 = vld [vmem:[#allocation2 + $0x84] sm:$0xff]   ;;  %2964 = vrot.lane.b32.xlu1 %v5099_v10, %s5227_s6  ;;  %v3648_v45 = vrot.slane %v5113_v28, 1  ;;  %v5116_v46 = vld [vmem:[#allocation2 + $0x8c] ss:$0 sps:$4 sm:$0x11]   ;;  %v820_v12 = vrot.slane %v818_v2, 7 }
  0xdb   : > { %v5115_v20 = vld [vmem:[#allocation2 + $0x84] sm:$0xff]   ;;  %v3296_v21 = vshrl.u32 %v5104_v13, 16  ;;  %v3298_v11 = vshll.u32 %v5104_v13, 16  ;;  %v3305_v34 = vrot.slane %v3303_v24, 1  ;;  %v1527_v9 = vshll.u32 %v5116_v46, 16  ;;  %v3386_v0 = vpop.permute.xlu1 %3385 }
  0xdc   : > { %v5112_v29 = vld [vmem:[#allocation2 + $0x84] sm:$0xfe]   ;;  %v1520_v39 = vshrl.u32 %v5115_v20, 16  ;;  %v1522_v48 = vshll.u32 %v5115_v20, 16  ;;  %v3675_v59 = vpop.permute.xlu0 %3674  ;;  %3431 = vst.msk [vmem:[#allocation3 + $0x18] sm:$0xff] %vm6333_vm7, %v3386_v0  ;;  %v823_v18 = vor.u32 %v821_v3, %v820_v12  ;;  %v824_v20 = vrot.slane %v820_v12, 4  ;;  %vm6344_vm7 = vmmov %vm6342_vm11 }
  0xdd   : > { %v3300_v30 = vrot.slane %v3298_v11, 1  ;;  %v3647_v41 = vrot.slane %v5112_v29, 1  ;;  %v5119_v55 = vld [vmem:[#allocation2 + $0x84] sm:$0xfe]   ;;  %v1529_v22 = vrot.slane %v1527_v9, 1  ;;  %3720 = vst.msk [vmem:[#allocation3 + $0x18] sm:$0xff] %vm6332_vm1, %v3675_v59 }
  0xde   : > { %v1524_v54 = vrot.slane %v1522_v48, 1  ;;  %v5120_v26 = vld [vmem:[#allocation2 + $0x8c] ss:$0 sps:$4 sm:$0x11]   ;;  %v1854_v27 = vrot.slane %v5119_v55, 1  ;;  %v5121_v40 = vld [vmem:[#allocation2 + $0x84] sm:$0xff]   ;;  %v832_v46 = vsel %vm5356_vm10, %v824_v20, %v831_v19 }
  0xdf   : > { %v3301_v42 = vor.u32 %v3300_v30, %v3296_v21  ;;  %v3649_v52 = vsel %vm1820_vm6, %v3647_v41, %v3648_v45  ;;  %v1855_v16 = vrot.slane %v5120_v26, 1  ;;  %v5123_v25 = vld [vmem:[#allocation2 + $0x84] sm:$0xff]   ;;  %v5124_v5 = vld [vmem:[#allocation2 + $0x8c] ss:$0 sps:$4 sm:$0x11]   ;;  %v1588_v35 = vpop.permute.xlu1 %1587  ;;  %v833_v24 = vrot.slane %v5859_v44, 4 }
  0xe0   : > { %3686 = vrot.lane.b32.xlu0 %v3649_v52, %s5229_s8  ;;  %v1525_v36 = vor.u32 %v1524_v54, %v1520_v39  ;;  %v1878_v4 = vpop.permute.xlu0 %1877  ;;  %v514_v13 = vld [vmem:[#allocation2 + $0x98] sm:$0x1]  ;;  %v3735_v47 = vld [vmem:[#allocation3 + $0x10] sm:$0xff]  ;;  %v2408_v63 = vshrl.u32 %v5123_v25, 16  ;;  %v2410_v21 = vshll.u32 %v5123_v25, 16  ;;  %1632 = vst.msk [vmem:[#allocation3 + $0x20] sm:$0xff] %vm1627_vm12, %v1588_v35 }
  0xe1   : > { %v3306_v51 = vsel %vm1386_vm8, %v3301_v42, %v3305_v34  ;;  %4913 = vmatprep.mubr.msk.bf16.mxu0 %vm3769_vm0, %v3735_v47  ;;  %v4881_v11 = vld [vmem:[%s5306_s23 + $0x68] sm:$0xff]   ;;  %v2415_v29 = vshll.u32 %v5124_v5, 16  ;;  %v515_v39 = vsel %vm5290_vm5, 0, %v514_v13  ;;  %1922 = vst.msk [vmem:[#allocation3 + $0x20] sm:$0xff] %vm1917_vm13, %v1878_v4  ;;  %v333_v34 = vmul.f32 %v5804_v33, %v4856_v14  ;;  %v5162_v42 = vld [vmem:[#allocation2 + $0x54] sm:$0xff]  }
  0xe2   : > { %3397 = vrot.lane.b32.xlu1 %v3306_v51, %s5231_s10  ;;  %v1530_v10 = vsel %vm1386_vm8, %v1525_v36, %v1529_v22  ;;  %v5157_v30 = vld [vmem:[#allocation2 + $0x48] sm:$0xff]   ;;  %v2412_v28 = vrot.slane %v2410_v21, 1  ;;  %516 = vst [vmem:[#allocation2 + $0x98] sm:$0x1] %v515_v39  ;;  %v4859_v41 = vunpack.c.l.bf16 %v4881_v11  ;;  %v1856_v45 = vsel %vm1820_vm6, %v1854_v27, %v1855_v16  ;;  %v1030_v58 = vld [vmem:[#allocation2 + $0x90] sm:$0xf] }
  0xe3   : > { %v2417_v48 = vrot.slane %v2415_v29, 1  ;;  %v5128_v49 = vld [vmem:[#allocation2 + $0x84] sm:$0xfe]   ;;  %v5129_v53 = vld [vmem:[#allocation2 + $0x8c] ss:$0 sps:$4 sm:$0x11]   ;;  %v1590_v50 = vpop.permute.xlu1 %1589  ;;  %v4860_v6 = vunpack.c.h.bf16 %v4881_v11  ;;  %v371_v51 = vadd.f32 %v5820_v56, %v332_v31  ;;  %v372_v52 = vadd.f32 %v5820_v56, %v333_v34 }
  0xe4   : > { %1889 = vrot.lane.b32.xlu0 %v1853_v61, %s5224_s28  ;;  %v2055_v38 = vpop.permute.xlu0 %2054  ;;  %1200 = vst.msk [vmem:[#allocation3 + $0x30] sm:$0xff] %vm6342_vm11, %v5157_v30  ;;  %vm6343_vm1 = vcmask 27648   ;;  %v2413_v60 = vor.u32 %v2412_v28, %v2408_v63  ;;  %v334_v54 = vmul.f32 %v5804_v33, %v4859_v41  ;;  %v1031_v9 = vsel %vm5350_vm9, %v823_v18, %v1030_v58  ;;  %v461_v26 = vld [vmem:[#allocation2 + $0x9c] sm:$0x1]  ;;  %v517_v59 = vld [vmem:[#allocation2 + $0xa4] sm:$0x1] }
  0xe5   : > { %2099 = vst.msk [vmem:[#allocation3 + $0x20] sm:$0xff] %vm2094_vm14, %v2055_v38  ;;  %v2750_v55 = vrot.slane %v5128_v49, 1  ;;  %v335_v36 = vmul.f32 %v5804_v33, %v4860_v6  ;;  %1032 = vst [vmem:[#allocation2 + $0x90] sm:$0xf] %v1031_v9  ;;  %v403_v61 = vmax.f32 %v371_v51, 0.0  ;;  %v404_v27 = vmax.f32 %v372_v52, 0.0 }
  0xe6   : > { %1599 = vrot.lane.b32.xlu1 %v1518_v57, %s5225_s29  ;;  %1033 = vst.msk [vmem:[#allocation2 + $0x94] sm:$0xf] %vm6343_vm1, %v832_v46  ;;  %v2751_v57 = vrot.slane %v5129_v53, 1  ;;  %v2418_v22 = vsel %vm1386_vm8, %v2413_v60, %v2417_v48  ;;  %v462_v62 = vsel %vm5278_vm4, 0, %v461_v26  ;;  %v3736_v0 = vld [vmem:[#allocation3 + $0x18] sm:$0xff]  ;;  %v518_v3 = vsel %vm5290_vm5, 0, %v517_v59 }
  0xe7   : > { %1633 = vst.msk [vmem:[#allocation3 + $0x28] sm:$0xff] %vm1627_vm12, %v1590_v50  ;;  %463 = vst [vmem:[#allocation2 + $0x9c] sm:$0x1] %v462_v62  ;;  %v1880_v2 = vpop.permute.xlu1 %1879  ;;  %4914 = vmatmul.mubr.msk.bf16.gmra.mrb[4].mxu0 %vm3769_vm0, %v3736_v0  ;;  %v5898_v43 = vadd.f32 %v5820_v56, %v334_v54  ;;  %v520_v37 = vld [vmem:[#allocation2 + $0xb0] sm:$0x1]  ;;  %v4765_v12 = vpack.c.bf16 %v403_v61, %v403_v61  ;;  %v4766_v25 = vpack.c.bf16 %v404_v27, %v404_v27  ;;  %vm6346_vm11 = vcmask 294144  }
  0xe8   : > { %2066 = vrot.lane.b32.xlu0 %v5121_v40, %s5226_s30  ;;  %1201 = vst.msk [vmem:[#allocation3 + $0x38] sm:$0xff] %vm6344_vm7, %v5162_v42  ;;  %v2488_v16 = vpop.permute.xlu0 %2487  ;;  %v464_v40 = vld [vmem:[#allocation2 + $0xa8] sm:$0x1]  ;;  %v2752_v32 = vsel %vm1820_vm6, %v2750_v55, %v2751_v57  ;;  %519 = vst [vmem:[#allocation2 + $0xa4] sm:$0x1] %v518_v3  ;;  %v521_v8 = vsel %vm5290_vm5, 0, %v520_v37 }
  0xe9   : > { %2532 = vst.msk [vmem:[#allocation3 + $0x20] sm:$0xff] %vm2527_vm15, %v2488_v16  ;;  %v465_v5 = vsel %vm5278_vm4, 0, %v464_v40  ;;  %v1034_v4 = vld [vmem:[#allocation2 + $0x98] sm:$0x1]  ;;  %v405_v13 = vmax.f32 %v5898_v43, 0.0  ;;  %v835_v15 = vshrl.u32 %v4765_v12, 16 }
  0xea   : > { %1601 = vrot.lane.b32.xlu1 %v1530_v10, %s5225_s29  ;;  %1923 = vst.msk [vmem:[#allocation3 + $0x28] sm:$0xff] %vm1917_vm13, %v1880_v2  ;;  %v5906_v10 = vadd.f32 %v5820_v56, %v335_v36  ;;  %466 = vst [vmem:[#allocation2 + $0xa8] sm:$0x1] %v465_v5  ;;  %v1035_v35 = vsel %vm5278_vm4, %v833_v24, %v1034_v4  ;;  %v838_v14 = vshll.u32 %v4765_v12, 16  ;;  %v843_v47 = vshrl.u32 %v4766_v25, 16  ;;  %v5935_v37 = vld [vmem:[%s5306_s23 + $0x70] sm:$0xff]  }
  0xeb   : > { %522 = vst [vmem:[#allocation2 + $0xb0] sm:$0x1] %v521_v8  ;;  %v467_v20 = vld [vmem:[#allocation2 + $0xb4] sm:$0x1]  ;;  %1036 = vst [vmem:[#allocation2 + $0x98] sm:$0x1] %v1035_v35  ;;  %v2057_v63 = vpop.permute.xlu1 %2056  ;;  %v5931_v61 = vpack.c.bf16 %v405_v13, %v405_v13 }
  0xec   : > { %2499 = vrot.lane.b32.xlu0 %v2418_v22, %s5230_s9  ;;  %v2777_v18 = vpop.permute.xlu0 %2776  ;;  %v837_v21 = vrot.slane %v835_v15, 7  ;;  %v845_v11 = vrot.slane %v843_v47, 7  ;;  %v846_v19 = vshll.u32 %v4766_v25, 16  ;;  %2100 = vst.msk [vmem:[#allocation3 + $0x28] sm:$0xff] %vm2094_vm14, %v2057_v63  ;;  %v468_v44 = vsel %vm5278_vm4, 0, %v467_v20 }
  0xed   : > { %2821 = vst.msk [vmem:[#allocation3 + $0x20] sm:$0xff] %vm2816_vm2, %v2777_v18  ;;  %v5122_v24 = vld [vmem:[#allocation2 + $0x90] sm:$0xff]   ;;  %v406_v29 = vmax.f32 %v5906_v10, 0.0  ;;  %469 = vst [vmem:[#allocation2 + $0xb4] sm:$0x1] %v468_v44  ;;  %vm6345_vm7 = vcmask 261344  }
  0xee   : > { %1891 = vrot.lane.b32.xlu1 %v1856_v45, %s5224_s28  ;;  %v5125_v39 = vld [vmem:[#allocation2 + $0x90] sm:$0xff]   ;;  %v840_v28 = vor.u32 %v838_v14, %v837_v21  ;;  %v841_v31 = vrot.slane %v837_v21, 4  ;;  %v848_v34 = vor.u32 %v846_v19, %v845_v11  ;;  %v850_v42 = vrot.slane %v845_v11, 4  ;;  %v1037_v45 = vld [vmem:[#allocation2 + $0x9c] sm:$0xf] }
  0xef   : > { %v5130_v30 = vld [vmem:[#allocation2 + $0x90] sm:$0xfe]   ;;  %v2490_v46 = vpop.permute.xlu1 %2489  ;;  %v2420_v48 = vshrl.u32 %v5125_v39, 16  ;;  %v2422_v49 = vshll.u32 %v5125_v39, 16  ;;  %v1041_v60 = vld [vmem:[#allocation2 + $0xa4] sm:$0x1] }
  0xf0   : > { %2788 = vrot.lane.b32.xlu0 %v2752_v32, %s5228_s7  ;;  %v2955_v38 = vpop.permute.xlu0 %2954  ;;  %v5133_v41 = vld [vmem:[#allocation2 + $0x90] sm:$0xff]   ;;  %v2753_v53 = vrot.slane %v5130_v30, 1  ;;  %v849_v50 = vsel %vm5356_vm10, %v841_v31, %v848_v34  ;;  %2533 = vst.msk [vmem:[#allocation3 + $0x28] sm:$0xff] %vm2527_vm15, %v2490_v46  ;;  %v1038_v58 = vsel %vm5350_vm9, %v840_v28, %v1037_v45  ;;  %v1042_v54 = vsel %vm5278_vm4, %v850_v42, %v1041_v60 }
  0xf1   : > { %2999 = vst.msk [vmem:[#allocation3 + $0x20] sm:$0xff] %vm2994_vm3, %v2955_v38  ;;  %v5135_v6 = vld [vmem:[#allocation2 + $0x90] sm:$0xff]   ;;  %v2424_v52 = vrot.slane %v2422_v49, 1  ;;  %1039 = vst [vmem:[#allocation2 + $0x9c] sm:$0xf] %v1038_v58  ;;  %v852_v5 = vshrl.u32 %v5931_v61, 16 }
  0xf2   : > { %2068 = vrot.lane.b32.xlu1 %v5122_v24, %s5226_s30  ;;  %1040 = vst.msk [vmem:[#allocation2 + $0xa0] sm:$0xf] %vm6343_vm1, %v849_v50  ;;  %v5126_v51 = vld [vmem:[#allocation2 + $0x98] ss:$0 sps:$4 sm:$0x11]   ;;  %v3308_v55 = vshrl.u32 %v5135_v6, 16  ;;  %v4863_v24 = vunpack.c.l.bf16 %v5935_v37  ;;  %vm6347_vm1 = vmmov %vm6345_vm7 }
  0xf3   : > { %v5131_v9 = vld [vmem:[#allocation2 + $0x98] ss:$0 sps:$4 sm:$0x11]   ;;  %1043 = vst [vmem:[#allocation2 + $0xa4] sm:$0x1] %v1042_v54  ;;  %v2779_v57 = vpop.permute.xlu1 %2778  ;;  %v2425_v59 = vor.u32 %v2424_v52, %v2420_v48  ;;  %v2427_v36 = vshll.u32 %v5126_v51, 16  ;;  %v4864_v51 = vunpack.c.h.bf16 %v5935_v37 }
  0xf4   : > { %2966 = vrot.lane.b32.xlu0 %v5133_v41, %s5227_s6  ;;  %v3388_v26 = vpop.permute.xlu0 %3387  ;;  %v5136_v22 = vld [vmem:[#allocation2 + $0x98] ss:$0 sps:$4 sm:$0x11]   ;;  %2822 = vst.msk [vmem:[#allocation3 + $0x28] sm:$0xff] %vm2816_vm2, %v2779_v57  ;;  %v2754_v27 = vrot.slane %v5131_v9, 1  ;;  %v3310_v62 = vshll.u32 %v5135_v6, 16 }
  0xf5   : > { %3432 = vst.msk [vmem:[#allocation3 + $0x20] sm:$0xff] %vm6345_vm7, %v3388_v26  ;;  %v2429_v0 = vrot.slane %v2427_v36, 1  ;;  %v3315_v16 = vshll.u32 %v5136_v22, 16  ;;  %v5139_v40 = vld [vmem:[#allocation2 + $0x90] sm:$0xfe]   ;;  %vm6348_vm7 = vmmov %vm6346_vm11  ;;  %v5955_v57 = vld [vmem:[%s5306_s23 + $0x78] sm:$0xff]  }
  0xf6   : > { %v3312_v32 = vrot.slane %v3310_v62, 1  ;;  %v5140_v2 = vld [vmem:[#allocation2 + $0x98] ss:$0 sps:$4 sm:$0x11]   ;;  %v3650_v4 = vrot.slane %v5139_v40, 1  ;;  %v2755_v35 = vsel %vm1820_vm6, %v2753_v53, %v2754_v27  ;;  %v5141_v18 = vld [vmem:[#allocation2 + $0x90] sm:$0xff]  }
  0xf7   : > { %v2957_v3 = vpop.permute.xlu1 %2956  ;;  %v2430_v12 = vsel %vm1386_vm8, %v2425_v59, %v2429_v0  ;;  %v3317_v25 = vrot.slane %v3315_v16, 1  ;;  %v3651_v13 = vrot.slane %v5140_v2, 1  ;;  %v5142_v20 = vld [vmem:[#allocation2 + $0x98] ss:$0 sps:$4 sm:$0x11]   ;;  %v1532_v28 = vshrl.u32 %v5141_v18, 16 }
  0xf8   : > { %v3677_v43 = vpop.permute.xlu0 %3676  ;;  %3000 = vst.msk [vmem:[#allocation3 + $0x28] sm:$0xff] %vm2994_vm3, %v2957_v3  ;;  %2501 = vrot.lane.b32.xlu1 %v2430_v12, %s5230_s9  ;;  %v3313_v8 = vor.u32 %v3312_v32, %v3308_v55  ;;  %v1534_v31 = vshll.u32 %v5141_v18, 16  ;;  %v1539_v34 = vshll.u32 %v5142_v20, 16  ;;  %v336_v55 = vmul.f32 %v5804_v33, %v4863_v24  ;;  %v5147_v0 = vld [vmem:[#allocation2 + $0x90] sm:$0xfe]  }
  0xf9   : > { %3721 = vst.msk [vmem:[#allocation3 + $0x20] sm:$0xff] %vm6346_vm11, %v3677_v43  ;;  %v5137_v15 = vld [vmem:[#allocation2 + $0x9c] sm:$0xff]   ;;  %v3652_v30 = vsel %vm1820_vm6, %v3650_v4, %v3651_v13  ;;  %v5958_v22 = vrot.slane %v852_v5, 7  ;;  %v4768_v16 = vpack.c.bf16 %v406_v29, %v406_v29  ;;  %v855_v40 = vshll.u32 %v5931_v61, 16 }
  0xfa   : > { %v5138_v14 = vld [vmem:[#allocation2 + $0xa4] ss:$0 sps:$4 sm:$0x11]   ;;  %v3318_v47 = vsel %vm1386_vm8, %v3313_v8, %v3317_v25  ;;  %v3320_v21 = vshrl.u32 %v5137_v15, 16  ;;  %v3322_v11 = vshll.u32 %v5137_v15, 16  ;;  %v5145_v44 = vld [vmem:[#allocation2 + $0x9c] sm:$0xff]   ;;  %v337_v43 = vmul.f32 %v5804_v33, %v4864_v51 }
  0xfb   : > { %3399 = vrot.lane.b32.xlu0 %v3318_v47, %s5231_s10  ;;  %v3327_v19 = vshll.u32 %v5138_v14, 16  ;;  %v5134_v39 = vld [vmem:[#allocation2 + $0x9c] sm:$0xff]   ;;  %v3390_v38 = vpop.permute.xlu1 %3389  ;;  %v1536_v46 = vrot.slane %v1534_v31, 1  ;;  %v1541_v48 = vrot.slane %v1539_v34, 1  ;;  %v1544_v53 = vshrl.u32 %v5145_v44, 16 }
  0xfc   : > { %v3679_v63 = vpop.permute.xlu0 %3678  ;;  %2790 = vrot.lane.b32.xlu1 %v2755_v35, %s5228_s7  ;;  %v3324_v41 = vrot.slane %v3322_v11, 1  ;;  %v5143_v45 = vld [vmem:[#allocation2 + $0x9c] sm:$0xfe]   ;;  %3433 = vst.msk [vmem:[#allocation3 + $0x28] sm:$0xff] %vm6347_vm1, %v3390_v38  ;;  %v1546_v60 = vshll.u32 %v5145_v44, 16  ;;  %v858_v3 = vrot.slane %v5958_v22, 4  ;;  %v857_v29 = vor.u32 %v855_v40, %v5958_v22 }
  0xfd   : > { %v3329_v42 = vrot.slane %v3327_v19, 1  ;;  %v5144_v49 = vld [vmem:[#allocation2 + $0xa4] ss:$0 sps:$4 sm:$0x11]   ;;  %3722 = vst.msk [vmem:[#allocation3 + $0x28] sm:$0xff] %vm6348_vm7, %v3679_v63  ;;  %v3653_v58 = vrot.slane %v5143_v45, 1  ;;  %v1537_v59 = vor.u32 %v1536_v46, %v1532_v28  ;;  %v375_v61 = vadd.f32 %v5820_v56, %v336_v55 }
  0xfe   : > { %v3325_v6 = vor.u32 %v3324_v41, %v3320_v21  ;;  %v3654_v52 = vrot.slane %v5144_v49, 1  ;;  %v5146_v54 = vld [vmem:[#allocation2 + $0xa4] ss:$0 sps:$4 sm:$0x11]   ;;  %v1548_v36 = vrot.slane %v1546_v60, 1  ;;  %v1857_v10 = vrot.slane %v5147_v0, 1 }
  0xff   : > { %3688 = vrot.lane.b32.xlu0 %v3652_v30, %s5229_s8  ;;  %v1592_v9 = vpop.permute.xlu1 %1591  ;;  %v1551_v62 = vshll.u32 %v5146_v54, 16  ;;  %v5148_v2 = vld [vmem:[#allocation2 + $0x98] ss:$0 sps:$4 sm:$0x11]   ;;  %v1542_v25 = vsel %vm1386_vm8, %v1537_v59, %v1541_v48  ;;  %v5149_v4 = vld [vmem:[#allocation2 + $0x9c] sm:$0xfe]   ;;  %v4867_v35 = vunpack.c.l.bf16 %v5955_v57  ;;  %v376_v11 = vadd.f32 %v5820_v56, %v337_v43 }
 0x100   : > { %v1882_v50 = vpop.permute.xlu0 %1881  ;;  %2968 = vrot.lane.b32.xlu1 %v5134_v39, %s5227_s6  ;;  %v3330_v26 = vsel %vm1386_vm8, %v3325_v6, %v3329_v42  ;;  %1634 = vst.msk [vmem:[#allocation3 + $0x30] sm:$0xff] %vm1627_vm12, %v1592_v9  ;;  %v3655_v27 = vsel %vm1820_vm6, %v3653_v58, %v3654_v52  ;;  %v1549_v5 = vor.u32 %v1548_v36, %v1544_v53  ;;  %v1858_v8 = vrot.slane %v5148_v2, 1  ;;  %v5150_v13 = vld [vmem:[#allocation2 + $0xa4] ss:$0 sps:$4 sm:$0x11]   ;;  %v5151_v15 = vld [vmem:[#allocation2 + $0x9c] sm:$0xff]  }
 0x101   : > { %1924 = vst.msk [vmem:[#allocation3 + $0x30] sm:$0xff] %vm1917_vm13, %v1882_v50  ;;  %v1553_v37 = vrot.slane %v1551_v62, 1  ;;  %v860_v14 = vshrl.u32 %v4768_v16, 16  ;;  %v863_v47 = vshll.u32 %v4768_v16, 16  ;;  %v1860_v20 = vrot.slane %v5149_v4, 1  ;;  %v5153_v39 = vld [vmem:[#allocation2 + $0x9c] sm:$0xff]  }
 0x102   : > { %v1859_v18 = vsel %vm1820_vm6, %v1857_v10, %v1858_v8  ;;  %v1861_v63 = vrot.slane %v5150_v13, 1  ;;  %v1044_v21 = vld [vmem:[#allocation2 + $0xa8] sm:$0xf]  ;;  %v5154_v31 = vld [vmem:[#allocation2 + $0xa4] ss:$0 sps:$4 sm:$0x11]   ;;  %v338_v41 = vmul.f32 %v5804_v33, %v4867_v35 }
 0x103   : > { %3690 = vrot.lane.b32.xlu0 %v3655_v27, %s5229_s8  ;;  %v1594_v12 = vpop.permute.xlu1 %1593  ;;  %v862_v44 = vrot.slane %v860_v14, 7  ;;  %v1045_v24 = vsel %vm5350_vm9, %v857_v29, %v1044_v21  ;;  %v1554_v28 = vsel %vm1386_vm8, %v1549_v5, %v1553_v37  ;;  %v1048_v34 = vld [vmem:[#allocation2 + $0xb0] sm:$0x1]  ;;  %v407_v38 = vmax.f32 %v375_v61, 0.0  ;;  %v3737_v49 = vld [vmem:[#allocation3 + $0x20] sm:$0xff] }
 0x104   : > { %v2059_v32 = vpop.permute.xlu0 %2058  ;;  %3401 = vrot.lane.b32.xlu1 %v3330_v26, %s5231_s10  ;;  %1635 = vst.msk [vmem:[#allocation3 + $0x38] sm:$0xff] %vm1627_vm12, %v1594_v12  ;;  %1046 = vst [vmem:[#allocation2 + $0xa8] sm:$0xf] %v1045_v24  ;;  %v2432_v45 = vshrl.u32 %v5153_v39, 16  ;;  %v2434_v46 = vshll.u32 %v5153_v39, 16  ;;  %v2439_v53 = vshll.u32 %v5154_v31, 16  ;;  %4917 = vmatprep.mubr.msk.bf16.mxu0 %vm3769_vm0, %v3737_v49  ;;  %v1862_v60 = vsel %vm1820_vm6, %v1860_v20, %v1861_v63 }
 0x105   : > { %2101 = vst.msk [vmem:[#allocation3 + $0x30] sm:$0xff] %vm2094_vm14, %v2059_v32  ;;  %v865_v42 = vor.u32 %v863_v47, %v862_v44  ;;  %v867_v48 = vrot.slane %v862_v44, 4  ;;  %v408_v50 = vmax.f32 %v376_v11, 0.0  ;;  %v4769_v6 = vpack.c.bf16 %v407_v38, %v407_v38  ;;  %v5158_v54 = vld [vmem:[#allocation2 + $0x9c] sm:$0xfe]  }
 0x106   : > { %v2436_v51 = vrot.slane %v2434_v46, 1  ;;  %v5159_v9 = vld [vmem:[#allocation2 + $0xa4] ss:$0 sps:$4 sm:$0x11]   ;;  %vm6349_vm11 = vcmask 27648   ;;  %v2441_v55 = vrot.slane %v2439_v53, 1  ;;  %v5999_v2 = vadd.f32 %v5820_v56, %v338_v41 }
 0x107   : > { %1893 = vrot.lane.b32.xlu0 %v1859_v18, %s5224_s28  ;;  %v1884_v30 = vpop.permute.xlu1 %1883  ;;  %v866_v33 = vsel %vm5356_vm10, %v858_v3, %v865_v42  ;;  %v1049_v52 = vsel %vm5278_vm4, %v867_v48, %v1048_v34  ;;  %v4770_v26 = vpack.c.bf16 %v408_v50, %v408_v50  ;;  %v869_v59 = vshrl.u32 %v4769_v6, 16  ;;  %v3738_v22 = vld [vmem:[#allocation3 + $0x28] sm:$0xff]  ;;  %v1051_v16 = vld [vmem:[#allocation2 + $0xb4] sm:$0xf]  ;;  %v523_v40 = vld [vmem:[#allocation2 + $0xbc] sm:$0x1] }
 0x108   : > { %v2492_v19 = vpop.permute.xlu0 %2491  ;;  %1603 = vrot.lane.b32.xlu1 %v1542_v25, %s5225_s29  ;;  %1925 = vst.msk [vmem:[#allocation3 + $0x38] sm:$0xff] %vm1917_vm13, %v1884_v30  ;;  %1050 = vst [vmem:[#allocation2 + $0xb0] sm:$0x1] %v1049_v52  ;;  %v872_v36 = vshll.u32 %v4769_v6, 16  ;;  %v2437_v27 = vor.u32 %v2436_v51, %v2432_v45  ;;  %v2756_v62 = vrot.slane %v5158_v54, 1  ;;  %v2757_v0 = vrot.slane %v5159_v9, 1  ;;  %4918 = vmatmul.mubr.msk.bf16.gmra.mrb[8].mxu0 %vm3769_vm0, %v3738_v22 }
 0x109   : > { %2534 = vst.msk [vmem:[#allocation3 + $0x30] sm:$0xff] %vm2527_vm15, %v2492_v19  ;;  %v5187_v3 = vld [vmem:[#allocation2 + $0x60] sm:$0xff]   ;;  %v871_v43 = vrot.slane %v869_v59, 7  ;;  %v877_v37 = vshrl.u32 %v4770_v26, 16  ;;  %v880_v10 = vshll.u32 %v4770_v26, 16  ;;  %v524_v29 = vsel %vm5290_vm5, 0, %v523_v40  ;;  %vm6351_vm7 = vmmov %vm6349_vm11 }
 0x10a   : > { %1047 = vst.msk [vmem:[#allocation2 + $0xac] sm:$0xf] %vm6349_vm11, %v866_v33  ;;  %v470_v12 = vld [vmem:[#allocation2 + $0xc0] sm:$0x1]  ;;  %v2442_v61 = vsel %vm1386_vm8, %v2437_v27, %v2441_v55  ;;  %525 = vst [vmem:[#allocation2 + $0xbc] sm:$0x1] %v524_v29  ;;  %v4868_v5 = vunpack.c.h.bf16 %v5955_v57  ;;  %v2758_v13 = vsel %vm1820_vm6, %v2756_v62, %v2757_v0 }
 0x10b   : > { %2070 = vrot.lane.b32.xlu0 %v5151_v15, %s5226_s30  ;;  %v2061_v32 = vpop.permute.xlu1 %2060  ;;  %vm6350_vm1 = vcmask 31744   ;;  %v874_v56 = vor.u32 %v872_v36, %v871_v43  ;;  %v875_v8 = vrot.slane %v871_v43, 4  ;;  %v879_v4 = vrot.slane %v877_v37, 7  ;;  %v5213_v57 = vld [vmem:[%s6325_s2] ss:$0 sm:$0xff] }
 0x10c   : > { %v2781_v58 = vpop.permute.xlu0 %2780  ;;  %1605 = vrot.lane.b32.xlu1 %v1554_v28, %s5225_s29  ;;  %2102 = vst.msk [vmem:[#allocation3 + $0x38] sm:$0xff] %vm2094_vm14, %v2061_v32  ;;  %v409_v47 = vmax.f32 %v5999_v2, 0.0  ;;  %v339_v20 = vmul.f32 %v5213_v57, %v4868_v5  ;;  %v471_v63 = vsel %vm5278_vm4, 0, %v470_v12  ;;  %v5214_v38 = vld [vmem:[%s6326_s3] ss:$0 sm:$0xff]  ;;  %vm6352_vm11 = vcmask 261344  }
 0x10d   : > { %2823 = vst.msk [vmem:[#allocation3 + $0x30] sm:$0xff] %vm2816_vm2, %v2781_v58  ;;  %v882_v35 = vor.u32 %v880_v10, %v879_v4  ;;  %v1052_v15 = vsel %vm5350_vm9, %v874_v56, %v1051_v16  ;;  %v884_v14 = vrot.slane %v879_v4, 4  ;;  %472 = vst [vmem:[#allocation2 + $0xc0] sm:$0x1] %v471_v63 }
 0x10e   : > { %1202 = vst.msk [vmem:[#allocation3 + $0x40] sm:$0xff] %vm6350_vm1, %v5187_v3  ;;  %1053 = vst [vmem:[#allocation2 + $0xb4] sm:$0xf] %v1052_v15  ;;  %v6027_v41 = vadd.f32 %v5214_v38, %v339_v20  ;;  %v6039_v29 = vpack.c.bf16 %v409_v47, %v409_v47  ;;  %vm6353_vm1 = vcmask 294144  }
 0x10f   : > { %2503 = vrot.lane.b32.xlu0 %v2442_v61, %s5230_s9  ;;  %v5156_v11 = vld [vmem:[#allocation2 + $0xb0] ss:$0 sps:$4 sm:$0x11]   ;;  %v883_v19 = vsel %vm5356_vm10, %v875_v8, %v882_v35  ;;  %v2494_v49 = vpop.permute.xlu1 %2493 }
 0x110   : > { %1895 = vrot.lane.b32.xlu1 %v1862_v60, %s5224_s28  ;;  %v2959_v25 = vpop.permute.xlu0 %2958  ;;  %1054 = vst.msk [vmem:[#allocation2 + $0xb8] sm:$0xf] %vm6351_vm7, %v883_v19  ;;  %v2451_v30 = vshll.u32 %v5156_v11, 16  ;;  %v5161_v28 = vld [vmem:[#allocation2 + $0xb0] ss:$0 sps:$4 sm:$0x11]   ;;  %vm6354_vm7 = vmmov %vm6352_vm11 }
 0x111   : > { %3001 = vst.msk [vmem:[#allocation3 + $0x30] sm:$0xff] %vm2994_vm3, %v2959_v25  ;;  %v5152_v18 = vld [vmem:[#allocation2 + $0xa8] sm:$0xff]   ;;  %v2760_v46 = vrot.slane %v5161_v28, 1  ;;  %v5166_v53 = vld [vmem:[#allocation2 + $0xb0] ss:$0 sps:$4 sm:$0x11]  }
 0x112   : > { %v5155_v21 = vld [vmem:[#allocation2 + $0xa8] sm:$0xff]   ;;  %v2453_v45 = vrot.slane %v2451_v30, 1  ;;  %v1055_v50 = vld [vmem:[#allocation2 + $0xbc] sm:$0x1]  ;;  %2535 = vst.msk [vmem:[#allocation3 + $0x38] sm:$0xff] %vm2527_vm15, %v2494_v49  ;;  %v3339_v52 = vshll.u32 %v5166_v53, 16 }
 0x113   : > { %2792 = vrot.lane.b32.xlu0 %v2758_v13, %s5228_s7  ;;  %v5160_v44 = vld [vmem:[#allocation2 + $0xa8] sm:$0xfe]   ;;  %v2444_v24 = vshrl.u32 %v5155_v21, 16  ;;  %v2446_v39 = vshll.u32 %v5155_v21, 16  ;;  %v1056_v54 = vsel %vm5278_vm4, %v884_v14, %v1055_v50  ;;  %v410_v9 = vmax.f32 %v6027_v41, 0.0  ;;  %v2783_v36 = vpop.permute.xlu1 %2782 }
 0x114   : > { %2072 = vrot.lane.b32.xlu1 %v5152_v18, %s5226_s30  ;;  %v2759_v31 = vrot.slane %v5160_v44, 1  ;;  %v5163_v34 = vld [vmem:[#allocation2 + $0xa8] sm:$0xff]   ;;  %1057 = vst [vmem:[#allocation2 + $0xbc] sm:$0x1] %v1056_v54  ;;  %v3341_v22 = vrot.slane %v3339_v52, 1  ;;  %2824 = vst.msk [vmem:[#allocation3 + $0x38] sm:$0xff] %vm2816_vm2, %v2783_v36 }
 0x115   : > { %v2448_v42 = vrot.slane %v2446_v39, 1  ;;  %v5165_v48 = vld [vmem:[#allocation2 + $0xa8] sm:$0xff]   ;;  %v5170_v40 = vld [vmem:[#allocation2 + $0xb0] ss:$0 sps:$4 sm:$0x11]   ;;  %v886_v18 = vshrl.u32 %v6039_v29, 16 }
 0x116   : > { %v5171_v6 = vld [vmem:[#allocation2 + $0xa8] sm:$0xff]   ;;  %v3332_v60 = vshrl.u32 %v5165_v48, 16  ;;  %v3334_v33 = vshll.u32 %v5165_v48, 16  ;;  %v2761_v0 = vsel %vm1820_vm6, %v2759_v31, %v2760_v46  ;;  %v5172_v10 = vld [vmem:[#allocation2 + $0xb0] ss:$0 sps:$4 sm:$0x11]  }
 0x117   : > { %2970 = vrot.lane.b32.xlu0 %v5163_v34, %s5227_s6  ;;  %v2449_v58 = vor.u32 %v2448_v42, %v2444_v24  ;;  %v1556_v59 = vshrl.u32 %v5171_v6, 16  ;;  %v5167_v27 = vld [vmem:[#allocation2 + $0xb4] sm:$0xff]   ;;  %v5169_v62 = vld [vmem:[#allocation2 + $0xa8] sm:$0xfe]   ;;  %v1558_v32 = vshll.u32 %v5171_v6, 16  ;;  %v3657_v25 = vrot.slane %v5170_v40, 1  ;;  %v2961_v5 = vpop.permute.xlu1 %2960 }
 0x118   : > { %v3392_v51 = vpop.permute.xlu0 %3391  ;;  %v3336_v26 = vrot.slane %v3334_v33, 1  ;;  %v5164_v3 = vld [vmem:[#allocation2 + $0xb4] sm:$0xff]   ;;  %v3346_v43 = vshll.u32 %v5167_v27, 16  ;;  %v3656_v37 = vrot.slane %v5169_v62, 1  ;;  %v3344_v61 = vshrl.u32 %v5167_v27, 16  ;;  %3002 = vst.msk [vmem:[#allocation3 + $0x38] sm:$0xff] %vm2994_vm3, %v2961_v5 }
 0x119   : > { %3434 = vst.msk [vmem:[#allocation3 + $0x30] sm:$0xff] %vm6352_vm11, %v3392_v51  ;;  %v2454_v55 = vsel %vm1386_vm8, %v2449_v58, %v2453_v45  ;;  %v1560_v8 = vrot.slane %v1558_v32, 1  ;;  %v5173_v4 = vld [vmem:[#allocation2 + $0xb4] sm:$0xfe]   ;;  %v1563_v35 = vshll.u32 %v5172_v10, 16  ;;  %vm6355_vm11 = vmmov %vm6353_vm1  ;;  %v4772_v42 = vpack.c.bf16 %v410_v9, %v410_v9  ;;  %v5192_v10 = vld [vmem:[#allocation2 + $0x6c] sm:$0xff]  }
 0x11a   : > { %2505 = vrot.lane.b32.xlu1 %v2454_v55, %s5230_s9  ;;  %v3337_v16 = vor.u32 %v3336_v26, %v3332_v60  ;;  %v3348_v56 = vrot.slane %v3346_v43, 1  ;;  %v3658_v13 = vsel %vm1820_vm6, %v3656_v37, %v3657_v25  ;;  %v5175_v15 = vld [vmem:[#allocation2 + $0xb4] sm:$0xff]   ;;  %v3659_v20 = vrot.slane %v5173_v4, 1  ;;  %v5177_v41 = vld [vmem:[#allocation2 + $0xa8] sm:$0xfe]  }
 0x11b   : > { %v5168_v47 = vld [vmem:[#allocation2 + $0xbc] ss:$0 sps:$4 sm:$0x11]   ;;  %v3394_v63 = vpop.permute.xlu1 %3393  ;;  %v1561_v19 = vor.u32 %v1560_v8, %v1556_v59  ;;  %v1565_v24 = vrot.slane %v1563_v35, 1  ;;  %v1568_v30 = vshrl.u32 %v5175_v15, 16  ;;  %v1570_v28 = vshll.u32 %v5175_v15, 16 }
 0x11c   : > { %v3681_v2 = vpop.permute.xlu0 %3680  ;;  %v3342_v12 = vsel %vm1386_vm8, %v3337_v16, %v3341_v22  ;;  %v5174_v57 = vld [vmem:[#allocation2 + $0xbc] ss:$0 sps:$4 sm:$0x11]   ;;  %v3349_v21 = vor.u32 %v3348_v56, %v3344_v61  ;;  %v3351_v11 = vshll.u32 %v5168_v47, 16  ;;  %3435 = vst.msk [vmem:[#allocation3 + $0x38] sm:$0xff] %vm6354_vm7, %v3394_v63  ;;  %v1863_v6 = vrot.slane %v5177_v41, 1 }
 0x11d   : > { %3723 = vst.msk [vmem:[#allocation3 + $0x30] sm:$0xff] %vm6353_vm1, %v3681_v2  ;;  %3403 = vrot.lane.b32.xlu0 %v3342_v12, %s5231_s10  ;;  %v5176_v44 = vld [vmem:[#allocation2 + $0xbc] ss:$0 sps:$4 sm:$0x11]   ;;  %v3660_v39 = vrot.slane %v5174_v57, 1  ;;  %v1572_v46 = vrot.slane %v1570_v28, 1  ;;  %v1566_v33 = vsel %vm1386_vm8, %v1561_v19, %v1565_v24 }
 0x11e   : > { %2794 = vrot.lane.b32.xlu1 %v2761_v0, %s5228_s7  ;;  %v3353_v34 = vrot.slane %v3351_v11, 1  ;;  %v1575_v38 = vshll.u32 %v5176_v44, 16  ;;  %v5178_v48 = vld [vmem:[#allocation2 + $0xb0] ss:$0 sps:$4 sm:$0x11]   ;;  %v5181_v55 = vld [vmem:[#allocation2 + $0xb4] sm:$0xff]  }
 0x11f   : > { %v3661_v45 = vsel %vm1820_vm6, %v3659_v20, %v3660_v39  ;;  %v1596_v49 = vpop.permute.xlu1 %1595  ;;  %v5179_v58 = vld [vmem:[#allocation2 + $0xb4] sm:$0xfe]   ;;  %v526_v60 = vld [vmem:[#allocation2 + $0xc8] sm:$0x1]  ;;  %v1864_v51 = vrot.slane %v5178_v48, 1  ;;  %v1573_v9 = vor.u32 %v1572_v46, %v1568_v30  ;;  %v888_v26 = vrot.slane %v886_v18, 7 }
 0x120   : > { %v3683_v14 = vpop.permute.xlu0 %3682  ;;  %v3354_v53 = vsel %vm1386_vm8, %v3349_v21, %v3353_v34  ;;  %v1577_v50 = vrot.slane %v1575_v38, 1  ;;  %1636 = vst.msk [vmem:[#allocation3 + $0x40] sm:$0xff] %vm1627_vm12, %v1596_v49  ;;  %v5180_v52 = vld [vmem:[#allocation2 + $0xbc] ss:$0 sps:$4 sm:$0x11]   ;;  %v889_v59 = vshll.u32 %v6039_v29, 16 }
 0x121   : > { %3692 = vrot.lane.b32.xlu0 %v3658_v13, %s5229_s8  ;;  %3724 = vst.msk [vmem:[#allocation3 + $0x38] sm:$0xff] %vm6355_vm11, %v3683_v14  ;;  %v894_v36 = vshrl.u32 %v4772_v42, 16  ;;  %v1865_v22 = vsel %vm1820_vm6, %v1863_v6, %v1864_v51  ;;  %v1866_v27 = vrot.slane %v5179_v58, 1  ;;  %v897_v62 = vshll.u32 %v4772_v42, 16  ;;  %v1058_v0 = vld [vmem:[#allocation2 + $0xc0] sm:$0xf] }
 0x122   : > { %2972 = vrot.lane.b32.xlu1 %v5164_v3, %s5227_s6  ;;  %v891_v40 = vor.u32 %v889_v59, %v888_v26  ;;  %v892_v32 = vrot.slane %v888_v26, 4  ;;  %v5183_v3 = vld [vmem:[#allocation2 + $0xb4] sm:$0xff]   ;;  %v5184_v43 = vld [vmem:[#allocation2 + $0xbc] ss:$0 sps:$4 sm:$0x11]   ;;  %v527_v37 = vsel %vm5290_vm5, 0, %v526_v60  ;;  %v1578_v29 = vsel %vm1386_vm8, %v1573_v9, %v1577_v50 }
 0x123   : > { %v1598_v16 = vpop.permute.xlu1 %1597  ;;  %v896_v2 = vrot.slane %v894_v36, 7  ;;  %v1867_v12 = vrot.slane %v5180_v52, 1  ;;  %528 = vst [vmem:[#allocation2 + $0xc8] sm:$0x1] %v527_v37  ;;  %v2456_v56 = vshrl.u32 %v5183_v3, 16  ;;  %v2458_v8 = vshll.u32 %v5183_v3, 16 }
 0x124   : > { %v1886_v31 = vpop.permute.xlu0 %1885  ;;  %v1059_v25 = vsel %vm5350_vm9, %v891_v40, %v1058_v0  ;;  %v3739_v5 = vld [vmem:[#allocation3 + $0x30] sm:$0xff]  ;;  %v2463_v4 = vshll.u32 %v5184_v43, 16  ;;  %vm6356_vm1 = vcmask 31744   ;;  %v5188_v17 = vld [vmem:[#allocation2 + $0xb4] sm:$0xfe]   ;;  %vm6357_vm9 = vcmask 27648  }
 0x125   : > { %3694 = vrot.lane.b32.xlu0 %v3661_v45, %s5229_s8  ;;  %1926 = vst.msk [vmem:[#allocation3 + $0x40] sm:$0xff] %vm1917_vm13, %v1886_v31  ;;  %v899_v61 = vor.u32 %v897_v62, %v896_v2  ;;  %1060 = vst [vmem:[#allocation2 + $0xc0] sm:$0xf] %v1059_v25  ;;  %4921 = vmatprep.mubr.msk.bf16.mxu0 %vm3769_vm0, %v3739_v5  ;;  %v2460_v47 = vrot.slane %v2458_v8, 1  ;;  %v5203_v20 = vld [vmem:[#allocation2 + $0x78] sm:$0xff]   ;;  %v1868_v23 = vsel %vm1820_vm6, %v1866_v27, %v1867_v12  ;;  %v5204_v11 = vld [vmem:[#allocation2 + $0x84] sm:$0xff]  }
 0x126   : > { %3405 = vrot.lane.b32.xlu1 %v3354_v53, %s5231_s10  ;;  %1203 = vst.msk [vmem:[#allocation3 + $0x48] sm:$0xff] %vm6356_vm1, %v5192_v10  ;;  %v2465_v18 = vrot.slane %v2463_v4, 1  ;;  %v5189_v57 = vld [vmem:[#allocation2 + $0xbc] ss:$0 sps:$4 sm:$0x11]   ;;  %v901_v63 = vrot.slane %v896_v2, 4  ;;  %vm6359_vm7 = vmmov %vm6356_vm1 }
 0x127   : > { %v900_v14 = vsel %vm5356_vm10, %v892_v32, %v899_v61  ;;  %1637 = vst.msk [vmem:[#allocation3 + $0x48] sm:$0xff] %vm1627_vm12, %v1598_v16  ;;  %v473_v21 = vld [vmem:[#allocation2 + $0xcc] sm:$0x1]  ;;  %v2461_v19 = vor.u32 %v2460_v47, %v2456_v56  ;;  %v2762_v44 = vrot.slane %v5188_v17, 1  ;;  %v2763_v24 = vrot.slane %v5189_v57, 1  ;;  %vm6358_vm10 = vmmov %vm6356_vm1  ;;  %v5205_v38 = vld [vmem:[#allocation2 + $0x90] sm:$0xff]  }
 0x128   : > { %v2063_v54 = vpop.permute.xlu0 %2062  ;;  %v3740_v35 = vld [vmem:[#allocation3 + $0x38] sm:$0xff]  ;;  %1061 = vst.msk [vmem:[#allocation2 + $0xc4] sm:$0xf] %vm6357_vm9, %v900_v14  ;;  %v474_v39 = vsel %vm5278_vm4, 0, %v473_v21  ;;  %v5206_v45 = vld [vmem:[#allocation2 + $0x9c] sm:$0xff]   ;;  %vm6361_vm11 = vmmov %vm6356_vm1  ;;  %vm6364_vm9 = vcmask 294144  }
 0x129   : > { %2103 = vst.msk [vmem:[#allocation3 + $0x40] sm:$0xff] %vm2094_vm14, %v2063_v54  ;;  %1897 = vrot.lane.b32.xlu0 %v1865_v22, %s5224_s28  ;;  %4922 = vmatmul.mubr.msk.bf16.gmra.mrb[12].mxu0 %vm3769_vm0, %v3740_v35  ;;  %v529_v30 = vld [vmem:[#allocation2 + $0xd4] sm:$0x1]  ;;  %475 = vst [vmem:[#allocation2 + $0xcc] sm:$0x1] %v474_v39  ;;  %v2466_v41 = vsel %vm1386_vm8, %v2461_v19, %v2465_v18  ;;  %v2764_v46 = vsel %vm1820_vm6, %v2762_v44, %v2763_v24  ;;  %v5207_v54 = vld [vmem:[#allocation2 + $0xa8] sm:$0xff]  }
 0x12a   : > { %1607 = vrot.lane.b32.xlu1 %v1566_v33, %s5225_s29  ;;  %1204 = vst.msk [vmem:[#allocation3 + $0x50] sm:$0xff] %vm6358_vm10, %v5203_v20  ;;  %v530_v34 = vsel %vm5290_vm5, 0, %v529_v30  ;;  %v1062_v42 = vld [vmem:[#allocation2 + $0xc8] sm:$0x1]  ;;  %vm6360_vm5 = vmmov %vm6356_vm1  ;;  %v5208_v10 = vld [vmem:[#allocation2 + $0xb4] sm:$0xff]  }
 0x12b   : > { %1205 = vst.msk [vmem:[#allocation3 + $0x58] sm:$0xff] %vm6359_vm7, %v5204_v11  ;;  %531 = vst [vmem:[#allocation2 + $0xd4] sm:$0x1] %v530_v34  ;;  %v1063_v7 = vsel %vm5278_vm4, %v901_v63, %v1062_v42  ;;  %v5201_v11 = vld [vmem:[#allocation2 + $0xcc] sm:$0xfe]  }
 0x12c   : > { %1206 = vst.msk [vmem:[#allocation3 + $0x60] sm:$0xff] %vm6360_vm5, %v5205_v38  ;;  %1064 = vst [vmem:[#allocation2 + $0xc8] sm:$0x1] %v1063_v7 }
 0x12d   : > { %2074 = vrot.lane.b32.xlu0 %v5181_v55, %s5226_s30  ;;  %1207 = vst.msk [vmem:[#allocation3 + $0x68] sm:$0xff] %vm6361_vm11, %v5206_v45  ;;  %vm6362_vm4 = vmmov %vm6356_vm1  ;;  %vm6363_vm1 = vcmask 261344  }
 0x12e   : > { %1609 = vrot.lane.b32.xlu1 %v1578_v29, %s5225_s29  ;;  %1208 = vst.msk [vmem:[#allocation3 + $0x70] sm:$0xff] %vm6362_vm4, %v5207_v54  ;;  %vm6365_vm10 = vmmov %vm6362_vm4 }
 0x12f   : > { %v5182_v49 = vld [vmem:[#allocation2 + $0xc0] sm:$0xff]   ;;  %1209 = vst.msk [vmem:[#allocation3 + $0x78] sm:$0xff] %vm6365_vm10, %v5208_v10  ;;  %vm6366_vm7 = vmmov %vm6363_vm1 }
 0x130   : > { %v5185_v53 = vld [vmem:[#allocation2 + $0xc0] sm:$0xff]   ;;  %v5197_v52 = vld [vmem:[#allocation2 + $0xcc] sm:$0xff]   ;;  %vm6367_vm5 = vmmov %vm6364_vm9 }
 0x131   : > { %2507 = vrot.lane.b32.xlu0 %v2466_v41, %s5230_s9  ;;  %v5193_v50 = vld [vmem:[#allocation2 + $0xc0] sm:$0xff]   ;;  %v2470_v6 = vshll.u32 %v5185_v53, 16  ;;  %v2468_v58 = vshrl.u32 %v5185_v53, 16  ;;  %v3370_v2 = vshll.u32 %v5197_v52, 16  ;;  %v3368_v4 = vshrl.u32 %v5197_v52, 16  ;;  %v5194_v57 = vld [vmem:[#allocation2 + $0xcc] sm:$0xff]   ;;  %vm6370_vm11 = vmmov %vm6363_vm1 }
 0x132   : > { %1899 = vrot.lane.b32.xlu1 %v1868_v23, %s5224_s28  ;;  %v5195_v60 = vld [vmem:[#allocation2 + $0xc0] sm:$0xff]   ;;  %v5198_v36 = vld [vmem:[#allocation2 + $0xd4] ss:$0 sps:$4 sm:$0x11]   ;;  %vm6371_vm4 = vmmov %vm6367_vm5 }
 0x133   : > { %v2472_v33 = vrot.slane %v2470_v6, 1  ;;  %v5190_v51 = vld [vmem:[#allocation2 + $0xc0] sm:$0xfe]   ;;  %v5186_v9 = vld [vmem:[#allocation2 + $0xc8] ss:$0 sps:$4 sm:$0x11]   ;;  %vm6373_vm10 = vmmov %vm6363_vm1 }
 0x134   : > { %v3356_v55 = vshrl.u32 %v5195_v60, 16  ;;  %v5191_v26 = vld [vmem:[#allocation2 + $0xc8] ss:$0 sps:$4 sm:$0x11]   ;;  %v3358_v59 = vshll.u32 %v5195_v60, 16  ;;  %v2475_v0 = vshll.u32 %v5186_v9, 16 }
 0x135   : > { %2796 = vrot.lane.b32.xlu0 %v2764_v46, %s5228_s7  ;;  %v2473_v62 = vor.u32 %v2472_v33, %v2468_v58  ;;  %v5196_v16 = vld [vmem:[#allocation2 + $0xc8] ss:$0 sps:$4 sm:$0x11]   ;;  %v2765_v40 = vrot.slane %v5190_v51, 1  ;;  %v2766_v43 = vrot.slane %v5191_v26, 1  ;;  %v3375_v35 = vshll.u32 %v5198_v36, 16 }
 0x136   : > { %2076 = vrot.lane.b32.xlu1 %v5182_v49, %s5226_s30  ;;  %v3360_v32 = vrot.slane %v3358_v59, 1  ;;  %v2477_v3 = vrot.slane %v2475_v0, 1  ;;  %v3363_v37 = vshll.u32 %v5196_v16, 16  ;;  %v5199_v12 = vld [vmem:[#allocation2 + $0xc0] sm:$0xfe]   ;;  %s6171_s30 = scalar_lea.vmem %s6327_s4, %s4739_s20  ;;  %s4411_s20 = sshll.u32 %s6472_s19, 1 }
 0x137   : > { %v5200_v61 = vld [vmem:[#allocation2 + $0xc8] ss:$0 sps:$4 sm:$0x11]   ;;  %v2767_v17 = vsel %vm1820_vm6, %v2765_v40, %v2766_v43  ;;  %v3377_v21 = vrot.slane %v3375_v35, 1 }
 0x138   : > { %v2496_v15 = vpop.permute.xlu0 %2495  ;;  %v3361_v29 = vor.u32 %v3360_v32, %v3356_v55  ;;  %v2478_v56 = vsel %vm1386_vm8, %v2473_v62, %v2477_v3  ;;  %v3365_v8 = vrot.slane %v3363_v37, 1  ;;  %v3663_v14 = vrot.slane %v5200_v61, 1  ;;  %v5202_v19 = vld [vmem:[#allocation2 + $0xd4] ss:$0 sps:$4 sm:$0x11]  }
 0x139   : > { %2536 = vst.msk [vmem:[#allocation3 + $0x40] sm:$0xff] %vm2527_vm15, %v2496_v15  ;;  %2974 = vrot.lane.b32.xlu0 %v5193_v50, %s5227_s6  ;;  %v3662_v15 = vrot.slane %v5199_v12, 1 }
 0x13a   : > { %2509 = vrot.lane.b32.xlu1 %v2478_v56, %s5230_s9  ;;  %v3366_v47 = vsel %vm1386_vm8, %v3361_v29, %v3365_v8 }
 0x13b   : > { %v1888_v13 = vpop.permute.xlu1 %1887  ;;  %v3664_v18 = vsel %vm1820_vm6, %v3662_v15, %v3663_v14 }
 0x13c   : > { %1927 = vst.msk [vmem:[#allocation3 + $0x48] sm:$0xff] %vm1917_vm13, %v1888_v13  ;;  %v3372_v13 = vrot.slane %v3370_v2, 1 }
 0x13d   : > { %v2785_v31 = vpop.permute.xlu0 %2784  ;;  %3407 = vrot.lane.b32.xlu0 %v3366_v47, %s5231_s10 }
 0x13e   : > { %2825 = vst.msk [vmem:[#allocation3 + $0x40] sm:$0xff] %vm2816_vm2, %v2785_v31  ;;  %2798 = vrot.lane.b32.xlu1 %v2767_v17, %s5228_s7  ;;  %v3373_v63 = vor.u32 %v3372_v13, %v3368_v4  ;;  %v3666_v31 = vrot.slane %v5202_v19, 1 }
 0x13f   : > { %v2065_v28 = vpop.permute.xlu1 %2064 }
 0x140   : > { %2104 = vst.msk [vmem:[#allocation3 + $0x48] sm:$0xff] %vm2094_vm14, %v2065_v28  ;;  %v3378_v30 = vsel %vm1386_vm8, %v3373_v63, %v3377_v21  ;;  %v3665_v28 = vrot.slane %v5201_v11, 1  ;;  %vm6369_vm8 = vmmov %vm6367_vm5 }
 0x141   : > { %v2963_v48 = vpop.permute.xlu0 %2962  ;;  %3696 = vrot.lane.b32.xlu0 %v3664_v18, %s5229_s8 }
 0x142   : > { %3003 = vst.msk [vmem:[#allocation3 + $0x40] sm:$0xff] %vm2994_vm3, %v2963_v48  ;;  %2976 = vrot.lane.b32.xlu1 %v5194_v57, %s5227_s6  ;;  %v3667_v41 = vsel %vm1820_vm6, %v3665_v28, %v3666_v31  ;;  %vm6368_vm6 = vmmov %vm6363_vm1 }
 0x143   : > { %v2498_v1 = vpop.permute.xlu1 %2497 }
 0x144   : > { %2537 = vst.msk [vmem:[#allocation3 + $0x48] sm:$0xff] %vm2527_vm15, %v2498_v1 }
 0x145   : > { %v3396_v27 = vpop.permute.xlu0 %3395 }
 0x146   : > { %3436 = vst.msk [vmem:[#allocation3 + $0x40] sm:$0xff] %vm6363_vm1, %v3396_v27  ;;  %3409 = vrot.lane.b32.xlu1 %v3378_v30, %s5231_s10 }
 0x147   : > { %v2787_v22 = vpop.permute.xlu1 %2786 }
 0x148   : > { %2826 = vst.msk [vmem:[#allocation3 + $0x48] sm:$0xff] %vm2816_vm2, %v2787_v22 }
 0x149   : > { %v3685_v5 = vpop.permute.xlu0 %3684 }
 0x14a   : > { %3725 = vst.msk [vmem:[#allocation3 + $0x40] sm:$0xff] %vm6364_vm9, %v3685_v5  ;;  %3698 = vrot.lane.b32.xlu1 %v3667_v41, %s5229_s8  ;;  %vm6372_vm9 = vmmov %vm6371_vm4  ;;  %s235_s8 = scalar_lea.vmem %s6328_s5, %s4411_s20 }
 0x14c   : > { %v2965_v25 = vpop.permute.xlu1 %2964 }
 0x14d   : > { %3004 = vst.msk [vmem:[#allocation3 + $0x48] sm:$0xff] %vm2994_vm3, %v2965_v25 }
 0x151   : > { %v3741_v44 = vld [vmem:[#allocation3 + $0x40] sm:$0xff] }
 0x152   : > { %v3687_v23 = vpop.permute.xlu0 %3686  ;;  %4925 = vmatprep.mubr.msk.bf16.mxu1 %vm3769_vm0, %v3741_v44 }
 0x154   : > { %v3398_v20 = vpop.permute.xlu1 %3397 }
 0x155   : > { %3437 = vst.msk [vmem:[#allocation3 + $0x48] sm:$0xff] %vm6366_vm7, %v3398_v20  ;;  %vm6374_vm7 = vmmov %vm6371_vm4 }
 0x156   : > { %3726 = vst.msk [vmem:[#allocation3 + $0x48] sm:$0xff] %vm6367_vm5, %v3687_v23  ;;  %v1890_v39 = vpop.permute.xlu0 %1889  ;;  %vm6377_vm5 = vcmask 31744  }
 0x158   : > { %v1600_v24 = vpop.permute.xlu1 %1599 }
 0x159   : > { %1638 = vst.msk [vmem:[#allocation3 + $0x50] sm:$0xff] %vm1627_vm12, %v1600_v24 }
 0x15a   : > { %1928 = vst.msk [vmem:[#allocation3 + $0x50] sm:$0xff] %vm1917_vm13, %v1890_v39  ;;  %v2067_v38 = vpop.permute.xlu0 %2066 }
 0x15b   : > { %2105 = vst.msk [vmem:[#allocation3 + $0x50] sm:$0xff] %vm2094_vm14, %v2067_v38 }
 0x15c   : > { %v1602_v34 = vpop.permute.xlu1 %1601 }
 0x15d   : > { %1639 = vst.msk [vmem:[#allocation3 + $0x58] sm:$0xff] %vm1627_vm12, %v1602_v34  ;;  %v3742_v42 = vld [vmem:[#allocation3 + $0x48] sm:$0xff] }
 0x15e   : > { %4926 = vmatmul.mubr.msk.bf16.vlgmr.msra.gmra.mrb[0].mxu1 %vm3769_vm0, %v3742_v42  ;;  %v2500_v7 = vpop.permute.xlu0 %2499 }
 0x15f   : > { %2538 = vst.msk [vmem:[#allocation3 + $0x50] sm:$0xff] %vm2527_vm15, %v2500_v7 }
 0x160   : > { %v1892_v45 = vpop.permute.xlu1 %1891 }
 0x161   : > { %1929 = vst.msk [vmem:[#allocation3 + $0x58] sm:$0xff] %vm1917_vm13, %v1892_v45 }
 0x162   : > { %v2789_v46 = vpop.permute.xlu0 %2788 }
 0x163   : > { %2827 = vst.msk [vmem:[#allocation3 + $0x50] sm:$0xff] %vm2816_vm2, %v2789_v46 }
 0x164   : > { %v2069_v48 = vpop.permute.xlu1 %2068 }
 0x165   : > { %2106 = vst.msk [vmem:[#allocation3 + $0x58] sm:$0xff] %vm2094_vm14, %v2069_v48 }
 0x166   : > { %v2967_v49 = vpop.permute.xlu0 %2966 }
 0x167   : > { %3005 = vst.msk [vmem:[#allocation3 + $0x50] sm:$0xff] %vm2994_vm3, %v2967_v49 }
 0x16a   : > { %v2502_v53 = vpop.permute.xlu1 %2501 }
 0x16b   : > { %2539 = vst.msk [vmem:[#allocation3 + $0x58] sm:$0xff] %vm2527_vm15, %v2502_v53 }
 0x16d   : > { %v3400_v50 = vpop.permute.xlu0 %3399 }
 0x16e   : > { %v2791_v6 = vpop.permute.xlu1 %2790  ;;  %3438 = vst.msk [vmem:[#allocation3 + $0x50] sm:$0xff] %vm6368_vm6, %v3400_v50 }
 0x16f   : > { %2828 = vst.msk [vmem:[#allocation3 + $0x58] sm:$0xff] %vm2816_vm2, %v2791_v6 }
 0x171   : > { %v3689_v1 = vpop.permute.xlu0 %3688 }
 0x172   : > { %v2969_v58 = vpop.permute.xlu1 %2968  ;;  %3727 = vst.msk [vmem:[#allocation3 + $0x50] sm:$0xff] %vm6369_vm8, %v3689_v1  ;;  %vm6379_vm8 = vmmov %vm6377_vm5 }
 0x173   : > { %3006 = vst.msk [vmem:[#allocation3 + $0x58] sm:$0xff] %vm2994_vm3, %v2969_v58 }
 0x175   : > { %v3691_v60 = vpop.permute.xlu0 %3690 }
 0x176   : > { %v3402_v33 = vpop.permute.xlu1 %3401 }
 0x177   : > { %3439 = vst.msk [vmem:[#allocation3 + $0x58] sm:$0xff] %vm6370_vm11, %v3402_v33  ;;  %vm6380_vm11 = vmmov %vm6377_vm5 }
 0x178   : > { %3728 = vst.msk [vmem:[#allocation3 + $0x58] sm:$0xff] %vm6371_vm4, %v3691_v60  ;;  %vm6381_vm4 = vmmov %vm6377_vm5 }
 0x179   : > { %v3743_v51 = vld [vmem:[#allocation3 + $0x50] sm:$0xff]  ;;  %v1894_v54 = vpop.permute.xlu0 %1893 }
 0x17a   : > { %v1604_v52 = vpop.permute.xlu1 %1603  ;;  %4929 = vmatprep.mubr.msk.bf16.mxu1 %vm3769_vm0, %v3743_v51 }
 0x17b   : > { %1640 = vst.msk [vmem:[#allocation3 + $0x60] sm:$0xff] %vm1627_vm12, %v1604_v52 }
 0x17c   : > { %1930 = vst.msk [vmem:[#allocation3 + $0x60] sm:$0xff] %vm1917_vm13, %v1894_v54 }
 0x17d   : > { %v2071_v55 = vpop.permute.xlu0 %2070 }
 0x17e   : > { %v1606_v9 = vpop.permute.xlu1 %1605  ;;  %2107 = vst.msk [vmem:[#allocation3 + $0x60] sm:$0xff] %vm2094_vm14, %v2071_v55 }
 0x17f   : > { %1641 = vst.msk [vmem:[#allocation3 + $0x68] sm:$0xff] %vm1627_vm12, %v1606_v9  ;;  %v3744_v26 = vld [vmem:[#allocation3 + $0x58] sm:$0xff] }
 0x180   : > { %4930 = vmatmul.mubr.msk.bf16.gmra.mrb[4].mxu1 %vm3769_vm0, %v3744_v26 }
 0x181   : > { %v2504_v36 = vpop.permute.xlu0 %2503 }
 0x182   : > { %v1896_v59 = vpop.permute.xlu1 %1895  ;;  %2540 = vst.msk [vmem:[#allocation3 + $0x60] sm:$0xff] %vm2527_vm15, %v2504_v36 }
 0x183   : > { %1931 = vst.msk [vmem:[#allocation3 + $0x68] sm:$0xff] %vm1917_vm13, %v1896_v59 }
 0x185   : > { %v2793_v22 = vpop.permute.xlu0 %2792 }
 0x186   : > { %v2073_v27 = vpop.permute.xlu1 %2072  ;;  %2829 = vst.msk [vmem:[#allocation3 + $0x60] sm:$0xff] %vm2816_vm2, %v2793_v22 }
 0x187   : > { %2108 = vst.msk [vmem:[#allocation3 + $0x68] sm:$0xff] %vm2094_vm14, %v2073_v27 }
 0x189   : > { %v2971_v62 = vpop.permute.xlu0 %2970 }
 0x18a   : > { %3007 = vst.msk [vmem:[#allocation3 + $0x60] sm:$0xff] %vm2994_vm3, %v2971_v62 }
 0x18c   : > { %v2506_v0 = vpop.permute.xlu1 %2505 }
 0x18d   : > { %2541 = vst.msk [vmem:[#allocation3 + $0x68] sm:$0xff] %vm2527_vm15, %v2506_v0 }
 0x18f   : > { %v3404_v40 = vpop.permute.xlu0 %3403 }
 0x190   : > { %v2795_v16 = vpop.permute.xlu1 %2794  ;;  %3440 = vst.msk [vmem:[#allocation3 + $0x60] sm:$0xff] %vm6363_vm1, %v3404_v40  ;;  %vm6383_vm1 = vmmov %vm6381_vm4 }
 0x191   : > { %2830 = vst.msk [vmem:[#allocation3 + $0x68] sm:$0xff] %vm2816_vm2, %v2795_v16 }
 0x193   : > { %v3693_v2 = vpop.permute.xlu0 %3692 }
 0x194   : > { %v2973_v32 = vpop.permute.xlu1 %2972  ;;  %3729 = vst.msk [vmem:[#allocation3 + $0x60] sm:$0xff] %vm6372_vm9, %v3693_v2  ;;  %vm6384_vm9 = vmmov %vm6383_vm1 }
 0x195   : > { %3008 = vst.msk [vmem:[#allocation3 + $0x68] sm:$0xff] %vm2994_vm3, %v2973_v32 }
 0x197   : > { %v3695_v3 = vpop.permute.xlu0 %3694 }
 0x198   : > { %v3406_v43 = vpop.permute.xlu1 %3405 }
 0x199   : > { %3441 = vst.msk [vmem:[#allocation3 + $0x68] sm:$0xff] %vm6373_vm10, %v3406_v43  ;;  %vm6385_vm10 = vmmov %vm6383_vm1 }
 0x19a   : > { %3730 = vst.msk [vmem:[#allocation3 + $0x68] sm:$0xff] %vm6374_vm7, %v3695_v3  ;;  %vm6386_vm7 = vmmov %vm6383_vm1 }
 0x19b   : > { %v1898_v37 = vpop.permute.xlu0 %1897  ;;  %v3745_v10 = vld [vmem:[#allocation3 + $0x60] sm:$0xff] }
 0x19c   : > { %v1608_v29 = vpop.permute.xlu1 %1607  ;;  %4933 = vmatprep.mubr.msk.bf16.mxu1 %vm3769_vm0, %v3745_v10 }
 0x19d   : > { %1642 = vst.msk [vmem:[#allocation3 + $0x70] sm:$0xff] %vm1627_vm12, %v1608_v29 }
 0x19e   : > { %1932 = vst.msk [vmem:[#allocation3 + $0x70] sm:$0xff] %vm1917_vm13, %v1898_v37 }
 0x19f   : > { %v2075_v12 = vpop.permute.xlu0 %2074 }
 0x1a0   : > { %v1610_v61 = vpop.permute.xlu1 %1609  ;;  %2109 = vst.msk [vmem:[#allocation3 + $0x70] sm:$0xff] %vm2094_vm14, %v2075_v12 }
 0x1a1   : > { %1643 = vst.msk [vmem:[#allocation3 + $0x78] sm:$0xff] %vm1627_vm12, %v1610_v61  ;;  %v3746_v25 = vld [vmem:[#allocation3 + $0x68] sm:$0xff]  ;;  %vm6375_vm12 = vcmask 27648  }
 0x1a2   : > { %4934 = vmatmul.mubr.msk.bf16.gmra.mrb[8].mxu1 %vm3769_vm0, %v3746_v25  ;;  %vm6378_vm6 = vmmov %vm6375_vm12 }
 0x1a3   : > { %v2508_v56 = vpop.permute.xlu0 %2507 }
 0x1a4   : > { %v1900_v5 = vpop.permute.xlu1 %1899  ;;  %2542 = vst.msk [vmem:[#allocation3 + $0x70] sm:$0xff] %vm2527_vm15, %v2508_v56 }
 0x1a5   : > { %1933 = vst.msk [vmem:[#allocation3 + $0x78] sm:$0xff] %vm1917_vm13, %v1900_v5  ;;  %vm6376_vm13 = vmmov %vm6375_vm12 }
 0x1a7   : > { %v2797_v17 = vpop.permute.xlu0 %2796 }
 0x1a8   : > { %v2077_v14 = vpop.permute.xlu1 %2076  ;;  %2831 = vst.msk [vmem:[#allocation3 + $0x70] sm:$0xff] %vm2816_vm2, %v2797_v17 }
 0x1a9   : > { %v4911_v8 = vpop.f32.mrb[0].mxu0  ;;  %2110 = vst.msk [vmem:[#allocation3 + $0x78] sm:$0xff] %vm2094_vm14, %v2077_v14  ;;  %vm6382_vm14 = vmmov %vm6378_vm6 }
 0x1aa   : > { %v4775_v4 = vpack.c.bf16 %v4911_v8, %v4911_v8  ;;  %v3856_v13 = vpop.f32.mrb[1].mxu0  ;;  %v4216_v57 = vmul.f32 %v4911_v8, %v4911_v8  ;;  %v4146_v24 = vsel %vm6380_vm11, %v4911_v8, 0.0 }
 0x1ab   : > { %v4773_v35 = vpack.c.bf16 %v3856_v13, %v3856_v13  ;;  %v4912_v15 = vpop.f32.mrb[2].mxu0  ;;  %v4214_v47 = vmul.f32 %v3856_v13, %v3856_v13  ;;  %v4143_v23 = vsel %vm6377_vm5, %v3856_v13, 0.0  ;;  %v2975_v44 = vpop.permute.xlu0 %2974  ;;  %vm6389_vm5 = vmmov %vm6378_vm6 }
 0x1ac   : > { %4113 = vst.msk [vmem:[%s6171_s30 + $0x8] sm:$0xf] %vm6375_vm12, %v4775_v4  ;;  %v4776_v18 = vpack.c.bf16 %v4912_v15, %v4912_v15  ;;  %v3859_v20 = vpop.f32.mrb[3].mxu0  ;;  %v4217_v30 = vmul.f32 %v4912_v15, %v4912_v15  ;;  %v4249_v38 = vsel %vm6384_vm9, %v4216_v57, 0.0  ;;  %v4148_v41 = vsel %vm6385_vm10, %v4912_v15, 0.0  ;;  %v2510_v48 = vpop.permute.xlu1 %2509  ;;  %vm6387_vm12 = vmmov %vm6383_vm1 }
 0x1ad   : > { %4111 = vst.msk [vmem:[%s6171_s30] sm:$0xf] %vm6376_vm13, %v4773_v35  ;;  %v4774_v63 = vpack.c.bf16 %v3859_v20, %v3859_v20  ;;  %v4144_v21 = vsel %vm6379_vm8, %v3859_v20, 0.0  ;;  %v4215_v11 = vmul.f32 %v3859_v20, %v3859_v20  ;;  %v4246_v39 = vsel %vm6381_vm4, %v4214_v47, 0.0  ;;  %vm6392_vm8 = vmmov %vm6383_vm1 }
 0x1ae   : > { %4114 = vst.msk [vmem:[%s6171_s30 + $0xc] sm:$0xf] %vm6378_vm6, %v4776_v18  ;;  %v4145_v19 = vadd.f32 %v4144_v21, %v4143_v23  ;;  %v4251_v7 = vsel %vm6386_vm7, %v4217_v30, 0.0  ;;  %vm6388_vm13 = vcmask 261344   ;;  %vm6390_vm6 = vmmov %vm6389_vm5 }
 0x1af   : > { %4112 = vst.msk [vmem:[%s6171_s30 + $0x4] sm:$0xf] %vm6382_vm14, %v4774_v63  ;;  %v4247_v28 = vsel %vm6383_vm1, %v4215_v11, 0.0  ;;  %v3408_v6 = vpop.permute.xlu0 %3407  ;;  %vm6393_vm11 = vmmov %vm6389_vm5 }
 0x1b0   : > { %3009 = vst.msk [vmem:[#allocation3 + $0x70] sm:$0xff] %vm2994_vm3, %v2975_v44  ;;  %v4147_v31 = vadd.f32 %v4146_v24, %v4145_v19  ;;  %v4248_v34 = vadd.f32 %v4247_v28, %v4246_v39  ;;  %v2799_v9 = vpop.permute.xlu1 %2798  ;;  %vm6394_vm4 = vmmov %vm6383_vm1 }
 0x1b1   : > { %2543 = vst.msk [vmem:[#allocation3 + $0x78] sm:$0xff] %vm2527_vm15, %v2510_v48  ;;  %vm6391_vm15 = vmmov %vm6383_vm1  ;;  %vm6396_vm1 = vcmask 294144  }
 0x1b2   : > { %v4250_v42 = vadd.f32 %v4249_v38, %v4248_v34  ;;  %v4149_v45 = vadd.f32 %v4148_v41, %v4147_v31  ;;  %3442 = vst.msk [vmem:[#allocation3 + $0x70] sm:$0xff] %vm6388_vm13, %v3408_v6  ;;  %vm6395_vm14 = vmmov %vm6389_vm5 }
 0x1b3   : > { %2832 = vst.msk [vmem:[#allocation3 + $0x78] sm:$0xff] %vm2816_vm2, %v2799_v9  ;;  %v3697_v0 = vpop.permute.xlu0 %3696  ;;  %vm6397_vm9 = vmmov %vm6394_vm4 }
 0x1b4   : > { %v4252_v46 = vadd.f32 %v4251_v7, %v4250_v42  ;;  %3731 = vst.msk [vmem:[#allocation3 + $0x70] sm:$0xff] %vm6396_vm1, %v3697_v0  ;;  %v2977_v3 = vpop.permute.xlu1 %2976  ;;  %vm6398_vm10 = vmmov %vm6394_vm4 }
 0x1b5   : > { %3010 = vst.msk [vmem:[#allocation3 + $0x78] sm:$0xff] %vm2994_vm3, %v2977_v3  ;;  %vm6399_vm2 = vmmov %vm6394_vm4 }
 0x1b6   : > { %vm6400_vm7 = vmmov %vm6399_vm2 }
 0x1b7   : > { %vm6403_vm3 = vmmov %vm6399_vm2 }
 0x1b8   : > { %v3410_v25 = vpop.permute.xlu1 %3409 }
 0x1ba   : > { %v4915_v49 = vpop.f32.mrb[4].mxu0 }
 0x1bb   : > { %v4779_v53 = vpack.c.bf16 %v4915_v49, %v4915_v49  ;;  %v3872_v50 = vpop.f32.mrb[5].mxu0  ;;  %v4220_v36 = vmul.f32 %v4915_v49, %v4915_v49  ;;  %v4154_v16 = vsel %vm6394_vm4, %v4915_v49, 0.0  ;;  %v3747_v56 = vld [vmem:[#allocation3 + $0x70] sm:$0xff]  ;;  %vm6409_vm4 = vmmov %vm6389_vm5 }
 0x1bc   : > { %v4777_v1 = vpack.c.bf16 %v3872_v50, %v3872_v50  ;;  %v4150_v58 = vsel %vm6387_vm12, %v3872_v50, 0.0  ;;  %v4218_v60 = vmul.f32 %v3872_v50, %v3872_v50  ;;  %v4916_v33 = vpop.f32.mrb[6].mxu0  ;;  %vm6401_vm12 = vmmov %vm6388_vm13  ;;  %4937 = vmatprep.mubr.msk.bf16.mxu1 %vm3769_vm0, %v3747_v56  ;;  %v3699_v8 = vpop.permute.xlu1 %3698 }
 0x1bd   : > { %4117 = vst.msk [vmem:[%s6171_s30 + $0x18] sm:$0xf] %vm6389_vm5, %v4779_v53  ;;  %v4151_v51 = vadd.f32 %v4150_v58, %v4149_v45  ;;  %v4780_v52 = vpack.c.bf16 %v4916_v33, %v4916_v33  ;;  %v3875_v54 = vpop.f32.mrb[7].mxu0  ;;  %v4221_v40 = vmul.f32 %v4916_v33, %v4916_v33  ;;  %v4156_v43 = vsel %vm6398_vm10, %v4916_v33, 0.0  ;;  %vm6402_vm13 = vmmov %vm6396_vm1 }
 0x1be   : > { %4115 = vst.msk [vmem:[%s6171_s30 + $0x10] sm:$0xf] %vm6390_vm6, %v4777_v1  ;;  %v4253_v55 = vsel %vm6391_vm15, %v4218_v60, 0.0  ;;  %v4778_v26 = vpack.c.bf16 %v3875_v54, %v3875_v54  ;;  %v4152_v59 = vsel %vm6392_vm8, %v3875_v54, 0.0  ;;  %v4219_v62 = vmul.f32 %v3875_v54, %v3875_v54  ;;  %vm6404_vm6 = vmmov %vm6389_vm5 }
 0x1bf   : > { %v4254_v22 = vadd.f32 %v4253_v55, %v4252_v46  ;;  %4118 = vst.msk [vmem:[%s6171_s30 + $0x1c] sm:$0xf] %vm6393_vm11, %v4780_v52  ;;  %v4153_v27 = vadd.f32 %v4152_v59, %v4151_v51  ;;  %v4257_v10 = vsel %vm6399_vm2, %v4220_v36, 0.0  ;;  %v4259_v61 = vsel %vm6400_vm7, %v4221_v40, 0.0  ;;  %vm6405_vm15 = vmmov %vm6399_vm2 }
 0x1c0   : > { %4116 = vst.msk [vmem:[%s6171_s30 + $0x14] sm:$0xf] %vm6395_vm14, %v4778_v26  ;;  %v4255_v2 = vsel %vm6397_vm9, %v4219_v62, 0.0  ;;  %vm6407_vm8 = vmmov %vm6389_vm5 }
 0x1c1   : > { %v4155_v32 = vadd.f32 %v4154_v16, %v4153_v27  ;;  %v4256_v37 = vadd.f32 %v4255_v2, %v4254_v22  ;;  %3443 = vst.msk [vmem:[#allocation3 + $0x78] sm:$0xff] %vm6401_vm12, %v3410_v25  ;;  %vm6415_vm7 = vmmov %vm6409_vm4 }
 0x1c2   : > { %3732 = vst.msk [vmem:[#allocation3 + $0x78] sm:$0xff] %vm6402_vm13, %v3699_v8  ;;  %vm6416_vm12 = vmmov %vm6409_vm4 }
 0x1c3   : > { %v4157_v29 = vadd.f32 %v4156_v43, %v4155_v32  ;;  %v4258_v12 = vadd.f32 %v4257_v10, %v4256_v37 }
 0x1c5   : > { %v4260_v5 = vadd.f32 %v4259_v61, %v4258_v12 }
 0x1c9   : > { %v3748_v4 = vld [vmem:[#allocation3 + $0x78] sm:$0xff] }
 0x1ca   : > { %4938 = vmatmul.mubr.msk.bf16.gmra.mrb[12].mxu1 %vm3769_vm0, %v3748_v4  ;;  %vm6406_vm0 = vmmov %vm6399_vm2 }
 0x1cb   : > { %vm6408_vm11 = vmmov %vm6406_vm0 }
 0x1cc   : > { %vm6410_vm14 = vmmov %vm6406_vm0 }
 0x1cd   : > { %vm6411_vm1 = vmmov %vm6406_vm0 }
 0x1ce   : > { %vm6412_vm9 = vmmov %vm6406_vm0 }
 0x1cf   : > { %vm6413_vm10 = vmmov %vm6406_vm0 }
 0x1d0   : > { %vm6414_vm2 = vmmov %vm6406_vm0 }
 0x1d1   : > { %vm6417_vm13 = vmmov %vm6406_vm0 }
 0x1db   : > { %v4919_v13 = vpop.f32.mrb[8].mxu0 }
 0x1dc   : > { %v4783_v35 = vpack.c.bf16 %v4919_v13, %v4919_v13  ;;  %v3888_v15 = vpop.f32.mrb[9].mxu0  ;;  %v4224_v19 = vmul.f32 %v4919_v13, %v4919_v13  ;;  %v4162_v30 = vsel %vm6408_vm11, %v4919_v13, 0.0  ;;  %vm6423_vm11 = vmmov %vm6406_vm0 }
 0x1dd   : > { %v4781_v14 = vpack.c.bf16 %v3888_v15, %v3888_v15  ;;  %v4158_v17 = vsel %vm6403_vm3, %v3888_v15, 0.0  ;;  %v4222_v47 = vmul.f32 %v3888_v15, %v3888_v15  ;;  %v4920_v18 = vpop.f32.mrb[10].mxu0  ;;  %vm6418_vm3 = vmmov %vm6406_vm0 }
 0x1de   : > { %4121 = vst.msk [vmem:[%s6171_s30 + $0x28] sm:$0xf] %vm6389_vm5, %v4783_v35  ;;  %v4159_v57 = vadd.f32 %v4158_v17, %v4157_v29  ;;  %v4784_v20 = vpack.c.bf16 %v4920_v18, %v4920_v18  ;;  %v3891_v23 = vpop.f32.mrb[11].mxu0  ;;  %v4225_v28 = vmul.f32 %v4920_v18, %v4920_v18  ;;  %v4164_v38 = vsel %vm6411_vm1, %v4920_v18, 0.0  ;;  %vm6419_vm5 = vmmov %vm6409_vm4 }
 0x1df   : > { %4119 = vst.msk [vmem:[%s6171_s30 + $0x20] sm:$0xf] %vm6404_vm6, %v4781_v14  ;;  %v4261_v63 = vsel %vm6405_vm15, %v4222_v47, 0.0  ;;  %v4782_v21 = vpack.c.bf16 %v3891_v23, %v3891_v23  ;;  %v4160_v11 = vsel %vm6406_vm0, %v3891_v23, 0.0  ;;  %v4223_v39 = vmul.f32 %v3891_v23, %v3891_v23  ;;  %vm6420_vm6 = vmmov %vm6406_vm0 }
 0x1e0   : > { %v4262_v44 = vadd.f32 %v4261_v63, %v4260_v5  ;;  %4122 = vst.msk [vmem:[%s6171_s30 + $0x2c] sm:$0xf] %vm6407_vm8, %v4784_v20  ;;  %v4161_v24 = vadd.f32 %v4160_v11, %v4159_v57  ;;  %v4265_v42 = vsel %vm6412_vm9, %v4224_v19, 0.0  ;;  %v4267_v46 = vsel %vm6413_vm10, %v4225_v28, 0.0  ;;  %vm6421_vm15 = vmmov %vm6409_vm4 }
 0x1e1   : > { %4120 = vst.msk [vmem:[%s6171_s30 + $0x24] sm:$0xf] %vm6409_vm4, %v4782_v21  ;;  %v4263_v34 = vsel %vm6410_vm14, %v4223_v39, 0.0  ;;  %vm6422_vm8 = vmmov %vm6406_vm0 }
 0x1e2   : > { %v4163_v31 = vadd.f32 %v4162_v30, %v4161_v24  ;;  %v4264_v41 = vadd.f32 %v4263_v34, %v4262_v44  ;;  %vm6424_vm4 = vmmov %vm6406_vm0 }
 0x1e3   : > { %vm6425_vm14 = vmmov %vm6406_vm0 }
 0x1e4   : > { %v4165_v45 = vadd.f32 %v4164_v38, %v4163_v31  ;;  %v4266_v7 = vadd.f32 %v4265_v42, %v4264_v41  ;;  %vm6426_vm1 = vmmov %vm6419_vm5 }
 0x1e5   : > { %vm6427_vm9 = vmmov %vm6426_vm1 }
 0x1e6   : > { %v4268_v48 = vadd.f32 %v4267_v46, %v4266_v7  ;;  %vm6428_vm10 = vmmov %vm6406_vm0 }
 0x1fc   : > { %v4923_v49 = vpop.f32.mrb[12].mxu0 }
 0x1fd   : > { %v4787_v53 = vpack.c.bf16 %v4923_v49, %v4923_v49  ;;  %v3904_v50 = vpop.f32.mrb[13].mxu0  ;;  %v4228_v26 = vmul.f32 %v4923_v49, %v4923_v49  ;;  %v4170_v27 = vsel %vm6420_vm6, %v4923_v49, 0.0  ;;  %vm6435_vm6 = vmmov %vm6406_vm0 }
 0x1fe   : > { %v4785_v6 = vpack.c.bf16 %v3904_v50, %v3904_v50  ;;  %v4166_v1 = vsel %vm6414_vm2, %v3904_v50, 0.0  ;;  %v4226_v58 = vmul.f32 %v3904_v50, %v3904_v50  ;;  %v4924_v60 = vpop.f32.mrb[14].mxu0  ;;  %vm6429_vm2 = vmmov %vm6406_vm0 }
 0x1ff   : > { %4125 = vst.msk [vmem:[%s6171_s30 + $0x38] sm:$0xf] %vm6415_vm7, %v4787_v53  ;;  %v4167_v33 = vadd.f32 %v4166_v1, %v4165_v45  ;;  %v4788_v51 = vpack.c.bf16 %v4924_v60, %v4924_v60  ;;  %v3907_v52 = vpop.f32.mrb[15].mxu0  ;;  %v4229_v62 = vmul.f32 %v4924_v60, %v4924_v60  ;;  %v4172_v40 = vsel %vm6422_vm8, %v4924_v60, 0.0  ;;  %vm6430_vm7 = vmmov %vm6426_vm1 }
 0x200   : > { %4123 = vst.msk [vmem:[%s6171_s30 + $0x30] sm:$0xf] %vm6416_vm12, %v4785_v6  ;;  %v4269_v54 = vsel %vm6417_vm13, %v4226_v58, 0.0  ;;  %v4786_v9 = vpack.c.bf16 %v3907_v52, %v3907_v52  ;;  %v4168_v55 = vsel %vm6418_vm3, %v3907_v52, 0.0  ;;  %v4227_v22 = vmul.f32 %v3907_v52, %v3907_v52  ;;  %vm6431_vm12 = vmmov %vm6406_vm0 }
 0x201   : > { %v4270_v59 = vadd.f32 %v4269_v54, %v4268_v48  ;;  %4126 = vst.msk [vmem:[%s6171_s30 + $0x3c] sm:$0xf] %vm6419_vm5, %v4788_v51  ;;  %v4169_v36 = vadd.f32 %v4168_v55, %v4167_v33  ;;  %v4273_v2 = vsel %vm6423_vm11, %v4228_v26, 0.0  ;;  %v4275_v37 = vsel %vm6424_vm4, %v4229_v62, 0.0  ;;  %vm6432_vm13 = vmmov %vm6426_vm1 }
 0x202   : > { %4124 = vst.msk [vmem:[%s6171_s30 + $0x34] sm:$0xf] %vm6421_vm15, %v4786_v9  ;;  %v4271_v16 = vsel %vm6406_vm0, %v4227_v22, 0.0  ;;  %vm6433_vm3 = vmmov %vm6406_vm0 }
 0x203   : > { %v4171_v0 = vadd.f32 %v4170_v27, %v4169_v36  ;;  %v4272_v32 = vadd.f32 %v4271_v16, %v4270_v59  ;;  %vm6434_vm5 = vmmov %vm6406_vm0 }
 0x204   : > { %vm6436_vm15 = vmmov %vm6406_vm0 }
 0x205   : > { %v4173_v3 = vadd.f32 %v4172_v40, %v4171_v0  ;;  %v4274_v43 = vadd.f32 %v4273_v2, %v4272_v32  ;;  %vm6437_vm8 = vmmov %vm6426_vm1 }
 0x206   : > { %vm6438_vm11 = vmmov %vm6426_vm1 }
 0x207   : > { %v4276_v10 = vadd.f32 %v4275_v37, %v4274_v43  ;;  %vm6439_vm4 = vmmov %vm6406_vm0 }
 0x231   : > { %v4927_v29 = vpop.f32.mrb[0].mxu1 }
 0x232   : > { %v4791_v12 = vpack.c.bf16 %v4927_v29, %v4927_v29  ;;  %v3920_v61 = vpop.f32.mrb[1].mxu1  ;;  %v4232_v47 = vmul.f32 %v4927_v29, %v4927_v29  ;;  %v4178_v23 = vsel %vm6431_vm12, %v4927_v29, 0.0  ;;  %vm6445_vm12 = vmmov %vm6406_vm0 }
 0x233   : > { %v4789_v25 = vpack.c.bf16 %v3920_v61, %v3920_v61  ;;  %v4174_v5 = vsel %vm6425_vm14, %v3920_v61, 0.0  ;;  %v4230_v56 = vmul.f32 %v3920_v61, %v3920_v61  ;;  %v4928_v8 = vpop.f32.mrb[2].mxu1  ;;  %vm6440_vm14 = vmmov %vm6406_vm0 }
 0x234   : > { %4129 = vst.msk [vmem:[%s6171_s30 + $0x48] sm:$0xf] %vm6426_vm1, %v4791_v12  ;;  %v4175_v4 = vadd.f32 %v4174_v5, %v4173_v3  ;;  %v4792_v13 = vpack.c.bf16 %v4928_v8, %v4928_v8  ;;  %v3923_v35 = vpop.f32.mrb[3].mxu1  ;;  %v4233_v63 = vmul.f32 %v4928_v8, %v4928_v8  ;;  %v4180_v19 = vsel %vm6434_vm5, %v4928_v8, 0.0  ;;  %vm6448_vm5 = vmmov %vm6426_vm1 }
 0x235   : > { %4127 = vst.msk [vmem:[%s6171_s30 + $0x40] sm:$0xf] %vm6427_vm9, %v4789_v25  ;;  %v4277_v15 = vsel %vm6428_vm10, %v4230_v56, 0.0  ;;  %v4790_v14 = vpack.c.bf16 %v3923_v35, %v3923_v35  ;;  %v4176_v17 = vsel %vm6429_vm2, %v3923_v35, 0.0  ;;  %v4231_v20 = vmul.f32 %v3923_v35, %v3923_v35  ;;  %vm6441_vm9 = vmmov %vm6406_vm0 }
 0x236   : > { %v4278_v18 = vadd.f32 %v4277_v15, %v4276_v10  ;;  %4130 = vst.msk [vmem:[%s6171_s30 + $0x4c] sm:$0xf] %vm6430_vm7, %v4792_v13  ;;  %v4177_v57 = vadd.f32 %v4176_v17, %v4175_v4  ;;  %v4281_v24 = vsel %vm6435_vm6, %v4232_v47, 0.0  ;;  %v4283_v28 = vsel %vm6436_vm15, %v4233_v63, 0.0  ;;  %vm6442_vm10 = vmmov %vm6426_vm1 }
 0x237   : > { %4128 = vst.msk [vmem:[%s6171_s30 + $0x44] sm:$0xf] %vm6432_vm13, %v4790_v14  ;;  %v4279_v11 = vsel %vm6433_vm3, %v4231_v20, 0.0  ;;  %vm6443_vm2 = vmmov %vm6406_vm0 }
 0x238   : > { %v4179_v21 = vadd.f32 %v4178_v23, %v4177_v57  ;;  %v4280_v44 = vadd.f32 %v4279_v11, %v4278_v18  ;;  %vm6444_vm7 = vmmov %vm6406_vm0 }
 0x239   : > { %vm6446_vm13 = vmmov %vm6406_vm0 }
 0x23a   : > { %v4181_v39 = vadd.f32 %v4180_v19, %v4179_v21  ;;  %v4282_v30 = vadd.f32 %v4281_v24, %v4280_v44  ;;  %vm6447_vm3 = vmmov %vm6406_vm0 }
 0x23b   : > { %vm6449_vm6 = vmmov %vm6426_vm1 }
 0x23c   : > { %v4284_v31 = vadd.f32 %v4283_v28, %v4282_v30  ;;  %vm6450_vm15 = vmmov %vm6406_vm0 }
 0x253   : > { %v4931_v34 = vpop.f32.mrb[4].mxu1 }
 0x254   : > { %v4795_v38 = vpack.c.bf16 %v4931_v34, %v4931_v34  ;;  %v3936_v41 = vpop.f32.mrb[5].mxu1  ;;  %v4236_v58 = vmul.f32 %v4931_v34, %v4931_v34  ;;  %v4186_v52 = vsel %vm6441_vm9, %v4931_v34, 0.0  ;;  %vm6456_vm9 = vmmov %vm6406_vm0 }
 0x255   : > { %v4793_v42 = vpack.c.bf16 %v3936_v41, %v3936_v41  ;;  %v4182_v45 = vsel %vm6406_vm0, %v3936_v41, 0.0  ;;  %v4234_v7 = vmul.f32 %v3936_v41, %v3936_v41  ;;  %v4932_v46 = vpop.f32.mrb[6].mxu1 }
 0x256   : > { %4133 = vst.msk [vmem:[%s6171_s30 + $0x58] sm:$0xf] %vm6437_vm8, %v4795_v38  ;;  %v4183_v48 = vadd.f32 %v4182_v45, %v4181_v39  ;;  %v4796_v49 = vpack.c.bf16 %v4932_v46, %v4932_v46  ;;  %v3939_v53 = vpop.f32.mrb[7].mxu1  ;;  %v4237_v54 = vmul.f32 %v4932_v46, %v4932_v46  ;;  %v4188_v26 = vsel %vm6444_vm7, %v4932_v46, 0.0  ;;  %vm6451_vm8 = vmmov %vm6426_vm1 }
 0x257   : > { %4131 = vst.msk [vmem:[%s6171_s30 + $0x50] sm:$0xf] %vm6438_vm11, %v4793_v42  ;;  %v4285_v50 = vsel %vm6439_vm4, %v4234_v7, 0.0  ;;  %v4794_v6 = vpack.c.bf16 %v3939_v53, %v3939_v53  ;;  %v4184_v1 = vsel %vm6440_vm14, %v3939_v53, 0.0  ;;  %v4235_v51 = vmul.f32 %v3939_v53, %v3939_v53  ;;  %vm6452_vm11 = vmmov %vm6406_vm0 }
 0x258   : > { %v4286_v60 = vadd.f32 %v4285_v50, %v4284_v31  ;;  %4134 = vst.msk [vmem:[%s6171_s30 + $0x5c] sm:$0xf] %vm6426_vm1, %v4796_v49  ;;  %v4185_v33 = vadd.f32 %v4184_v1, %v4183_v48  ;;  %v4289_v36 = vsel %vm6445_vm12, %v4236_v58, 0.0  ;;  %v4291_v62 = vsel %vm6446_vm13, %v4237_v54, 0.0  ;;  %vm6453_vm4 = vmmov %vm6426_vm1 }
 0x259   : > { %4132 = vst.msk [vmem:[%s6171_s30 + $0x54] sm:$0xf] %vm6442_vm10, %v4794_v6  ;;  %v4287_v55 = vsel %vm6443_vm2, %v4235_v51, 0.0  ;;  %vm6454_vm14 = vmmov %vm6406_vm0 }
 0x25a   : > { %v4187_v9 = vadd.f32 %v4186_v52, %v4185_v33  ;;  %v4288_v59 = vadd.f32 %v4287_v55, %v4286_v60  ;;  %vm6455_vm1 = vmmov %vm6406_vm0 }
 0x25b   : > { %vm6457_vm10 = vmmov %vm6406_vm0 }
 0x25c   : > { %v4189_v22 = vadd.f32 %v4188_v26, %v4187_v9  ;;  %v4290_v27 = vadd.f32 %v4289_v36, %v4288_v59  ;;  %vm6458_vm2 = vmmov %vm6406_vm0 }
 0x25d   : > { %vm6459_vm7 = vmmov %vm6453_vm4 }
 0x25e   : > { %v4292_v0 = vadd.f32 %v4291_v62, %v4290_v27  ;;  %vm6460_vm12 = vmmov %vm6453_vm4 }
 0x25f   : > { %vm6461_vm13 = vmmov %vm6406_vm0 }
 0x275   : > { %v4935_v16 = vpop.f32.mrb[8].mxu1 }
 0x276   : > { %v4799_v40 = vpack.c.bf16 %v4935_v16, %v4935_v16  ;;  %v3952_v32 = vpop.f32.mrb[9].mxu1  ;;  %v4240_v56 = vmul.f32 %v4935_v16, %v4935_v16  ;;  %v4194_v35 = vsel %vm6452_vm11, %v4935_v16, 0.0  ;;  %vm6467_vm11 = vmmov %vm6406_vm0 }
 0x277   : > { %v4797_v2 = vpack.c.bf16 %v3952_v32, %v3952_v32  ;;  %v4190_v3 = vsel %vm6447_vm3, %v3952_v32, 0.0  ;;  %v4238_v43 = vmul.f32 %v3952_v32, %v3952_v32  ;;  %v4936_v37 = vpop.f32.mrb[10].mxu1  ;;  %vm6462_vm3 = vmmov %vm6406_vm0 }
 0x278   : > { %4137 = vst.msk [vmem:[%s6171_s30 + $0x68] sm:$0xf] %vm6448_vm5, %v4799_v40  ;;  %v4191_v10 = vadd.f32 %v4190_v3, %v4189_v22  ;;  %v4800_v29 = vpack.c.bf16 %v4936_v37, %v4936_v37  ;;  %v3955_v12 = vpop.f32.mrb[11].mxu1  ;;  %v4241_v15 = vmul.f32 %v4936_v37, %v4936_v37  ;;  %v4196_v47 = vsel %vm6455_vm1, %v4936_v37, 0.0  ;;  %vm6463_vm5 = vmmov %vm6453_vm4 }
 0x279   : > { %4135 = vst.msk [vmem:[%s6171_s30 + $0x60] sm:$0xf] %vm6449_vm6, %v4797_v2  ;;  %v4293_v61 = vsel %vm6450_vm15, %v4238_v43, 0.0  ;;  %v4798_v25 = vpack.c.bf16 %v3955_v12, %v3955_v12  ;;  %v4192_v5 = vsel %vm6406_vm0, %v3955_v12, 0.0  ;;  %v4239_v13 = vmul.f32 %v3955_v12, %v3955_v12  ;;  %vm6464_vm6 = vmmov %vm6406_vm0 }
 0x27a   : > { %v4294_v8 = vadd.f32 %v4293_v61, %v4292_v0  ;;  %4138 = vst.msk [vmem:[%s6171_s30 + $0x6c] sm:$0xf] %vm6451_vm8, %v4800_v29  ;;  %v4193_v4 = vadd.f32 %v4192_v5, %v4191_v10  ;;  %v4297_v57 = vsel %vm6456_vm9, %v4240_v56, 0.0  ;;  %v4299_v63 = vsel %vm6457_vm10, %v4241_v15, 0.0  ;;  %vm6465_vm15 = vmmov %vm6453_vm4 }
 0x27b   : > { %4136 = vst.msk [vmem:[%s6171_s30 + $0x64] sm:$0xf] %vm6453_vm4, %v4798_v25  ;;  %v4295_v17 = vsel %vm6454_vm14, %v4239_v13, 0.0  ;;  %vm6466_vm8 = vmmov %vm6406_vm0  ;;  %vm6469_vm14 = vcmask 24576  }
 0x27c   : > { %v4195_v14 = vadd.f32 %v4194_v35, %v4193_v4  ;;  %v4296_v18 = vadd.f32 %v4295_v17, %v4294_v8  ;;  %vm6468_vm4 = vmmov %vm6406_vm0 }
 0x27d   : > { %vm6470_vm1 = vmmov %vm6469_vm14 }
 0x27e   : > { %v4197_v20 = vadd.f32 %v4196_v47, %v4195_v14  ;;  %v4298_v23 = vadd.f32 %v4297_v57, %v4296_v18 }
 0x280   : > { %v4300_v21 = vadd.f32 %v4299_v63, %v4298_v23 }
 0x29d   : > { %v4939_v11 = vpop.f32.mrb[12].mxu1 }
 0x29e   : > { %v4803_v19 = vpack.c.bf16 %v4939_v11, %v4939_v11  ;;  %v3968_v44 = vpop.f32.mrb[13].mxu1  ;;  %v4244_v7 = vmul.f32 %v4939_v11, %v4939_v11  ;;  %v4202_v53 = vsel %vm6464_vm6, %v4939_v11, 0.0 }
 0x29f   : > { %v4801_v24 = vpack.c.bf16 %v3968_v44, %v3968_v44  ;;  %v4198_v39 = vsel %vm6458_vm2, %v3968_v44, 0.0  ;;  %v4242_v30 = vmul.f32 %v3968_v44, %v3968_v44  ;;  %v4940_v28 = vpop.f32.mrb[14].mxu1 }
 0x2a0   : > { %4141 = vst.msk [vmem:[%s6171_s30 + $0x78] sm:$0xf] %vm6459_vm7, %v4803_v19  ;;  %v4199_v31 = vadd.f32 %v4198_v39, %v4197_v20  ;;  %v4804_v34 = vpack.c.bf16 %v4940_v28, %v4940_v28  ;;  %v3971_v38 = vpop.f32.mrb[15].mxu1  ;;  %v4245_v50 = vmul.f32 %v4940_v28, %v4940_v28  ;;  %v4204_v58 = vsel %vm6466_vm8, %v4940_v28, 0.0 }
 0x2a1   : > { %4139 = vst.msk [vmem:[%s6171_s30 + $0x70] sm:$0xf] %vm6460_vm12, %v4801_v24  ;;  %v4301_v41 = vsel %vm6461_vm13, %v4242_v30, 0.0  ;;  %v4802_v42 = vpack.c.bf16 %v3971_v38, %v3971_v38  ;;  %v4200_v45 = vsel %vm6462_vm3, %v3971_v38, 0.0  ;;  %v4243_v49 = vmul.f32 %v3971_v38, %v3971_v38 }
 0x2a2   : > { %v4302_v46 = vadd.f32 %v4301_v41, %v4300_v21  ;;  %4142 = vst.msk [vmem:[%s6171_s30 + $0x7c] sm:$0xf] %vm6463_vm5, %v4804_v34  ;;  %v4201_v48 = vadd.f32 %v4200_v45, %v4199_v31  ;;  %v4305_v33 = vsel %vm6467_vm11, %v4244_v7, 0.0  ;;  %v4307_v54 = vsel %vm6468_vm4, %v4245_v50, 0.0 }
 0x2a3   : > { %4140 = vst.msk [vmem:[%s6171_s30 + $0x74] sm:$0xf] %vm6465_vm15, %v4802_v42  ;;  %v4303_v1 = vsel %vm6406_vm0, %v4243_v49, 0.0 }
 0x2a4   : > { %v4203_v6 = vadd.f32 %v4202_v53, %v4201_v48  ;;  %v4304_v60 = vadd.f32 %v4303_v1, %v4302_v46 }
 0x2a6   : > { %v4205_v51 = vadd.f32 %v4204_v58, %v4203_v6  ;;  %v4306_v52 = vadd.f32 %v4305_v33, %v4304_v60 }
 0x2a8   : > { %v4206_v9 = vrot.slane %v4205_v51, 4  ;;  %v4308_v55 = vadd.f32 %v4307_v54, %v4306_v52 }
 0x2aa   : > { %v4207_v26 = vadd.f32 %v4206_v9, %v4205_v51  ;;  %v4309_v59 = vrot.slane %v4308_v55, 4 }
 0x2ac   : > { %v4208_v36 = vrot.slane %v4207_v26, 2  ;;  %v4310_v22 = vadd.f32 %v4309_v59, %v4308_v55 }
 0x2ae   : > { %v4209_v27 = vadd.f32 %v4208_v36, %v4207_v26  ;;  %v4311_v62 = vrot.slane %v4310_v22, 2 }
 0x2b0   : > { %v4210_v0 = vrot.slane %v4209_v27, 1  ;;  %v4312_v16 = vadd.f32 %v4311_v62, %v4310_v22 }
 0x2b2   : > { %v4211_v40 = vadd.f32 %v4210_v0, %v4209_v27  ;;  %v4313_v32 = vrot.slane %v4312_v16, 1 }
 0x2b4   : > { %4213 = vst.msk [vmem:[%s235_s8] sm:$0x1] %vm6469_vm14, %v4211_v40  ;;  %v4314_v2 = vadd.f32 %v4313_v32, %v4312_v16 }
 0x2b6   : > { %4315 = vst.msk [vmem:[%s235_s8 + $0x1] sm:$0x1] %vm6470_vm1, %v4314_v2 }
 0x2b7 PF: > { %s16_s18 = sadd.s32 1, %s5221_s18  }
 0x2b8   : > { %p13_p4 = scmp.ge.s32.totalorder %s16_s18, 4  }
 0x2ba   :  { %15 = sbr.rel (!%p13_p4) target bundleno = 1 (0x1), region = 81 }

</bundles_post_ra>
